<compile_context>
chip_gen: v7x
topology: tpu7x:2x2x1
jax: 0.10.0
libtpu: 0.0.40
codegen_flags: <defaults>
</compile_context>

<pallas_src>
import functools

import jax
import jax.numpy as jnp
from jax import lax
from jax.experimental import pallas as pl
from jax.experimental.pallas import tpu as pltpu


# --------------------------------------------------------------------------- #
# Pallas kernel: one (batch, output-row-tile) grid step.
# --------------------------------------------------------------------------- #
def _up_gblock_kernel(x_ref, wae_ref, wao_ref, ba_ref, wb_ref, bb_ref,
                      w1_ref, b1_ref, o_ref, *, tile_rows):
    # x_ref  : (H, W, Cin)     original-resolution input image (one batch elem)
    # wae_ref: (6*Cin, Cin)    conv3x3_1 weights, column-phase collapsed (even cols)
    # wao_ref: (6*Cin, Cin)    conv3x3_1 weights, column-phase collapsed (odd cols)
    # ba_ref : (1, Cin)
    # wb_ref : (9*Cin, Cout)   conv3x3_2 weights, im2col order (u, v, cin)
    # bb_ref : (1, Cout)
    # w1_ref : (Cin, Cout)     conv1x1 weight
    # b1_ref : (1, Cout)
    # o_ref  : (TH*W, 2*Cout)  output rows [t*TH, (t+1)*TH), phase-interleaved
    H, W, Cin = x_ref.shape
    TH = tile_rows                         # output (upsampled) rows per tile
    TH2 = TH // 2                          # input rows per tile
    Cout = o_ref.shape[1] // 2
    f32 = jnp.float32

    t = pl.program_id(1)
    nt = pl.num_programs(1)
    is_top = t == 0
    is_bot = t == nt - 1
    r0 = pl.multiple_of(t * TH2, TH2)      # first input row of this tile

    # ------------------ load input rows (original resolution) ---------------
    x_int = x_ref[pl.ds(r0, TH2)]                        # (TH2, W, Cin), raw
    top = x_ref[pl.ds(jnp.maximum(r0 - 1, 0), 1)]        # (1, W, Cin)
    bot = x_ref[pl.ds(jnp.minimum(r0 + TH2, H - 1), 1)]  # (1, W, Cin)
    top = top * jnp.where(is_top, 0.0, 1.0)              # zero halo at border
    bot = bot * jnp.where(is_bot, 0.0, 1.0)

    # relu'd copies for the main branch (relu commutes with nearest upsample
    # and zero padding, so it is applied at original resolution).
    x_int_r = jnp.maximum(x_int, 0.0)
    top_r = jnp.maximum(top, 0.0)
    bot_r = jnp.maximum(bot, 0.0)

    # ------ row-upsampled (nearest 2x along H), row-extended tile -----------
    # xe row k  <->  upsampled row (t*TH - 2 + k), k in [0, TH+4)
    x_up = jnp.broadcast_to(x_int_r[:, None], (TH2, 2, W, Cin)).reshape(TH, W, Cin)
    xe = jnp.concatenate([
        jnp.broadcast_to(top_r, (2, W, Cin)),
        x_up,
        jnp.broadcast_to(bot_r, (2, W, Cin)),
    ], axis=0)                                           # (TH+4, W, Cin)

    # Column neighbours at original resolution (the W-upsample is folded into
    # the collapsed phase weights); zero columns at the image border.
    zc = jnp.zeros((TH + 4, 1, Cin), f32)
    tap_l = jnp.concatenate([zc, xe[:, :W - 1, :]], axis=1)   # col j <- x[:, j-1]
    tap_r = jnp.concatenate([xe[:, 1:, :], zc], axis=1)       # col j <- x[:, j+1]

    # ---------------------- conv3x3_1 (fused K = 6*Cin) ---------------------
    # h rows m in [0, TH+2)  <->  upsampled rows (t*TH - 1 + m)  (1-row halo is
    # recomputed, so conv2 needs no cross-tile communication).
    P2 = (TH + 2) * W

    def row_win(a, u):
        return a[u:u + TH + 2].reshape(P2, Cin)

    a_even = jnp.concatenate(
        [row_win(tap_l, 0), row_win(xe, 0),
         row_win(tap_l, 1), row_win(xe, 1),
         row_win(tap_l, 2), row_win(xe, 2)], axis=1)          # (P2, 6*Cin)
    a_odd = jnp.concatenate(
        [row_win(xe, 0), row_win(tap_r, 0),
         row_win(xe, 1), row_win(tap_r, 1),
         row_win(xe, 2), row_win(tap_r, 2)], axis=1)          # (P2, 6*Cin)

    h_e = jnp.maximum(jnp.dot(a_even, wae_ref[...],
                              preferred_element_type=f32) + ba_ref[...], 0.0)
    h_o = jnp.maximum(jnp.dot(a_odd, wao_ref[...],
                              preferred_element_type=f32) + ba_ref[...], 0.0)
    h_e = h_e.reshape(TH + 2, W, Cin)
    h_o = h_o.reshape(TH + 2, W, Cin)

    # conv3x3_2 must see zero padding (not conv1-of-zeros) outside the image:
    # kill halo rows that fall outside [0, 2H).
    row_m = lax.broadcasted_iota(jnp.int32, (TH + 2, W, Cin), 0)
    kill = ((row_m == 0) & is_top) | ((row_m == TH + 1) & is_bot)
    h_e = jnp.where(kill, 0.0, h_e)
    h_o = jnp.where(kill, 0.0, h_o)

    # ---------------------- conv3x3_2 (fused K = 9*Cin) ---------------------
    zc2 = jnp.zeros((TH + 2, 1, Cin), f32)
    h_o_sr = jnp.concatenate([zc2, h_o[:, :W - 1, :]], axis=1)  # hr col (2j-1)
    h_e_sl = jnp.concatenate([h_e[:, 1:, :], zc2], axis=1)      # hr col (2j+2)

    P = TH * W

    def row_win2(a, u):
        return a[u:u + TH].reshape(P, Cin)

    b_even = jnp.concatenate(
        [row_win2(h_o_sr, 0), row_win2(h_e, 0), row_win2(h_o, 0),
         row_win2(h_o_sr, 1), row_win2(h_e, 1), row_win2(h_o, 1),
         row_win2(h_o_sr, 2), row_win2(h_e, 2), row_win2(h_o, 2)], axis=1)
    b_odd = jnp.concatenate(
        [row_win2(h_e, 0), row_win2(h_o, 0), row_win2(h_e_sl, 0),
         row_win2(h_e, 1), row_win2(h_o, 1), row_win2(h_e_sl, 1),
         row_win2(h_e, 2), row_win2(h_o, 2), row_win2(h_e_sl, 2)], axis=1)

    y_even = jnp.dot(b_even, wb_ref[...], preferred_element_type=f32) + bb_ref[...]
    y_odd = jnp.dot(b_odd, wb_ref[...], preferred_element_type=f32) + bb_ref[...]

    # --------------- residual branch: 1x1 conv on raw upsample --------------
    res_h = jnp.dot(x_int.reshape(TH2 * W, Cin), w1_ref[...],
                    preferred_element_type=f32) + b1_ref[...]    # (TH2*W, Cout)
    res_h = res_h.reshape(TH2, W, Cout)
    res = jnp.broadcast_to(res_h[:, None], (TH2, 2, W, Cout)).reshape(P, Cout)

    # Phase-interleaved store: lane k = b*Cout + c  <->  output col 2j+b, ch c.
    o_ref[...] = jnp.concatenate([y_even + res, y_odd + res], axis=1)


# --------------------------------------------------------------------------- #
# Wrapper: layout glue + weight collapsing in plain JAX, one fused pallas_call.
# --------------------------------------------------------------------------- #
def _pick_tile_rows(hu):
    for th in (128, 64, 32, 16, 8, 4, 2):
        if th <= hu and hu % th == 0:
            return th
    return hu


def up_gblock_forward(x_nchw, w1, b1, wa, ba, wb, bb, tile_rows=None):
    """x_nchw: (N, Cin, H, W); weights in PyTorch OIHW layout. Returns NCHW."""
    N, Cin, H, W = x_nchw.shape
    Cout = Cin // 2
    Hu, Wu = 2 * H, 2 * W
    TH = int(tile_rows) if tile_rows is not None else _pick_tile_rows(Hu)
    assert TH % 2 == 0 and Hu % TH == 0, (TH, Hu)
    nt = Hu // TH

    x = jnp.transpose(x_nchw, (0, 2, 3, 1)).astype(jnp.float32)      # (N, H, W, Cin)

    wa_h = jnp.transpose(wa, (2, 3, 1, 0)).astype(jnp.float32)       # (3,3,Cin,Cin)
    wb_h = jnp.transpose(wb, (2, 3, 1, 0)).astype(jnp.float32)       # (3,3,Cin,Cout)

    # conv3x3_1 on a nearest-2x upsampled image == per-column-phase conv on the
    # original image with collapsed column weights (2 taps instead of 3):
    #   even out col 2j  : wa[:,0] @ x[:,j-1] + (wa[:,1]+wa[:,2]) @ x[:,j]
    #   odd  out col 2j+1: (wa[:,0]+wa[:,1]) @ x[:,j] + wa[:,2] @ x[:,j+1]
    wae = jnp.concatenate([wa_h[0, 0], wa_h[0, 1] + wa_h[0, 2],
                           wa_h[1, 0], wa_h[1, 1] + wa_h[1, 2],
                           wa_h[2, 0], wa_h[2, 1] + wa_h[2, 2]], axis=0)   # (6Cin, Cin)
    wao = jnp.concatenate([wa_h[0, 0] + wa_h[0, 1], wa_h[0, 2],
                           wa_h[1, 0] + wa_h[1, 1], wa_h[1, 2],
                           wa_h[2, 0] + wa_h[2, 1], wa_h[2, 2]], axis=0)   # (6Cin, Cin)
    wbk = wb_h.reshape(9 * Cin, Cout)                                      # (9Cin, Cout)
    w1k = jnp.transpose(w1[:, :, 0, 0], (1, 0)).astype(jnp.float32)        # (Cin, Cout)
    bak = ba.reshape(1, Cin).astype(jnp.float32)
    bbk = bb.reshape(1, Cout).astype(jnp.float32)
    b1k = b1.reshape(1, Cout).astype(jnp.float32)

    # VMEM budget from actual tile sizes, clamped to be v7x (64 MiB) safe.
    blk_in = H * W * Cin * 4
    blk_out = TH * W * 2 * Cout * 4
    blk_w = (12 * Cin * Cin + 10 * Cin * Cout + Cin + 2 * Cout) * 4
    work = (TH + 4) * W * Cin * 4 * 48 + TH * W * Cout * 4 * 8
    vmem_limit = int(min(56 * 2 ** 20,
                         max(16 * 2 ** 20, 2 * (blk_in + blk_out + blk_w) + work)))

    kernel = functools.partial(_up_gblock_kernel, tile_rows=TH)

    out = pl.pallas_call(
        kernel,
        out_shape=jax.ShapeDtypeStruct((N, Hu * W, 2 * Cout), jnp.float32),
        grid=(N, nt),
        in_specs=[
            pl.BlockSpec((None, H, W, Cin), lambda n, t: (n, 0, 0, 0)),
            pl.BlockSpec((6 * Cin, Cin), lambda n, t: (0, 0)),
            pl.BlockSpec((6 * Cin, Cin), lambda n, t: (0, 0)),
            pl.BlockSpec((1, Cin), lambda n, t: (0, 0)),
            pl.BlockSpec((9 * Cin, Cout), lambda n, t: (0, 0)),
            pl.BlockSpec((1, Cout), lambda n, t: (0, 0)),
            pl.BlockSpec((Cin, Cout), lambda n, t: (0, 0)),
            pl.BlockSpec((1, Cout), lambda n, t: (0, 0)),
        ],
        out_specs=pl.BlockSpec((None, TH * W, 2 * Cout), lambda n, t: (n, t, 0)),
        compiler_params=pltpu.CompilerParams(
            dimension_semantics=("parallel", "parallel"),
            vmem_limit_bytes=vmem_limit,
        ),
    )(x, wae, wao, bak, wbk, bbk, w1k, b1k)

    # (N, Hu*W, 2*Cout) -> (N, Hu, Wu, Cout) is a pure row-major reinterpretation
    # (lane k = b*Cout + c of column-block j  <->  output column 2j+b).
    out = out.reshape(N, Hu, Wu, Cout)
    return jnp.transpose(out, (0, 3, 1, 2))                           # NCHW


# --------------------------------------------------------------------------- #
# Deterministic parameter setup + pure-JAX reference.
# --------------------------------------------------------------------------- #
def spectral_norm_weight(w, n_iters=50):
    """Deterministic spectral normalization of an OIHW conv weight
    (mirrors torch spectral_norm's W / sigma, applied as preprocessing)."""
    m = w.reshape(w.shape[0], -1)
    u = jnp.ones((m.shape[0],), jnp.float32) / jnp.sqrt(float(m.shape[0]))
    v = jnp.ones((m.shape[1],), jnp.float32) / jnp.sqrt(float(m.shape[1]))
    for _ in range(n_iters):
        v = m.T @ u
        v = v / (jnp.linalg.norm(v) + 1e-12)
        u = m @ v
        u = u / (jnp.linalg.norm(u) + 1e-12)
    sigma = u @ (m @ v)
    return w / sigma


def up_gblock_reference(x_nchw, w1, b1, wa, ba, wb, bb):
    x = jnp.transpose(x_nchw, (0, 2, 3, 1)).astype(jnp.float32)

    def conv(t, w_oihw, b, pad):
        w_hwio = jnp.transpose(w_oihw, (2, 3, 1, 0))
        y = lax.conv_general_dilated(
            t, w_hwio, (1, 1), pad, dimension_numbers=("NHWC", "HWIO", "NHWC"))
        return y + b.reshape(1, 1, 1, -1)

    up = lambda t: jnp.repeat(jnp.repeat(t, 2, axis=1), 2, axis=2)
    res = conv(up(x), w1, b1, [(0, 0), (0, 0)])
    h = up(jnp.maximum(x, 0.0))
    h = conv(h, wa, ba, [(1, 1), (1, 1)])
    h = jnp.maximum(h, 0.0)
    h = conv(h, wb, bb, [(1, 1), (1, 1)])
    return jnp.transpose(h + res, (0, 3, 1, 2))


if __name__ == "__main__":
    key = jax.random.PRNGKey(0)
    N, Cin, H, W = 2, 4, 16, 16
    Cout = Cin // 2
    ks = jax.random.split(key, 7)

    x = jax.random.normal(ks[0], (N, Cin, H, W), jnp.float32)
    w1 = jax.random.normal(ks[1], (Cout, Cin, 1, 1), jnp.float32) * 0.2
    b1 = jax.random.normal(ks[2], (Cout,), jnp.float32) * 0.1
    wa = jax.random.normal(ks[3], (Cin, Cin, 3, 3), jnp.float32) * 0.2
    ba = jax.random.normal(ks[4], (Cin,), jnp.float32) * 0.1
    wb = jax.random.normal(ks[5], (Cout, Cin, 3, 3), jnp.float32) * 0.2
    bb = jax.random.normal(ks[6], (Cout,), jnp.float32) * 0.1

    # spectral_norm parametrization as deterministic weight preprocessing
    w1 = spectral_norm_weight(w1)
    wa = spectral_norm_weight(wa)
    wb = spectral_norm_weight(wb)

    # tile_rows=16 -> 2 row tiles per image: exercises the halo-recompute path.
    y = up_gblock_forward(x, w1, b1, wa, ba, wb, bb, tile_rows=16)
    y = jax.block_until_ready(y)

    y_ref = jax.block_until_ready(up_gblock_reference(x, w1, b1, wa, ba, wb, bb))
    assert y.shape == (N, Cout, 2 * H, 2 * W), y.shape
    assert jnp.allclose(y, y_ref, atol=2e-3, rtol=2e-3), (
        float(jnp.max(jnp.abs(y - y_ref))))

    print("KERNEL_OK")
</pallas_src>

<mosaic_0001>
module attributes {stable_mosaic.version = 11 : i64} {
  func.func @_up_gblock_kernel(%arg0: i32, %arg1: i32, %arg2: memref<1x16x16x4xf32, #tpu.memory_space<vmem>>, %arg3: memref<24x4xf32, #tpu.memory_space<vmem>>, %arg4: memref<24x4xf32, #tpu.memory_space<vmem>>, %arg5: memref<1x4xf32, #tpu.memory_space<vmem>>, %arg6: memref<36x2xf32, #tpu.memory_space<vmem>>, %arg7: memref<1x2xf32, #tpu.memory_space<vmem>>, %arg8: memref<4x2xf32, #tpu.memory_space<vmem>>, %arg9: memref<1x2xf32, #tpu.memory_space<vmem>>, %arg10: memref<1x256x4xf32, #tpu.memory_space<vmem>>) attributes {dimension_semantics = [#tpu.dimension_semantics<parallel>, #tpu.dimension_semantics<parallel>], iteration_bounds = array<i64: 2, 2>, scalar_prefetch = 0 : i64, scratch_operands = 0 : i64, tpu.core_type = #tpu.core_type<tc>, window_params = [{transform_indices = @transform_0, window_bounds = array<i64: 1, 16, 16, 4>}, {pipeline_mode = #tpu.pipeline_mode<synchronous>, transform_indices = @transform_1, window_bounds = array<i64: 24, 4>}, {pipeline_mode = #tpu.pipeline_mode<synchronous>, transform_indices = @transform_2, window_bounds = array<i64: 24, 4>}, {pipeline_mode = #tpu.pipeline_mode<synchronous>, transform_indices = @transform_3, window_bounds = array<i64: 1, 4>}, {pipeline_mode = #tpu.pipeline_mode<synchronous>, transform_indices = @transform_4, window_bounds = array<i64: 36, 2>}, {pipeline_mode = #tpu.pipeline_mode<synchronous>, transform_indices = @transform_5, window_bounds = array<i64: 1, 2>}, {pipeline_mode = #tpu.pipeline_mode<synchronous>, transform_indices = @transform_6, window_bounds = array<i64: 4, 2>}, {pipeline_mode = #tpu.pipeline_mode<synchronous>, transform_indices = @transform_7, window_bounds = array<i64: 1, 2>}, {transform_indices = @transform_8, window_bounds = array<i64: 1, 256, 4>}]} {
    %c0_i32 = arith.constant 0 : i32
    %0 = arith.cmpi eq, %arg1, %c0_i32 : i32
    %c1_i32 = arith.constant 1 : i32
    %1 = arith.cmpi eq, %arg1, %c1_i32 : i32
    %c8_i32 = arith.constant 8 : i32
    %2 = arith.muli %arg1, %c8_i32 : i32
    %3 = tpu.assume_multiple %2, 8 : i32
    %c0 = arith.constant 0 : index
    %4 = arith.index_cast %3 : i32 to index
    %c0_0 = arith.constant 0 : index
    %c0_1 = arith.constant 0 : index
    %5 = vector.load %arg2[%c0, %4, %c0_0, %c0_1] : memref<1x16x16x4xf32, #tpu.memory_space<vmem>>, vector<1x8x16x4xf32>
    %6 = vector.shape_cast %5 : vector<1x8x16x4xf32> to vector<8x16x4xf32>
    %c1_i32_2 = arith.constant 1 : i32
    %7 = arith.subi %3, %c1_i32_2 : i32
    %c0_i32_3 = arith.constant 0 : i32
    %8 = arith.maxsi %7, %c0_i32_3 : i32
    %c0_4 = arith.constant 0 : index
    %9 = arith.index_cast %8 : i32 to index
    %c0_5 = arith.constant 0 : index
    %c0_6 = arith.constant 0 : index
    %10 = vector.load %arg2[%c0_4, %9, %c0_5, %c0_6] : memref<1x16x16x4xf32, #tpu.memory_space<vmem>>, vector<1x1x16x4xf32>
    %11 = vector.shape_cast %10 : vector<1x1x16x4xf32> to vector<1x16x4xf32>
    %c8_i32_7 = arith.constant 8 : i32
    %12 = arith.addi %3, %c8_i32_7 : i32
    %c15_i32 = arith.constant 15 : i32
    %13 = arith.minsi %12, %c15_i32 : i32
    %c0_8 = arith.constant 0 : index
    %14 = arith.index_cast %13 : i32 to index
    %c0_9 = arith.constant 0 : index
    %c0_10 = arith.constant 0 : index
    %15 = vector.load %arg2[%c0_8, %14, %c0_9, %c0_10] : memref<1x16x16x4xf32, #tpu.memory_space<vmem>>, vector<1x1x16x4xf32>
    %16 = vector.shape_cast %15 : vector<1x1x16x4xf32> to vector<1x16x4xf32>
    %cst = arith.constant 0.000000e+00 : f32
    %cst_11 = arith.constant 1.000000e+00 : f32
    %17 = arith.select %0, %cst, %cst_11 : f32
    %18 = vector.broadcast %17 : f32 to vector<1x16x4xf32>
    %19 = arith.mulf %11, %18 : vector<1x16x4xf32>
    %cst_12 = arith.constant 0.000000e+00 : f32
    %cst_13 = arith.constant 1.000000e+00 : f32
    %20 = arith.select %1, %cst_12, %cst_13 : f32
    %21 = vector.broadcast %20 : f32 to vector<1x16x4xf32>
    %22 = arith.mulf %16, %21 : vector<1x16x4xf32>
    %cst_14 = arith.constant 0.000000e+00 : f32
    %23 = vector.broadcast %cst_14 : f32 to vector<8x16x4xf32>
    %24 = arith.maximumf %6, %23 : vector<8x16x4xf32>
    %cst_15 = arith.constant 0.000000e+00 : f32
    %25 = vector.broadcast %cst_15 : f32 to vector<1x16x4xf32>
    %26 = arith.maximumf %19, %25 : vector<1x16x4xf32>
    %cst_16 = arith.constant 0.000000e+00 : f32
    %27 = vector.broadcast %cst_16 : f32 to vector<1x16x4xf32>
    %28 = arith.maximumf %22, %27 : vector<1x16x4xf32>
    %29 = vector.shape_cast %24 : vector<8x16x4xf32> to vector<8x1x16x4xf32>
    %30 = vector.shape_cast %29 : vector<8x1x16x4xf32> to vector<8x1x16x4xf32>
    %31 = vector.broadcast %30 : vector<8x1x16x4xf32> to vector<8x2x16x4xf32>
    %32 = vector.shape_cast %31 : vector<8x2x16x4xf32> to vector<16x16x4xf32>
    %33 = vector.shape_cast %26 : vector<1x16x4xf32> to vector<1x16x4xf32>
    %34 = vector.broadcast %33 : vector<1x16x4xf32> to vector<2x16x4xf32>
    %35 = vector.shape_cast %28 : vector<1x16x4xf32> to vector<1x16x4xf32>
    %36 = vector.broadcast %35 : vector<1x16x4xf32> to vector<2x16x4xf32>
    %37 = tpu.concatenate %34, %32, %36 in 0 : vector<2x16x4xf32>, vector<16x16x4xf32>, vector<2x16x4xf32> -> vector<20x16x4xf32>
    %cst_17 = arith.constant 0.000000e+00 : f32
    %38 = vector.broadcast %cst_17 : f32 to vector<20x1x4xf32>
    %39 = vector.extract_strided_slice %37 {offsets = [0, 0, 0], sizes = [20, 15, 4], strides = [1, 1, 1]} : vector<20x16x4xf32> to vector<20x15x4xf32>
    %40 = tpu.concatenate %38, %39 in 1 : vector<20x1x4xf32>, vector<20x15x4xf32> -> vector<20x16x4xf32>
    %41 = vector.extract_strided_slice %37 {offsets = [0, 1, 0], sizes = [20, 15, 4], strides = [1, 1, 1]} : vector<20x16x4xf32> to vector<20x15x4xf32>
    %42 = tpu.concatenate %41, %38 in 1 : vector<20x15x4xf32>, vector<20x1x4xf32> -> vector<20x16x4xf32>
    %43 = vector.extract_strided_slice %40 {offsets = [0, 0, 0], sizes = [18, 16, 4], strides = [1, 1, 1]} : vector<20x16x4xf32> to vector<18x16x4xf32>
    %44 = vector.shape_cast %43 : vector<18x16x4xf32> to vector<288x4xf32>
    %45 = vector.extract_strided_slice %37 {offsets = [0, 0, 0], sizes = [18, 16, 4], strides = [1, 1, 1]} : vector<20x16x4xf32> to vector<18x16x4xf32>
    %46 = vector.shape_cast %45 : vector<18x16x4xf32> to vector<288x4xf32>
    %47 = vector.extract_strided_slice %40 {offsets = [1, 0, 0], sizes = [18, 16, 4], strides = [1, 1, 1]} : vector<20x16x4xf32> to vector<18x16x4xf32>
    %48 = vector.shape_cast %47 : vector<18x16x4xf32> to vector<288x4xf32>
    %49 = vector.extract_strided_slice %37 {offsets = [1, 0, 0], sizes = [18, 16, 4], strides = [1, 1, 1]} : vector<20x16x4xf32> to vector<18x16x4xf32>
    %50 = vector.shape_cast %49 : vector<18x16x4xf32> to vector<288x4xf32>
    %51 = vector.extract_strided_slice %40 {offsets = [2, 0, 0], sizes = [18, 16, 4], strides = [1, 1, 1]} : vector<20x16x4xf32> to vector<18x16x4xf32>
    %52 = vector.shape_cast %51 : vector<18x16x4xf32> to vector<288x4xf32>
    %53 = vector.extract_strided_slice %37 {offsets = [2, 0, 0], sizes = [18, 16, 4], strides = [1, 1, 1]} : vector<20x16x4xf32> to vector<18x16x4xf32>
    %54 = vector.shape_cast %53 : vector<18x16x4xf32> to vector<288x4xf32>
    %55 = tpu.concatenate %44, %46, %48, %50, %52, %54 in 1 : vector<288x4xf32>, vector<288x4xf32>, vector<288x4xf32>, vector<288x4xf32>, vector<288x4xf32>, vector<288x4xf32> -> vector<288x24xf32>
    %56 = vector.extract_strided_slice %37 {offsets = [0, 0, 0], sizes = [18, 16, 4], strides = [1, 1, 1]} : vector<20x16x4xf32> to vector<18x16x4xf32>
    %57 = vector.shape_cast %56 : vector<18x16x4xf32> to vector<288x4xf32>
    %58 = vector.extract_strided_slice %42 {offsets = [0, 0, 0], sizes = [18, 16, 4], strides = [1, 1, 1]} : vector<20x16x4xf32> to vector<18x16x4xf32>
    %59 = vector.shape_cast %58 : vector<18x16x4xf32> to vector<288x4xf32>
    %60 = vector.extract_strided_slice %37 {offsets = [1, 0, 0], sizes = [18, 16, 4], strides = [1, 1, 1]} : vector<20x16x4xf32> to vector<18x16x4xf32>
    %61 = vector.shape_cast %60 : vector<18x16x4xf32> to vector<288x4xf32>
    %62 = vector.extract_strided_slice %42 {offsets = [1, 0, 0], sizes = [18, 16, 4], strides = [1, 1, 1]} : vector<20x16x4xf32> to vector<18x16x4xf32>
    %63 = vector.shape_cast %62 : vector<18x16x4xf32> to vector<288x4xf32>
    %64 = vector.extract_strided_slice %37 {offsets = [2, 0, 0], sizes = [18, 16, 4], strides = [1, 1, 1]} : vector<20x16x4xf32> to vector<18x16x4xf32>
    %65 = vector.shape_cast %64 : vector<18x16x4xf32> to vector<288x4xf32>
    %66 = vector.extract_strided_slice %42 {offsets = [2, 0, 0], sizes = [18, 16, 4], strides = [1, 1, 1]} : vector<20x16x4xf32> to vector<18x16x4xf32>
    %67 = vector.shape_cast %66 : vector<18x16x4xf32> to vector<288x4xf32>
    %68 = tpu.concatenate %57, %59, %61, %63, %65, %67 in 1 : vector<288x4xf32>, vector<288x4xf32>, vector<288x4xf32>, vector<288x4xf32>, vector<288x4xf32>, vector<288x4xf32> -> vector<288x24xf32>
    %c0_18 = arith.constant 0 : index
    %c0_19 = arith.constant 0 : index
    %69 = vector.load %arg3[%c0_18, %c0_19] : memref<24x4xf32, #tpu.memory_space<vmem>>, vector<24x4xf32>
    %cst_20 = arith.constant dense<0.000000e+00> : vector<288x4xf32>
    %70 = tpu.matmul %55, %69, %cst_20 {dimension_numbers = #tpu.dot_dimension_numbers<[1], [0], [0], [1], [0, 0, 1, 1], [], []>} : vector<288x24xf32>, vector<24x4xf32>, vector<288x4xf32> -> vector<288x4xf32>
    %c0_21 = arith.constant 0 : index
    %c0_22 = arith.constant 0 : index
    %71 = vector.load %arg5[%c0_21, %c0_22] : memref<1x4xf32, #tpu.memory_space<vmem>>, vector<1x4xf32>
    %72 = vector.broadcast %71 : vector<1x4xf32> to vector<288x4xf32>
    %73 = arith.addf %70, %72 : vector<288x4xf32>
    %cst_23 = arith.constant 0.000000e+00 : f32
    %74 = vector.broadcast %cst_23 : f32 to vector<288x4xf32>
    %75 = arith.maximumf %73, %74 : vector<288x4xf32>
    %c0_24 = arith.constant 0 : index
    %c0_25 = arith.constant 0 : index
    %76 = vector.load %arg4[%c0_24, %c0_25] : memref<24x4xf32, #tpu.memory_space<vmem>>, vector<24x4xf32>
    %cst_26 = arith.constant dense<0.000000e+00> : vector<288x4xf32>
    %77 = tpu.matmul %68, %76, %cst_26 {dimension_numbers = #tpu.dot_dimension_numbers<[1], [0], [0], [1], [0, 0, 1, 1], [], []>} : vector<288x24xf32>, vector<24x4xf32>, vector<288x4xf32> -> vector<288x4xf32>
    %c0_27 = arith.constant 0 : index
    %c0_28 = arith.constant 0 : index
    %78 = vector.load %arg5[%c0_27, %c0_28] : memref<1x4xf32, #tpu.memory_space<vmem>>, vector<1x4xf32>
    %79 = vector.broadcast %78 : vector<1x4xf32> to vector<288x4xf32>
    %80 = arith.addf %77, %79 : vector<288x4xf32>
    %cst_29 = arith.constant 0.000000e+00 : f32
    %81 = vector.broadcast %cst_29 : f32 to vector<288x4xf32>
    %82 = arith.maximumf %80, %81 : vector<288x4xf32>
    %83 = vector.shape_cast %75 : vector<288x4xf32> to vector<18x16x4xf32>
    %84 = vector.shape_cast %82 : vector<288x4xf32> to vector<18x16x4xf32>
    %85 = tpu.iota {dimensions = array<i32: 0>} : vector<18x16x4xi32>
    %c0_i32_30 = arith.constant 0 : i32
    %86 = vector.broadcast %c0_i32_30 : i32 to vector<18x16x4xi32>
    %87 = arith.cmpi eq, %85, %86 : vector<18x16x4xi32>
    %88 = vector.broadcast %0 : i1 to vector<18x16x4xi1>
    %89 = arith.andi %87, %88 : vector<18x16x4xi1>
    %c17_i32 = arith.constant 17 : i32
    %90 = vector.broadcast %c17_i32 : i32 to vector<18x16x4xi32>
    %91 = arith.cmpi eq, %85, %90 : vector<18x16x4xi32>
    %92 = vector.broadcast %1 : i1 to vector<18x16x4xi1>
    %93 = arith.andi %91, %92 : vector<18x16x4xi1>
    %94 = arith.ori %89, %93 : vector<18x16x4xi1>
    %cst_31 = arith.constant 0.000000e+00 : f32
    %95 = vector.broadcast %cst_31 : f32 to vector<18x16x4xf32>
    %96 = arith.select %94, %95, %83 : vector<18x16x4xi1>, vector<18x16x4xf32>
    %cst_32 = arith.constant 0.000000e+00 : f32
    %97 = vector.broadcast %cst_32 : f32 to vector<18x16x4xf32>
    %98 = arith.select %94, %97, %84 : vector<18x16x4xi1>, vector<18x16x4xf32>
    %cst_33 = arith.constant 0.000000e+00 : f32
    %99 = vector.broadcast %cst_33 : f32 to vector<18x1x4xf32>
    %100 = vector.extract_strided_slice %98 {offsets = [0, 0, 0], sizes = [18, 15, 4], strides = [1, 1, 1]} : vector<18x16x4xf32> to vector<18x15x4xf32>
    %101 = tpu.concatenate %99, %100 in 1 : vector<18x1x4xf32>, vector<18x15x4xf32> -> vector<18x16x4xf32>
    %102 = vector.extract_strided_slice %96 {offsets = [0, 1, 0], sizes = [18, 15, 4], strides = [1, 1, 1]} : vector<18x16x4xf32> to vector<18x15x4xf32>
    %103 = tpu.concatenate %102, %99 in 1 : vector<18x15x4xf32>, vector<18x1x4xf32> -> vector<18x16x4xf32>
    %104 = vector.extract_strided_slice %101 {offsets = [0, 0, 0], sizes = [16, 16, 4], strides = [1, 1, 1]} : vector<18x16x4xf32> to vector<16x16x4xf32>
    %105 = vector.shape_cast %104 : vector<16x16x4xf32> to vector<256x4xf32>
    %106 = vector.extract_strided_slice %96 {offsets = [0, 0, 0], sizes = [16, 16, 4], strides = [1, 1, 1]} : vector<18x16x4xf32> to vector<16x16x4xf32>
    %107 = vector.shape_cast %106 : vector<16x16x4xf32> to vector<256x4xf32>
    %108 = vector.extract_strided_slice %98 {offsets = [0, 0, 0], sizes = [16, 16, 4], strides = [1, 1, 1]} : vector<18x16x4xf32> to vector<16x16x4xf32>
    %109 = vector.shape_cast %108 : vector<16x16x4xf32> to vector<256x4xf32>
    %110 = vector.extract_strided_slice %101 {offsets = [1, 0, 0], sizes = [16, 16, 4], strides = [1, 1, 1]} : vector<18x16x4xf32> to vector<16x16x4xf32>
    %111 = vector.shape_cast %110 : vector<16x16x4xf32> to vector<256x4xf32>
    %112 = vector.extract_strided_slice %96 {offsets = [1, 0, 0], sizes = [16, 16, 4], strides = [1, 1, 1]} : vector<18x16x4xf32> to vector<16x16x4xf32>
    %113 = vector.shape_cast %112 : vector<16x16x4xf32> to vector<256x4xf32>
    %114 = vector.extract_strided_slice %98 {offsets = [1, 0, 0], sizes = [16, 16, 4], strides = [1, 1, 1]} : vector<18x16x4xf32> to vector<16x16x4xf32>
    %115 = vector.shape_cast %114 : vector<16x16x4xf32> to vector<256x4xf32>
    %116 = vector.extract_strided_slice %101 {offsets = [2, 0, 0], sizes = [16, 16, 4], strides = [1, 1, 1]} : vector<18x16x4xf32> to vector<16x16x4xf32>
    %117 = vector.shape_cast %116 : vector<16x16x4xf32> to vector<256x4xf32>
    %118 = vector.extract_strided_slice %96 {offsets = [2, 0, 0], sizes = [16, 16, 4], strides = [1, 1, 1]} : vector<18x16x4xf32> to vector<16x16x4xf32>
    %119 = vector.shape_cast %118 : vector<16x16x4xf32> to vector<256x4xf32>
    %120 = vector.extract_strided_slice %98 {offsets = [2, 0, 0], sizes = [16, 16, 4], strides = [1, 1, 1]} : vector<18x16x4xf32> to vector<16x16x4xf32>
    %121 = vector.shape_cast %120 : vector<16x16x4xf32> to vector<256x4xf32>
    %122 = tpu.concatenate %105, %107, %109, %111, %113, %115, %117, %119, %121 in 1 : vector<256x4xf32>, vector<256x4xf32>, vector<256x4xf32>, vector<256x4xf32>, vector<256x4xf32>, vector<256x4xf32>, vector<256x4xf32>, vector<256x4xf32>, vector<256x4xf32> -> vector<256x36xf32>
    %123 = vector.extract_strided_slice %96 {offsets = [0, 0, 0], sizes = [16, 16, 4], strides = [1, 1, 1]} : vector<18x16x4xf32> to vector<16x16x4xf32>
    %124 = vector.shape_cast %123 : vector<16x16x4xf32> to vector<256x4xf32>
    %125 = vector.extract_strided_slice %98 {offsets = [0, 0, 0], sizes = [16, 16, 4], strides = [1, 1, 1]} : vector<18x16x4xf32> to vector<16x16x4xf32>
    %126 = vector.shape_cast %125 : vector<16x16x4xf32> to vector<256x4xf32>
    %127 = vector.extract_strided_slice %103 {offsets = [0, 0, 0], sizes = [16, 16, 4], strides = [1, 1, 1]} : vector<18x16x4xf32> to vector<16x16x4xf32>
    %128 = vector.shape_cast %127 : vector<16x16x4xf32> to vector<256x4xf32>
    %129 = vector.extract_strided_slice %96 {offsets = [1, 0, 0], sizes = [16, 16, 4], strides = [1, 1, 1]} : vector<18x16x4xf32> to vector<16x16x4xf32>
    %130 = vector.shape_cast %129 : vector<16x16x4xf32> to vector<256x4xf32>
    %131 = vector.extract_strided_slice %98 {offsets = [1, 0, 0], sizes = [16, 16, 4], strides = [1, 1, 1]} : vector<18x16x4xf32> to vector<16x16x4xf32>
    %132 = vector.shape_cast %131 : vector<16x16x4xf32> to vector<256x4xf32>
    %133 = vector.extract_strided_slice %103 {offsets = [1, 0, 0], sizes = [16, 16, 4], strides = [1, 1, 1]} : vector<18x16x4xf32> to vector<16x16x4xf32>
    %134 = vector.shape_cast %133 : vector<16x16x4xf32> to vector<256x4xf32>
    %135 = vector.extract_strided_slice %96 {offsets = [2, 0, 0], sizes = [16, 16, 4], strides = [1, 1, 1]} : vector<18x16x4xf32> to vector<16x16x4xf32>
    %136 = vector.shape_cast %135 : vector<16x16x4xf32> to vector<256x4xf32>
    %137 = vector.extract_strided_slice %98 {offsets = [2, 0, 0], sizes = [16, 16, 4], strides = [1, 1, 1]} : vector<18x16x4xf32> to vector<16x16x4xf32>
    %138 = vector.shape_cast %137 : vector<16x16x4xf32> to vector<256x4xf32>
    %139 = vector.extract_strided_slice %103 {offsets = [2, 0, 0], sizes = [16, 16, 4], strides = [1, 1, 1]} : vector<18x16x4xf32> to vector<16x16x4xf32>
    %140 = vector.shape_cast %139 : vector<16x16x4xf32> to vector<256x4xf32>
    %141 = tpu.concatenate %124, %126, %128, %130, %132, %134, %136, %138, %140 in 1 : vector<256x4xf32>, vector<256x4xf32>, vector<256x4xf32>, vector<256x4xf32>, vector<256x4xf32>, vector<256x4xf32>, vector<256x4xf32>, vector<256x4xf32>, vector<256x4xf32> -> vector<256x36xf32>
    %c0_34 = arith.constant 0 : index
    %c0_35 = arith.constant 0 : index
    %142 = vector.load %arg6[%c0_34, %c0_35] : memref<36x2xf32, #tpu.memory_space<vmem>>, vector<36x2xf32>
    %cst_36 = arith.constant dense<0.000000e+00> : vector<256x2xf32>
    %143 = tpu.matmul %122, %142, %cst_36 {dimension_numbers = #tpu.dot_dimension_numbers<[1], [0], [0], [1], [0, 0, 1, 1], [], []>} : vector<256x36xf32>, vector<36x2xf32>, vector<256x2xf32> -> vector<256x2xf32>
    %c0_37 = arith.constant 0 : index
    %c0_38 = arith.constant 0 : index
    %144 = vector.load %arg7[%c0_37, %c0_38] : memref<1x2xf32, #tpu.memory_space<vmem>>, vector<1x2xf32>
    %145 = vector.broadcast %144 : vector<1x2xf32> to vector<256x2xf32>
    %146 = arith.addf %143, %145 : vector<256x2xf32>
    %c0_39 = arith.constant 0 : index
    %c0_40 = arith.constant 0 : index
    %147 = vector.load %arg6[%c0_39, %c0_40] : memref<36x2xf32, #tpu.memory_space<vmem>>, vector<36x2xf32>
    %cst_41 = arith.constant dense<0.000000e+00> : vector<256x2xf32>
    %148 = tpu.matmul %141, %147, %cst_41 {dimension_numbers = #tpu.dot_dimension_numbers<[1], [0], [0], [1], [0, 0, 1, 1], [], []>} : vector<256x36xf32>, vector<36x2xf32>, vector<256x2xf32> -> vector<256x2xf32>
    %c0_42 = arith.constant 0 : index
    %c0_43 = arith.constant 0 : index
    %149 = vector.load %arg7[%c0_42, %c0_43] : memref<1x2xf32, #tpu.memory_space<vmem>>, vector<1x2xf32>
    %150 = vector.broadcast %149 : vector<1x2xf32> to vector<256x2xf32>
    %151 = arith.addf %148, %150 : vector<256x2xf32>
    %152 = vector.shape_cast %6 : vector<8x16x4xf32> to vector<128x4xf32>
    %c0_44 = arith.constant 0 : index
    %c0_45 = arith.constant 0 : index
    %153 = vector.load %arg8[%c0_44, %c0_45] : memref<4x2xf32, #tpu.memory_space<vmem>>, vector<4x2xf32>
    %cst_46 = arith.constant dense<0.000000e+00> : vector<128x2xf32>
    %154 = tpu.matmul %152, %153, %cst_46 {dimension_numbers = #tpu.dot_dimension_numbers<[1], [0], [0], [1], [0, 0, 1, 1], [], []>} : vector<128x4xf32>, vector<4x2xf32>, vector<128x2xf32> -> vector<128x2xf32>
    %c0_47 = arith.constant 0 : index
    %c0_48 = arith.constant 0 : index
    %155 = vector.load %arg9[%c0_47, %c0_48] : memref<1x2xf32, #tpu.memory_space<vmem>>, vector<1x2xf32>
    %156 = vector.broadcast %155 : vector<1x2xf32> to vector<128x2xf32>
    %157 = arith.addf %154, %156 : vector<128x2xf32>
    %158 = vector.shape_cast %157 : vector<128x2xf32> to vector<8x16x2xf32>
    %159 = vector.shape_cast %158 : vector<8x16x2xf32> to vector<8x1x16x2xf32>
    %160 = vector.shape_cast %159 : vector<8x1x16x2xf32> to vector<8x1x16x2xf32>
    %161 = vector.broadcast %160 : vector<8x1x16x2xf32> to vector<8x2x16x2xf32>
    %162 = vector.shape_cast %161 : vector<8x2x16x2xf32> to vector<256x2xf32>
    %163 = arith.addf %146, %162 : vector<256x2xf32>
    %164 = arith.addf %151, %162 : vector<256x2xf32>
    %165 = tpu.concatenate %163, %164 in 1 : vector<256x2xf32>, vector<256x2xf32> -> vector<256x4xf32>
    %c0_49 = arith.constant 0 : index
    %c0_50 = arith.constant 0 : index
    %c0_51 = arith.constant 0 : index
    %166 = vector.load %arg10[%c0_49, %c0_50, %c0_51] : memref<1x256x4xf32, #tpu.memory_space<vmem>>, vector<1x256x4xf32>
    %167 = vector.shape_cast %166 : vector<1x256x4xf32> to vector<256x4xf32>
    %168 = vector.shape_cast %165 : vector<256x4xf32> to vector<1x256x4xf32>
    tpu.vector_store %arg10[%c0_49, %c0_50, %c0_51], %168 {strides = array<i32>} : memref<1x256x4xf32, #tpu.memory_space<vmem>>, vector<1x256x4xf32>,
    return
  }
  func.func @transform_0(%arg0: i32, %arg1: i32) -> (i32, i32, i32, i32) {
    %c0_i32 = arith.constant 0 : i32
    %c0_i32_0 = arith.constant 0 : i32
    %c0_i32_1 = arith.constant 0 : i32
    %c0_i32_2 = arith.constant 0 : i32
    return %arg0, %c0_i32, %c0_i32_0, %c0_i32_1 : i32, i32, i32, i32
  }
  func.func @transform_1(%arg0: i32, %arg1: i32) -> (i32, i32) {
    %c0_i32 = arith.constant 0 : i32
    %c0_i32_0 = arith.constant 0 : i32
    %c0_i32_1 = arith.constant 0 : i32
    return %c0_i32, %c0_i32_0 : i32, i32
  }
  func.func @transform_2(%arg0: i32, %arg1: i32) -> (i32, i32) {
    %c0_i32 = arith.constant 0 : i32
    %c0_i32_0 = arith.constant 0 : i32
    %c0_i32_1 = arith.constant 0 : i32
    return %c0_i32, %c0_i32_0 : i32, i32
  }
  func.func @transform_3(%arg0: i32, %arg1: i32) -> (i32, i32) {
    %c0_i32 = arith.constant 0 : i32
    %c0_i32_0 = arith.constant 0 : i32
    %c0_i32_1 = arith.constant 0 : i32
    return %c0_i32, %c0_i32_0 : i32, i32
  }
  func.func @transform_4(%arg0: i32, %arg1: i32) -> (i32, i32) {
    %c0_i32 = arith.constant 0 : i32
    %c0_i32_0 = arith.constant 0 : i32
    %c0_i32_1 = arith.constant 0 : i32
    return %c0_i32, %c0_i32_0 : i32, i32
  }
  func.func @transform_5(%arg0: i32, %arg1: i32) -> (i32, i32) {
    %c0_i32 = arith.constant 0 : i32
    %c0_i32_0 = arith.constant 0 : i32
    %c0_i32_1 = arith.constant 0 : i32
    return %c0_i32, %c0_i32_0 : i32, i32
  }
  func.func @transform_6(%arg0: i32, %arg1: i32) -> (i32, i32) {
    %c0_i32 = arith.constant 0 : i32
    %c0_i32_0 = arith.constant 0 : i32
    %c0_i32_1 = arith.constant 0 : i32
    return %c0_i32, %c0_i32_0 : i32, i32
  }
  func.func @transform_7(%arg0: i32, %arg1: i32) -> (i32, i32) {
    %c0_i32 = arith.constant 0 : i32
    %c0_i32_0 = arith.constant 0 : i32
    %c0_i32_1 = arith.constant 0 : i32
    return %c0_i32, %c0_i32_0 : i32, i32
  }
  func.func @transform_8(%arg0: i32, %arg1: i32) -> (i32, i32, i32) {
    %c0_i32 = arith.constant 0 : i32
    %c0_i32_0 = arith.constant 0 : i32
    return %arg0, %arg1, %c0_i32 : i32, i32, i32
  }
}

</mosaic_0001>

<bundles_post_ra>
// kernel: tpu_custom_call.1
= control target key start
LH: loop header
LB: loop body
LE: loop exit
PB: predicated region body
PF: predicated region fallthrough
CT: control target
= control target key end

     0   :  { %s6665_s27 = smov 0   ;;  %s6667_s28 = smov 0   ;;  %s12127_s0 = inlined_call_operand.vmem [shape: f32[2,16,16,4], index: 0, kind: input, shape index: {}]   ;;  %s12128_s1 = inlined_call_operand.vmem [shape: f32[24,4], index: 1, kind: input, shape index: {}]   ;;  %s12129_s2 = inlined_call_operand.vmem [shape: f32[24,4], index: 2, kind: input, shape index: {}]   ;;  %s12130_s3 = inlined_call_operand.vmem [shape: f32[1,4], index: 3, kind: input, shape index: {}]   ;;  %s12131_s4 = inlined_call_operand.vmem [shape: f32[36,2], index: 4, kind: input, shape index: {}]   ;;  %s12132_s5 = inlined_call_operand.vmem [shape: f32[1,2], index: 5, kind: input, shape index: {}]   ;;  %s12133_s6 = inlined_call_operand.vmem [shape: f32[4,2], index: 6, kind: input, shape index: {}]   ;;  %s12134_s7 = inlined_call_operand.vmem [shape: f32[1,2], index: 7, kind: input, shape index: {}]   ;;  %s12135_s8 = inlined_call_operand.vmem [shape: f32[2,512,4], index: 8, kind: output, shape index: {}]  }
   0x1   :  { %s6669_s29 = smov 0   ;;  %s6671_s30 = smov 0  }
   0x2   :  { %s6673_s9 = smov 0  }
   0x3 LB: > { %s27_s10 = sadd.s32 1, %s6601_s29  ;;  %s30_s11 = sadd.s32 1, %s6605_s30  ;;  %s6609_s9 = sphi %s6673_s9, %s18_s9   ;;  %s6605_s30 = sphi %s6671_s30, %s13609_s30   ;;  %s6601_s29 = sphi %s6669_s29, %s13608_s29   ;;  %s6597_s28 = sphi %s6667_s28, %s13607_s28   ;;  %s6593_s27 = sphi %s6665_s27, %s13606_s27  }
   0x4   : > { %p28_p0 = scmp.ge.s32.totalorder %s27_s10, 2  ;;  %p5873_p1 = scmp.ge.s32.totalorder %s6609_s9, 1 }
   0x5   : > { %p276_p2 = scmp.lt.s32.totalorder %s6609_s9, 5 }
   0x6   : > { %s13611_s10 = smov (%p28_p0, %s27_s10), 0  ;;  %s13613_s11 = smov (!%p28_p0, %s30_s11), %s6605_s30 }
   0x7   : > { %p277_p3 = pnand %p5873_p1, %p276_p2  ;;  %p32_p4 = scmp.ge.s32.totalorder %s13613_s11, 2 }
   0x9   : > { %s13615_s11 = smov (%p32_p4, %s13613_s11), 0  ;;  %280 = sbr.rel (%p277_p3) target bundleno = 2125 (0x84d), region = 52 }
  0x10   : > { %p314_p5 = scmp.lt.s32.totalorder %s6597_s28, 1  ;;  %s6045_s12 = sshll.u32 %s6593_s27, 7  ;;  %vm412_vm0 = vcmask 1040384   ;;  %vm472_vm1 = vcmask 1046528   ;;  %vm834_vm2 = vcmask 64512   ;;  %vm815_vm3 = vcmask 31744  }
  0x11   : > { %p329_p6 = scmp.eq.s32.totalorder %s6593_s27, 0  ;;  %s5879_s18 = sshll.u32 %s6593_s27, 3  ;;  %vm871_vm4 = vcmask 97280   ;;  %vm908_vm5 = vcmask 130048   ;;  %vm945_vm6 = vcmask 162816   ;;  %vm1446_vm7 = vcmask 195584  }
  0x12   : > { %s13617_s28 = smov (!%p314_p5, %s6597_s28), 1  ;;  %s5881_s19 = sadd.s32 4294967295, %s5879_s18  ;;  %vm4768_vm10 = vcmask 1043456   ;;  %vm3551_vm11 = vcmask 228352   ;;  %vm3584_vm12 = vcmask 261120   ;;  %vm4671_vm13 = vcmask 293888  }
  0x13   : > { %s6044_s13 = sshll.u32 %s13617_s28, 8  ;;  %s6611_s20 = smov 4   ;;  %vm5714_vm14 = vcmask 15360  }
  0x14   : > { %s6704_s16 = scalar_lea.vmem %s12127_s0, %s6044_s13  ;;  %p351_p7 = scmp.gt.s32.totalorder %s5881_s19, 0 }
  0x15   : > { %s6707_s17 = scalar_lea.vmem %s6704_s16, %s6045_s12  ;;  %s6612_s24 = smov 8  }
  0x16   : > { %v336_v0 = vld [vmem:[%s6707_s17 + $0x10] sm:$0xff]  ;;  %v334_v1 = vld [vmem:[%s6707_s17] sm:$0xff]  ;;  %v335_v5 = vld [vmem:[%s6707_s17 + $0x8] sm:$0xff]  ;;  %s364_s21 = scalar_select %p329_p6, 0.0, 1.0 }
  0x17   : > { %v338_v2 = vld [vmem:[%s6707_s17 + $0x20] sm:$0xff]  ;;  %v6712_v3 = vmax.f32 %v336_v0, 0.0  ;;  %v6714_v4 = vmax.f32 %v334_v1, 0.0  ;;  %v6727_v7 = vmax.f32 %v335_v5, 0.0  ;;  %v337_v8 = vld [vmem:[%s6707_s17 + $0x18] sm:$0xff]  ;;  %s13619_s19 = smov (!%p351_p7, %s5881_s19), 0 }
  0x18   : > { %v6725_v6 = vmax.f32 %v338_v2, 0.0  ;;  %s5882_s22 = sshll.u32 %s13619_s19, 4  ;;  %v365_v9 = vstv %s364_s21  ;;  %v6736_v10 = vmax.f32 %v337_v8, 0.0  ;;  %v339_v11 = vld [vmem:[%s6707_s17 + $0x28] sm:$0xff]  ;;  %v341_v18 = vld [vmem:[%s6707_s17 + $0x38] sm:$0xff]  ;;  %v340_v20 = vld [vmem:[%s6707_s17 + $0x30] sm:$0xff] }
  0x19   : > { %12460 = vst [vmem:[#allocation2_spill] sm:$0xff] %v6712_v3  ;;  %12461 = vst [vmem:[#allocation3_spill] sm:$0xff] %v6714_v4  ;;  %531 = vrot.lane.b32.xlu0 %v6712_v3, %s6611_s20  ;;  %527 = vrot.lane.b32.xlu1 %v6714_v4, %s6611_s20  ;;  %s354_s23 = scalar_lea.vmem %s6704_s16, %s5882_s22  ;;  %v6742_v16 = vmax.f32 %v339_v11, 0.0  ;;  %v6754_v21 = vmax.f32 %v341_v18, 0.0  ;;  %v343_v22 = vld [vmem:[%s6707_s17 + $0x48] sm:$0xff]  ;;  %v6759_v23 = vmax.f32 %v340_v20, 0.0 }
  0x1a   : > { %12462 = vst [vmem:[#allocation4_spill] sm:$0xff] %v6725_v6  ;;  %12463 = vst [vmem:[#allocation5_spill] sm:$0xff] %v6736_v10  ;;  %v355_v12 = vld [vmem:[%s354_s23] sm:$0xff]  ;;  %v356_v13 = vld [vmem:[%s354_s23 + $0x8] sm:$0xff]  ;;  %v6764_v25 = vmax.f32 %v343_v22, 0.0  ;;  %v416_v42 = vrot.slane %v6714_v4, 7 }
  0x1b   : > { %v366_v14 = vmul.f32 %v365_v9, %v355_v12  ;;  %v367_v15 = vmul.f32 %v365_v9, %v356_v13  ;;  %12464 = vst [vmem:[#allocation6_spill] sm:$0xff] %v6742_v16  ;;  %12467 = vst [vmem:[#allocation9_spill] sm:$0xff] %v6754_v21  ;;  %v342_v24 = vld [vmem:[%s6707_s17 + $0x40] sm:$0xff]  ;;  %v345_v26 = vld [vmem:[%s6707_s17 + $0x58] sm:$0xff]  ;;  %v417_v43 = vrot.slane %v6727_v7, 7  ;;  %s357_s25 = sadd.s32 8, %s5879_s18 }
  0x1c   : > { %12468 = vst [vmem:[#allocation10_spill] sm:$0xff] %v6759_v23  ;;  %12469 = vst [vmem:[#allocation11_spill] sm:$0xff] %v6764_v25  ;;  %v6769_v27 = vmax.f32 %v342_v24, 0.0  ;;  %v344_v28 = vld [vmem:[%s6707_s17 + $0x50] sm:$0xff]  ;;  %v6774_v29 = vmax.f32 %v345_v26, 0.0  ;;  %v347_v30 = vld [vmem:[%s6707_s17 + $0x68] sm:$0xff] }
  0x1d   : > { %535 = vrot.lane.b32.xlu0 %v6725_v6, %s6611_s20  ;;  %529 = vrot.lane.b32.xlu1 %v6727_v7, %s6611_s20  ;;  %v6744_v17 = vmax.f32 %v366_v14, 0.0  ;;  %v6749_v19 = vmax.f32 %v367_v15, 0.0  ;;  %v6779_v31 = vmax.f32 %v344_v28, 0.0  ;;  %v346_v32 = vld [vmem:[%s6707_s17 + $0x60] sm:$0xff]  ;;  %v6784_v33 = vmax.f32 %v347_v30, 0.0  ;;  %v349_v34 = vld [vmem:[%s6707_s17 + $0x78] sm:$0xff] }
  0x1e   : > { %12470 = vst [vmem:[#allocation12_spill] sm:$0xff] %v6769_v27  ;;  %12471 = vst [vmem:[#allocation13_spill] sm:$0xff] %v6774_v29  ;;  %v6789_v35 = vmax.f32 %v346_v32, 0.0  ;;  %v348_v36 = vld [vmem:[%s6707_s17 + $0x70] sm:$0xff]  ;;  %v6794_v37 = vmax.f32 %v349_v34, 0.0  ;;  %v6819_v45 = vsel %vm412_vm0, %v416_v42, %v417_v43  ;;  %v419_v46 = vrot.slane %v6712_v3, 7 }
  0x1f   : > { %12465 = vst [vmem:[#allocation7_spill] sm:$0xff] %v6744_v17  ;;  %12466 = vst [vmem:[#allocation8_spill] sm:$0xff] %v6749_v19  ;;  %v413_v38 = vrot.slane %v6744_v17, 7  ;;  %v414_v39 = vrot.slane %v6749_v19, 7  ;;  %v6800_v40 = vmax.f32 %v348_v36, 0.0  ;;  %v420_v47 = vrot.slane %v6736_v10, 7 }
  0x20   : > { %12472 = vst [vmem:[#allocation14_spill] sm:$0xff] %v6779_v31  ;;  %12473 = vst [vmem:[#allocation15_spill] sm:$0xff] %v6784_v33  ;;  %p358_p8 = scmp.lt.s32.totalorder %s357_s25, 15  ;;  %v6826_v48 = vsel %vm412_vm0, 0.0, %v416_v42  ;;  %v422_v50 = vrot.slane %v6725_v6, 7  ;;  %v423_v51 = vrot.slane %v6742_v16, 7 }
  0x21   : > { %533 = vrot.lane.b32.xlu1 %v6736_v10, %s6611_s20  ;;  %523 = vrot.lane.b32.xlu0 %v6744_v17, %s6611_s20  ;;  %12474 = vst [vmem:[#allocation16_spill] sm:$0xff] %v6789_v35  ;;  %12475 = vst [vmem:[#allocation17_spill] sm:$0xff] %v6794_v37  ;;  %v6805_v41 = vsel %vm412_vm0, %v413_v38, %v414_v39  ;;  %v6812_v44 = vsel %vm412_vm0, 0.0, %v413_v38  ;;  %v6831_v49 = vsel %vm412_vm0, %v419_v46, %v420_v47  ;;  %p330_p9 = scmp.eq.s32.totalorder %s6593_s27, 1  ;;  %s6613_s14 = smov 12  }
  0x22   : > { %12476 = vst [vmem:[#allocation18_spill] sm:$0xff] %v6800_v40  ;;  %12477 = vst [vmem:[#allocation19_spill] sm:$0xff] %v6831_v49  ;;  %s13621_s25 = smov (!%p358_p8, %s357_s25), 15  ;;  %v6838_v52 = vsel %vm412_vm0, 0.0, %v419_v46  ;;  %v6843_v53 = vsel %vm412_vm0, %v422_v50, %v423_v51  ;;  %v425_v54 = vrot.slane %v6759_v23, 7  ;;  %v426_v55 = vrot.slane %v6754_v21, 7 }
  0x23   : > { %12478 = vst [vmem:[#allocation20_spill] sm:$0xff] %v6843_v53  ;;  %v6851_v56 = vsel %vm412_vm0, 0.0, %v422_v50  ;;  %s5883_s26 = sshll.u32 %s13621_s25, 4  ;;  %v428_v58 = vrot.slane %v6769_v27, 7  ;;  %v429_v59 = vrot.slane %v6764_v25, 7  ;;  %v431_v62 = vrot.slane %v6779_v31, 7 }
  0x24   : > { %12479 = vst [vmem:[#allocation21_spill] sm:$0xff] %v6851_v56  ;;  %v6856_v57 = vsel %vm412_vm0, %v425_v54, %v426_v55  ;;  %s368_s12 = scalar_select %p330_p9, 0.0, 1.0  ;;  %v6866_v60 = vsel %vm412_vm0, 0.0, %v425_v54  ;;  %v432_v63 = vrot.slane %v6774_v29, 7  ;;  %v434_v8 = vrot.slane %v6789_v35, 7 }
  0x25   : > { %537 = vrot.lane.b32.xlu1 %v6742_v16, %s6611_s20  ;;  %525 = vrot.lane.b32.xlu0 %v6749_v19, %s6611_s20  ;;  %12480 = vst [vmem:[#allocation22_spill] sm:$0xff] %v6856_v57  ;;  %s361_s13 = scalar_lea.vmem %s6704_s16, %s5883_s26  ;;  %12481 = vst [vmem:[#allocation23_spill] sm:$0xff] %v6866_v60  ;;  %v6871_v61 = vsel %vm412_vm0, %v428_v58, %v429_v59  ;;  %v6878_v5 = vsel %vm412_vm0, 0.0, %v428_v58  ;;  %v435_v9 = vrot.slane %v6784_v33, 7  ;;  %v6890_v14 = vsel %vm412_vm0, 0.0, %v431_v62  ;;  %s6614_s15 = smov 16  }
  0x26   : > { %12482 = vst [vmem:[#allocation24_spill] sm:$0xff] %v6871_v61  ;;  %v362_v0 = vld [vmem:[%s361_s13] sm:$0xff]  ;;  %v363_v1 = vld [vmem:[%s361_s13 + $0x8] sm:$0xff]  ;;  %v369_v2 = vstv %s368_s12  ;;  %12483 = vst [vmem:[#allocation25_spill] sm:$0xff] %v6878_v5  ;;  %v6885_v11 = vsel %vm412_vm0, %v431_v62, %v432_v63  ;;  %v437_v18 = vrot.slane %v6800_v40, 7  ;;  %v438_v20 = vrot.slane %v6794_v37, 7 }
  0x27   : > { %12484 = vst [vmem:[#allocation26_spill] sm:$0xff] %v6885_v11  ;;  %v370_v12 = vmul.f32 %v369_v2, %v362_v0  ;;  %v371_v13 = vmul.f32 %v369_v2, %v363_v1  ;;  %12485 = vst [vmem:[#allocation27_spill] sm:$0xff] %v6890_v14  ;;  %v6895_v15 = vsel %vm412_vm0, %v434_v8, %v435_v9  ;;  %v6906_v26 = vsel %vm412_vm0, 0.0, %v434_v8  ;;  %v1436_v62 = vld [vmem:[%s12128_s1] sm:$0xff]  ;;  %v1437_v63 = vld [vmem:[%s12128_s1 + $0x8] sm:$0xff]  ;;  %s6615_s25 = smov 20  }
  0x28   : > { %12486 = vst [vmem:[#allocation28_spill] sm:$0xff] %v6895_v15  ;;  %12487 = vst [vmem:[#allocation29_spill] sm:$0xff] %v6906_v26  ;;  %v6911_v28 = vsel %vm412_vm0, %v437_v18, %v438_v20  ;;  %v6918_v34 = vsel %vm412_vm0, 0.0, %v437_v18  ;;  %v6477_v0 = vpack.c.bf16 %v1437_v63, %v1436_v62  ;;  %v1438_v9 = vld [vmem:[%s12128_s1 + $0x10] sm:$0xff]  ;;  %s2228_s21 = scalar_select %p329_p6, 1, 0 }
  0x29   : > { %541 = vrot.lane.b32.xlu1 %v6754_v21, %s6611_s20  ;;  %539 = vrot.lane.b32.xlu0 %v6759_v23, %s6611_s20  ;;  %v6899_v22 = vmax.f32 %v370_v12, 0.0  ;;  %v6901_v24 = vmax.f32 %v371_v13, 0.0  ;;  %12488 = vst [vmem:[#allocation30_spill] sm:$0xff] %v6911_v28  ;;  %12489 = vst [vmem:[#allocation31_spill] sm:$0xff] %v6918_v34  ;;  %s6616_s13 = smov 24   ;;  %s6617_s18 = smov 28  }
  0x2a   : > { %6478 = vmatprep.subr.bf16.mxu0 %v6477_v0  ;;  %6501 = vmatprep.subr.bf16.mxu1 %v6477_v0  ;;  %s2231_s16 = scalar_select %p330_p9, 1, 0 }
  0x2b   : > { %v440_v30 = vrot.slane %v6899_v22, 7  ;;  %v441_v32 = vrot.slane %v6901_v24, 7  ;;  %6480 = vmatpush3.bf16.msra.mxu0 %v6477_v0  ;;  %6503 = vmatpush3.bf16.msra.mxu1 %v6477_v0  ;;  %s6618_s23 = smov 32  }
  0x2c   : > { %6219 = vmatprep.subr.mxu0 %v1438_v9  ;;  %6502 = vmatprep.subr.mxu1 %v1438_v9 }
  0x2d   : > { %545 = vrot.lane.b32.xlu1 %v6764_v25, %s6611_s20  ;;  %543 = vrot.lane.b32.xlu0 %v6769_v27, %s6611_s20  ;;  %v6923_v36 = vsel %vm412_vm0, %v440_v30, %v441_v32  ;;  %v6928_v38 = vsel %vm412_vm0, 0.0, %v440_v30 }
  0x2f   : > { %6220 = vmatpush3.msra.mxu0 %v1438_v9  ;;  %6504 = vmatpush3.msra.mxu1 %v1438_v9 }
  0x31   : > { %549 = vrot.lane.b32.xlu1 %v6774_v29, %s6611_s20  ;;  %547 = vrot.lane.b32.xlu0 %v6779_v31, %s6611_s20 }
  0x35   : > { %553 = vrot.lane.b32.xlu1 %v6784_v33, %s6611_s20  ;;  %551 = vrot.lane.b32.xlu0 %v6789_v35, %s6611_s20 }
  0x39   : > { %557 = vrot.lane.b32.xlu1 %v6794_v37, %s6611_s20  ;;  %555 = vrot.lane.b32.xlu0 %v6800_v40, %s6611_s20 }
  0x3d   : > { %589 = vrot.lane.b32.xlu1 %v6805_v41, %s6612_s24  ;;  %587 = vrot.lane.b32.xlu0 %v6812_v44, %s6612_s24 }
  0x41   : > { %593 = vrot.lane.b32.xlu1 %v6819_v45, %s6612_s24  ;;  %591 = vrot.lane.b32.xlu0 %v6826_v48, %s6612_s24 }
  0x45   : > { %597 = vrot.lane.b32.xlu1 %v6831_v49, %s6612_s24  ;;  %595 = vrot.lane.b32.xlu0 %v6838_v52, %s6612_s24 }
  0x49   : > { %601 = vrot.lane.b32.xlu1 %v6843_v53, %s6612_s24  ;;  %599 = vrot.lane.b32.xlu0 %v6851_v56, %s6612_s24 }
  0x4d   : > { %605 = vrot.lane.b32.xlu1 %v6856_v57, %s6612_s24  ;;  %603 = vrot.lane.b32.xlu0 %v6866_v60, %s6612_s24 }
  0x51   : > { %609 = vrot.lane.b32.xlu1 %v6871_v61, %s6612_s24  ;;  %607 = vrot.lane.b32.xlu0 %v6878_v5, %s6612_s24 }
  0x55   : > { %613 = vrot.lane.b32.xlu1 %v6885_v11, %s6612_s24  ;;  %611 = vrot.lane.b32.xlu0 %v6890_v14, %s6612_s24 }
  0x59   : > { %617 = vrot.lane.b32.xlu1 %v6895_v15, %s6612_s24  ;;  %615 = vrot.lane.b32.xlu0 %v6906_v26, %s6612_s24 }
  0x5d   : > { %621 = vrot.lane.b32.xlu1 %v6911_v28, %s6612_s24  ;;  %619 = vrot.lane.b32.xlu0 %v6918_v34, %s6612_s24 }
  0x61   : > { %625 = vrot.lane.b32.xlu1 %v6923_v36, %s6612_s24  ;;  %623 = vrot.lane.b32.xlu0 %v6928_v38, %s6612_s24 }
  0x65   : > { %649 = vrot.lane.b32.xlu1 %v6749_v19, %s6613_s14  ;;  %647 = vrot.lane.b32.xlu0 %v6744_v17, %s6613_s14 }
  0x69   : > { %653 = vrot.lane.b32.xlu1 %v6727_v7, %s6613_s14  ;;  %651 = vrot.lane.b32.xlu0 %v6714_v4, %s6613_s14 }
  0x6d   : > { %657 = vrot.lane.b32.xlu1 %v6736_v10, %s6613_s14  ;;  %655 = vrot.lane.b32.xlu0 %v6712_v3, %s6613_s14 }
  0x71   : > { %661 = vrot.lane.b32.xlu1 %v6742_v16, %s6613_s14  ;;  %659 = vrot.lane.b32.xlu0 %v6725_v6, %s6613_s14 }
  0x75   : > { %665 = vrot.lane.b32.xlu1 %v6754_v21, %s6613_s14  ;;  %663 = vrot.lane.b32.xlu0 %v6759_v23, %s6613_s14 }
  0x79   : > { %669 = vrot.lane.b32.xlu1 %v6764_v25, %s6613_s14  ;;  %667 = vrot.lane.b32.xlu0 %v6769_v27, %s6613_s14 }
  0x7d   : > { %673 = vrot.lane.b32.xlu1 %v6774_v29, %s6613_s14  ;;  %671 = vrot.lane.b32.xlu0 %v6779_v31, %s6613_s14 }
  0x81   : > { %677 = vrot.lane.b32.xlu1 %v6784_v33, %s6613_s14  ;;  %675 = vrot.lane.b32.xlu0 %v6789_v35, %s6613_s14 }
  0x85   : > { %681 = vrot.lane.b32.xlu1 %v6794_v37, %s6613_s14  ;;  %679 = vrot.lane.b32.xlu0 %v6800_v40, %s6613_s14 }
  0x89   : > { %685 = vrot.lane.b32.xlu1 %v6901_v24, %s6613_s14  ;;  %683 = vrot.lane.b32.xlu0 %v6899_v22, %s6613_s14 }
  0x8b   : > { %v6972_v39 = vpop.permute.xlu0 %531  ;;  %v6974_v42 = vpop.permute.xlu1 %527 }
  0x8d   : > { %709 = vrot.lane.b32.xlu1 %v6819_v45, %s6614_s15  ;;  %707 = vrot.lane.b32.xlu0 %v6826_v48, %s6614_s15 }
  0x8f   : > { %v6980_v43 = vpop.permute.xlu1 %529  ;;  %v6984_v46 = vpop.permute.xlu0 %535 }
  0x91   : > { %713 = vrot.lane.b32.xlu1 %v6831_v49, %s6614_s15  ;;  %711 = vrot.lane.b32.xlu0 %v6838_v52, %s6614_s15 }
  0x93   : > { %v6988_v47 = vpop.permute.xlu1 %533  ;;  %v6994_v50 = vpop.permute.xlu0 %523 }
  0x94   : > { %12490 = vst [vmem:[#allocation32_spill] sm:$0xff] %v6988_v47  ;;  %v495_v47 = vrot.slane %v6784_v33, 1 }
  0x95   : > { %717 = vrot.lane.b32.xlu1 %v6843_v53, %s6614_s15  ;;  %715 = vrot.lane.b32.xlu0 %v6851_v56, %s6614_s15 }
  0x97   : > { %v6996_v51 = vpop.permute.xlu1 %537  ;;  %v7002_v54 = vpop.permute.xlu0 %525 }
  0x98   : > { %12491 = vst [vmem:[#allocation33_spill] sm:$0xff] %v6996_v51  ;;  %v492_v51 = vrot.slane %v6774_v29, 1 }
  0x99   : > { %721 = vrot.lane.b32.xlu1 %v6856_v57, %s6614_s15  ;;  %719 = vrot.lane.b32.xlu0 %v6866_v60, %s6614_s15 }
  0x9b   : > { %v7004_v55 = vpop.permute.xlu1 %541  ;;  %v7010_v58 = vpop.permute.xlu0 %539 }
  0x9c   : > { %12492 = vst [vmem:[#allocation34_spill] sm:$0xff] %v7004_v55  ;;  %12493 = vst [vmem:[#allocation35_spill] sm:$0xff] %v7010_v58  ;;  %v489_v58 = vrot.slane %v6764_v25, 1 }
  0x9d   : > { %725 = vrot.lane.b32.xlu1 %v6871_v61, %s6614_s15  ;;  %723 = vrot.lane.b32.xlu0 %v6878_v5, %s6614_s15 }
  0x9e   : > { %v7208_v53 = vsel %vm472_vm1, %v489_v58, 0.0 }
  0x9f   : > { %v7012_v59 = vpop.permute.xlu1 %545  ;;  %v7024_v1 = vpop.permute.xlu0 %543  ;;  %12519 = vst [vmem:[#allocation61_spill] sm:$0xff] %v7208_v53 }
  0xa0   : > { %12494 = vst [vmem:[#allocation36_spill] sm:$0xff] %v7012_v59  ;;  %12495 = vst [vmem:[#allocation37_spill] sm:$0xff] %v7024_v1 }
  0xa1   : > { %729 = vrot.lane.b32.xlu1 %v6885_v11, %s6614_s15  ;;  %727 = vrot.lane.b32.xlu0 %v6890_v14, %s6614_s15 }
  0xa3   : > { %v7026_v2 = vpop.permute.xlu1 %549  ;;  %v7032_v8 = vpop.permute.xlu0 %547 }
  0xa4   : > { %12496 = vst [vmem:[#allocation38_spill] sm:$0xff] %v7026_v2  ;;  %12497 = vst [vmem:[#allocation39_spill] sm:$0xff] %v7032_v8 }
  0xa5   : > { %733 = vrot.lane.b32.xlu1 %v6895_v15, %s6614_s15  ;;  %731 = vrot.lane.b32.xlu0 %v6906_v26, %s6614_s15  ;;  %v480_v26 = vrot.slane %v6736_v10, 1  ;;  %v483_v15 = vrot.slane %v6742_v16, 1 }
  0xa7   : > { %v7037_v12 = vpop.permute.xlu1 %553  ;;  %v7043_v13 = vpop.permute.xlu0 %551  ;;  %v7176_v1 = vsel %vm472_vm1, %v483_v15, 0.0 }
  0xa8   : > { %12498 = vst [vmem:[#allocation40_spill] sm:$0xff] %v7037_v12  ;;  %12499 = vst [vmem:[#allocation41_spill] sm:$0xff] %v7043_v13 }
  0xa9   : > { %737 = vrot.lane.b32.xlu1 %v6911_v28, %s6614_s15  ;;  %735 = vrot.lane.b32.xlu0 %v6918_v34, %s6614_s15  ;;  %v476_v28 = vrot.slane %v6714_v4, 1 }
  0xab   : > { %v7045_v18 = vpop.permute.xlu1 %557  ;;  %v7051_v20 = vpop.permute.xlu0 %555 }
  0xac   : > { %12500 = vst [vmem:[#allocation42_spill] sm:$0xff] %v7045_v18  ;;  %12501 = vst [vmem:[#allocation43_spill] sm:$0xff] %v7051_v20 }
  0xad   : > { %741 = vrot.lane.b32.xlu1 %v6923_v36, %s6614_s15  ;;  %739 = vrot.lane.b32.xlu0 %v6928_v38, %s6614_s15 }
  0xaf   : > { %v7053_v30 = vpop.permute.xlu1 %589  ;;  %v7059_v32 = vpop.permute.xlu0 %587 }
  0xb1   : > { %763 = vrot.lane.b32.xlu1 %v6727_v7, %s6615_s25  ;;  %761 = vrot.lane.b32.xlu0 %v6714_v4, %s6615_s25 }
  0xb3   : > { %v7061_v62 = vpop.permute.xlu1 %593  ;;  %v7067_v36 = vpop.permute.xlu0 %591 }
  0xb5   : > { %767 = vrot.lane.b32.xlu1 %v6736_v10, %s6615_s25  ;;  %765 = vrot.lane.b32.xlu0 %v6712_v3, %s6615_s25 }
  0xb7   : > { %v7069_v63 = vpop.permute.xlu1 %597  ;;  %v7075_v38 = vpop.permute.xlu0 %595 }
  0xb9   : > { %771 = vrot.lane.b32.xlu1 %v6742_v16, %s6615_s25  ;;  %769 = vrot.lane.b32.xlu0 %v6725_v6, %s6615_s25 }
  0xbb   : > { %v7077_v0 = vpop.permute.xlu1 %601  ;;  %v7083_v9 = vpop.permute.xlu0 %599 }
  0xbc   : > { %12502 = vst [vmem:[#allocation44_spill] sm:$0xff] %v7077_v0  ;;  %12503 = vst [vmem:[#allocation45_spill] sm:$0xff] %v7083_v9  ;;  %v486_v9 = vrot.slane %v6754_v21, 1 }
  0xbd   : > { %775 = vrot.lane.b32.xlu1 %v6754_v21, %s6615_s25  ;;  %773 = vrot.lane.b32.xlu0 %v6759_v23, %s6615_s25 }
  0xbe   : > { %v7192_v60 = vsel %vm472_vm1, %v486_v9, 0.0 }
  0xbf   : > { %v7085_v11 = vpop.permute.xlu1 %605  ;;  %v7091_v2 = vpop.permute.xlu0 %603 }
  0xc0   : > { %12504 = vst [vmem:[#allocation46_spill] sm:$0xff] %v7085_v11  ;;  %12505 = vst [vmem:[#allocation47_spill] sm:$0xff] %v7091_v2 }
  0xc1   : > { %779 = vrot.lane.b32.xlu1 %v6764_v25, %s6615_s25  ;;  %777 = vrot.lane.b32.xlu0 %v6769_v27, %s6615_s25 }
  0xc3   : > { %v7093_v14 = vpop.permute.xlu1 %609  ;;  %v7099_v8 = vpop.permute.xlu0 %607 }
  0xc4   : > { %12506 = vst [vmem:[#allocation48_spill] sm:$0xff] %v7093_v14  ;;  %12507 = vst [vmem:[#allocation49_spill] sm:$0xff] %v7099_v8 }
  0xc5   : > { %783 = vrot.lane.b32.xlu1 %v6774_v29, %s6615_s25  ;;  %781 = vrot.lane.b32.xlu0 %v6779_v31, %s6615_s25 }
  0xc7   : > { %v7101_v0 = vpop.permute.xlu1 %613  ;;  %v7107_v11 = vpop.permute.xlu0 %611 }
  0xc8   : > { %12508 = vst [vmem:[#allocation50_spill] sm:$0xff] %v7101_v0  ;;  %12509 = vst [vmem:[#allocation51_spill] sm:$0xff] %v7107_v11  ;;  %v474_v0 = vrot.slane %v6749_v19, 1  ;;  %v473_v11 = vrot.slane %v6744_v17, 1 }
  0xc9   : > { %787 = vrot.lane.b32.xlu1 %v6784_v33, %s6615_s25  ;;  %785 = vrot.lane.b32.xlu0 %v6789_v35, %s6615_s25 }
  0xca   : > { %v7128_v34 = vsel %vm472_vm1, %v474_v0, 0.0 }
  0xcb   : > { %v7109_v2 = vpop.permute.xlu1 %617  ;;  %v7115_v14 = vpop.permute.xlu0 %615 }
  0xcc   : > { %12510 = vst [vmem:[#allocation52_spill] sm:$0xff] %v7109_v2  ;;  %12511 = vst [vmem:[#allocation53_spill] sm:$0xff] %v7115_v14  ;;  %v477_v14 = vrot.slane %v6727_v7, 1 }
  0xcd   : > { %791 = vrot.lane.b32.xlu1 %v6794_v37, %s6615_s25  ;;  %789 = vrot.lane.b32.xlu0 %v6800_v40, %s6615_s25 }
  0xcf   : > { %v7118_v8 = vpop.permute.xlu1 %621  ;;  %v7125_v2 = vpop.permute.xlu0 %619 }
  0xd0   : > { %12512 = vst [vmem:[#allocation54_spill] sm:$0xff] %v7118_v8  ;;  %12513 = vst [vmem:[#allocation55_spill] sm:$0xff] %v7125_v2  ;;  %v7136_v8 = vsel %vm472_vm1, %v473_v11, %v474_v0  ;;  %v7144_v2 = vsel %vm472_vm1, %v477_v14, 0.0  ;;  %v7152_v11 = vsel %vm472_vm1, %v476_v28, %v477_v14  ;;  %v479_v0 = vrot.slane %v6712_v3, 1 }
  0xd1   : > { %795 = vrot.lane.b32.xlu1 %v6901_v24, %s6615_s25  ;;  %793 = vrot.lane.b32.xlu0 %v6899_v22, %s6615_s25  ;;  %v482_v28 = vrot.slane %v6725_v6, 1 }
  0xd2   : > { %v7168_v14 = vsel %vm472_vm1, %v479_v0, %v480_v26  ;;  %v485_v0 = vrot.slane %v6759_v23, 1 }
  0xd3   : > { %v7131_v20 = vpop.permute.xlu1 %625  ;;  %v7141_v18 = vpop.permute.xlu0 %623 }
  0xd4   : > { %12514 = vst [vmem:[#allocation56_spill] sm:$0xff] %v7131_v20  ;;  %12515 = vst [vmem:[#allocation57_spill] sm:$0xff] %v7141_v18  ;;  %v7160_v18 = vsel %vm472_vm1, %v480_v26, 0.0  ;;  %v7184_v26 = vsel %vm472_vm1, %v482_v28, %v483_v15  ;;  %v7200_v15 = vsel %vm472_vm1, %v485_v0, %v486_v9  ;;  %v488_v28 = vrot.slane %v6769_v27, 1 }
  0xd5   : > { %993 = vrot.lane.b32.xlu1 %v7128_v34, %s6611_s20  ;;  %991 = vrot.lane.b32.xlu0 %v7136_v8, %s6611_s20  ;;  %12517 = vst [vmem:[#allocation59_spill] sm:$0xff] %v7200_v15  ;;  %v491_v0 = vrot.slane %v6779_v31, 1 }
  0xd6   : > { %v7216_v9 = vsel %vm472_vm1, %v488_v28, %v489_v58  ;;  %v494_v28 = vrot.slane %v6789_v35, 1 }
  0xd7   : > { %v7147_v13 = vpop.permute.xlu1 %649  ;;  %v7157_v20 = vpop.permute.xlu0 %647  ;;  %12521 = vst [vmem:[#allocation63_spill] sm:$0xff] %v7216_v9  ;;  %v7232_v58 = vsel %vm472_vm1, %v491_v0, %v492_v51  ;;  %v497_v0 = vrot.slane %v6800_v40, 1 }
  0xd8   : > { %12525 = vst [vmem:[#allocation67_spill] sm:$0xff] %v7232_v58 }
  0xd9   : > { %997 = vrot.lane.b32.xlu1 %v7144_v2, %s6611_s20  ;;  %995 = vrot.lane.b32.xlu0 %v7152_v11, %s6611_s20 }
  0xdb   : > { %v7163_v12 = vpop.permute.xlu1 %653  ;;  %v7173_v5 = vpop.permute.xlu0 %651 }
  0xdd   : > { %1001 = vrot.lane.b32.xlu1 %v7160_v18, %s6611_s20  ;;  %999 = vrot.lane.b32.xlu0 %v7168_v14, %s6611_s20 }
  0xdf   : > { %v7179_v61 = vpop.permute.xlu1 %657  ;;  %v7189_v59 = vpop.permute.xlu0 %655 }
  0xe1   : > { %1005 = vrot.lane.b32.xlu1 %v7176_v1, %s6611_s20  ;;  %1003 = vrot.lane.b32.xlu0 %v7184_v26, %s6611_s20 }
  0xe3   : > { %v7195_v57 = vpop.permute.xlu1 %661  ;;  %v7205_v55 = vpop.permute.xlu0 %659 }
  0xe4   : > { %12516 = vst [vmem:[#allocation58_spill] sm:$0xff] %v7195_v57  ;;  %12518 = vst [vmem:[#allocation60_spill] sm:$0xff] %v7205_v55  ;;  %v7224_v55 = vsel %vm472_vm1, %v492_v51, 0.0  ;;  %v7248_v51 = vsel %vm472_vm1, %v494_v28, %v495_v47 }
  0xe5   : > { %1009 = vrot.lane.b32.xlu1 %v7192_v60, %s6611_s20  ;;  %1007 = vrot.lane.b32.xlu0 %v7200_v15, %s6611_s20  ;;  %12523 = vst [vmem:[#allocation65_spill] sm:$0xff] %v7224_v55  ;;  %12529 = vst [vmem:[#allocation71_spill] sm:$0xff] %v7248_v51 }
  0xe7   : > { %v7211_v49 = vpop.permute.xlu1 %665  ;;  %v7221_v57 = vpop.permute.xlu0 %663 }
  0xe8   : > { %12520 = vst [vmem:[#allocation62_spill] sm:$0xff] %v7211_v49  ;;  %12522 = vst [vmem:[#allocation64_spill] sm:$0xff] %v7221_v57  ;;  %v7240_v57 = vsel %vm472_vm1, %v495_v47, 0.0 }
  0xe9   : > { %1013 = vrot.lane.b32.xlu1 %v7208_v53, %s6611_s20  ;;  %1011 = vrot.lane.b32.xlu0 %v7216_v9, %s6611_s20  ;;  %12527 = vst [vmem:[#allocation69_spill] sm:$0xff] %v7240_v57  ;;  %v498_v53 = vrot.slane %v6794_v37, 1 }
  0xeb   : > { %v7227_v56 = vpop.permute.xlu1 %669  ;;  %v7237_v49 = vpop.permute.xlu0 %667 }
  0xec   : > { %12524 = vst [vmem:[#allocation66_spill] sm:$0xff] %v7227_v56  ;;  %12526 = vst [vmem:[#allocation68_spill] sm:$0xff] %v7237_v49  ;;  %v7256_v49 = vsel %vm472_vm1, %v498_v53, 0.0 }
  0xed   : > { %1017 = vrot.lane.b32.xlu1 %v7224_v55, %s6611_s20  ;;  %1015 = vrot.lane.b32.xlu0 %v7232_v58, %s6611_s20 }
  0xef   : > { %v7243_v15 = vpop.permute.xlu1 %673  ;;  %v7253_v56 = vpop.permute.xlu0 %671 }
  0xf0   : > { %12528 = vst [vmem:[#allocation70_spill] sm:$0xff] %v7243_v15  ;;  %12530 = vst [vmem:[#allocation72_spill] sm:$0xff] %v7253_v56  ;;  %v7263_v15 = vsel %vm472_vm1, %v497_v0, %v498_v53 }
  0xf1   : > { %1021 = vrot.lane.b32.xlu1 %v7240_v57, %s6611_s20  ;;  %1019 = vrot.lane.b32.xlu0 %v7248_v51, %s6611_s20 }
  0xf3   : > { %v7258_v55 = vpop.permute.xlu1 %677  ;;  %v7267_v47 = vpop.permute.xlu0 %675 }
  0xf4   : > { %12531 = vst [vmem:[#allocation73_spill] sm:$0xff] %v7258_v55 }
  0xf5   : > { %1025 = vrot.lane.b32.xlu1 %v7256_v49, %s6611_s20  ;;  %1023 = vrot.lane.b32.xlu0 %v7263_v15, %s6611_s20 }
  0xf7   : > { %v7269_v28 = vpop.permute.xlu1 %681  ;;  %v7275_v56 = vpop.permute.xlu0 %679 }
  0xf8   : > { %12532 = vst [vmem:[#allocation74_spill] sm:$0xff] %v7269_v28 }
  0xf9   : > { %1047 = vrot.lane.b32.xlu1 %v6749_v19, %s6612_s24  ;;  %1045 = vrot.lane.b32.xlu0 %v6744_v17, %s6612_s24 }
  0xfb   : > { %v7277_v55 = vpop.permute.xlu1 %685  ;;  %v7283_v53 = vpop.permute.xlu0 %683 }
  0xfc   : > { %12533 = vst [vmem:[#allocation75_spill] sm:$0xff] %v7277_v55 }
  0xfd   : > { %1051 = vrot.lane.b32.xlu1 %v6727_v7, %s6612_s24  ;;  %1049 = vrot.lane.b32.xlu0 %v6714_v4, %s6612_s24 }
  0xff   : > { %v7285_v0 = vpop.permute.xlu1 %709  ;;  %v708_v19 = vpop.permute.xlu0 %707 }
 0x101   : > { %1055 = vrot.lane.b32.xlu1 %v6736_v10, %s6612_s24  ;;  %1053 = vrot.lane.b32.xlu0 %v6712_v3, %s6612_s24 }
 0x103   : > { %v7291_v28 = vpop.permute.xlu1 %713  ;;  %v7297_v17 = vpop.permute.xlu0 %711 }
 0x105   : > { %1059 = vrot.lane.b32.xlu1 %v6742_v16, %s6612_s24  ;;  %1057 = vrot.lane.b32.xlu0 %v6725_v6, %s6612_s24 }
 0x107   : > { %v7299_v55 = vpop.permute.xlu1 %717  ;;  %v7305_v10 = vpop.permute.xlu0 %715 }
 0x109   : > { %1063 = vrot.lane.b32.xlu1 %v6754_v21, %s6612_s24  ;;  %1061 = vrot.lane.b32.xlu0 %v6759_v23, %s6612_s24 }
 0x10b   : > { %v7307_v4 = vpop.permute.xlu1 %721  ;;  %v7313_v16 = vpop.permute.xlu0 %719 }
 0x10d   : > { %1067 = vrot.lane.b32.xlu1 %v6764_v25, %s6612_s24  ;;  %1065 = vrot.lane.b32.xlu0 %v6769_v27, %s6612_s24 }
 0x10f   : > { %v7315_v3 = vpop.permute.xlu1 %725  ;;  %v7321_v21 = vpop.permute.xlu0 %723 }
 0x111   : > { %1071 = vrot.lane.b32.xlu1 %v6774_v29, %s6612_s24  ;;  %1069 = vrot.lane.b32.xlu0 %v6779_v31, %s6612_s24 }
 0x113   : > { %v7323_v6 = vpop.permute.xlu1 %729  ;;  %v7329_v25 = vpop.permute.xlu0 %727 }
 0x114   : > { %12534 = vst [vmem:[#allocation76_spill] sm:$0xff] %v7323_v6 }
 0x115   : > { %1075 = vrot.lane.b32.xlu1 %v6784_v33, %s6612_s24  ;;  %1073 = vrot.lane.b32.xlu0 %v6789_v35, %s6612_s24  ;;  %v816_v35 = vsel %vm815_vm3, %v6812_v44, %v6994_v50 }
 0x116   : > { %v835_v6 = vsel %vm834_vm2, %v816_v35, %v7059_v32  ;;  %v837_v50 = vsel %vm834_vm2, %v816_v35, %v7067_v36  ;;  %v818_v35 = vsel %vm815_vm3, %v6826_v48, %v6974_v42 }
 0x117   : > { %v7331_v23 = vpop.permute.xlu1 %733  ;;  %v7337_v29 = vpop.permute.xlu0 %731 }
 0x118   : > { %12535 = vst [vmem:[#allocation77_spill] sm:$0xff] %v7331_v23  ;;  %12536 = vst [vmem:[#allocation78_spill] sm:$0xff] %v7337_v29 }
 0x119   : > { %1079 = vrot.lane.b32.xlu1 %v6794_v37, %s6612_s24  ;;  %1077 = vrot.lane.b32.xlu0 %v6800_v40, %s6612_s24  ;;  %v817_v40 = vsel %vm815_vm3, %v6805_v41, %v7002_v54  ;;  %v872_v41 = vsel %vm871_vm4, %v835_v6, %v7157_v20 }
 0x11a   : > { %v836_v23 = vsel %vm834_vm2, %v817_v40, %v7053_v30  ;;  %v909_v30 = vsel %vm908_vm5, %v872_v41, %v708_v19  ;;  %v838_v32 = vsel %vm834_vm2, %v817_v40, %v7061_v62 }
 0x11b   : > { %v7339_v27 = vpop.permute.xlu1 %737  ;;  %v7345_v33 = vpop.permute.xlu0 %735  ;;  %v875_v41 = vsel %vm871_vm4, %v838_v32, %v7163_v12 }
 0x11c   : > { %v912_v40 = vsel %vm908_vm5, %v875_v41, %v7285_v0 }
 0x11d   : > { %1083 = vrot.lane.b32.xlu1 %v6901_v24, %s6612_s24  ;;  %1081 = vrot.lane.b32.xlu0 %v6899_v22, %s6612_s24 }
 0x11f   : > { %v7347_v31 = vpop.permute.xlu1 %741  ;;  %v7356_v37 = vpop.permute.xlu0 %739 }
 0x121   : > { %1108 = vrot.lane.b32.xlu1 %v7128_v34, %s6613_s14  ;;  %v873_v34 = vsel %vm871_vm4, %v836_v23, %v7147_v13  ;;  %1106 = vrot.lane.b32.xlu0 %v7136_v8, %s6613_s14  ;;  %v874_v8 = vsel %vm871_vm4, %v837_v50, %v7173_v5  ;;  %v819_v50 = vsel %vm815_vm3, %v6819_v45, %v6980_v43 }
 0x122   : > { %v910_v44 = vsel %vm908_vm5, %v873_v34, %v7285_v0  ;;  %v911_v20 = vsel %vm908_vm5, %v874_v8, %v708_v19  ;;  %v839_v19 = vsel %vm834_vm2, %v818_v35, %v7067_v36  ;;  %v841_v45 = vsel %vm834_vm2, %v818_v35, %v7075_v38 }
 0x123   : > { %v764_v29 = vpop.permute.xlu1 %763  ;;  %v762_v54 = vpop.permute.xlu0 %761  ;;  %v876_v48 = vsel %vm871_vm4, %v839_v19, %v7173_v5  ;;  %v840_v5 = vsel %vm834_vm2, %v819_v50, %v7061_v62 }
 0x124   : > { %v947_v23 = vsel %vm945_vm6, %v910_v44, %v764_v29  ;;  %v946_v6 = vsel %vm945_vm6, %v909_v30, %v762_v54  ;;  %v948_v34 = vsel %vm945_vm6, %v911_v20, %v762_v54  ;;  %v913_v36 = vsel %vm908_vm5, %v876_v48, %v7297_v17  ;;  %v12539_v48 = vld [vmem:[#allocation19_spill] sm:$0xff] }
 0x125   : > { %1112 = vrot.lane.b32.xlu1 %v7144_v2, %s6613_s14  ;;  %1110 = vrot.lane.b32.xlu0 %v7152_v11, %s6613_s14  ;;  %v949_v54 = vsel %vm945_vm6, %v912_v40, %v764_v29  ;;  %v877_v43 = vsel %vm871_vm4, %v840_v5, %v7163_v12  ;;  %v878_v29 = vsel %vm871_vm4, %v841_v45, %v7189_v59 }
 0x126   : > { %6221 = vmatprep.mubr.msk.f32.mxu0 %vm1446_vm7, %v946_v6  ;;  %v914_v62 = vsel %vm908_vm5, %v877_v43, %v7291_v28  ;;  %v915_v8 = vsel %vm908_vm5, %v878_v29, %v7297_v17  ;;  %v820_v12 = vsel %vm815_vm3, %v6838_v52, %v6972_v39  ;;  %v842_v20 = vsel %vm834_vm2, %v819_v50, %v7069_v63  ;;  %v12537_v52 = vld [vmem:[#allocation21_spill] sm:$0xff] }
 0x127   : > { %v768_v13 = vpop.permute.xlu1 %767  ;;  %6222 = vmatmul.mubr.msk.f32.vlgmr.msra.gmra.mrb[0].mxu0 %vm1446_vm7, %v947_v23  ;;  %v766_v44 = vpop.permute.xlu0 %765  ;;  %v843_v17 = vsel %vm834_vm2, %v820_v12, %v7075_v38  ;;  %v879_v32 = vsel %vm871_vm4, %v842_v20, %v7179_v61  ;;  %v822_v39 = vsel %vm815_vm3, %v12537_v52, %v6984_v46  ;;  %v12538_v38 = vld [vmem:[#allocation32_spill] sm:$0xff]  ;;  %v12540_v50 = vld [vmem:[#allocation33_spill] sm:$0xff]  ;;  %v12542_v46 = vld [vmem:[#allocation59_spill] sm:$0xff] }
 0x128   : > { %6224 = vmatprep.mubr.msk.f32.mxu0 %vm1446_vm7, %v948_v34  ;;  %v950_v0 = vsel %vm945_vm6, %v913_v36, %v766_v44  ;;  %v951_v6 = vsel %vm945_vm6, %v914_v62, %v768_v13  ;;  %v952_v35 = vsel %vm945_vm6, %v915_v8, %v766_v44  ;;  %v880_v19 = vsel %vm871_vm4, %v843_v17, %v7189_v59  ;;  %v12541_v36 = vld [vmem:[#allocation20_spill] sm:$0xff]  ;;  %v12545_v62 = vld [vmem:[#allocation61_spill] sm:$0xff]  ;;  %v12546_v8 = vld [vmem:[#allocation35_spill] sm:$0xff] }
 0x129   : > { %1116 = vrot.lane.b32.xlu1 %v7160_v18, %s6613_s14  ;;  %1114 = vrot.lane.b32.xlu0 %v7168_v14, %s6613_s14  ;;  %v916_v41 = vsel %vm908_vm5, %v879_v32, %v7291_v28  ;;  %v821_v40 = vsel %vm815_vm3, %v12539_v48, %v12538_v38  ;;  %v917_v5 = vsel %vm908_vm5, %v880_v19, %v7305_v10  ;;  %v12544_v28 = vld [vmem:[#allocation22_spill] sm:$0xff]  ;;  %v12550_v32 = vld [vmem:[#allocation45_spill] sm:$0xff] }
 0x12a   : > { %v953_v59 = vsel %vm945_vm6, %v916_v41, %v768_v13  ;;  %v844_v43 = vsel %vm834_vm2, %v821_v40, %v7069_v63  ;;  %v12549_v13 = vld [vmem:[#allocation24_spill] sm:$0xff]  ;;  %v845_v52 = vsel %vm834_vm2, %v820_v12, %v12550_v32  ;;  %v12551_v41 = vld [vmem:[#allocation37_spill] sm:$0xff] }
 0x12b   : > { %v7404_v42 = vpop.permute.xlu1 %771  ;;  %6225 = vmatmul.mubr.msk.f32.gmra.mrb[2].mxu0 %vm1446_vm7, %v949_v54  ;;  %v770_v30 = vpop.permute.xlu0 %769  ;;  %v823_v54 = vsel %vm815_vm3, %v12541_v36, %v12540_v50  ;;  %v881_v63 = vsel %vm871_vm4, %v844_v43, %v7179_v61  ;;  %v12552_v38 = vld [vmem:[#allocation25_spill] sm:$0xff]  ;;  %v12553_v50 = vld [vmem:[#allocation40_spill] sm:$0xff] }
 0x12c   : > { %6227 = vmatprep.mubr.msk.f32.mxu0 %vm1446_vm7, %v950_v0  ;;  %v12543_v0 = vld [vmem:[#allocation34_spill] sm:$0xff]  ;;  %v954_v29 = vsel %vm945_vm6, %v917_v5, %v770_v30  ;;  %v7499_v48 = vsel %vm815_vm3, %v12552_v38, %v12551_v41  ;;  %v12554_v36 = vld [vmem:[#allocation28_spill] sm:$0xff]  ;;  %v918_v61 = vsel %vm908_vm5, %v881_v63, %v7299_v55  ;;  %v12557_v43 = vld [vmem:[#allocation29_spill] sm:$0xff] }
 0x12d   : > { %1120 = vrot.lane.b32.xlu1 %v7176_v1, %s6613_s14  ;;  %1118 = vrot.lane.b32.xlu0 %v7184_v26, %s6613_s14  ;;  %v825_v45 = vsel %vm815_vm3, %v12544_v28, %v12543_v0  ;;  %v7504_v5 = vsel %vm815_vm3, %v12554_v36, %v12553_v50  ;;  %v12556_v28 = vld [vmem:[#allocation41_spill] sm:$0xff]  ;;  %v12560_v63 = vld [vmem:[#allocation43_spill] sm:$0xff]  ;;  %v12562_v50 = vld [vmem:[#allocation44_spill] sm:$0xff] }
 0x12e   : > { %v12561_v41 = vld [vmem:[#allocation31_spill] sm:$0xff]  ;;  %v846_v36 = vsel %vm834_vm2, %v821_v40, %v12562_v50 }
 0x12f   : > { %v7429_v23 = vpop.permute.xlu1 %775  ;;  %6228 = vmatmul.mubr.msk.f32.gmra.mrb[4].mxu0 %vm1446_vm7, %v951_v6  ;;  %v7449_v34 = vpop.permute.xlu0 %773  ;;  %v12547_v6 = vld [vmem:[#allocation23_spill] sm:$0xff]  ;;  %v7529_v38 = vsel %vm815_vm3, %v12561_v41, %v12560_v63  ;;  %v501_v41 = vrot.slane %v6901_v24, 1 }
 0x130   : > { %6230 = vmatprep.mubr.msk.f32.mxu0 %vm1446_vm7, %v952_v35  ;;  %v824_v20 = vsel %vm815_vm3, %v12547_v6, %v12546_v8  ;;  %v12548_v35 = vld [vmem:[#allocation36_spill] sm:$0xff]  ;;  %v12558_v8 = vld [vmem:[#allocation42_spill] sm:$0xff] }
 0x131   : > { %1124 = vrot.lane.b32.xlu1 %v7192_v60, %s6613_s14  ;;  %1122 = vrot.lane.b32.xlu0 %v12542_v46, %s6613_s14  ;;  %v7487_v17 = vsel %vm815_vm3, %v12549_v13, %v12548_v35  ;;  %v12559_v6 = vld [vmem:[#allocation30_spill] sm:$0xff] }
 0x132   : > { %v7518_v35 = vsel %vm815_vm3, %v12559_v6, %v12558_v8  ;;  %v12565_v6 = vld [vmem:[#allocation58_spill] sm:$0xff] }
 0x133   : > { %v7459_v44 = vpop.permute.xlu1 %779  ;;  %6231 = vmatmul.mubr.msk.f32.gmra.mrb[6].mxu0 %vm1446_vm7, %v953_v59  ;;  %v7493_v19 = vpop.permute.xlu0 %777  ;;  %v12555_v59 = vld [vmem:[#allocation60_spill] sm:$0xff]  ;;  %v883_v63 = vsel %vm871_vm4, %v846_v36, %v12565_v6 }
 0x134   : > { %6233 = vmatprep.mubr.msk.f32.mxu0 %vm1446_vm7, %v954_v29  ;;  %v882_v12 = vsel %vm871_vm4, %v845_v52, %v12555_v59  ;;  %v830_v29 = vsel %vm815_vm3, %v12557_v43, %v12556_v28  ;;  %v955_v52 = vsel %vm945_vm6, %v918_v61, %v7404_v42  ;;  %v848_v61 = vsel %vm834_vm2, %v823_v54, %v12562_v50  ;;  %v12564_v43 = vld [vmem:[#allocation46_spill] sm:$0xff] }
 0x135   : > { %1128 = vrot.lane.b32.xlu1 %v12545_v62, %s6613_s14  ;;  %v919_v13 = vsel %vm908_vm5, %v882_v12, %v7305_v10  ;;  %1126 = vrot.lane.b32.xlu0 %v7216_v9, %s6613_s14  ;;  %v12563_v10 = vld [vmem:[#allocation65_spill] sm:$0xff]  ;;  %v847_v12 = vsel %vm834_vm2, %v822_v39, %v12550_v32  ;;  %v850_v8 = vsel %vm834_vm2, %v823_v54, %v12564_v43  ;;  %v12566_v54 = vld [vmem:[#allocation47_spill] sm:$0xff] }
 0x136   : > { %v956_v28 = vsel %vm945_vm6, %v919_v13, %v770_v30  ;;  %v884_v30 = vsel %vm871_vm4, %v847_v12, %v12555_v59  ;;  %v920_v13 = vsel %vm908_vm5, %v883_v63, %v7299_v55  ;;  %v849_v50 = vsel %vm834_vm2, %v822_v39, %v12566_v54  ;;  %v12567_v12 = vld [vmem:[#allocation48_spill] sm:$0xff] }
 0x137   : > { %v7510_v0 = vpop.permute.xlu1 %783  ;;  %6234 = vmatmul.mubr.msk.f32.gmra.mrb[8].mxu0 %vm1446_vm7, %v955_v52  ;;  %v7545_v40 = vpop.permute.xlu0 %781  ;;  %v500_v52 = vrot.slane %v6899_v22, 1  ;;  %v852_v36 = vsel %vm834_vm2, %v825_v45, %v12564_v43  ;;  %v957_v55 = vsel %vm945_vm6, %v920_v13, %v7404_v42  ;;  %v851_v59 = vsel %vm834_vm2, %v824_v20, %v12566_v54  ;;  %v12568_v43 = vld [vmem:[#allocation49_spill] sm:$0xff] }
 0x138   : > { %6236 = vmatprep.mubr.msk.f32.mxu0 %vm1446_vm7, %v956_v28  ;;  %v921_v28 = vsel %vm908_vm5, %v884_v30, %v7313_v16  ;;  %v7570_v63 = vsel %vm834_vm2, %v825_v45, %v12567_v12  ;;  %v853_v30 = vsel %vm834_vm2, %v824_v20, %v12568_v43  ;;  %v7582_v42 = vsel %vm834_vm2, %v7499_v48, %v12568_v43 }
 0x139   : > { %1132 = vrot.lane.b32.xlu1 %v12563_v10, %s6613_s14  ;;  %1130 = vrot.lane.b32.xlu0 %v7232_v58, %s6613_s14  ;;  %v958_v39 = vsel %vm945_vm6, %v921_v28, %v7449_v34  ;;  %v7587_v45 = vsel %vm834_vm2, %v7487_v17, %v12567_v12  ;;  %v885_v13 = vsel %vm871_vm4, %v848_v61, %v12565_v6  ;;  %v12569_v28 = vld [vmem:[#allocation52_spill] sm:$0xff]  ;;  %v12571_v10 = vld [vmem:[#allocation53_spill] sm:$0xff] }
 0x13a   : > { %v864_v20 = vsel %vm834_vm2, %v7504_v5, %v12569_v28  ;;  %v7602_v12 = vsel %vm472_vm1, %v500_v52, %v501_v41  ;;  %v863_v61 = vsel %vm834_vm2, %v830_v29, %v12571_v10  ;;  %v12572_v6 = vld [vmem:[#allocation73_spill] sm:$0xff] }
 0x13b   : > { %v7552_v32 = vpop.permute.xlu1 %787  ;;  %6237 = vmatmul.mubr.msk.f32.gmra.mrb[10].mxu0 %vm1446_vm7, %v957_v55  ;;  %v7591_v54 = vpop.permute.xlu0 %785  ;;  %v12570_v55 = vld [vmem:[#allocation64_spill] sm:$0xff] }
 0x13c   : > { %6239 = vmatprep.mubr.msk.f32.mxu0 %vm1446_vm7, %v958_v39  ;;  %v886_v43 = vsel %vm871_vm4, %v849_v50, %v12570_v55  ;;  %v901_v39 = vsel %vm871_vm4, %v864_v20, %v12572_v6 }
 0x13d   : > { %1136 = vrot.lane.b32.xlu1 %v7240_v57, %s6613_s14  ;;  %v922_v57 = vsel %vm908_vm5, %v885_v13, %v7307_v4  ;;  %v923_v9 = vsel %vm908_vm5, %v886_v43, %v7313_v16  ;;  %1134 = vrot.lane.b32.xlu0 %v7248_v51, %s6613_s14  ;;  %v900_v13 = vsel %vm871_vm4, %v863_v61, %v7267_v47  ;;  %v12573_v16 = vld [vmem:[#allocation55_spill] sm:$0xff]  ;;  %v12574_v51 = vld [vmem:[#allocation62_spill] sm:$0xff] }
 0x13e   : > { %v959_v50 = vsel %vm945_vm6, %v922_v57, %v7429_v23  ;;  %v938_v52 = vsel %vm908_vm5, %v901_v39, %v7339_v27  ;;  %v960_v20 = vsel %vm945_vm6, %v923_v9, %v7449_v34  ;;  %v865_v43 = vsel %vm834_vm2, %v830_v29, %v12573_v16 }
 0x13f   : > { %v792_v58 = vpop.permute.xlu1 %791  ;;  %6240 = vmatmul.mubr.msk.f32.gmra.mrb[12].mxu0 %vm1446_vm7, %v959_v50  ;;  %v887_v57 = vsel %vm871_vm4, %v850_v8, %v12574_v51  ;;  %v790_v62 = vpop.permute.xlu0 %789  ;;  %v937_v61 = vsel %vm908_vm5, %v900_v13, %v7345_v33  ;;  %v888_v9 = vsel %vm871_vm4, %v851_v59, %v12570_v55  ;;  %v902_v34 = vsel %vm871_vm4, %v865_v43, %v7275_v56  ;;  %v12575_v55 = vld [vmem:[#allocation54_spill] sm:$0xff] }
 0x140   : > { %6242 = vmatprep.mubr.msk.f32.mxu0 %vm1446_vm7, %v960_v20  ;;  %v975_v39 = vsel %vm945_vm6, %v938_v52, %v792_v58  ;;  %v924_v29 = vsel %vm908_vm5, %v887_v57, %v7307_v4  ;;  %v974_v50 = vsel %vm945_vm6, %v937_v61, %v790_v62  ;;  %v925_v20 = vsel %vm908_vm5, %v888_v9, %v7321_v21  ;;  %v12576_v57 = vld [vmem:[#allocation74_spill] sm:$0xff] }
 0x141   : > { %1140 = vrot.lane.b32.xlu1 %v7256_v49, %s6613_s14  ;;  %v939_v13 = vsel %vm908_vm5, %v902_v34, %v7345_v33  ;;  %1138 = vrot.lane.b32.xlu0 %v7263_v15, %s6613_s14  ;;  %v961_v59 = vsel %vm945_vm6, %v924_v29, %v7429_v23  ;;  %v7650_v4 = vsel %vm472_vm1, %v501_v41, 0.0  ;;  %v866_v52 = vsel %vm834_vm2, %v7504_v5, %v12575_v55 }
 0x142   : > { %6263 = vmatprep.mubr.msk.f32.mxu1 %vm1446_vm7, %v974_v50  ;;  %v976_v33 = vsel %vm945_vm6, %v939_v13, %v790_v62  ;;  %v962_v43 = vsel %vm945_vm6, %v925_v20, %v7493_v19  ;;  %v867_v23 = vsel %vm834_vm2, %v7529_v38, %v12573_v16  ;;  %v889_v41 = vsel %vm871_vm4, %v852_v36, %v12574_v51  ;;  %v12578_v20 = vld [vmem:[#allocation57_spill] sm:$0xff] }
 0x143   : > { %v7638_v8 = vpop.permute.xlu1 %795  ;;  %6243 = vmatmul.mubr.msk.f32.gmra.mrb[14].mxu0 %vm1446_vm7, %v961_v59  ;;  %6264 = vmatmul.mubr.msk.f32.vlgmr.msra.gmra.mrb[0].mxu1 %vm1446_vm7, %v975_v39  ;;  %v903_v61 = vsel %vm871_vm4, %v866_v52, %v12576_v57  ;;  %v794_v5 = vpop.permute.xlu0 %793  ;;  %v12577_v39 = vld [vmem:[#allocation68_spill] sm:$0xff]  ;;  %v904_v9 = vsel %vm871_vm4, %v867_v23, %v7275_v56  ;;  %v926_v16 = vsel %vm908_vm5, %v889_v41, %v7315_v3  ;;  %v12579_v59 = vld [vmem:[#allocation66_spill] sm:$0xff]  ;;  %v12580_v41 = vld [vmem:[#allocation3_spill] sm:$0xff] }
 0x144   : > { %6266 = vmatprep.mubr.msk.f32.mxu1 %vm1446_vm7, %v976_v33  ;;  %6245 = vmatprep.mubr.msk.f32.mxu0 %vm1446_vm7, %v962_v43  ;;  %v890_v62 = vsel %vm871_vm4, %v853_v30, %v12577_v39  ;;  %v940_v51 = vsel %vm908_vm5, %v903_v61, %v7339_v27  ;;  %v941_v30 = vsel %vm908_vm5, %v904_v9, %v7356_v37 }
 0x145   : > { %1144 = vrot.lane.b32.xlu1 %v7650_v4, %s6613_s14  ;;  %v927_v34 = vsel %vm908_vm5, %v890_v62, %v7321_v21  ;;  %1142 = vrot.lane.b32.xlu0 %v7602_v12, %s6613_s14  ;;  %v963_v56 = vsel %vm945_vm6, %v926_v16, %v7459_v44  ;;  %v977_v29 = vsel %vm945_vm6, %v940_v51, %v792_v58  ;;  %v12582_v62 = vld [vmem:[#allocation51_spill] sm:$0xff] }
 0x146   : > { %v868_v27 = vsel %vm834_vm2, %v7518_v35, %v12575_v55  ;;  %v978_v21 = vsel %vm945_vm6, %v941_v30, %v794_v5  ;;  %v964_v50 = vsel %vm945_vm6, %v927_v34, %v7493_v19  ;;  %v869_v13 = vsel %vm834_vm2, %v7529_v38, %v12578_v20  ;;  %v12583_v16 = vld [vmem:[#allocation75_spill] sm:$0xff]  ;;  %v12585_v30 = vld [vmem:[#allocation76_spill] sm:$0xff] }
 0x147   : > { %v7679_v36 = vpop.permute.xlu1 %993  ;;  %6246 = vmatmul.mubr.msk.f32.gmra.mrb[16].mxu0 %vm1446_vm7, %v963_v56  ;;  %6267 = vmatmul.mubr.msk.f32.gmra.mrb[2].mxu1 %vm1446_vm7, %v977_v29  ;;  %v891_v58 = vsel %vm871_vm4, %v7570_v63, %v12579_v59  ;;  %v905_v55 = vsel %vm871_vm4, %v868_v27, %v12576_v57  ;;  %v7706_v52 = vpop.permute.xlu0 %991  ;;  %v892_v19 = vsel %vm871_vm4, %v7582_v42, %v12577_v39  ;;  %v12581_v57 = vld [vmem:[#allocation56_spill] sm:$0xff] }
 0x148   : > { %6269 = vmatprep.mubr.msk.f32.mxu1 %vm1446_vm7, %v978_v21  ;;  %6248 = vmatprep.mubr.msk.f32.mxu0 %vm1446_vm7, %v964_v50  ;;  %v906_v38 = vsel %vm871_vm4, %v869_v13, %v7283_v53  ;;  %v928_v33 = vsel %vm908_vm5, %v891_v58, %v7315_v3  ;;  %v942_v63 = vsel %vm908_vm5, %v905_v55, %v7347_v31  ;;  %v12587_v21 = vld [vmem:[#allocation2_spill] sm:$0xff]  ;;  %v12588_v13 = vld [vmem:[#allocation39_spill] sm:$0xff] }
 0x149   : > { %1168 = vrot.lane.b32.xlu1 %v6727_v7, %s6614_s15  ;;  %v929_v23 = vsel %vm908_vm5, %v892_v19, %v7329_v25  ;;  %v943_v42 = vsel %vm908_vm5, %v906_v38, %v7356_v37  ;;  %1166 = vrot.lane.b32.xlu0 %v12580_v41, %s6614_s15  ;;  %v965_v3 = vsel %vm945_vm6, %v928_v33, %v7459_v44  ;;  %v12590_v58 = vld [vmem:[#allocation50_spill] sm:$0xff] }
 0x14a   : > { %v979_v53 = vsel %vm945_vm6, %v942_v63, %v7638_v8  ;;  %v870_v61 = vsel %vm834_vm2, %v7518_v35, %v12581_v57  ;;  %v980_v39 = vsel %vm945_vm6, %v943_v42, %v794_v5  ;;  %v966_v37 = vsel %vm945_vm6, %v929_v23, %v7545_v40  ;;  %v12584_v5 = vld [vmem:[#allocation72_spill] sm:$0xff]  ;;  %v12591_v38 = vld [vmem:[#allocation70_spill] sm:$0xff] }
 0x14b   : > { %v7721_v43 = vpop.permute.xlu1 %997  ;;  %6249 = vmatmul.mubr.msk.f32.gmra.mrb[18].mxu0 %vm1446_vm7, %v965_v3  ;;  %6270 = vmatmul.mubr.msk.f32.gmra.mrb[4].mxu1 %vm1446_vm7, %v979_v53  ;;  %v857_v44 = vsel %vm834_vm2, %v7499_v48, %v12582_v62  ;;  %v893_v9 = vsel %vm871_vm4, %v7587_v45, %v12579_v59  ;;  %v907_v35 = vsel %vm871_vm4, %v870_v61, %v12583_v16  ;;  %v7749_v51 = vpop.permute.xlu0 %995  ;;  %v12586_v45 = vld [vmem:[#allocation5_spill] sm:$0xff]  ;;  %v12589_v59 = vld [vmem:[#allocation27_spill] sm:$0xff]  ;;  %v12592_v23 = vld [vmem:[#allocation6_spill] sm:$0xff] }
 0x14c   : > { %6272 = vmatprep.mubr.msk.f32.mxu1 %vm1446_vm7, %v980_v39  ;;  %6251 = vmatprep.mubr.msk.f32.mxu0 %vm1446_vm7, %v966_v37  ;;  %v894_v34 = vsel %vm871_vm4, %v857_v44, %v12584_v5  ;;  %v930_v56 = vsel %vm908_vm5, %v893_v9, %v12585_v30  ;;  %v944_v48 = vsel %vm908_vm5, %v907_v35, %v7347_v31  ;;  %v1836_v42 = vld [vmem:[%s12129_s2] sm:$0xff]  ;;  %v1837_v3 = vld [vmem:[%s12129_s2 + $0x8] sm:$0xff] }
 0x14d   : > { %1172 = vrot.lane.b32.xlu1 %v12586_v45, %s6614_s15  ;;  %v931_v27 = vsel %vm908_vm5, %v894_v34, %v7329_v25  ;;  %1170 = vrot.lane.b32.xlu0 %v12587_v21, %s6614_s15  ;;  %v967_v50 = vsel %vm945_vm6, %v930_v56, %v7510_v0  ;;  %v981_v20 = vsel %vm945_vm6, %v944_v48, %v7638_v8  ;;  %v12593_v53 = vld [vmem:[#allocation38_spill] sm:$0xff]  ;;  %v12597_v56 = vld [vmem:[#allocation77_spill] sm:$0xff] }
 0x14e   : > { %v828_v31 = vsel %vm815_vm3, %v12589_v59, %v12588_v13  ;;  %v858_v55 = vsel %vm834_vm2, %v7487_v17, %v12590_v58  ;;  %v968_v25 = vsel %vm945_vm6, %v931_v27, %v7545_v40  ;;  %v12594_v57 = vld [vmem:[#allocation26_spill] sm:$0xff]  ;;  %v6481_v9 = vpack.c.bf16 %v1837_v3, %v1836_v42  ;;  %v12598_v27 = vld [vmem:[#allocation9_spill] sm:$0xff]  ;;  %v12607_v3 = vld [vmem:[#allocation15_spill] sm:$0xff] }
 0x14f   : > { %v7761_v29 = vpop.permute.xlu1 %1001  ;;  %6252 = vmatmul.mubr.msk.f32.gmra.mrb[20].mxu0 %vm1446_vm7, %v967_v50  ;;  %6273 = vmatmul.mubr.msk.f32.gmra.mrb[6].mxu1 %vm1446_vm7, %v981_v20  ;;  %v859_v19 = vsel %vm834_vm2, %v828_v31, %v12582_v62  ;;  %v895_v8 = vsel %vm871_vm4, %v858_v55, %v12591_v38  ;;  %v7785_v33 = vpop.permute.xlu0 %999  ;;  %v829_v61 = vsel %vm815_vm3, %v12594_v57, %v12593_v53  ;;  %v12595_v39 = vld [vmem:[#allocation78_spill] sm:$0xff]  ;;  %v12596_v62 = vld [vmem:[#allocation4_spill] sm:$0xff] }
 0x150   : > { %6254 = vmatprep.mubr.msk.f32.mxu0 %vm1446_vm7, %v968_v25  ;;  %v896_v17 = vsel %vm871_vm4, %v859_v19, %v12584_v5  ;;  %v932_v63 = vsel %vm908_vm5, %v895_v8, %v12585_v30  ;;  %v860_v16 = vsel %vm834_vm2, %v829_v61, %v12590_v58  ;;  %v861_v5 = vsel %vm834_vm2, %v828_v31, %v12571_v10  ;;  %v12599_v20 = vld [vmem:[#allocation10_spill] sm:$0xff]  ;;  %v12600_v25 = vld [vmem:[#allocation11_spill] sm:$0xff]  ;;  %v12603_v8 = vld [vmem:[#allocation13_spill] sm:$0xff] }
 0x151   : > { %1176 = vrot.lane.b32.xlu1 %v12592_v23, %s6614_s15  ;;  %v933_v37 = vsel %vm908_vm5, %v896_v17, %v12595_v39  ;;  %1174 = vrot.lane.b32.xlu0 %v12596_v62, %s6614_s15  ;;  %v969_v44 = vsel %vm945_vm6, %v932_v63, %v7510_v0  ;;  %v897_v34 = vsel %vm871_vm4, %v860_v16, %v12591_v38  ;;  %v12605_v63 = vld [vmem:[#allocation14_spill] sm:$0xff]  ;;  %v12609_v53 = vld [vmem:[#allocation16_spill] sm:$0xff] }
 0x152   : > { %v970_v35 = vsel %vm945_vm6, %v933_v37, %v7591_v54  ;;  %6482 = vmatprep.subr.bf16.mxu1 %v6481_v9  ;;  %v898_v0 = vsel %vm871_vm4, %v861_v5, %v7267_v47  ;;  %v934_v48 = vsel %vm908_vm5, %v897_v34, %v12597_v56  ;;  %v862_v47 = vsel %vm834_vm2, %v829_v61, %v12569_v28  ;;  %v1838_v28 = vld [vmem:[%s12129_s2 + $0x10] sm:$0xff]  ;;  %v12611_v61 = vld [vmem:[#allocation17_spill] sm:$0xff]  ;;  %v12613_v37 = vld [vmem:[#allocation18_spill] sm:$0xff] }
 0x153   : > { %v7794_v40 = vpop.permute.xlu1 %1005  ;;  %6255 = vmatmul.mubr.msk.f32.gmra.mrb[22].mxu0 %vm1446_vm7, %v969_v44  ;;  %v7820_v30 = vpop.permute.xlu0 %1003  ;;  %6484 = vmatpush3.bf16.msra.mxu1 %v6481_v9  ;;  %v935_v10 = vsel %vm908_vm5, %v898_v0, %v12595_v39  ;;  %v971_v13 = vsel %vm945_vm6, %v934_v48, %v7552_v32  ;;  %v899_v31 = vsel %vm871_vm4, %v862_v47, %v12572_v6  ;;  %v12615_v34 = vld [vmem:[#allocation61_spill] sm:$0xff]  ;;  %v12616_v0 = vld [vmem:[#allocation63_spill] sm:$0xff] }
 0x154   : > { %6257 = vmatprep.mubr.msk.f32.mxu0 %vm1446_vm7, %v970_v35  ;;  %v972_v59 = vsel %vm945_vm6, %v935_v10, %v7591_v54  ;;  %v936_v55 = vsel %vm908_vm5, %v899_v31, %v12597_v56  ;;  %v12602_v54 = vld [vmem:[#allocation12_spill] sm:$0xff]  ;;  %6279 = vmatprep.subr.mxu1 %v1838_v28  ;;  %v12617_v56 = vld [vmem:[#allocation65_spill] sm:$0xff]  ;;  %v12619_v48 = vld [vmem:[#allocation67_spill] sm:$0xff] }
 0x155   : > { %1180 = vrot.lane.b32.xlu1 %v12598_v27, %s6614_s15  ;;  %1178 = vrot.lane.b32.xlu0 %v12599_v20, %s6614_s15  ;;  %v973_v6 = vsel %vm945_vm6, %v936_v55, %v7552_v32  ;;  %v12621_v10 = vld [vmem:[#allocation69_spill] sm:$0xff]  ;;  %v12623_v47 = vld [vmem:[#allocation71_spill] sm:$0xff] }
 0x157   : > { %v7829_v50 = vpop.permute.xlu1 %1009  ;;  %6258 = vmatmul.mubr.msk.f32.gmra.mrb[24].mxu0 %vm1446_vm7, %v971_v13  ;;  %v7844_v58 = vpop.permute.xlu0 %1007  ;;  %6280 = vmatpush3.msra.mxu1 %v1838_v28 }
 0x158   : > { %6260 = vmatprep.mubr.msk.f32.mxu0 %vm1446_vm7, %v972_v59 }
 0x159   : > { %1184 = vrot.lane.b32.xlu1 %v12600_v25, %s6614_s15  ;;  %1182 = vrot.lane.b32.xlu0 %v12602_v54, %s6614_s15 }
 0x15b   : > { %v7851_v19 = vpop.permute.xlu1 %1013  ;;  %6261 = vmatmul.mubr.msk.f32.gmra.mrb[26].mxu0 %vm1446_vm7, %v973_v6  ;;  %v7861_v38 = vpop.permute.xlu0 %1011 }
 0x15c   : > { %12601 = vst [vmem:[#allocation21_spill] sm:$0xff] %v7851_v19 }
 0x15d   : > { %1188 = vrot.lane.b32.xlu1 %v12603_v8, %s6614_s15  ;;  %1186 = vrot.lane.b32.xlu0 %v12605_v63, %s6614_s15 }
 0x15f   : > { %v7865_v17 = vpop.permute.xlu1 %1017  ;;  %v7869_v42 = vpop.permute.xlu0 %1015 }
 0x160   : > { %12604 = vst [vmem:[#allocation32_spill] sm:$0xff] %v7865_v17  ;;  %12606 = vst [vmem:[#allocation19_spill] sm:$0xff] %v7869_v42 }
 0x161   : > { %1192 = vrot.lane.b32.xlu1 %v12607_v3, %s6614_s15  ;;  %1190 = vrot.lane.b32.xlu0 %v12609_v53, %s6614_s15 }
 0x163   : > { %v7873_v32 = vpop.permute.xlu1 %1021  ;;  %v7877_v57 = vpop.permute.xlu0 %1019 }
 0x164   : > { %12608 = vst [vmem:[#allocation33_spill] sm:$0xff] %v7873_v32  ;;  %12610 = vst [vmem:[#allocation20_spill] sm:$0xff] %v7877_v57 }
 0x165   : > { %1196 = vrot.lane.b32.xlu1 %v12611_v61, %s6614_s15  ;;  %1194 = vrot.lane.b32.xlu0 %v12613_v37, %s6614_s15 }
 0x167   : > { %v7881_v39 = vpop.permute.xlu1 %1025  ;;  %v7885_v44 = vpop.permute.xlu0 %1023 }
 0x168   : > { %12612 = vst [vmem:[#allocation59_spill] sm:$0xff] %v7881_v39  ;;  %12614 = vst [vmem:[#allocation34_spill] sm:$0xff] %v7885_v44 }
 0x169   : > { %1200 = vrot.lane.b32.xlu1 %v6901_v24, %s6614_s15  ;;  %1198 = vrot.lane.b32.xlu0 %v6899_v22, %s6614_s15 }
 0x16b   : > { %v7889_v9 = vpop.permute.xlu1 %1047  ;;  %v7893_v16 = vpop.permute.xlu0 %1045 }
 0x16d   : > { %1222 = vrot.lane.b32.xlu1 %v7144_v2, %s6615_s25  ;;  %1220 = vrot.lane.b32.xlu0 %v7152_v11, %s6615_s25 }
 0x16f   : > { %v7897_v35 = vpop.permute.xlu1 %1051  ;;  %v7901_v5 = vpop.permute.xlu0 %1049 }
 0x171   : > { %1226 = vrot.lane.b32.xlu1 %v7160_v18, %s6615_s25  ;;  %1224 = vrot.lane.b32.xlu0 %v7168_v14, %s6615_s25 }
 0x173   : > { %v7905_v24 = vpop.permute.xlu1 %1055  ;;  %v7909_v22 = vpop.permute.xlu0 %1053 }
 0x175   : > { %1230 = vrot.lane.b32.xlu1 %v7176_v1, %s6615_s25  ;;  %1228 = vrot.lane.b32.xlu0 %v7184_v26, %s6615_s25 }
 0x177   : > { %v7913_v2 = vpop.permute.xlu1 %1059  ;;  %v7917_v11 = vpop.permute.xlu0 %1057 }
 0x179   : > { %1234 = vrot.lane.b32.xlu1 %v7192_v60, %s6615_s25  ;;  %1232 = vrot.lane.b32.xlu0 %v12542_v46, %s6615_s25 }
 0x17b   : > { %v7921_v18 = vpop.permute.xlu1 %1063  ;;  %v7925_v14 = vpop.permute.xlu0 %1061 }
 0x17d   : > { %1238 = vrot.lane.b32.xlu1 %v12615_v34, %s6615_s25  ;;  %1236 = vrot.lane.b32.xlu0 %v12616_v0, %s6615_s25 }
 0x17f   : > { %v7929_v1 = vpop.permute.xlu1 %1067  ;;  %v7933_v26 = vpop.permute.xlu0 %1065 }
 0x181   : > { %1242 = vrot.lane.b32.xlu1 %v12617_v56, %s6615_s25  ;;  %1240 = vrot.lane.b32.xlu0 %v12619_v48, %s6615_s25 }
 0x183   : > { %v7937_v60 = vpop.permute.xlu1 %1071  ;;  %v7941_v46 = vpop.permute.xlu0 %1069 }
 0x184   : > { %12618 = vst [vmem:[#allocation22_spill] sm:$0xff] %v7937_v60  ;;  %12620 = vst [vmem:[#allocation35_spill] sm:$0xff] %v7941_v46  ;;  %v12645_v46 = vld [vmem:[#allocation8_spill] sm:$0xff] }
 0x185   : > { %1246 = vrot.lane.b32.xlu1 %v12621_v10, %s6615_s25  ;;  %1244 = vrot.lane.b32.xlu0 %v12623_v47, %s6615_s25  ;;  %v1275_v25 = vsel %vm815_vm3, %v12645_v46, %v7679_v36 }
 0x187   : > { %v7945_v13 = vpop.permute.xlu1 %1075  ;;  %v7949_v59 = vpop.permute.xlu0 %1073 }
 0x188   : > { %12622 = vst [vmem:[#allocation23_spill] sm:$0xff] %v7945_v13  ;;  %12624 = vst [vmem:[#allocation36_spill] sm:$0xff] %v7949_v59 }
 0x189   : > { %1250 = vrot.lane.b32.xlu1 %v7256_v49, %s6615_s25  ;;  %1248 = vrot.lane.b32.xlu0 %v7263_v15, %s6615_s25 }
 0x18b   : > { %v7953_v31 = vpop.permute.xlu1 %1079  ;;  %v7957_v55 = vpop.permute.xlu0 %1077 }
 0x18c   : > { %12625 = vst [vmem:[#allocation24_spill] sm:$0xff] %v7953_v31  ;;  %12626 = vst [vmem:[#allocation45_spill] sm:$0xff] %v7957_v55 }
 0x18d   : > { %1254 = vrot.lane.b32.xlu1 %v7650_v4, %s6615_s25  ;;  %1252 = vrot.lane.b32.xlu0 %v7602_v12, %s6615_s25 }
 0x18f   : > { %v7961_v28 = vpop.permute.xlu1 %1083  ;;  %v7965_v6 = vpop.permute.xlu0 %1081 }
 0x190   : > { %12627 = vst [vmem:[#allocation37_spill] sm:$0xff] %v7961_v28  ;;  %12628 = vst [vmem:[#allocation25_spill] sm:$0xff] %v7965_v6 }
 0x193   : > { %v1109_v34 = vpop.permute.xlu1 %1108  ;;  %v1107_v0 = vpop.permute.xlu0 %1106 }
 0x197   : > { %v7967_v49 = vpop.permute.xlu1 %1112  ;;  %v1111_v56 = vpop.permute.xlu0 %1110 }
 0x19b   : > { %v7969_v48 = vpop.permute.xlu1 %1116  ;;  %v7971_v15 = vpop.permute.xlu0 %1114 }
 0x19f   : > { %v7973_v10 = vpop.permute.xlu1 %1120  ;;  %v7975_v47 = vpop.permute.xlu0 %1118 }
 0x1a3   : > { %v7977_v4 = vpop.permute.xlu1 %1124  ;;  %v7979_v28 = vpop.permute.xlu0 %1122 }
 0x1a7   : > { %v7981_v12 = vpop.permute.xlu1 %1128  ;;  %v7983_v6 = vpop.permute.xlu0 %1126 }
 0x1a8   : > { %12629 = vst [vmem:[#allocation40_spill] sm:$0xff] %v7981_v12 }
 0x1ab   : > { %v7985_v61 = vpop.permute.xlu1 %1132  ;;  %v7987_v39 = vpop.permute.xlu0 %1130 }
 0x1ac   : > { %12630 = vst [vmem:[#allocation28_spill] sm:$0xff] %v7985_v61  ;;  %12631 = vst [vmem:[#allocation60_spill] sm:$0xff] %v7987_v39 }
 0x1af   : > { %v7989_v31 = vpop.permute.xlu1 %1136  ;;  %v7991_v37 = vpop.permute.xlu0 %1134 }
 0x1b0   : > { %12632 = vst [vmem:[#allocation41_spill] sm:$0xff] %v7989_v31  ;;  %12633 = vst [vmem:[#allocation29_spill] sm:$0xff] %v7991_v37 }
 0x1b3   : > { %v7993_v44 = vpop.permute.xlu1 %1140  ;;  %v7995_v55 = vpop.permute.xlu0 %1138 }
 0x1b4   : > { %12634 = vst [vmem:[#allocation42_spill] sm:$0xff] %v7993_v44  ;;  %12635 = vst [vmem:[#allocation30_spill] sm:$0xff] %v7995_v55 }
 0x1b7   : > { %v7997_v3 = vpop.permute.xlu1 %1144  ;;  %v7999_v32 = vpop.permute.xlu0 %1142 }
 0x1b8   : > { %12636 = vst [vmem:[#allocation43_spill] sm:$0xff] %v7997_v3  ;;  %12637 = vst [vmem:[#allocation31_spill] sm:$0xff] %v7999_v32 }
 0x1bb   : > { %v1169_v13 = vpop.permute.xlu1 %1168  ;;  %v1167_v53 = vpop.permute.xlu0 %1166 }
 0x1bf   : > { %v8001_v57 = vpop.permute.xlu1 %1172  ;;  %v1171_v59 = vpop.permute.xlu0 %1170 }
 0x1c3   : > { %v8003_v8 = vpop.permute.xlu1 %1176  ;;  %v8005_v17 = vpop.permute.xlu0 %1174 }
 0x1c7   : > { %v8007_v31 = vpop.permute.xlu1 %1180  ;;  %v8009_v37 = vpop.permute.xlu0 %1178 }
 0x1cb   : > { %v8011_v44 = vpop.permute.xlu1 %1184  ;;  %v8013_v55 = vpop.permute.xlu0 %1182 }
 0x1cf   : > { %v8015_v3 = vpop.permute.xlu1 %1188  ;;  %v8017_v32 = vpop.permute.xlu0 %1186 }
 0x1d0   : > { %12638 = vst [vmem:[#allocation44_spill] sm:$0xff] %v8015_v3  ;;  %12639 = vst [vmem:[#allocation46_spill] sm:$0xff] %v8017_v32  ;;  %v12647_v3 = vld [vmem:[#allocation7_spill] sm:$0xff] }
 0x1d1   : > { %v1274_v32 = vsel %vm815_vm3, %v12647_v3, %v7706_v52 }
 0x1d2   : > { %v1294_v36 = vsel %vm834_vm2, %v1274_v32, %v7901_v5 }
 0x1d3   : > { %v8019_v61 = vpop.permute.xlu1 %1192  ;;  %v8021_v60 = vpop.permute.xlu0 %1190  ;;  %v1330_v3 = vsel %vm871_vm4, %v1294_v36, %v1111_v56  ;;  %v1278_v36 = vsel %vm815_vm3, %v12587_v21, %v7785_v33  ;;  %v1279_v33 = vsel %vm815_vm3, %v12586_v45, %v7761_v29 }
 0x1d4   : > { %12640 = vst [vmem:[#allocation58_spill] sm:$0xff] %v8019_v61  ;;  %12641 = vst [vmem:[#allocation47_spill] sm:$0xff] %v8021_v60  ;;  %v1293_v61 = vsel %vm834_vm2, %v1275_v25, %v7889_v9 }
 0x1d7   : > { %v8023_v63 = vpop.permute.xlu1 %1196  ;;  %v8025_v42 = vpop.permute.xlu0 %1194 }
 0x1d8   : > { %12642 = vst [vmem:[#allocation48_spill] sm:$0xff] %v8023_v63  ;;  %12643 = vst [vmem:[#allocation49_spill] sm:$0xff] %v8025_v42  ;;  %v1292_v63 = vsel %vm834_vm2, %v1274_v32, %v7893_v16  ;;  %v1329_v42 = vsel %vm871_vm4, %v1293_v61, %v1109_v34  ;;  %v1366_v16 = vsel %vm908_vm5, %v1330_v3, %v1167_v53 }
 0x1d9   : > { %v1365_v60 = vsel %vm908_vm5, %v1329_v42, %v1169_v13  ;;  %v1295_v42 = vsel %vm834_vm2, %v1275_v25, %v7897_v35 }
 0x1db   : > { %v8027_v39 = vpop.permute.xlu1 %1200  ;;  %v8032_v19 = vpop.permute.xlu0 %1198 }
 0x1dc   : > { %12644 = vst [vmem:[#allocation52_spill] sm:$0xff] %v8027_v39  ;;  %12646 = vst [vmem:[#allocation64_spill] sm:$0xff] %v8032_v19  ;;  %v1328_v39 = vsel %vm871_vm4, %v1292_v63, %v1107_v0  ;;  %v1276_v63 = vsel %vm815_vm3, %v12580_v41, %v7749_v51  ;;  %v1277_v51 = vsel %vm815_vm3, %v6727_v7, %v7721_v43 }
 0x1dd   : > { %v1364_v46 = vsel %vm908_vm5, %v1328_v39, %v1167_v53  ;;  %v1296_v61 = vsel %vm834_vm2, %v1276_v63, %v7901_v5  ;;  %v1331_v39 = vsel %vm871_vm4, %v1295_v42, %v7967_v49  ;;  %v1297_v5 = vsel %vm834_vm2, %v1277_v51, %v7897_v35 }
 0x1de   : > { %v1367_v41 = vsel %vm908_vm5, %v1331_v39, %v1169_v13  ;;  %v1333_v13 = vsel %vm871_vm4, %v1297_v5, %v7967_v49  ;;  %v1280_v39 = vsel %vm815_vm3, %v12596_v62, %v7820_v30  ;;  %v1281_v30 = vsel %vm815_vm3, %v12592_v23, %v7794_v40  ;;  %v8160_v23 = vld [vmem:[%s12130_s3] ss:$0 sm:$0xff] }
 0x1df   : > { %v1223_v12 = vpop.permute.xlu1 %1222  ;;  %v1221_v19 = vpop.permute.xlu0 %1220  ;;  %v1369_v43 = vsel %vm908_vm5, %v1333_v13, %v8001_v57 }
 0x1e0   : > { %v1401_v52 = vsel %vm945_vm6, %v1365_v60, %v1223_v12  ;;  %v1400_v9 = vsel %vm945_vm6, %v1364_v46, %v1221_v19  ;;  %v1402_v32 = vsel %vm945_vm6, %v1366_v16, %v1221_v19  ;;  %v1332_v60 = vsel %vm871_vm4, %v1296_v61, %v1111_v56 }
 0x1e1   : > { %6281 = vmatprep.mubr.msk.f32.mxu1 %vm1446_vm7, %v1400_v9  ;;  %v1368_v25 = vsel %vm908_vm5, %v1332_v60, %v1171_v59  ;;  %v1403_v19 = vsel %vm945_vm6, %v1367_v41, %v1223_v12  ;;  %v1298_v56 = vsel %vm834_vm2, %v1276_v63, %v7909_v22  ;;  %v1299_v46 = vsel %vm834_vm2, %v1277_v51, %v7905_v24 }
 0x1e2   : > { %6282 = vmatmul.mubr.msk.f32.vlgmr.msra.gmra.mrb[8].mxu1 %vm1446_vm7, %v1401_v52  ;;  %v1334_v7 = vsel %vm871_vm4, %v1298_v56, %v7971_v15  ;;  %v1300_v52 = vsel %vm834_vm2, %v1278_v36, %v7909_v22  ;;  %v1335_v3 = vsel %vm871_vm4, %v1299_v46, %v7969_v48  ;;  %v1301_v63 = vsel %vm834_vm2, %v1279_v33, %v7905_v24 }
 0x1e3   : > { %v1225_v53 = vpop.permute.xlu0 %1224  ;;  %6284 = vmatprep.mubr.msk.f32.mxu1 %vm1446_vm7, %v1402_v32  ;;  %v1227_v34 = vpop.permute.xlu1 %1226  ;;  %v1370_v35 = vsel %vm908_vm5, %v1334_v7, %v1171_v59  ;;  %v1336_v9 = vsel %vm871_vm4, %v1300_v52, %v7971_v15  ;;  %v1371_v21 = vsel %vm908_vm5, %v1335_v3, %v8001_v57  ;;  %v1302_v57 = vsel %vm834_vm2, %v1278_v36, %v7917_v11 }
 0x1e4   : > { %v1404_v0 = vsel %vm945_vm6, %v1368_v25, %v1225_v53  ;;  %v1405_v12 = vsel %vm945_vm6, %v1369_v43, %v1227_v34  ;;  %v1406_v49 = vsel %vm945_vm6, %v1370_v35, %v1225_v53  ;;  %v1372_v16 = vsel %vm908_vm5, %v1336_v9, %v8005_v17 }
 0x1e5   : > { %v1407_v22 = vsel %vm945_vm6, %v1371_v21, %v1227_v34  ;;  %v1337_v32 = vsel %vm871_vm4, %v1301_v63, %v7969_v48  ;;  %v1338_v45 = vsel %vm871_vm4, %v1302_v57, %v7975_v47  ;;  %v1303_v48 = vsel %vm834_vm2, %v1279_v33, %v7913_v2 }
 0x1e6   : > { %6285 = vmatmul.mubr.msk.f32.gmra.mrb[10].mxu1 %vm1446_vm7, %v1403_v19  ;;  %v1373_v29 = vsel %vm908_vm5, %v1337_v32, %v8003_v8  ;;  %v1374_v24 = vsel %vm908_vm5, %v1338_v45, %v8005_v17  ;;  %v1304_v60 = vsel %vm834_vm2, %v1280_v39, %v7917_v11  ;;  %v1339_v41 = vsel %vm871_vm4, %v1303_v48, %v7973_v10 }
 0x1e7   : > { %6287 = vmatprep.mubr.msk.f32.mxu1 %vm1446_vm7, %v1404_v0  ;;  %v1229_v59 = vpop.permute.xlu0 %1228  ;;  %v1231_v42 = vpop.permute.xlu1 %1230  ;;  %v1340_v51 = vsel %vm871_vm4, %v1304_v60, %v7975_v47  ;;  %v1375_v62 = vsel %vm908_vm5, %v1339_v41, %v8003_v8  ;;  %v1305_v19 = vsel %vm834_vm2, %v1281_v30, %v7913_v2  ;;  %v1306_v8 = vsel %vm834_vm2, %v1280_v39, %v7925_v14 }
 0x1e8   : > { %v1408_v15 = vsel %vm945_vm6, %v1372_v16, %v1229_v59  ;;  %v1409_v61 = vsel %vm945_vm6, %v1373_v29, %v1231_v42  ;;  %v1410_v53 = vsel %vm945_vm6, %v1374_v24, %v1229_v59  ;;  %v1376_v11 = vsel %vm908_vm5, %v1340_v51, %v8009_v37  ;;  %v12654_v51 = vld [vmem:[#allocation40_spill] sm:$0xff] }
 0x1e9   : > { %v1411_v25 = vsel %vm945_vm6, %v1375_v62, %v1231_v42  ;;  %v1341_v34 = vsel %vm871_vm4, %v1305_v19, %v7973_v10  ;;  %v1342_v40 = vsel %vm871_vm4, %v1306_v8, %v7979_v28  ;;  %v2229_v0 = vstv %s2228_s21  ;;  %v12656_v19 = vld [vmem:[#allocation11_spill] sm:$0xff] }
 0x1ea   : > { %6288 = vmatmul.mubr.msk.f32.gmra.mrb[12].mxu1 %vm1446_vm7, %v1405_v12  ;;  %v1377_v2 = vsel %vm908_vm5, %v1341_v34, %v8007_v31  ;;  %v1378_v56 = vsel %vm908_vm5, %v1342_v40, %v8009_v37  ;;  %v1282_v7 = vsel %vm815_vm3, %v12599_v20, %v7844_v58  ;;  %v1307_v43 = vsel %vm834_vm2, %v1281_v30, %v7921_v18 }
 0x1eb   : > { %6290 = vmatprep.mubr.msk.f32.mxu1 %vm1446_vm7, %v1406_v49  ;;  %v1233_v17 = vpop.permute.xlu0 %1232  ;;  %v1235_v5 = vpop.permute.xlu1 %1234  ;;  %v1308_v37 = vsel %vm834_vm2, %v1282_v7, %v7925_v14  ;;  %v1343_v46 = vsel %vm871_vm4, %v1307_v43, %v7977_v4  ;;  %vm8181_vm8 = vcmp.eq.s32.totalorder %v2229_v0, 1  ;;  %v1283_v14 = vsel %vm815_vm3, %v12598_v27, %v7829_v50 }
 0x1ec   : > { %v1412_v47 = vsel %vm945_vm6, %v1376_v11, %v1233_v17  ;;  %v1413_v10 = vsel %vm945_vm6, %v1377_v2, %v1235_v5  ;;  %v1414_v36 = vsel %vm945_vm6, %v1378_v56, %v1233_v17  ;;  %v1344_v58 = vsel %vm871_vm4, %v1308_v37, %v7979_v28 }
 0x1ed   : > { %v1379_v3 = vsel %vm908_vm5, %v1343_v46, %v8007_v31  ;;  %v1380_v9 = vsel %vm908_vm5, %v1344_v58, %v8013_v55  ;;  %v1310_v50 = vsel %vm834_vm2, %v1282_v7, %v7933_v26  ;;  %v1284_v48 = vsel %vm815_vm3, %v12602_v54, %v7861_v38 }
 0x1ee   : > { %6291 = vmatmul.mubr.msk.f32.gmra.mrb[14].mxu1 %vm1446_vm7, %v1407_v22  ;;  %v1415_v16 = vsel %vm945_vm6, %v1379_v3, %v1235_v5  ;;  %v1309_v22 = vsel %vm834_vm2, %v1283_v14, %v7921_v18  ;;  %v1346_v32 = vsel %vm871_vm4, %v1310_v50, %v7983_v6 }
 0x1ef   : > { %6293 = vmatprep.mubr.msk.f32.mxu1 %vm1446_vm7, %v1408_v15  ;;  %v1237_v49 = vpop.permute.xlu0 %1236  ;;  %v1239_v63 = vpop.permute.xlu1 %1238  ;;  %v1345_v15 = vsel %vm871_vm4, %v1309_v22, %v7977_v4  ;;  %v1382_v4 = vsel %vm908_vm5, %v1346_v32, %v8013_v55  ;;  %v1312_v55 = vsel %vm834_vm2, %v1284_v48, %v7933_v26  ;;  %v12655_v26 = vld [vmem:[#allocation21_spill] sm:$0xff] }
 0x1f0   : > { %v1416_v27 = vsel %vm945_vm6, %v1380_v9, %v1237_v49  ;;  %v1381_v45 = vsel %vm908_vm5, %v1345_v15, %v8011_v44  ;;  %v1418_v17 = vsel %vm945_vm6, %v1382_v4, %v1237_v49  ;;  %v1348_v54 = vsel %vm871_vm4, %v1312_v55, %v7983_v6  ;;  %v12668_v4 = vld [vmem:[#allocation32_spill] sm:$0xff] }
 0x1f1   : > { %v1417_v39 = vsel %vm945_vm6, %v1381_v45, %v1239_v63  ;;  %v1285_v5 = vsel %vm815_vm3, %v12656_v19, %v12655_v26 }
 0x1f2   : > { %6294 = vmatmul.mubr.msk.f32.gmra.mrb[16].mxu1 %vm1446_vm7, %v1409_v61 }
 0x1f3   : > { %6296 = vmatprep.mubr.msk.f32.mxu1 %vm1446_vm7, %v1410_v53  ;;  %v1311_v53 = vsel %vm834_vm2, %v1283_v14, %v7929_v1  ;;  %v1241_v30 = vpop.permute.xlu0 %1240  ;;  %v1243_v2 = vpop.permute.xlu1 %1242  ;;  %v12664_v14 = vld [vmem:[#allocation14_spill] sm:$0xff] }
 0x1f4   : > { %v1347_v62 = vsel %vm871_vm4, %v1311_v53, %v12654_v51 }
 0x1f5   : > { %v1383_v38 = vsel %vm908_vm5, %v1347_v62, %v8011_v44  ;;  %v1313_v44 = vsel %vm834_vm2, %v1285_v5, %v7929_v1  ;;  %v12660_v1 = vld [vmem:[#allocation60_spill] sm:$0xff] }
 0x1f6   : > { %6297 = vmatmul.mubr.msk.f32.gmra.mrb[18].mxu1 %vm1446_vm7, %v1411_v25  ;;  %v1419_v6 = vsel %vm945_vm6, %v1383_v38, %v1239_v63  ;;  %v1349_v43 = vsel %vm871_vm4, %v1313_v44, %v12654_v51 }
 0x1f7   : > { %6299 = vmatprep.mubr.msk.f32.mxu1 %vm1446_vm7, %v1412_v47  ;;  %v12657_v47 = vld [vmem:[#allocation46_spill] sm:$0xff]  ;;  %v1245_v50 = vpop.permute.xlu0 %1244  ;;  %v1247_v51 = vpop.permute.xlu1 %1246 }
 0x1f8   : > { %v1384_v8 = vsel %vm908_vm5, %v1348_v54, %v12657_v47  ;;  %v12672_v54 = vld [vmem:[#allocation36_spill] sm:$0xff] }
 0x1fa   : > { %v6223_v13 = vpop.f32.mrb[0].mxu0  ;;  %6300 = vmatmul.mubr.msk.f32.gmra.mrb[20].mxu1 %vm1446_vm7, %v1413_v10  ;;  %v12659_v10 = vld [vmem:[#allocation35_spill] sm:$0xff] }
 0x1fb   : > { %v1627_v35 = vadd.f32 %v6223_v13, %v8160_v23  ;;  %v1621_v12 = vpop.f32.mrb[1].mxu0  ;;  %6302 = vmatprep.mubr.msk.f32.mxu1 %vm1446_vm7, %v1414_v36  ;;  %v1420_v13 = vsel %vm945_vm6, %v1384_v8, %v1241_v30  ;;  %v1314_v7 = vsel %vm834_vm2, %v1284_v48, %v12659_v10  ;;  %v12661_v36 = vld [vmem:[#allocation44_spill] sm:$0xff]  ;;  %v12670_v48 = vld [vmem:[#allocation47_spill] sm:$0xff]  ;;  %v12674_v8 = vld [vmem:[#allocation58_spill] sm:$0xff] }
 0x1fc   : > { %v1622_v20 = vadd.f32 %v8160_v23, %v1621_v12  ;;  %v1350_v12 = vsel %vm871_vm4, %v1314_v7, %v12660_v1  ;;  %v1385_v37 = vsel %vm908_vm5, %v1349_v43, %v12661_v36  ;;  %v12679_v43 = vld [vmem:[#allocation23_spill] sm:$0xff] }
 0x1fd   : > { %v1801_v59 = vmax.f32 %v1627_v35, 0.0  ;;  %v1386_v49 = vsel %vm908_vm5, %v1350_v12, %v12657_v47  ;;  %v1421_v3 = vsel %vm945_vm6, %v1385_v37, %v1243_v2 }
 0x1fe   : > { %v1800_v21 = vmax.f32 %v1622_v20, 0.0  ;;  %v6226_v33 = vpop.f32.mrb[2].mxu0  ;;  %6303 = vmatmul.mubr.msk.f32.gmra.mrb[22].mxu1 %vm1446_vm7, %v1415_v16  ;;  %v1422_v63 = vsel %vm945_vm6, %v1386_v49, %v1241_v30  ;;  %v12680_v49 = vld [vmem:[#allocation41_spill] sm:$0xff] }
 0x1ff   : > { %v8201_v28 = vsel %vm8181_vm8, 0.0, %v1801_v59  ;;  %v1637_v31 = vadd.f32 %v6226_v33, %v8160_v23  ;;  %v1631_v42 = vpop.f32.mrb[3].mxu0  ;;  %6305 = vmatprep.mubr.msk.f32.mxu1 %vm1446_vm7, %v1416_v27  ;;  %v12663_v59 = vld [vmem:[#allocation19_spill] sm:$0xff] }
 0x200   : > { %12650 = vst [vmem:[#allocation53_spill] sm:$0xff] %v8201_v28  ;;  %v8212_v18 = vsel %vm8181_vm8, 0.0, %v1800_v21  ;;  %v1632_v57 = vadd.f32 %v8160_v23, %v1631_v42  ;;  %2576 = vrot.lane.b32.xlu1 %v8201_v28, %s6611_s20  ;;  %v1286_v9 = vsel %vm815_vm3, %v12664_v14, %v12663_v59  ;;  %v12665_v21 = vld [vmem:[#allocation22_spill] sm:$0xff]  ;;  %v12666_v42 = vld [vmem:[#allocation28_spill] sm:$0xff] }
 0x201   : > { %12651 = vst [vmem:[#allocation73_spill] sm:$0xff] %v8212_v18  ;;  %v8222_v29 = vmax.f32 %v1637_v31, 0.0  ;;  %2574 = vrot.lane.b32.xlu0 %v8212_v18, %s6611_s20  ;;  %v1315_v33 = vsel %vm834_vm2, %v1285_v5, %v12665_v21  ;;  %v1316_v31 = vsel %vm834_vm2, %v1286_v9, %v12659_v10  ;;  %v1318_v38 = vsel %vm834_vm2, %v1286_v9, %v12672_v54  ;;  %v12673_v5 = vld [vmem:[#allocation29_spill] sm:$0xff]  ;;  %v12678_v10 = vld [vmem:[#allocation16_spill] sm:$0xff] }
 0x202   : > { %v8228_v24 = vmax.f32 %v1632_v57, 0.0  ;;  %v6229_v61 = vpop.f32.mrb[4].mxu0  ;;  %6306 = vmatmul.mubr.msk.f32.gmra.mrb[24].mxu1 %vm1446_vm7, %v1417_v39  ;;  %v1351_v27 = vsel %vm871_vm4, %v1315_v33, %v12666_v42  ;;  %v1352_v57 = vsel %vm871_vm4, %v1316_v31, %v12660_v1  ;;  %v1354_v47 = vsel %vm871_vm4, %v1318_v38, %v12673_v5  ;;  %v12684_v31 = vld [vmem:[#allocation49_spill] sm:$0xff] }
 0x203   : > { %12652 = vst [vmem:[#allocation55_spill] sm:$0xff] %v8222_v29  ;;  %v1647_v60 = vadd.f32 %v6229_v61, %v8160_v23  ;;  %v1641_v41 = vpop.f32.mrb[5].mxu0  ;;  %6308 = vmatprep.mubr.msk.f32.mxu1 %vm1446_vm7, %v1418_v17  ;;  %v1387_v32 = vsel %vm908_vm5, %v1351_v27, %v12661_v36  ;;  %v12669_v61 = vld [vmem:[#allocation13_spill] sm:$0xff]  ;;  %v1388_v53 = vsel %vm908_vm5, %v1352_v57, %v12670_v48 }
 0x204   : > { %12653 = vst [vmem:[#allocation62_spill] sm:$0xff] %v8228_v24  ;;  %v1642_v11 = vadd.f32 %v8160_v23, %v1641_v41  ;;  %2580 = vrot.lane.b32.xlu1 %v8222_v29, %s6611_s20  ;;  %v1287_v39 = vsel %vm815_vm3, %v12669_v61, %v12668_v4  ;;  %v1423_v17 = vsel %vm945_vm6, %v1387_v32, %v1243_v2 }
 0x205   : > { %v8251_v25 = vmax.f32 %v1647_v60, 0.0  ;;  %2578 = vrot.lane.b32.xlu0 %v8228_v24, %s6611_s20  ;;  %v1317_v55 = vsel %vm834_vm2, %v1287_v39, %v12665_v21  ;;  %v1390_v44 = vsel %vm908_vm5, %v1354_v47, %v12670_v48  ;;  %v1251_v21 = vpop.permute.xlu1 %1250 }
 0x206   : > { %v8260_v34 = vmax.f32 %v1642_v11, 0.0  ;;  %v6232_v40 = vpop.f32.mrb[6].mxu0  ;;  %6309 = vmatmul.mubr.msk.f32.gmra.mrb[26].mxu1 %vm1446_vm7, %v1419_v6  ;;  %v1424_v11 = vsel %vm945_vm6, %v1388_v53, %v1245_v50  ;;  %v1353_v26 = vsel %vm871_vm4, %v1317_v55, %v12666_v42  ;;  %v1426_v36 = vsel %vm945_vm6, %v1390_v44, %v1245_v50  ;;  %v12686_v53 = vld [vmem:[#allocation45_spill] sm:$0xff] }
 0x207   : > { %v1657_v0 = vadd.f32 %v6232_v40, %v8160_v23  ;;  %v1651_v56 = vpop.f32.mrb[7].mxu0  ;;  %6311 = vmatprep.mubr.msk.f32.mxu1 %vm1446_vm7, %v1420_v13  ;;  %v1389_v40 = vsel %vm908_vm5, %v1353_v26, %v12674_v8  ;;  %v12677_v13 = vld [vmem:[#allocation20_spill] sm:$0xff] }
 0x208   : > { %12658 = vst [vmem:[#allocation54_spill] sm:$0xff] %v8260_v34  ;;  %v1652_v35 = vadd.f32 %v8160_v23, %v1651_v56  ;;  %2584 = vrot.lane.b32.xlu1 %v8251_v25, %s6611_s20  ;;  %v1425_v56 = vsel %vm945_vm6, %v1389_v40, %v1247_v51  ;;  %v1288_v7 = vsel %vm815_vm3, %v12678_v10, %v12677_v13  ;;  %v12692_v40 = vld [vmem:[#allocation18_spill] sm:$0xff] }
 0x209   : > { %v8280_v46 = vmax.f32 %v1657_v0, 0.0  ;;  %2582 = vrot.lane.b32.xlu0 %v8260_v34, %s6611_s20  ;;  %v1320_v37 = vsel %vm834_vm2, %v1288_v7, %v12672_v54 }
 0x20a   : > { %v8286_v20 = vmax.f32 %v1652_v35, 0.0  ;;  %v6235_v58 = vpop.f32.mrb[8].mxu0  ;;  %6312 = vmatmul.mubr.msk.f32.gmra.mrb[28].mxu1 %vm1446_vm7, %v1421_v3  ;;  %v1319_v35 = vsel %vm834_vm2, %v1287_v39, %v12679_v43  ;;  %v1249_v3 = vpop.permute.xlu0 %1248  ;;  %v1356_v14 = vsel %vm871_vm4, %v1320_v37, %v12673_v5 }
 0x20b   : > { %v1667_v16 = vadd.f32 %v6235_v58, %v8160_v23  ;;  %v1661_v22 = vpop.f32.mrb[9].mxu0  ;;  %6314 = vmatprep.mubr.msk.f32.mxu1 %vm1446_vm7, %v1422_v63  ;;  %v1355_v58 = vsel %vm871_vm4, %v1319_v35, %v12680_v49  ;;  %v1392_v42 = vsel %vm908_vm5, %v1356_v14, %v12684_v31  ;;  %v12696_v14 = vld [vmem:[#allocation59_spill] sm:$0xff] }
 0x20c   : > { %12662 = vst [vmem:[#allocation74_spill] sm:$0xff] %v8286_v20  ;;  %v1662_v15 = vadd.f32 %v8160_v23, %v1661_v22  ;;  %2588 = vrot.lane.b32.xlu1 %v8280_v46, %s6611_s20  ;;  %v1391_v9 = vsel %vm908_vm5, %v1355_v58, %v12674_v8  ;;  %v12683_v22 = vld [vmem:[#allocation15_spill] sm:$0xff]  ;;  %v1428_v48 = vsel %vm945_vm6, %v1392_v42, %v1249_v3  ;;  %v12691_v8 = vld [vmem:[#allocation34_spill] sm:$0xff] }
 0x20d   : > { %v8309_v45 = vmax.f32 %v1667_v16, 0.0  ;;  %2586 = vrot.lane.b32.xlu0 %v8286_v20, %s6611_s20  ;;  %v12682_v16 = vld [vmem:[#allocation33_spill] sm:$0xff]  ;;  %v1427_v57 = vsel %vm945_vm6, %v1391_v9, %v1247_v51  ;;  %v12687_v51 = vld [vmem:[#allocation30_spill] sm:$0xff]  ;;  %v1290_v44 = vsel %vm815_vm3, %v12692_v40, %v12691_v8 }
 0x20e   : > { %v8318_v60 = vmax.f32 %v1662_v15, 0.0  ;;  %v6238_v41 = vpop.f32.mrb[10].mxu0  ;;  %6315 = vmatmul.mubr.msk.f32.gmra.mrb[30].mxu1 %vm1446_vm7, %v1423_v17  ;;  %v1289_v63 = vsel %vm815_vm3, %v12683_v22, %v12682_v16  ;;  %v1324_v35 = vsel %vm834_vm2, %v1290_v44, %v12686_v53  ;;  %v12697_v9 = vld [vmem:[#allocation17_spill] sm:$0xff]  ;;  %v12698_v22 = vld [vmem:[#allocation64_spill] sm:$0xff] }
 0x20f   : > { %12667 = vst [vmem:[#allocation68_spill] sm:$0xff] %v8309_v45  ;;  %v1677_v62 = vadd.f32 %v6238_v41, %v8160_v23  ;;  %v1671_v30 = vpop.f32.mrb[11].mxu0  ;;  %6317 = vmatprep.mubr.msk.f32.mxu1 %vm1446_vm7, %v1424_v11  ;;  %v1321_v32 = vsel %vm834_vm2, %v1289_v63, %v12679_v43  ;;  %v1322_v41 = vsel %vm834_vm2, %v1288_v7, %v12686_v53 }
 0x210   : > { %12671 = vst [vmem:[#allocation57_spill] sm:$0xff] %v8318_v60  ;;  %v1672_v19 = vadd.f32 %v8160_v23, %v1671_v30  ;;  %2592 = vrot.lane.b32.xlu1 %v8309_v45, %s6611_s20  ;;  %v1357_v17 = vsel %vm871_vm4, %v1321_v32, %v12680_v49  ;;  %v12688_v30 = vld [vmem:[#allocation48_spill] sm:$0xff]  ;;  %v1360_v49 = vsel %vm871_vm4, %v1324_v35, %v12687_v51 }
 0x211   : > { %v8338_v6 = vmax.f32 %v1677_v62, 0.0  ;;  %2590 = vrot.lane.b32.xlu0 %v8318_v60, %s6611_s20  ;;  %v1358_v62 = vsel %vm871_vm4, %v1322_v41, %v12687_v51  ;;  %v1393_v11 = vsel %vm908_vm5, %v1357_v17, %v12688_v30  ;;  %v1291_v16 = vsel %vm815_vm3, %v12697_v9, %v12696_v14  ;;  %v12702_v41 = vld [vmem:[#allocation25_spill] sm:$0xff]  ;;  %v12703_v51 = vld [vmem:[#allocation31_spill] sm:$0xff] }
 0x212   : > { %v8344_v2 = vmax.f32 %v1672_v19, 0.0  ;;  %v6241_v0 = vpop.f32.mrb[12].mxu0  ;;  %6318 = vmatmul.mubr.msk.f32.gmra.mrb[32].mxu1 %vm1446_vm7, %v1425_v56  ;;  %v1394_v38 = vsel %vm908_vm5, %v1358_v62, %v12684_v31  ;;  %v1429_v47 = vsel %vm945_vm6, %v1393_v11, %v1251_v21  ;;  %v1326_v17 = vsel %vm834_vm2, %v1290_v44, %v12702_v41 }
 0x213   : > { %12675 = vst [vmem:[#allocation66_spill] sm:$0xff] %v8338_v6  ;;  %v1687_v1 = vadd.f32 %v6241_v0, %v8160_v23  ;;  %v1681_v12 = vpop.f32.mrb[13].mxu0  ;;  %6320 = vmatprep.mubr.msk.f32.mxu1 %vm1446_vm7, %v1426_v36  ;;  %v12693_v0 = vld [vmem:[#allocation24_spill] sm:$0xff]  ;;  %v1430_v43 = vsel %vm945_vm6, %v1394_v38, %v1249_v3  ;;  %v1253_v36 = vpop.permute.xlu0 %1252  ;;  %v1362_v62 = vsel %vm871_vm4, %v1326_v17, %v12703_v51 }
 0x214   : > { %12676 = vst [vmem:[#allocation3_spill] sm:$0xff] %v8344_v2  ;;  %v1682_v59 = vadd.f32 %v8160_v23, %v1681_v12  ;;  %2596 = vrot.lane.b32.xlu1 %v8338_v6, %s6611_s20  ;;  %v1323_v56 = vsel %vm834_vm2, %v1289_v63, %v12693_v0  ;;  %v1255_v3 = vpop.permute.xlu1 %1254  ;;  %v1396_v63 = vsel %vm908_vm5, %v1360_v49, %v12698_v22 }
 0x215   : > { %v8367_v33 = vmax.f32 %v1687_v1, 0.0  ;;  %2594 = vrot.lane.b32.xlu0 %v8344_v2, %s6611_s20  ;;  %v12694_v1 = vld [vmem:[#allocation42_spill] sm:$0xff]  ;;  %v1325_v32 = vsel %vm834_vm2, %v1291_v16, %v12693_v0  ;;  %v1432_v53 = vsel %vm945_vm6, %v1396_v63, %v1253_v36  ;;  %v12708_v0 = vld [vmem:[#allocation37_spill] sm:$0xff] }
 0x216   : > { %v8376_v27 = vmax.f32 %v1682_v59, 0.0  ;;  %v6244_v50 = vpop.f32.mrb[14].mxu0  ;;  %v8378_v15 = vpop.f32.mrb[0].mxu1  ;;  %6321 = vmatmul.mubr.msk.f32.gmra.mrb[34].mxu1 %vm1446_vm7, %v1427_v57  ;;  %v1359_v12 = vsel %vm871_vm4, %v1323_v56, %v12694_v1  ;;  %v1327_v56 = vsel %vm834_vm2, %v1291_v16, %v12708_v0 }
 0x217   : > { %12681 = vst [vmem:[#allocation56_spill] sm:$0xff] %v8367_v33  ;;  %v1697_v4 = vadd.f32 %v6244_v50, %v8160_v23  ;;  %v1691_v61 = vpop.f32.mrb[15].mxu0  ;;  %v8384_v39 = vpop.f32.mrb[1].mxu1  ;;  %6323 = vmatprep.mubr.msk.f32.mxu1 %vm1446_vm7, %v1428_v48  ;;  %v1395_v58 = vsel %vm908_vm5, %v1359_v12, %v12688_v30  ;;  %v12704_v30 = vld [vmem:[#allocation52_spill] sm:$0xff] }
 0x218   : > { %12685 = vst [vmem:[#allocation51_spill] sm:$0xff] %v8376_v27  ;;  %v1692_v55 = vadd.f32 %v8160_v23, %v1691_v61  ;;  %2600 = vrot.lane.b32.xlu1 %v8367_v33, %s6611_s20  ;;  %v1431_v57 = vsel %vm945_vm6, %v1395_v58, %v1251_v21 }
 0x219   : > { %v8400_v54 = vmax.f32 %v1697_v4, 0.0  ;;  %2598 = vrot.lane.b32.xlu0 %v8376_v27, %s6611_s20 }
 0x21a   : > { %v8406_v26 = vmax.f32 %v1692_v55, 0.0  ;;  %v6247_v19 = vpop.f32.mrb[16].mxu0  ;;  %v8408_v5 = vpop.f32.mrb[2].mxu1  ;;  %6324 = vmatmul.mubr.msk.f32.gmra.mrb[36].mxu1 %vm1446_vm7, %v1429_v47  ;;  %v1361_v55 = vsel %vm871_vm4, %v1325_v32, %v12694_v1  ;;  %v12710_v1 = vld [vmem:[#allocation43_spill] sm:$0xff] }
 0x21b   : > { %12689 = vst [vmem:[#allocation75_spill] sm:$0xff] %v8400_v54  ;;  %v1707_v13 = vadd.f32 %v6247_v19, %v8160_v23  ;;  %v1701_v10 = vpop.f32.mrb[17].mxu0  ;;  %v8417_v7 = vpop.f32.mrb[3].mxu1  ;;  %6326 = vmatprep.mubr.msk.f32.mxu1 %vm1446_vm7, %v1430_v43  ;;  %v1397_v11 = vsel %vm908_vm5, %v1361_v55, %v12704_v30  ;;  %v1398_v19 = vsel %vm908_vm5, %v1362_v62, %v12698_v22 }
 0x21c   : > { %12690 = vst [vmem:[#allocation72_spill] sm:$0xff] %v8406_v26  ;;  %v1702_v37 = vadd.f32 %v8160_v23, %v1701_v10  ;;  %2604 = vrot.lane.b32.xlu1 %v8400_v54, %s6611_s20  ;;  %v1433_v44 = vsel %vm945_vm6, %v1397_v11, %v1255_v3  ;;  %v1434_v35 = vsel %vm945_vm6, %v1398_v19, %v1253_v36 }
 0x21d   : > { %v8433_v59 = vmax.f32 %v1707_v13, 0.0  ;;  %2602 = vrot.lane.b32.xlu0 %v8406_v26, %s6611_s20  ;;  %v1363_v12 = vsel %vm871_vm4, %v1327_v56, %v12710_v1  ;;  %v1762_v19 = vadd.f32 %v8160_v23, %v8384_v39 }
 0x21e   : > { %v8442_v31 = vmax.f32 %v1702_v37, 0.0  ;;  %v6250_v42 = vpop.f32.mrb[18].mxu0  ;;  %v8444_v50 = vpop.f32.mrb[4].mxu1  ;;  %6327 = vmatmul.mubr.msk.f32.gmra.mrb[38].mxu1 %vm1446_vm7, %v1431_v57  ;;  %v1399_v49 = vsel %vm908_vm5, %v1363_v12, %v12704_v30  ;;  %v1767_v30 = vadd.f32 %v8378_v15, %v8160_v23  ;;  %v1772_v15 = vadd.f32 %v8160_v23, %v8417_v7 }
 0x21f   : > { %12695 = vst [vmem:[#allocation76_spill] sm:$0xff] %v8433_v59  ;;  %12700 = vst [vmem:[#allocation2_spill] sm:$0xff] %v8444_v50  ;;  %v1717_v4 = vadd.f32 %v6250_v42, %v8160_v23  ;;  %v1711_v61 = vpop.f32.mrb[19].mxu0  ;;  %v8450_v48 = vpop.f32.mrb[5].mxu1  ;;  %6329 = vmatprep.mubr.msk.f32.mxu1 %vm1446_vm7, %v1432_v53  ;;  %v1435_v9 = vsel %vm945_vm6, %v1399_v49, %v1255_v3  ;;  %v8542_v0 = vmax.f32 %v1762_v19, 0.0 }
 0x220   : > { %12699 = vst [vmem:[#allocation5_spill] sm:$0xff] %v8442_v31  ;;  %12701 = vst [vmem:[#allocation39_spill] sm:$0xff] %v8450_v48  ;;  %v1712_v21 = vadd.f32 %v8160_v23, %v1711_v61  ;;  %2608 = vrot.lane.b32.xlu1 %v8433_v59, %s6611_s20  ;;  %v8552_v56 = vmax.f32 %v1772_v15, 0.0 }
 0x221   : > { %v8466_v38 = vmax.f32 %v1717_v4, 0.0  ;;  %2606 = vrot.lane.b32.xlu0 %v8442_v31, %s6611_s20  ;;  %12720 = vst [vmem:[#allocation63_spill] sm:$0xff] %v8542_v0 }
 0x222   : > { %v8472_v47 = vmax.f32 %v1712_v21, 0.0  ;;  %v6253_v8 = vpop.f32.mrb[20].mxu0  ;;  %v8474_v40 = vpop.f32.mrb[6].mxu1  ;;  %6330 = vmatmul.mubr.msk.f32.gmra.mrb[40].mxu1 %vm1446_vm7, %v1433_v44  ;;  %v1777_v44 = vadd.f32 %v8408_v5, %v8160_v23  ;;  %12722 = vst [vmem:[#allocation67_spill] sm:$0xff] %v8552_v56 }
 0x223   : > { %12705 = vst [vmem:[#allocation27_spill] sm:$0xff] %v8466_v38  ;;  %12707 = vst [vmem:[#allocation70_spill] sm:$0xff] %v8474_v40  ;;  %v1727_v13 = vadd.f32 %v6253_v8, %v8160_v23  ;;  %v1721_v10 = vpop.f32.mrb[21].mxu0  ;;  %v8480_v43 = vpop.f32.mrb[7].mxu1  ;;  %6332 = vmatprep.mubr.msk.f32.mxu1 %vm1446_vm7, %v1434_v35  ;;  %v8538_v8 = vmax.f32 %v1767_v30, 0.0 }
 0x224   : > { %12706 = vst [vmem:[#allocation50_spill] sm:$0xff] %v8472_v47  ;;  %12709 = vst [vmem:[#allocation6_spill] sm:$0xff] %v8480_v43  ;;  %v1722_v37 = vadd.f32 %v8160_v23, %v1721_v10  ;;  %2612 = vrot.lane.b32.xlu1 %v8466_v38, %s6611_s20  ;;  %v8550_v39 = vmax.f32 %v1777_v44, 0.0 }
 0x225   : > { %v8492_v58 = vmax.f32 %v1727_v13, 0.0  ;;  %2610 = vrot.lane.b32.xlu0 %v8472_v47, %s6611_s20  ;;  %12719 = vst [vmem:[#allocation61_spill] sm:$0xff] %v8538_v8 }
 0x226   : > { %v8496_v14 = vmax.f32 %v1722_v37, 0.0  ;;  %v6256_v36 = vpop.f32.mrb[22].mxu0  ;;  %6333 = vmatmul.mubr.msk.f32.gmra.mrb[42].mxu1 %vm1446_vm7, %v1435_v9  ;;  %12721 = vst [vmem:[#allocation65_spill] sm:$0xff] %v8550_v39 }
 0x227   : > { %12711 = vst [vmem:[#allocation38_spill] sm:$0xff] %v8492_v58  ;;  %v1737_v16 = vadd.f32 %v6256_v36, %v8160_v23  ;;  %v1731_v22 = vpop.f32.mrb[23].mxu0 }
 0x228   : > { %12712 = vst [vmem:[#allocation26_spill] sm:$0xff] %v8496_v14  ;;  %v1732_v63 = vadd.f32 %v8160_v23, %v1731_v22  ;;  %2616 = vrot.lane.b32.xlu1 %v8492_v58, %s6611_s20 }
 0x229   : > { %v8504_v42 = vmax.f32 %v1737_v16, 0.0  ;;  %2614 = vrot.lane.b32.xlu0 %v8496_v14, %s6611_s20 }
 0x22a   : > { %v8508_v57 = vmax.f32 %v1732_v63, 0.0  ;;  %v6259_v32 = vpop.f32.mrb[24].mxu0 }
 0x22b   : > { %12713 = vst [vmem:[#allocation78_spill] sm:$0xff] %v8504_v42  ;;  %v1747_v3 = vadd.f32 %v6259_v32, %v8160_v23  ;;  %v1741_v4 = vpop.f32.mrb[25].mxu0 }
 0x22c   : > { %12714 = vst [vmem:[#allocation4_spill] sm:$0xff] %v8508_v57  ;;  %v1742_v61 = vadd.f32 %v8160_v23, %v1741_v4  ;;  %2620 = vrot.lane.b32.xlu1 %v8504_v42, %s6611_s20 }
 0x22d   : > { %v8514_v53 = vmax.f32 %v1747_v3, 0.0  ;;  %2618 = vrot.lane.b32.xlu0 %v8508_v57, %s6611_s20 }
 0x22e   : > { %v8518_v41 = vmax.f32 %v1742_v61, 0.0  ;;  %v6262_v17 = vpop.f32.mrb[26].mxu0 }
 0x22f   : > { %12715 = vst [vmem:[#allocation77_spill] sm:$0xff] %v8514_v53  ;;  %v1757_v55 = vadd.f32 %v6262_v17, %v8160_v23  ;;  %v1751_v21 = vpop.f32.mrb[27].mxu0 }
 0x230   : > { %12716 = vst [vmem:[#allocation9_spill] sm:$0xff] %v8518_v41  ;;  %v1752_v51 = vadd.f32 %v8160_v23, %v1751_v21  ;;  %2624 = vrot.lane.b32.xlu1 %v8514_v53, %s6611_s20 }
 0x231   : > { %v8524_v62 = vmax.f32 %v1757_v55, 0.0  ;;  %2622 = vrot.lane.b32.xlu0 %v8518_v41, %s6611_s20 }
 0x232   : > { %v8530_v11 = vmax.f32 %v1752_v51, 0.0 }
 0x233   : > { %12717 = vst [vmem:[#allocation10_spill] sm:$0xff] %v8524_v62 }
 0x234   : > { %12718 = vst [vmem:[#allocation12_spill] sm:$0xff] %v8530_v11  ;;  %2628 = vrot.lane.b32.xlu1 %v8524_v62, %s6611_s20 }
 0x235   : > { %2626 = vrot.lane.b32.xlu0 %v8530_v11, %s6611_s20 }
 0x238   : > { %2632 = vrot.lane.b32.xlu1 %v8538_v8, %s6611_s20 }
 0x239   : > { %2630 = vrot.lane.b32.xlu0 %v8542_v0, %s6611_s20 }
 0x23c   : > { %2636 = vrot.lane.b32.xlu1 %v8550_v39, %s6611_s20 }
 0x23d   : > { %2634 = vrot.lane.b32.xlu0 %v8552_v56, %s6611_s20 }
 0x2b5   : > { %v6283_v5 = vpop.f32.mrb[8].mxu1 }
 0x2b6   : > { %v2019_v13 = vadd.f32 %v6283_v5, %v8160_v23  ;;  %v2013_v7 = vpop.f32.mrb[9].mxu1 }
 0x2b7   : > { %v2014_v10 = vadd.f32 %v8160_v23, %v2013_v7 }
 0x2b8   : > { %v2193_v35 = vmax.f32 %v2019_v13, 0.0 }
 0x2b9   : > { %v2192_v1 = vmax.f32 %v2014_v10, 0.0  ;;  %v6286_v12 = vpop.f32.mrb[10].mxu1 }
 0x2ba   : > { %v8562_v37 = vsel %vm8181_vm8, 0.0, %v2193_v35  ;;  %v2029_v49 = vadd.f32 %v6286_v12, %v8160_v23  ;;  %v2023_v36 = vpop.f32.mrb[11].mxu1 }
 0x2bb   : > { %12723 = vst [vmem:[#allocation69_spill] sm:$0xff] %v8562_v37  ;;  %v8567_v9 = vsel %vm8181_vm8, 0.0, %v2192_v1  ;;  %v2024_v16 = vadd.f32 %v8160_v23, %v2023_v36  ;;  %2672 = vrot.lane.b32.xlu1 %v8562_v37, %s6612_s24 }
 0x2bc   : > { %12724 = vst [vmem:[#allocation71_spill] sm:$0xff] %v8567_v9  ;;  %v8572_v22 = vmax.f32 %v2029_v49, 0.0  ;;  %2670 = vrot.lane.b32.xlu0 %v8567_v9, %s6612_s24 }
 0x2bd   : > { %v8576_v63 = vmax.f32 %v2024_v16, 0.0  ;;  %v6289_v32 = vpop.f32.mrb[12].mxu1 }
 0x2be   : > { %12725 = vst [vmem:[#allocation8_spill] sm:$0xff] %v8572_v22  ;;  %v2039_v3 = vadd.f32 %v6289_v32, %v8160_v23  ;;  %v2033_v4 = vpop.f32.mrb[13].mxu1 }
 0x2bf   : > { %12726 = vst [vmem:[#allocation7_spill] sm:$0xff] %v8576_v63  ;;  %v2034_v52 = vadd.f32 %v8160_v23, %v2033_v4  ;;  %2676 = vrot.lane.b32.xlu1 %v8572_v22, %s6612_s24 }
 0x2c0   : > { %v8582_v61 = vmax.f32 %v2039_v3, 0.0  ;;  %2674 = vrot.lane.b32.xlu0 %v8576_v63, %s6612_s24 }
 0x2c1   : > { %v8586_v17 = vmax.f32 %v2034_v52, 0.0  ;;  %v6292_v55 = vpop.f32.mrb[14].mxu1 }
 0x2c2   : > { %12727 = vst [vmem:[#allocation40_spill] sm:$0xff] %v8582_v61  ;;  %v2049_v21 = vadd.f32 %v6292_v55, %v8160_v23  ;;  %v2043_v51 = vpop.f32.mrb[15].mxu1  ;;  %v8619_v55 = vpop.permute.xlu1 %2576 }
 0x2c3   : > { %12728 = vst [vmem:[#allocation21_spill] sm:$0xff] %v8586_v17  ;;  %v2044_v30 = vadd.f32 %v8160_v23, %v2043_v51  ;;  %2680 = vrot.lane.b32.xlu1 %v8582_v61, %s6612_s24  ;;  %12735 = vst [vmem:[#allocation14_spill] sm:$0xff] %v8619_v55  ;;  %v8624_v51 = vpop.permute.xlu0 %2574 }
 0x2c4   : > { %v8592_v19 = vmax.f32 %v2049_v21, 0.0  ;;  %2678 = vrot.lane.b32.xlu0 %v8586_v17, %s6612_s24  ;;  %12736 = vst [vmem:[#allocation22_spill] sm:$0xff] %v8624_v51 }
 0x2c5   : > { %v8596_v44 = vmax.f32 %v2044_v30, 0.0  ;;  %v6295_v15 = vpop.f32.mrb[16].mxu1 }
 0x2c6   : > { %12729 = vst [vmem:[#allocation11_spill] sm:$0xff] %v8592_v19  ;;  %v2059_v5 = vadd.f32 %v6295_v15, %v8160_v23  ;;  %v2053_v13 = vpop.f32.mrb[17].mxu1 }
 0x2c7   : > { %12730 = vst [vmem:[#allocation46_spill] sm:$0xff] %v8596_v44  ;;  %v2054_v7 = vadd.f32 %v8160_v23, %v2053_v13  ;;  %2684 = vrot.lane.b32.xlu1 %v8592_v19, %s6612_s24 }
 0x2c8   : > { %v8602_v10 = vmax.f32 %v2059_v5, 0.0  ;;  %2682 = vrot.lane.b32.xlu0 %v8596_v44, %s6612_s24 }
 0x2c9   : > { %v8606_v35 = vmax.f32 %v2054_v7, 0.0  ;;  %v6298_v1 = vpop.f32.mrb[18].mxu1 }
 0x2ca   : > { %12731 = vst [vmem:[#allocation35_spill] sm:$0xff] %v8602_v10  ;;  %v2069_v12 = vadd.f32 %v6298_v1, %v8160_v23  ;;  %v2063_v49 = vpop.f32.mrb[19].mxu1 }
 0x2cb   : > { %12732 = vst [vmem:[#allocation60_spill] sm:$0xff] %v8606_v35  ;;  %v2064_v36 = vadd.f32 %v8160_v23, %v2063_v49  ;;  %2688 = vrot.lane.b32.xlu1 %v8602_v10, %s6612_s24  ;;  %v8640_v49 = vpop.permute.xlu1 %2580 }
 0x2cc   : > { %v8612_v16 = vmax.f32 %v2069_v12, 0.0  ;;  %2686 = vrot.lane.b32.xlu0 %v8606_v35, %s6612_s24  ;;  %12740 = vst [vmem:[#allocation47_spill] sm:$0xff] %v8640_v49 }
 0x2cd   : > { %v8616_v32 = vmax.f32 %v2064_v36, 0.0  ;;  %v6301_v3 = vpop.f32.mrb[20].mxu1 }
 0x2ce   : > { %12733 = vst [vmem:[#allocation44_spill] sm:$0xff] %v8612_v16  ;;  %v2079_v4 = vadd.f32 %v6301_v3, %v8160_v23  ;;  %v2073_v52 = vpop.f32.mrb[21].mxu1 }
 0x2cf   : > { %12734 = vst [vmem:[#allocation19_spill] sm:$0xff] %v8616_v32  ;;  %v2074_v21 = vadd.f32 %v8160_v23, %v2073_v52  ;;  %2692 = vrot.lane.b32.xlu1 %v8612_v16, %s6612_s24 }
 0x2d0   : > { %v8626_v30 = vmax.f32 %v2079_v4, 0.0  ;;  %2690 = vrot.lane.b32.xlu0 %v8616_v32, %s6612_s24  ;;  %v8644_v4 = vpop.permute.xlu0 %2578 }
 0x2d1   : > { %v8630_v15 = vmax.f32 %v2074_v21, 0.0  ;;  %v6304_v5 = vpop.f32.mrb[22].mxu1  ;;  %12742 = vst [vmem:[#allocation29_spill] sm:$0xff] %v8644_v4  ;;  %v8657_v4 = vpop.permute.xlu1 %2584 }
 0x2d2   : > { %12737 = vst [vmem:[#allocation28_spill] sm:$0xff] %v8626_v30  ;;  %v2089_v13 = vadd.f32 %v6304_v5, %v8160_v23  ;;  %v2083_v7 = vpop.f32.mrb[23].mxu1  ;;  %12745 = vst [vmem:[#allocation16_spill] sm:$0xff] %v8657_v4 }
 0x2d3   : > { %12738 = vst [vmem:[#allocation32_spill] sm:$0xff] %v8630_v15  ;;  %v2084_v1 = vadd.f32 %v8160_v23, %v2083_v7  ;;  %2696 = vrot.lane.b32.xlu1 %v8626_v30, %s6612_s24 }
 0x2d4   : > { %v8636_v12 = vmax.f32 %v2089_v13, 0.0  ;;  %2694 = vrot.lane.b32.xlu0 %v8630_v15, %s6612_s24 }
 0x2d5   : > { %v8642_v36 = vmax.f32 %v2084_v1, 0.0  ;;  %v6307_v3 = vpop.f32.mrb[24].mxu1 }
 0x2d6   : > { %12739 = vst [vmem:[#allocation13_spill] sm:$0xff] %v8636_v12  ;;  %v2099_v52 = vadd.f32 %v6307_v3, %v8160_v23  ;;  %v2093_v21 = vpop.f32.mrb[25].mxu1 }
 0x2d7   : > { %12741 = vst [vmem:[#allocation36_spill] sm:$0xff] %v8642_v36  ;;  %v2094_v5 = vadd.f32 %v8160_v23, %v2093_v21  ;;  %2700 = vrot.lane.b32.xlu1 %v8636_v12, %s6612_s24  ;;  %v8662_v21 = vpop.permute.xlu0 %2582 }
 0x2d8   : > { %v8650_v13 = vmax.f32 %v2099_v52, 0.0  ;;  %2698 = vrot.lane.b32.xlu0 %v8642_v36, %s6612_s24  ;;  %12746 = vst [vmem:[#allocation23_spill] sm:$0xff] %v8662_v21 }
 0x2d9   : > { %v8654_v7 = vmax.f32 %v2094_v5, 0.0  ;;  %v6310_v1 = vpop.f32.mrb[26].mxu1 }
 0x2da   : > { %12743 = vst [vmem:[#allocation58_spill] sm:$0xff] %v8650_v13  ;;  %v2109_v49 = vadd.f32 %v6310_v1, %v8160_v23  ;;  %v2103_v51 = vpop.f32.mrb[27].mxu1 }
 0x2db   : > { %12744 = vst [vmem:[#allocation20_spill] sm:$0xff] %v8654_v7  ;;  %v2104_v3 = vadd.f32 %v8160_v23, %v2103_v51  ;;  %2704 = vrot.lane.b32.xlu1 %v8650_v13, %s6612_s24  ;;  %v8682_v28 = vpop.permute.xlu0 %2586 }
 0x2dc   : > { %v8664_v52 = vmax.f32 %v2109_v49, 0.0  ;;  %2702 = vrot.lane.b32.xlu0 %v8654_v7, %s6612_s24  ;;  %v8678_v49 = vpop.permute.xlu1 %2588  ;;  %12752 = vst [vmem:[#allocation30_spill] sm:$0xff] %v8682_v28 }
 0x2dd   : > { %v8668_v5 = vmax.f32 %v2104_v3, 0.0  ;;  %v6313_v55 = vpop.f32.mrb[28].mxu1  ;;  %12750 = vst [vmem:[#allocation49_spill] sm:$0xff] %v8678_v49 }
 0x2de   : > { %12747 = vst [vmem:[#allocation41_spill] sm:$0xff] %v8664_v52  ;;  %v2119_v1 = vadd.f32 %v6313_v55, %v8160_v23  ;;  %v2113_v18 = vpop.f32.mrb[29].mxu1 }
 0x2df   : > { %12748 = vst [vmem:[#allocation33_spill] sm:$0xff] %v8668_v5  ;;  %v2114_v4 = vadd.f32 %v8160_v23, %v2113_v18  ;;  %2708 = vrot.lane.b32.xlu1 %v8664_v52, %s6612_s24 }
 0x2e0   : > { %v8674_v51 = vmax.f32 %v2119_v1, 0.0  ;;  %2706 = vrot.lane.b32.xlu0 %v8668_v5, %s6612_s24  ;;  %v8695_v28 = vpop.permute.xlu1 %2592 }
 0x2e1   : > { %v8680_v21 = vmax.f32 %v2114_v4, 0.0  ;;  %v6316_v3 = vpop.f32.mrb[30].mxu1  ;;  %12755 = vst [vmem:[#allocation18_spill] sm:$0xff] %v8695_v28 }
 0x2e2   : > { %12749 = vst [vmem:[#allocation15_spill] sm:$0xff] %v8674_v51  ;;  %v2129_v55 = vadd.f32 %v6316_v3, %v8160_v23  ;;  %v2123_v9 = vpop.f32.mrb[31].mxu1 }
 0x2e3   : > { %12751 = vst [vmem:[#allocation45_spill] sm:$0xff] %v8680_v21  ;;  %v2124_v18 = vadd.f32 %v8160_v23, %v2123_v9  ;;  %2712 = vrot.lane.b32.xlu1 %v8674_v51, %s6612_s24  ;;  %v8700_v9 = vpop.permute.xlu0 %2590 }
 0x2e4   : > { %v8688_v1 = vmax.f32 %v2129_v55, 0.0  ;;  %2710 = vrot.lane.b32.xlu0 %v8680_v21, %s6612_s24  ;;  %12756 = vst [vmem:[#allocation24_spill] sm:$0xff] %v8700_v9 }
 0x2e5   : > { %v8692_v37 = vmax.f32 %v2124_v18, 0.0  ;;  %v6319_v4 = vpop.f32.mrb[32].mxu1 }
 0x2e6   : > { %12753 = vst [vmem:[#allocation48_spill] sm:$0xff] %v8688_v1  ;;  %v2139_v49 = vadd.f32 %v6319_v4, %v8160_v23  ;;  %v2133_v43 = vpop.f32.mrb[33].mxu1 }
 0x2e7   : > { %12754 = vst [vmem:[#allocation34_spill] sm:$0xff] %v8692_v37  ;;  %v2134_v3 = vadd.f32 %v8160_v23, %v2133_v43  ;;  %2716 = vrot.lane.b32.xlu1 %v8688_v1, %s6612_s24  ;;  %v8720_v39 = vpop.permute.xlu0 %2594 }
 0x2e8   : > { %v8702_v55 = vmax.f32 %v2139_v49, 0.0  ;;  %2714 = vrot.lane.b32.xlu0 %v8692_v37, %s6612_s24  ;;  %v8716_v49 = vpop.permute.xlu1 %2596  ;;  %12762 = vst [vmem:[#allocation31_spill] sm:$0xff] %v8720_v39 }
 0x2e9   : > { %v8706_v18 = vmax.f32 %v2134_v3, 0.0  ;;  %v6322_v40 = vpop.f32.mrb[34].mxu1  ;;  %12760 = vst [vmem:[#allocation64_spill] sm:$0xff] %v8716_v49 }
 0x2ea   : > { %12757 = vst [vmem:[#allocation42_spill] sm:$0xff] %v8702_v55  ;;  %v2149_v4 = vadd.f32 %v6322_v40, %v8160_v23  ;;  %v2143_v56 = vpop.f32.mrb[35].mxu1 }
 0x2eb   : > { %12758 = vst [vmem:[#allocation59_spill] sm:$0xff] %v8706_v18  ;;  %v2144_v28 = vadd.f32 %v8160_v23, %v2143_v56  ;;  %2720 = vrot.lane.b32.xlu1 %v8702_v55, %s6612_s24 }
 0x2ec   : > { %v8712_v43 = vmax.f32 %v2149_v4, 0.0  ;;  %2718 = vrot.lane.b32.xlu0 %v8706_v18, %s6612_s24  ;;  %v8733_v39 = vpop.permute.xlu1 %2600 }
 0x2ed   : > { %v8718_v9 = vmax.f32 %v2144_v28, 0.0  ;;  %v6325_v3 = vpop.f32.mrb[36].mxu1  ;;  %12765 = vst [vmem:[#allocation43_spill] sm:$0xff] %v8733_v39  ;;  %v2345_v39 = vrot.slane %v8576_v63, 7  ;;  %v2348_v63 = vrot.slane %v8586_v17, 7 }
 0x2ee   : > { %12759 = vst [vmem:[#allocation17_spill] sm:$0xff] %v8712_v43  ;;  %v2159_v40 = vadd.f32 %v6325_v3, %v8160_v23  ;;  %v2153_v48 = vpop.f32.mrb[37].mxu1 }
 0x2ef   : > { %12761 = vst [vmem:[#allocation25_spill] sm:$0xff] %v8718_v9  ;;  %v2154_v56 = vadd.f32 %v8160_v23, %v2153_v48  ;;  %2724 = vrot.lane.b32.xlu1 %v8712_v43, %s6612_s24  ;;  %v8738_v48 = vpop.permute.xlu0 %2598  ;;  %v8772_v41 = vsel %vm412_vm0, 0.0, %v2345_v39 }
 0x2f0   : > { %v8726_v4 = vmax.f32 %v2159_v40, 0.0  ;;  %2722 = vrot.lane.b32.xlu0 %v8718_v9, %s6612_s24  ;;  %12766 = vst [vmem:[#allocation79_spill] sm:$0xff] %v8738_v48  ;;  %12774 = vst [vmem:[#allocation87_spill] sm:$0xff] %v8772_v41 }
 0x2f1   : > { %v8730_v50 = vmax.f32 %v2154_v56, 0.0  ;;  %v6328_v28 = vpop.f32.mrb[38].mxu1 }
 0x2f2   : > { %12763 = vst [vmem:[#allocation52_spill] sm:$0xff] %v8726_v4  ;;  %v2169_v49 = vadd.f32 %v6328_v28, %v8160_v23  ;;  %v2163_v0 = vpop.f32.mrb[39].mxu1 }
 0x2f3   : > { %12764 = vst [vmem:[#allocation37_spill] sm:$0xff] %v8730_v50  ;;  %v2164_v3 = vadd.f32 %v8160_v23, %v2163_v0  ;;  %2728 = vrot.lane.b32.xlu1 %v8726_v4, %s6612_s24  ;;  %v2346_v0 = vrot.slane %v8572_v22, 7  ;;  %v2349_v22 = vrot.slane %v8582_v61, 7 }
 0x2f4   : > { %v8740_v40 = vmax.f32 %v2169_v49, 0.0  ;;  %2726 = vrot.lane.b32.xlu0 %v8730_v50, %s6612_s24  ;;  %v8756_v49 = vpop.permute.xlu1 %2604 }
 0x2f5   : > { %v8744_v56 = vmax.f32 %v2164_v3, 0.0  ;;  %v8746_v8 = vpop.f32.mrb[40].mxu1  ;;  %12769 = vst [vmem:[#allocation82_spill] sm:$0xff] %v8756_v49  ;;  %v8760_v3 = vpop.permute.xlu0 %2602  ;;  %v8765_v62 = vsel %vm412_vm0, %v2345_v39, %v2346_v0  ;;  %v2351_v49 = vrot.slane %v8596_v44, 7  ;;  %v2352_v0 = vrot.slane %v8592_v19, 7 }
 0x2f6   : > { %12767 = vst [vmem:[#allocation80_spill] sm:$0xff] %v8740_v40  ;;  %v8748_v28 = vpop.f32.mrb[41].mxu1  ;;  %12771 = vst [vmem:[#allocation84_spill] sm:$0xff] %v8760_v3  ;;  %v8777_v3 = vsel %vm412_vm0, %v2348_v63, %v2349_v22 }
 0x2f7   : > { %12768 = vst [vmem:[#allocation81_spill] sm:$0xff] %v8744_v56  ;;  %2732 = vrot.lane.b32.xlu1 %v8740_v40, %s6612_s24  ;;  %12773 = vst [vmem:[#allocation86_spill] sm:$0xff] %v8765_v62  ;;  %v8793_v22 = vsel %vm412_vm0, %v2351_v49, %v2352_v0 }
 0x2f8   : > { %2730 = vrot.lane.b32.xlu0 %v8744_v56, %s6612_s24  ;;  %12775 = vst [vmem:[#allocation88_spill] sm:$0xff] %v8777_v3  ;;  %12779 = vst [vmem:[#allocation92_spill] sm:$0xff] %v8793_v22 }
 0x2f9   : > { %v8758_v48 = vpop.f32.mrb[42].mxu1  ;;  %v8788_v39 = vpop.permute.xlu0 %2606 }
 0x2fa   : > { %12770 = vst [vmem:[#allocation83_spill] sm:$0xff] %v8758_v48  ;;  %v8762_v11 = vpop.f32.mrb[43].mxu1  ;;  %12778 = vst [vmem:[#allocation91_spill] sm:$0xff] %v8788_v39  ;;  %v2355_v48 = vrot.slane %v8602_v10, 7 }
 0x2fb   : > { %12772 = vst [vmem:[#allocation85_spill] sm:$0xff] %v8762_v11  ;;  %2784 = vrot.lane.b32.xlu1 %v8765_v62, %s6613_s14  ;;  %v8781_v11 = vpop.permute.xlu1 %2608  ;;  %v8786_v62 = vsel %vm412_vm0, 0.0, %v2348_v63 }
 0x2fc   : > { %2782 = vrot.lane.b32.xlu0 %v8772_v41, %s6613_s14  ;;  %12776 = vst [vmem:[#allocation89_spill] sm:$0xff] %v8781_v11  ;;  %12777 = vst [vmem:[#allocation90_spill] sm:$0xff] %v8786_v62  ;;  %v2354_v41 = vrot.slane %v8606_v35, 7  ;;  %v8800_v11 = vsel %vm412_vm0, 0.0, %v2351_v49 }
 0x2fd   : > { %12780 = vst [vmem:[#allocation93_spill] sm:$0xff] %v8800_v11  ;;  %v8806_v39 = vpop.permute.xlu0 %2610 }
 0x2fe   : > { %12782 = vst [vmem:[#allocation95_spill] sm:$0xff] %v8806_v39  ;;  %v8809_v0 = vsel %vm412_vm0, %v2354_v41, %v2355_v48  ;;  %v8816_v49 = vsel %vm412_vm0, 0.0, %v2354_v41  ;;  %v2360_v39 = vrot.slane %v8630_v15, 7  ;;  %v2361_v48 = vrot.slane %v8626_v30, 7 }
 0x2ff   : > { %2788 = vrot.lane.b32.xlu1 %v8777_v3, %s6613_s14  ;;  %v8804_v63 = vpop.permute.xlu1 %2612  ;;  %12783 = vst [vmem:[#allocation96_spill] sm:$0xff] %v8809_v0  ;;  %v2358_v3 = vrot.slane %v8612_v16, 7  ;;  %12784 = vst [vmem:[#allocation97_spill] sm:$0xff] %v8816_v49 }
 0x300   : > { %2786 = vrot.lane.b32.xlu0 %v8786_v62, %s6613_s14  ;;  %12781 = vst [vmem:[#allocation94_spill] sm:$0xff] %v8804_v63  ;;  %v2357_v62 = vrot.slane %v8616_v32, 7 }
 0x301   : > { %v8832_v41 = vpop.permute.xlu0 %2614 }
 0x302   : > { %v8821_v63 = vsel %vm412_vm0, %v2357_v62, %v2358_v3  ;;  %12788 = vst [vmem:[#allocation101_spill] sm:$0xff] %v8832_v41  ;;  %v8837_v3 = vsel %vm412_vm0, %v2360_v39, %v2361_v48 }
 0x303   : > { %2792 = vrot.lane.b32.xlu1 %v8793_v22, %s6613_s14  ;;  %12785 = vst [vmem:[#allocation98_spill] sm:$0xff] %v8821_v63  ;;  %12789 = vst [vmem:[#allocation102_spill] sm:$0xff] %v8837_v3  ;;  %v2364_v22 = vrot.slane %v8636_v12, 7 }
 0x304   : > { %2790 = vrot.lane.b32.xlu0 %v8800_v11, %s6613_s14  ;;  %v8825_v11 = vpop.permute.xlu1 %2616 }
 0x305   : > { %12786 = vst [vmem:[#allocation99_spill] sm:$0xff] %v8825_v11  ;;  %v8844_v11 = vsel %vm412_vm0, 0.0, %v2360_v39  ;;  %v8850_v41 = vpop.permute.xlu0 %2618 }
 0x306   : > { %12790 = vst [vmem:[#allocation103_spill] sm:$0xff] %v8844_v11  ;;  %12792 = vst [vmem:[#allocation105_spill] sm:$0xff] %v8850_v41  ;;  %v2369_v41 = vrot.slane %v8668_v5, 7 }
 0x307   : > { %2796 = vrot.lane.b32.xlu1 %v8809_v0, %s6613_s14  ;;  %v8830_v0 = vsel %vm412_vm0, 0.0, %v2357_v62 }
 0x308   : > { %2794 = vrot.lane.b32.xlu0 %v8816_v49, %s6613_s14  ;;  %12787 = vst [vmem:[#allocation100_spill] sm:$0xff] %v8830_v0  ;;  %v2363_v49 = vrot.slane %v8642_v36, 7  ;;  %v8848_v62 = vpop.permute.xlu1 %2620 }
 0x309   : > { %12791 = vst [vmem:[#allocation104_spill] sm:$0xff] %v8848_v62 }
 0x30a   : > { %v8853_v48 = vsel %vm412_vm0, %v2363_v49, %v2364_v22  ;;  %v8860_v39 = vsel %vm412_vm0, 0.0, %v2363_v49  ;;  %v2370_v22 = vrot.slane %v8664_v52, 7  ;;  %v8876_v49 = vpop.permute.xlu0 %2622 }
 0x30b   : > { %2800 = vrot.lane.b32.xlu1 %v8821_v63, %s6613_s14  ;;  %12793 = vst [vmem:[#allocation106_spill] sm:$0xff] %v8853_v48  ;;  %v2367_v63 = vrot.slane %v8650_v13, 7  ;;  %12794 = vst [vmem:[#allocation107_spill] sm:$0xff] %v8860_v39 }
 0x30c   : > { %2798 = vrot.lane.b32.xlu0 %v8830_v0, %s6613_s14  ;;  %v2366_v0 = vrot.slane %v8654_v7, 7  ;;  %12798 = vst [vmem:[#allocation111_spill] sm:$0xff] %v8876_v49 }
 0x30e   : > { %v8865_v62 = vsel %vm412_vm0, %v2366_v0, %v2367_v63  ;;  %v8881_v63 = vsel %vm412_vm0, %v2369_v41, %v2370_v22  ;;  %v8894_v49 = vpop.permute.xlu0 %2626 }
 0x30f   : > { %2804 = vrot.lane.b32.xlu1 %v8837_v3, %s6613_s14  ;;  %12795 = vst [vmem:[#allocation108_spill] sm:$0xff] %v8865_v62  ;;  %12799 = vst [vmem:[#allocation112_spill] sm:$0xff] %v8881_v63  ;;  %v2373_v3 = vrot.slane %v8674_v51, 7 }
 0x310   : > { %2802 = vrot.lane.b32.xlu0 %v8844_v11, %s6613_s14  ;;  %v8869_v11 = vpop.permute.xlu1 %2624  ;;  %12802 = vst [vmem:[#allocation115_spill] sm:$0xff] %v8894_v49  ;;  %v2378_v49 = vrot.slane %v8706_v18, 7 }
 0x311   : > { %12796 = vst [vmem:[#allocation109_spill] sm:$0xff] %v8869_v11  ;;  %v8888_v11 = vsel %vm412_vm0, 0.0, %v2369_v41 }
 0x312   : > { %12800 = vst [vmem:[#allocation113_spill] sm:$0xff] %v8888_v11 }
 0x313   : > { %2808 = vrot.lane.b32.xlu1 %v8853_v48, %s6613_s14  ;;  %v8874_v48 = vsel %vm412_vm0, 0.0, %v2366_v0 }
 0x314   : > { %2806 = vrot.lane.b32.xlu0 %v8860_v39, %s6613_s14  ;;  %12797 = vst [vmem:[#allocation110_spill] sm:$0xff] %v8874_v48  ;;  %v2372_v39 = vrot.slane %v8680_v21, 7  ;;  %v8892_v0 = vpop.permute.xlu1 %2628 }
 0x315   : > { %12801 = vst [vmem:[#allocation114_spill] sm:$0xff] %v8892_v0 }
 0x316   : > { %v8897_v22 = vsel %vm412_vm0, %v2372_v39, %v2373_v3  ;;  %v8904_v41 = vsel %vm412_vm0, 0.0, %v2372_v39  ;;  %v2379_v3 = vrot.slane %v8702_v55, 7  ;;  %v8920_v39 = vpop.permute.xlu0 %2630 }
 0x317   : > { %2812 = vrot.lane.b32.xlu1 %v8865_v62, %s6613_s14  ;;  %12803 = vst [vmem:[#allocation116_spill] sm:$0xff] %v8897_v22  ;;  %v2376_v62 = vrot.slane %v8688_v1, 7  ;;  %12804 = vst [vmem:[#allocation117_spill] sm:$0xff] %v8904_v41 }
 0x318   : > { %2810 = vrot.lane.b32.xlu0 %v8874_v48, %s6613_s14  ;;  %v2375_v48 = vrot.slane %v8692_v37, 7  ;;  %12808 = vst [vmem:[#allocation121_spill] sm:$0xff] %v8920_v39  ;;  %v2384_v39 = vrot.slane %v8730_v50, 7  ;;  %v2387_v50 = vrot.slane %v8744_v56, 7 }
 0x31a   : > { %v8909_v0 = vsel %vm412_vm0, %v2375_v48, %v2376_v62  ;;  %v8925_v62 = vsel %vm412_vm0, %v2378_v49, %v2379_v3  ;;  %v2385_v3 = vrot.slane %v8726_v4, 7 }
 0x31b   : > { %2816 = vrot.lane.b32.xlu1 %v8881_v63, %s6613_s14  ;;  %12805 = vst [vmem:[#allocation118_spill] sm:$0xff] %v8909_v0  ;;  %12809 = vst [vmem:[#allocation122_spill] sm:$0xff] %v8925_v62  ;;  %v2382_v63 = vrot.slane %v8712_v43, 7 }
 0x31c   : > { %2814 = vrot.lane.b32.xlu0 %v8888_v11, %s6613_s14  ;;  %v8913_v11 = vpop.permute.xlu1 %2632 }
 0x31d   : > { %12806 = vst [vmem:[#allocation119_spill] sm:$0xff] %v8913_v11  ;;  %v8932_v11 = vsel %vm412_vm0, 0.0, %v2378_v49 }
 0x31e   : > { %12810 = vst [vmem:[#allocation123_spill] sm:$0xff] %v8932_v11 }
 0x31f   : > { %2820 = vrot.lane.b32.xlu1 %v8897_v22, %s6613_s14  ;;  %v8918_v22 = vsel %vm412_vm0, 0.0, %v2375_v48 }
 0x320   : > { %2818 = vrot.lane.b32.xlu0 %v8904_v41, %s6613_s14  ;;  %12807 = vst [vmem:[#allocation120_spill] sm:$0xff] %v8918_v22  ;;  %v2381_v41 = vrot.slane %v8718_v9, 7  ;;  %v8936_v48 = vpop.permute.xlu1 %2636 }
 0x321   : > { %12811 = vst [vmem:[#allocation124_spill] sm:$0xff] %v8936_v48 }
 0x322   : > { %v8957_v48 = vsel %vm412_vm0, 0.0, %v2381_v41 }
 0x323   : > { %2824 = vrot.lane.b32.xlu1 %v8909_v0, %s6613_s14  ;;  %v2179_v0 = vadd.f32 %v8746_v8, %v8160_v23  ;;  %12814 = vst [vmem:[#allocation127_spill] sm:$0xff] %v8957_v48  ;;  %v8964_v8 = vsel %vm412_vm0, %v2384_v39, %v2385_v3 }
 0x324   : > { %2822 = vrot.lane.b32.xlu0 %v8918_v22, %s6613_s14  ;;  %v8940_v22 = vpop.permute.xlu0 %2634  ;;  %12816 = vst [vmem:[#allocation129_spill] sm:$0xff] %v8964_v8 }
 0x325   : > { %12812 = vst [vmem:[#allocation125_spill] sm:$0xff] %v8940_v22  ;;  %v8966_v22 = vmax.f32 %v2179_v0, 0.0 }
 0x327   : > { %2828 = vrot.lane.b32.xlu1 %v8925_v62, %s6613_s14  ;;  %v8947_v62 = vld [vmem:[%s12130_s3] ss:$0 sm:$0xff]  ;;  %12817 = vst [vmem:[#allocation130_spill] sm:$0xff] %v8966_v22 }
 0x328   : > { %2826 = vrot.lane.b32.xlu0 %v8932_v11, %s6613_s14  ;;  %v2174_v49 = vadd.f32 %v8947_v62, %v8748_v28  ;;  %v8952_v11 = vsel %vm412_vm0, %v2381_v41, %v2382_v63  ;;  %v8977_v41 = vsel %vm412_vm0, 0.0, %v2384_v39  ;;  %v8993_v39 = vsel %vm412_vm0, 0.0, %v2387_v50 }
 0x329   : > { %12813 = vst [vmem:[#allocation126_spill] sm:$0xff] %v8952_v11  ;;  %12820 = vst [vmem:[#allocation133_spill] sm:$0xff] %v8977_v41 }
 0x32a   : > { %v8968_v28 = vmax.f32 %v2174_v49, 0.0  ;;  %12824 = vst [vmem:[#allocation137_spill] sm:$0xff] %v8993_v39 }
 0x32b   : > { %2832 = vrot.lane.b32.xlu1 %v8952_v11, %s6613_s14  ;;  %v2388_v11 = vrot.slane %v8740_v40, 7 }
 0x32c   : > { %2830 = vrot.lane.b32.xlu0 %v8957_v48, %s6613_s14  ;;  %12818 = vst [vmem:[#allocation131_spill] sm:$0xff] %v8968_v28 }
 0x32d   : > { %v8961_v23 = vpop.permute.xlu1 %2672  ;;  %v8986_v49 = vsel %vm412_vm0, %v2387_v50, %v2388_v11 }
 0x32e   : > { %12815 = vst [vmem:[#allocation128_spill] sm:$0xff] %v8961_v23  ;;  %v8970_v63 = vpop.permute.xlu0 %2670  ;;  %12823 = vst [vmem:[#allocation136_spill] sm:$0xff] %v8986_v49  ;;  %v2390_v23 = vrot.slane %v8968_v28, 7 }
 0x32f   : > { %12819 = vst [vmem:[#allocation132_spill] sm:$0xff] %v8970_v63  ;;  %2836 = vrot.lane.b32.xlu1 %v8964_v8, %s6613_s14  ;;  %v2391_v63 = vrot.slane %v8966_v22, 7 }
 0x330   : > { %2834 = vrot.lane.b32.xlu0 %v8977_v41, %s6613_s14 }
 0x331   : > { %v8981_v3 = vpop.permute.xlu1 %2676  ;;  %v9002_v11 = vsel %vm412_vm0, %v2390_v23, %v2391_v63 }
 0x332   : > { %12821 = vst [vmem:[#allocation134_spill] sm:$0xff] %v8981_v3  ;;  %v8983_v0 = vpop.permute.xlu0 %2674 }
 0x333   : > { %12822 = vst [vmem:[#allocation135_spill] sm:$0xff] %v8983_v0  ;;  %2840 = vrot.lane.b32.xlu1 %v8986_v49, %s6613_s14  ;;  %v9007_v0 = vsel %vm412_vm0, 0.0, %v2390_v23 }
 0x334   : > { %2838 = vrot.lane.b32.xlu0 %v8993_v39, %s6613_s14 }
 0x335   : > { %v8997_v41 = vpop.permute.xlu1 %2680 }
 0x336   : > { %12825 = vst [vmem:[#allocation138_spill] sm:$0xff] %v8997_v41  ;;  %v8999_v3 = vpop.permute.xlu0 %2678 }
 0x337   : > { %12826 = vst [vmem:[#allocation139_spill] sm:$0xff] %v8999_v3  ;;  %2844 = vrot.lane.b32.xlu1 %v9002_v11, %s6613_s14 }
 0x338   : > { %2842 = vrot.lane.b32.xlu0 %v9007_v0, %s6613_s14 }
 0x339   : > { %v9011_v50 = vpop.permute.xlu1 %2684 }
 0x33a   : > { %12827 = vst [vmem:[#allocation140_spill] sm:$0xff] %v9011_v50  ;;  %v9013_v49 = vpop.permute.xlu0 %2682 }
 0x33b   : > { %12828 = vst [vmem:[#allocation141_spill] sm:$0xff] %v9013_v49  ;;  %2880 = vrot.lane.b32.xlu1 %v8222_v29, %s6614_s15 }
 0x33c   : > { %2878 = vrot.lane.b32.xlu0 %v8228_v24, %s6614_s15  ;;  %v12855_v24 = vld [vmem:[#allocation12_spill] sm:$0xff] }
 0x33d   : > { %v9019_v63 = vpop.permute.xlu1 %2688 }
 0x33e   : > { %12829 = vst [vmem:[#allocation142_spill] sm:$0xff] %v9019_v63  ;;  %v9021_v41 = vpop.permute.xlu0 %2686 }
 0x33f   : > { %12830 = vst [vmem:[#allocation143_spill] sm:$0xff] %v9021_v41  ;;  %2884 = vrot.lane.b32.xlu1 %v8251_v25, %s6614_s15 }
 0x340   : > { %2882 = vrot.lane.b32.xlu0 %v8260_v34, %s6614_s15 }
 0x341   : > { %v9027_v23 = vpop.permute.xlu1 %2692 }
 0x342   : > { %12831 = vst [vmem:[#allocation144_spill] sm:$0xff] %v9027_v23  ;;  %v9029_v50 = vpop.permute.xlu0 %2690 }
 0x343   : > { %12832 = vst [vmem:[#allocation145_spill] sm:$0xff] %v9029_v50  ;;  %2888 = vrot.lane.b32.xlu1 %v8280_v46, %s6614_s15 }
 0x344   : > { %2886 = vrot.lane.b32.xlu0 %v8286_v20, %s6614_s15 }
 0x345   : > { %v9035_v49 = vpop.permute.xlu1 %2696 }
 0x346   : > { %12833 = vst [vmem:[#allocation146_spill] sm:$0xff] %v9035_v49  ;;  %v9037_v63 = vpop.permute.xlu0 %2694 }
 0x347   : > { %12834 = vst [vmem:[#allocation147_spill] sm:$0xff] %v9037_v63  ;;  %2892 = vrot.lane.b32.xlu1 %v8309_v45, %s6614_s15 }
 0x348   : > { %2890 = vrot.lane.b32.xlu0 %v8318_v60, %s6614_s15 }
 0x349   : > { %v9043_v41 = vpop.permute.xlu1 %2700 }
 0x34a   : > { %12835 = vst [vmem:[#allocation148_spill] sm:$0xff] %v9043_v41  ;;  %v9045_v23 = vpop.permute.xlu0 %2698 }
 0x34b   : > { %12836 = vst [vmem:[#allocation149_spill] sm:$0xff] %v9045_v23  ;;  %2896 = vrot.lane.b32.xlu1 %v8338_v6, %s6614_s15 }
 0x34c   : > { %2894 = vrot.lane.b32.xlu0 %v8344_v2, %s6614_s15 }
 0x34d   : > { %v9051_v50 = vpop.permute.xlu1 %2704 }
 0x34e   : > { %12837 = vst [vmem:[#allocation150_spill] sm:$0xff] %v9051_v50  ;;  %v9053_v49 = vpop.permute.xlu0 %2702 }
 0x34f   : > { %12838 = vst [vmem:[#allocation151_spill] sm:$0xff] %v9053_v49  ;;  %2900 = vrot.lane.b32.xlu1 %v8367_v33, %s6614_s15 }
 0x350   : > { %2898 = vrot.lane.b32.xlu0 %v8376_v27, %s6614_s15 }
 0x351   : > { %v9059_v63 = vpop.permute.xlu1 %2708 }
 0x352   : > { %12839 = vst [vmem:[#allocation152_spill] sm:$0xff] %v9059_v63  ;;  %v9061_v41 = vpop.permute.xlu0 %2706 }
 0x353   : > { %12840 = vst [vmem:[#allocation153_spill] sm:$0xff] %v9061_v41  ;;  %2904 = vrot.lane.b32.xlu1 %v8400_v54, %s6614_s15 }
 0x354   : > { %2902 = vrot.lane.b32.xlu0 %v8406_v26, %s6614_s15 }
 0x355   : > { %v9067_v23 = vpop.permute.xlu1 %2712 }
 0x356   : > { %12841 = vst [vmem:[#allocation154_spill] sm:$0xff] %v9067_v23  ;;  %v9069_v50 = vpop.permute.xlu0 %2710 }
 0x357   : > { %12842 = vst [vmem:[#allocation155_spill] sm:$0xff] %v9069_v50  ;;  %2908 = vrot.lane.b32.xlu1 %v8433_v59, %s6614_s15 }
 0x358   : > { %2906 = vrot.lane.b32.xlu0 %v8442_v31, %s6614_s15 }
 0x359   : > { %v9075_v49 = vpop.permute.xlu1 %2716 }
 0x35a   : > { %12843 = vst [vmem:[#allocation156_spill] sm:$0xff] %v9075_v49  ;;  %v9077_v63 = vpop.permute.xlu0 %2714 }
 0x35b   : > { %12844 = vst [vmem:[#allocation157_spill] sm:$0xff] %v9077_v63  ;;  %2912 = vrot.lane.b32.xlu1 %v8466_v38, %s6614_s15 }
 0x35c   : > { %2910 = vrot.lane.b32.xlu0 %v8472_v47, %s6614_s15 }
 0x35d   : > { %v9083_v41 = vpop.permute.xlu1 %2720 }
 0x35e   : > { %12845 = vst [vmem:[#allocation158_spill] sm:$0xff] %v9083_v41  ;;  %v9085_v23 = vpop.permute.xlu0 %2718 }
 0x35f   : > { %12846 = vst [vmem:[#allocation159_spill] sm:$0xff] %v9085_v23  ;;  %2916 = vrot.lane.b32.xlu1 %v8492_v58, %s6614_s15  ;;  %v12851_v23 = vld [vmem:[#allocation9_spill] sm:$0xff] }
 0x360   : > { %2914 = vrot.lane.b32.xlu0 %v8496_v14, %s6614_s15 }
 0x361   : > { %v9091_v50 = vpop.permute.xlu1 %2724 }
 0x362   : > { %12847 = vst [vmem:[#allocation160_spill] sm:$0xff] %v9091_v50  ;;  %v9093_v49 = vpop.permute.xlu0 %2722 }
 0x363   : > { %12848 = vst [vmem:[#allocation161_spill] sm:$0xff] %v9093_v49  ;;  %2920 = vrot.lane.b32.xlu1 %v8504_v42, %s6614_s15  ;;  %v12854_v49 = vld [vmem:[#allocation10_spill] sm:$0xff] }
 0x364   : > { %2918 = vrot.lane.b32.xlu0 %v8508_v57, %s6614_s15  ;;  %v12862_v57 = vld [vmem:[#allocation39_spill] sm:$0xff] }
 0x365   : > { %v9099_v63 = vpop.permute.xlu1 %2728 }
 0x366   : > { %12849 = vst [vmem:[#allocation162_spill] sm:$0xff] %v9099_v63  ;;  %v9101_v41 = vpop.permute.xlu0 %2726 }
 0x367   : > { %12850 = vst [vmem:[#allocation163_spill] sm:$0xff] %v9101_v41  ;;  %2924 = vrot.lane.b32.xlu1 %v8514_v53, %s6614_s15  ;;  %v12858_v41 = vld [vmem:[#allocation61_spill] sm:$0xff]  ;;  %v12859_v53 = vld [vmem:[#allocation63_spill] sm:$0xff] }
 0x368   : > { %2922 = vrot.lane.b32.xlu0 %v12851_v23, %s6614_s15  ;;  %v12860_v23 = vld [vmem:[#allocation2_spill] sm:$0xff] }
 0x369   : > { %v9107_v3 = vpop.permute.xlu1 %2732 }
 0x36a   : > { %12852 = vst [vmem:[#allocation164_spill] sm:$0xff] %v9107_v3  ;;  %v9109_v50 = vpop.permute.xlu0 %2730  ;;  %v1787_v3 = vadd.f32 %v8947_v62, %v12860_v23 }
 0x36b   : > { %12853 = vst [vmem:[#allocation165_spill] sm:$0xff] %v9109_v50  ;;  %2928 = vrot.lane.b32.xlu1 %v12854_v49, %s6614_s15  ;;  %v1782_v49 = vadd.f32 %v8947_v62, %v12862_v57 }
 0x36c   : > { %2926 = vrot.lane.b32.xlu0 %v12855_v24, %s6614_s15 }
 0x36d   : > { %v9115_v29 = vpop.permute.xlu1 %2784 }
 0x36e   : > { %12856 = vst [vmem:[#allocation166_spill] sm:$0xff] %v9115_v29  ;;  %v9117_v63 = vpop.permute.xlu0 %2782  ;;  %v12864_v29 = vld [vmem:[#allocation65_spill] sm:$0xff] }
 0x36f   : > { %12857 = vst [vmem:[#allocation167_spill] sm:$0xff] %v9117_v63  ;;  %2932 = vrot.lane.b32.xlu1 %v12858_v41, %s6614_s15  ;;  %v12865_v63 = vld [vmem:[#allocation67_spill] sm:$0xff]  ;;  %v9135_v41 = vmax.f32 %v1787_v3, 0.0 }
 0x370   : > { %2930 = vrot.lane.b32.xlu0 %v12859_v53, %s6614_s15  ;;  %v9139_v53 = vmax.f32 %v1782_v49, 0.0  ;;  %v12873_v3 = vld [vmem:[#allocation7_spill] sm:$0xff] }
 0x371   : > { %v9125_v50 = vpop.permute.xlu1 %2788  ;;  %12866 = vst [vmem:[#allocation168_spill] sm:$0xff] %v9135_v41 }
 0x372   : > { %12861 = vst [vmem:[#allocation2_spill] sm:$0xff] %v9125_v50  ;;  %v9129_v42 = vpop.permute.xlu0 %2786  ;;  %12868 = vst [vmem:[#allocation170_spill] sm:$0xff] %v9139_v53 }
 0x373   : > { %12863 = vst [vmem:[#allocation39_spill] sm:$0xff] %v9129_v42  ;;  %2936 = vrot.lane.b32.xlu1 %v12864_v29, %s6614_s15  ;;  %v12872_v42 = vld [vmem:[#allocation8_spill] sm:$0xff] }
 0x374   : > { %2934 = vrot.lane.b32.xlu0 %v12865_v63, %s6614_s15 }
 0x375   : > { %v9137_v24 = vpop.permute.xlu1 %2792 }
 0x376   : > { %12867 = vst [vmem:[#allocation169_spill] sm:$0xff] %v9137_v24  ;;  %v9141_v23 = vpop.permute.xlu0 %2790 }
 0x377   : > { %12869 = vst [vmem:[#allocation171_spill] sm:$0xff] %v9141_v23  ;;  %2940 = vrot.lane.b32.xlu1 %v9135_v41, %s6614_s15 }
 0x378   : > { %2938 = vrot.lane.b32.xlu0 %v9139_v53, %s6614_s15 }
 0x379   : > { %v9147_v57 = vpop.permute.xlu1 %2796 }
 0x37a   : > { %12870 = vst [vmem:[#allocation172_spill] sm:$0xff] %v9147_v57  ;;  %v9149_v50 = vpop.permute.xlu0 %2794 }
 0x37b   : > { %12871 = vst [vmem:[#allocation173_spill] sm:$0xff] %v9149_v50  ;;  %2976 = vrot.lane.b32.xlu1 %v12872_v42, %s6615_s25  ;;  %v12908_v42 = vld [vmem:[#allocation90_spill] sm:$0xff] }
 0x37c   : > { %2974 = vrot.lane.b32.xlu0 %v12873_v3, %s6615_s25 }
 0x37d   : > { %v9155_v49 = vpop.permute.xlu1 %2800 }
 0x37e   : > { %12874 = vst [vmem:[#allocation174_spill] sm:$0xff] %v9155_v49  ;;  %v9157_v24 = vpop.permute.xlu0 %2798 }
 0x37f   : > { %12875 = vst [vmem:[#allocation175_spill] sm:$0xff] %v9157_v24  ;;  %2980 = vrot.lane.b32.xlu1 %v8582_v61, %s6615_s25 }
 0x380   : > { %2978 = vrot.lane.b32.xlu0 %v8586_v17, %s6615_s25 }
 0x381   : > { %v9163_v23 = vpop.permute.xlu1 %2804 }
 0x382   : > { %12876 = vst [vmem:[#allocation176_spill] sm:$0xff] %v9163_v23  ;;  %v9165_v57 = vpop.permute.xlu0 %2802 }
 0x383   : > { %12877 = vst [vmem:[#allocation177_spill] sm:$0xff] %v9165_v57  ;;  %2984 = vrot.lane.b32.xlu1 %v8592_v19, %s6615_s25 }
 0x384   : > { %2982 = vrot.lane.b32.xlu0 %v8596_v44, %s6615_s25 }
 0x385   : > { %v9171_v50 = vpop.permute.xlu1 %2808 }
 0x386   : > { %12878 = vst [vmem:[#allocation178_spill] sm:$0xff] %v9171_v50  ;;  %v9173_v49 = vpop.permute.xlu0 %2806 }
 0x387   : > { %12879 = vst [vmem:[#allocation179_spill] sm:$0xff] %v9173_v49  ;;  %2988 = vrot.lane.b32.xlu1 %v8602_v10, %s6615_s25 }
 0x388   : > { %2986 = vrot.lane.b32.xlu0 %v8606_v35, %s6615_s25 }
 0x389   : > { %v9179_v24 = vpop.permute.xlu1 %2812 }
 0x38a   : > { %12880 = vst [vmem:[#allocation180_spill] sm:$0xff] %v9179_v24  ;;  %v9181_v23 = vpop.permute.xlu0 %2810 }
 0x38b   : > { %12881 = vst [vmem:[#allocation181_spill] sm:$0xff] %v9181_v23  ;;  %2992 = vrot.lane.b32.xlu1 %v8612_v16, %s6615_s25 }
 0x38c   : > { %2990 = vrot.lane.b32.xlu0 %v8616_v32, %s6615_s25 }
 0x38d   : > { %v9187_v57 = vpop.permute.xlu1 %2816 }
 0x38e   : > { %12882 = vst [vmem:[#allocation182_spill] sm:$0xff] %v9187_v57  ;;  %v9189_v50 = vpop.permute.xlu0 %2814 }
 0x38f   : > { %12883 = vst [vmem:[#allocation183_spill] sm:$0xff] %v9189_v50  ;;  %2996 = vrot.lane.b32.xlu1 %v8626_v30, %s6615_s25 }
 0x390   : > { %2994 = vrot.lane.b32.xlu0 %v8630_v15, %s6615_s25 }
 0x391   : > { %v9195_v49 = vpop.permute.xlu1 %2820 }
 0x392   : > { %12884 = vst [vmem:[#allocation184_spill] sm:$0xff] %v9195_v49  ;;  %v9197_v24 = vpop.permute.xlu0 %2818 }
 0x393   : > { %12885 = vst [vmem:[#allocation185_spill] sm:$0xff] %v9197_v24  ;;  %3000 = vrot.lane.b32.xlu1 %v8636_v12, %s6615_s25 }
 0x394   : > { %2998 = vrot.lane.b32.xlu0 %v8642_v36, %s6615_s25 }
 0x395   : > { %v9203_v23 = vpop.permute.xlu1 %2824 }
 0x396   : > { %12886 = vst [vmem:[#allocation186_spill] sm:$0xff] %v9203_v23  ;;  %v9205_v57 = vpop.permute.xlu0 %2822 }
 0x397   : > { %12887 = vst [vmem:[#allocation187_spill] sm:$0xff] %v9205_v57  ;;  %3004 = vrot.lane.b32.xlu1 %v8650_v13, %s6615_s25 }
 0x398   : > { %3002 = vrot.lane.b32.xlu0 %v8654_v7, %s6615_s25 }
 0x399   : > { %v9211_v50 = vpop.permute.xlu1 %2828 }
 0x39a   : > { %12888 = vst [vmem:[#allocation188_spill] sm:$0xff] %v9211_v50  ;;  %v9213_v49 = vpop.permute.xlu0 %2826 }
 0x39b   : > { %12889 = vst [vmem:[#allocation189_spill] sm:$0xff] %v9213_v49  ;;  %3008 = vrot.lane.b32.xlu1 %v8664_v52, %s6615_s25 }
 0x39c   : > { %3006 = vrot.lane.b32.xlu0 %v8668_v5, %s6615_s25 }
 0x39d   : > { %v9219_v24 = vpop.permute.xlu1 %2832 }
 0x39e   : > { %12890 = vst [vmem:[#allocation190_spill] sm:$0xff] %v9219_v24  ;;  %v9221_v23 = vpop.permute.xlu0 %2830 }
 0x39f   : > { %12891 = vst [vmem:[#allocation191_spill] sm:$0xff] %v9221_v23  ;;  %3012 = vrot.lane.b32.xlu1 %v8674_v51, %s6615_s25 }
 0x3a0   : > { %3010 = vrot.lane.b32.xlu0 %v8680_v21, %s6615_s25 }
 0x3a1   : > { %v9227_v57 = vpop.permute.xlu1 %2836 }
 0x3a2   : > { %12892 = vst [vmem:[#allocation192_spill] sm:$0xff] %v9227_v57  ;;  %v9229_v50 = vpop.permute.xlu0 %2834 }
 0x3a3   : > { %12893 = vst [vmem:[#allocation193_spill] sm:$0xff] %v9229_v50  ;;  %3016 = vrot.lane.b32.xlu1 %v8688_v1, %s6615_s25 }
 0x3a4   : > { %3014 = vrot.lane.b32.xlu0 %v8692_v37, %s6615_s25 }
 0x3a5   : > { %v9235_v49 = vpop.permute.xlu1 %2840 }
 0x3a6   : > { %12894 = vst [vmem:[#allocation194_spill] sm:$0xff] %v9235_v49  ;;  %v9237_v24 = vpop.permute.xlu0 %2838 }
 0x3a7   : > { %12895 = vst [vmem:[#allocation195_spill] sm:$0xff] %v9237_v24  ;;  %3020 = vrot.lane.b32.xlu1 %v8702_v55, %s6615_s25  ;;  %v12900_v24 = vld [vmem:[#allocation37_spill] sm:$0xff] }
 0x3a8   : > { %3018 = vrot.lane.b32.xlu0 %v8706_v18, %s6615_s25 }
 0x3a9   : > { %v9243_v23 = vpop.permute.xlu1 %2844 }
 0x3aa   : > { %12896 = vst [vmem:[#allocation196_spill] sm:$0xff] %v9243_v23  ;;  %v9245_v57 = vpop.permute.xlu0 %2842 }
 0x3ab   : > { %12897 = vst [vmem:[#allocation197_spill] sm:$0xff] %v9245_v57  ;;  %3024 = vrot.lane.b32.xlu1 %v8712_v43, %s6615_s25 }
 0x3ac   : > { %3022 = vrot.lane.b32.xlu0 %v8718_v9, %s6615_s25 }
 0x3ad   : > { %v9251_v50 = vpop.permute.xlu1 %2880 }
 0x3ae   : > { %12898 = vst [vmem:[#allocation198_spill] sm:$0xff] %v9251_v50  ;;  %v9253_v49 = vpop.permute.xlu0 %2878 }
 0x3af   : > { %12899 = vst [vmem:[#allocation199_spill] sm:$0xff] %v9253_v49  ;;  %3028 = vrot.lane.b32.xlu1 %v8726_v4, %s6615_s25 }
 0x3b0   : > { %3026 = vrot.lane.b32.xlu0 %v12900_v24, %s6615_s25 }
 0x3b1   : > { %v9259_v3 = vpop.permute.xlu1 %2884 }
 0x3b2   : > { %12901 = vst [vmem:[#allocation200_spill] sm:$0xff] %v9259_v3  ;;  %v9261_v23 = vpop.permute.xlu0 %2882 }
 0x3b3   : > { %12902 = vst [vmem:[#allocation201_spill] sm:$0xff] %v9261_v23  ;;  %3032 = vrot.lane.b32.xlu1 %v8740_v40, %s6615_s25  ;;  %v12907_v23 = vld [vmem:[#allocation88_spill] sm:$0xff] }
 0x3b4   : > { %3030 = vrot.lane.b32.xlu0 %v8744_v56, %s6615_s25  ;;  %v12915_v56 = vld [vmem:[#allocation96_spill] sm:$0xff] }
 0x3b5   : > { %v9267_v57 = vpop.permute.xlu1 %2888 }
 0x3b6   : > { %12903 = vst [vmem:[#allocation202_spill] sm:$0xff] %v9267_v57  ;;  %v9269_v50 = vpop.permute.xlu0 %2886 }
 0x3b7   : > { %12904 = vst [vmem:[#allocation203_spill] sm:$0xff] %v9269_v50  ;;  %3036 = vrot.lane.b32.xlu1 %v8966_v22, %s6615_s25  ;;  %v12911_v22 = vld [vmem:[#allocation92_spill] sm:$0xff] }
 0x3b8   : > { %3034 = vrot.lane.b32.xlu0 %v8968_v28, %s6615_s25  ;;  %v12912_v28 = vld [vmem:[#allocation93_spill] sm:$0xff] }
 0x3b9   : > { %v9275_v49 = vpop.permute.xlu1 %2892 }
 0x3ba   : > { %12905 = vst [vmem:[#allocation204_spill] sm:$0xff] %v9275_v49  ;;  %v9277_v3 = vpop.permute.xlu0 %2890 }
 0x3bb   : > { %12906 = vst [vmem:[#allocation205_spill] sm:$0xff] %v9277_v3  ;;  %3073 = vrot.lane.b32.xlu1 %v12907_v23, %s6616_s13  ;;  %v12916_v23 = vld [vmem:[#allocation97_spill] sm:$0xff] }
 0x3bc   : > { %3071 = vrot.lane.b32.xlu0 %v12908_v42, %s6616_s13 }
 0x3bd   : > { %v9283_v57 = vpop.permute.xlu1 %2896 }
 0x3be   : > { %12909 = vst [vmem:[#allocation206_spill] sm:$0xff] %v9283_v57  ;;  %v9285_v50 = vpop.permute.xlu0 %2894 }
 0x3bf   : > { %12910 = vst [vmem:[#allocation207_spill] sm:$0xff] %v9285_v50  ;;  %3077 = vrot.lane.b32.xlu1 %v12911_v22, %s6616_s13  ;;  %v12919_v50 = vld [vmem:[#allocation98_spill] sm:$0xff]  ;;  %v12920_v22 = vld [vmem:[#allocation100_spill] sm:$0xff] }
 0x3c0   : > { %3075 = vrot.lane.b32.xlu0 %v12912_v28, %s6616_s13 }
 0x3c1   : > { %v9291_v49 = vpop.permute.xlu1 %2900 }
 0x3c2   : > { %12913 = vst [vmem:[#allocation208_spill] sm:$0xff] %v9291_v49  ;;  %v9293_v3 = vpop.permute.xlu0 %2898 }
 0x3c3   : > { %12914 = vst [vmem:[#allocation209_spill] sm:$0xff] %v9293_v3  ;;  %3081 = vrot.lane.b32.xlu1 %v12915_v56, %s6616_s13  ;;  %v12923_v3 = vld [vmem:[#allocation102_spill] sm:$0xff]  ;;  %v12924_v56 = vld [vmem:[#allocation103_spill] sm:$0xff] }
 0x3c4   : > { %3079 = vrot.lane.b32.xlu0 %v12916_v23, %s6616_s13 }
 0x3c5   : > { %v9299_v42 = vpop.permute.xlu1 %2904 }
 0x3c6   : > { %12917 = vst [vmem:[#allocation210_spill] sm:$0xff] %v9299_v42  ;;  %v9301_v57 = vpop.permute.xlu0 %2902 }
 0x3c7   : > { %12918 = vst [vmem:[#allocation211_spill] sm:$0xff] %v9301_v57  ;;  %3085 = vrot.lane.b32.xlu1 %v12919_v50, %s6616_s13  ;;  %v12927_v57 = vld [vmem:[#allocation106_spill] sm:$0xff]  ;;  %v12928_v50 = vld [vmem:[#allocation107_spill] sm:$0xff] }
 0x3c8   : > { %3083 = vrot.lane.b32.xlu0 %v12920_v22, %s6616_s13 }
 0x3c9   : > { %v9307_v28 = vpop.permute.xlu1 %2908 }
 0x3ca   : > { %12921 = vst [vmem:[#allocation212_spill] sm:$0xff] %v9307_v28  ;;  %v9309_v49 = vpop.permute.xlu0 %2906 }
 0x3cb   : > { %12922 = vst [vmem:[#allocation213_spill] sm:$0xff] %v9309_v49  ;;  %3089 = vrot.lane.b32.xlu1 %v12923_v3, %s6616_s13  ;;  %v12931_v49 = vld [vmem:[#allocation108_spill] sm:$0xff]  ;;  %v12932_v3 = vld [vmem:[#allocation110_spill] sm:$0xff] }
 0x3cc   : > { %3087 = vrot.lane.b32.xlu0 %v12924_v56, %s6616_s13 }
 0x3cd   : > { %v9315_v23 = vpop.permute.xlu1 %2912 }
 0x3ce   : > { %12925 = vst [vmem:[#allocation214_spill] sm:$0xff] %v9315_v23  ;;  %v9317_v42 = vpop.permute.xlu0 %2910 }
 0x3cf   : > { %12926 = vst [vmem:[#allocation215_spill] sm:$0xff] %v9317_v42  ;;  %3093 = vrot.lane.b32.xlu1 %v12927_v57, %s6616_s13  ;;  %v12935_v42 = vld [vmem:[#allocation112_spill] sm:$0xff]  ;;  %v12936_v57 = vld [vmem:[#allocation113_spill] sm:$0xff] }
 0x3d0   : > { %3091 = vrot.lane.b32.xlu0 %v12928_v50, %s6616_s13  ;;  %v12944_v50 = vld [vmem:[#allocation120_spill] sm:$0xff] }
 0x3d1   : > { %v9323_v22 = vpop.permute.xlu1 %2916 }
 0x3d2   : > { %12929 = vst [vmem:[#allocation216_spill] sm:$0xff] %v9323_v22  ;;  %v9325_v28 = vpop.permute.xlu0 %2914 }
 0x3d3   : > { %12930 = vst [vmem:[#allocation217_spill] sm:$0xff] %v9325_v28  ;;  %3097 = vrot.lane.b32.xlu1 %v12931_v49, %s6616_s13  ;;  %v12939_v49 = vld [vmem:[#allocation116_spill] sm:$0xff] }
 0x3d4   : > { %3095 = vrot.lane.b32.xlu0 %v12932_v3, %s6616_s13  ;;  %v12940_v3 = vld [vmem:[#allocation117_spill] sm:$0xff] }
 0x3d5   : > { %v9331_v56 = vpop.permute.xlu1 %2920 }
 0x3d6   : > { %12933 = vst [vmem:[#allocation218_spill] sm:$0xff] %v9331_v56  ;;  %v9333_v23 = vpop.permute.xlu0 %2918 }
 0x3d7   : > { %12934 = vst [vmem:[#allocation219_spill] sm:$0xff] %v9333_v23  ;;  %3101 = vrot.lane.b32.xlu1 %v12935_v42, %s6616_s13  ;;  %v12943_v42 = vld [vmem:[#allocation118_spill] sm:$0xff] }
 0x3d8   : > { %3099 = vrot.lane.b32.xlu0 %v12936_v57, %s6616_s13 }
 0x3d9   : > { %v9339_v22 = vpop.permute.xlu1 %2924 }
 0x3da   : > { %12937 = vst [vmem:[#allocation220_spill] sm:$0xff] %v9339_v22  ;;  %v9341_v28 = vpop.permute.xlu0 %2922 }
 0x3db   : > { %12938 = vst [vmem:[#allocation221_spill] sm:$0xff] %v9341_v28  ;;  %3105 = vrot.lane.b32.xlu1 %v12939_v49, %s6616_s13  ;;  %v12947_v28 = vld [vmem:[#allocation122_spill] sm:$0xff]  ;;  %v12948_v49 = vld [vmem:[#allocation123_spill] sm:$0xff] }
 0x3dc   : > { %3103 = vrot.lane.b32.xlu0 %v12940_v3, %s6616_s13 }
 0x3dd   : > { %v9347_v56 = vpop.permute.xlu1 %2928 }
 0x3de   : > { %12941 = vst [vmem:[#allocation222_spill] sm:$0xff] %v9347_v56  ;;  %v9349_v23 = vpop.permute.xlu0 %2926 }
 0x3df   : > { %12942 = vst [vmem:[#allocation223_spill] sm:$0xff] %v9349_v23  ;;  %3109 = vrot.lane.b32.xlu1 %v12943_v42, %s6616_s13  ;;  %v12951_v23 = vld [vmem:[#allocation83_spill] sm:$0xff] }
 0x3e0   : > { %3107 = vrot.lane.b32.xlu0 %v12944_v50, %s6616_s13  ;;  %v2189_v42 = vadd.f32 %v8947_v62, %v12951_v23  ;;  %v12952_v50 = vld [vmem:[#allocation85_spill] sm:$0xff] }
 0x3e1   : > { %v9355_v57 = vpop.permute.xlu1 %2932  ;;  %v12956_v23 = vld [vmem:[#allocation133_spill] sm:$0xff] }
 0x3e2   : > { %12945 = vst [vmem:[#allocation224_spill] sm:$0xff] %v9355_v57  ;;  %v9357_v22 = vpop.permute.xlu0 %2930  ;;  %v2184_v57 = vadd.f32 %v8947_v62, %v12952_v50 }
 0x3e3   : > { %12946 = vst [vmem:[#allocation225_spill] sm:$0xff] %v9357_v22  ;;  %3113 = vrot.lane.b32.xlu1 %v12947_v28, %s6616_s13  ;;  %v12953_v22 = vld [vmem:[#allocation126_spill] sm:$0xff] }
 0x3e4   : > { %3111 = vrot.lane.b32.xlu0 %v12948_v49, %s6616_s13  ;;  %v2226_v40 = vmax.f32 %v2184_v57, 0.0  ;;  %v12963_v57 = vld [vmem:[#allocation136_spill] sm:$0xff] }
 0x3e5   : > { %v9363_v3 = vpop.permute.xlu1 %2936 }
 0x3e6   : > { %12949 = vst [vmem:[#allocation226_spill] sm:$0xff] %v9363_v3  ;;  %v9365_v56 = vpop.permute.xlu0 %2934  ;;  %v2232_v3 = vstv %s2231_s16 }
 0x3e7   : > { %12950 = vst [vmem:[#allocation227_spill] sm:$0xff] %v9365_v56  ;;  %3117 = vrot.lane.b32.xlu1 %v12953_v22, %s6616_s13  ;;  %v2227_v56 = vmax.f32 %v2189_v42, 0.0  ;;  %vm9387_vm9 = vcmp.eq.s32.totalorder %v2232_v3, 1 }
 0x3e8   : > { %3115 = vrot.lane.b32.xlu0 %v8957_v48, %s6616_s13  ;;  %v9399_v42 = vsel %vm9387_vm9, 0.0, %v2226_v40 }
 0x3e9   : > { %v9377_v28 = vpop.permute.xlu1 %2940  ;;  %12962 = vst [vmem:[#allocation231_spill] sm:$0xff] %v9399_v42 }
 0x3ea   : > { %12954 = vst [vmem:[#allocation83_spill] sm:$0xff] %v9377_v28  ;;  %v9379_v49 = vpop.permute.xlu0 %2938  ;;  %v9395_v28 = vsel %vm9387_vm9, 0.0, %v2227_v56 }
 0x3eb   : > { %12955 = vst [vmem:[#allocation85_spill] sm:$0xff] %v9379_v49  ;;  %3121 = vrot.lane.b32.xlu1 %v8964_v8, %s6616_s13  ;;  %12961 = vst [vmem:[#allocation230_spill] sm:$0xff] %v9395_v28  ;;  %v2394_v49 = vrot.slane %v9395_v28, 7 }
 0x3ec   : > { %3119 = vrot.lane.b32.xlu0 %v12956_v23, %s6616_s13  ;;  %v2393_v23 = vrot.slane %v9399_v42, 7 }
 0x3ed   : > { %v9385_v50 = vpop.permute.xlu1 %2976 }
 0x3ee   : > { %12957 = vst [vmem:[#allocation228_spill] sm:$0xff] %v9385_v50  ;;  %v9391_v48 = vpop.permute.xlu0 %2974  ;;  %v4662_v50 = vld [vmem:[%s12131_s4 + $0x18] sm:$0xff] }
 0x3ef   : > { %12960 = vst [vmem:[#allocation229_spill] sm:$0xff] %v9391_v48  ;;  %3125 = vrot.lane.b32.xlu1 %v12963_v57, %s6616_s13  ;;  %v2395_v57 = vsel %vm412_vm0, %v2393_v23, %v2394_v49 }
 0x3f0   : > { %3123 = vrot.lane.b32.xlu0 %v8993_v39, %s6616_s13  ;;  %v2447_v39 = vsel %vm412_vm0, 0.0, %v2393_v23 }
 0x3f1   : > { %v9405_v3 = vpop.permute.xlu1 %2980 }
 0x3f2   : > { %12964 = vst [vmem:[#allocation232_spill] sm:$0xff] %v9405_v3  ;;  %v9409_v8 = vpop.permute.xlu0 %2978 }
 0x3f3   : > { %12965 = vst [vmem:[#allocation233_spill] sm:$0xff] %v9409_v8  ;;  %3129 = vrot.lane.b32.xlu1 %v9002_v11, %s6616_s13 }
 0x3f4   : > { %3127 = vrot.lane.b32.xlu0 %v9007_v0, %s6616_s13 }
 0x3f5   : > { %v9415_v40 = vpop.permute.xlu1 %2984 }
 0x3f6   : > { %12966 = vst [vmem:[#allocation234_spill] sm:$0xff] %v9415_v40  ;;  %v9417_v56 = vpop.permute.xlu0 %2982 }
 0x3f7   : > { %12967 = vst [vmem:[#allocation235_spill] sm:$0xff] %v9417_v56  ;;  %3133 = vrot.lane.b32.xlu1 %v2395_v57, %s6616_s13 }
 0x3f8   : > { %3131 = vrot.lane.b32.xlu0 %v2447_v39, %s6616_s13 }
 0x3f9   : > { %v9423_v3 = vpop.permute.xlu1 %2988 }
 0x3fa   : > { %12968 = vst [vmem:[#allocation236_spill] sm:$0xff] %v9423_v3  ;;  %v9425_v8 = vpop.permute.xlu0 %2986 }
 0x3fb   : > { %12969 = vst [vmem:[#allocation237_spill] sm:$0xff] %v9425_v8  ;;  %3169 = vrot.lane.b32.xlu1 %v8251_v25, %s6617_s18  ;;  %v12993_v8 = vld [vmem:[#allocation9_spill] sm:$0xff] }
 0x3fc   : > { %3167 = vrot.lane.b32.xlu0 %v8260_v34, %s6617_s18 }
 0x3fd   : > { %v9431_v0 = vpop.permute.xlu1 %2992 }
 0x3fe   : > { %12970 = vst [vmem:[#allocation238_spill] sm:$0xff] %v9431_v0  ;;  %v9433_v11 = vpop.permute.xlu0 %2990 }
 0x3ff   : > { %12971 = vst [vmem:[#allocation239_spill] sm:$0xff] %v9433_v11  ;;  %3173 = vrot.lane.b32.xlu1 %v8280_v46, %s6617_s18  ;;  %v12989_v11 = vld [vmem:[#allocation4_spill] sm:$0xff] }
 0x400   : > { %3171 = vrot.lane.b32.xlu0 %v8286_v20, %s6617_s18 }
 0x401   : > { %v9439_v39 = vpop.permute.xlu1 %2996 }
 0x402   : > { %12972 = vst [vmem:[#allocation240_spill] sm:$0xff] %v9439_v39  ;;  %v9441_v49 = vpop.permute.xlu0 %2994 }
 0x403   : > { %12973 = vst [vmem:[#allocation241_spill] sm:$0xff] %v9441_v49  ;;  %3177 = vrot.lane.b32.xlu1 %v8309_v45, %s6617_s18 }
 0x404   : > { %3175 = vrot.lane.b32.xlu0 %v8318_v60, %s6617_s18 }
 0x405   : > { %v9447_v23 = vpop.permute.xlu1 %3000 }
 0x406   : > { %12974 = vst [vmem:[#allocation242_spill] sm:$0xff] %v9447_v23  ;;  %v9449_v57 = vpop.permute.xlu0 %2998 }
 0x407   : > { %12975 = vst [vmem:[#allocation243_spill] sm:$0xff] %v9449_v57  ;;  %3181 = vrot.lane.b32.xlu1 %v8338_v6, %s6617_s18 }
 0x408   : > { %3179 = vrot.lane.b32.xlu0 %v8344_v2, %s6617_s18 }
 0x409   : > { %v9455_v0 = vpop.permute.xlu1 %3004 }
 0x40a   : > { %12976 = vst [vmem:[#allocation244_spill] sm:$0xff] %v9455_v0  ;;  %v9457_v39 = vpop.permute.xlu0 %3002 }
 0x40b   : > { %12977 = vst [vmem:[#allocation245_spill] sm:$0xff] %v9457_v39  ;;  %3185 = vrot.lane.b32.xlu1 %v8367_v33, %s6617_s18 }
 0x40c   : > { %3183 = vrot.lane.b32.xlu0 %v8376_v27, %s6617_s18 }
 0x40d   : > { %v9463_v49 = vpop.permute.xlu1 %3008 }
 0x40e   : > { %12978 = vst [vmem:[#allocation246_spill] sm:$0xff] %v9463_v49  ;;  %v9465_v23 = vpop.permute.xlu0 %3006 }
 0x40f   : > { %12979 = vst [vmem:[#allocation247_spill] sm:$0xff] %v9465_v23  ;;  %3189 = vrot.lane.b32.xlu1 %v8400_v54, %s6617_s18 }
 0x410   : > { %3187 = vrot.lane.b32.xlu0 %v8406_v26, %s6617_s18 }
 0x411   : > { %v9471_v57 = vpop.permute.xlu1 %3012 }
 0x412   : > { %12980 = vst [vmem:[#allocation248_spill] sm:$0xff] %v9471_v57  ;;  %v9473_v0 = vpop.permute.xlu0 %3010 }
 0x413   : > { %12981 = vst [vmem:[#allocation249_spill] sm:$0xff] %v9473_v0  ;;  %3193 = vrot.lane.b32.xlu1 %v8433_v59, %s6617_s18 }
 0x414   : > { %3191 = vrot.lane.b32.xlu0 %v8442_v31, %s6617_s18 }
 0x415   : > { %v9479_v39 = vpop.permute.xlu1 %3016 }
 0x416   : > { %12982 = vst [vmem:[#allocation250_spill] sm:$0xff] %v9479_v39  ;;  %v9481_v49 = vpop.permute.xlu0 %3014 }
 0x417   : > { %12983 = vst [vmem:[#allocation251_spill] sm:$0xff] %v9481_v49  ;;  %3197 = vrot.lane.b32.xlu1 %v8466_v38, %s6617_s18  ;;  %v12988_v49 = vld [vmem:[#allocation78_spill] sm:$0xff] }
 0x418   : > { %3195 = vrot.lane.b32.xlu0 %v8472_v47, %s6617_s18 }
 0x419   : > { %v9487_v23 = vpop.permute.xlu1 %3020 }
 0x41a   : > { %12984 = vst [vmem:[#allocation252_spill] sm:$0xff] %v9487_v23  ;;  %v9489_v57 = vpop.permute.xlu0 %3018 }
 0x41b   : > { %12985 = vst [vmem:[#allocation253_spill] sm:$0xff] %v9489_v57  ;;  %3201 = vrot.lane.b32.xlu1 %v8492_v58, %s6617_s18  ;;  %v12992_v57 = vld [vmem:[#allocation77_spill] sm:$0xff] }
 0x41c   : > { %3199 = vrot.lane.b32.xlu0 %v8496_v14, %s6617_s18 }
 0x41d   : > { %v9495_v0 = vpop.permute.xlu1 %3024 }
 0x41e   : > { %12986 = vst [vmem:[#allocation254_spill] sm:$0xff] %v9495_v0  ;;  %v9497_v39 = vpop.permute.xlu0 %3022  ;;  %v4659_v0 = vld [vmem:[%s12131_s4] sm:$0xff] }
 0x41f   : > { %12987 = vst [vmem:[#allocation255_spill] sm:$0xff] %v9497_v39  ;;  %3205 = vrot.lane.b32.xlu1 %v12988_v49, %s6617_s18  ;;  %v4660_v39 = vld [vmem:[%s12131_s4 + $0x8] sm:$0xff] }
 0x420   : > { %3203 = vrot.lane.b32.xlu0 %v12989_v11, %s6617_s18 }
 0x421   : > { %v9503_v3 = vpop.permute.xlu1 %3028 }
 0x422   : > { %12990 = vst [vmem:[#allocation256_spill] sm:$0xff] %v9503_v3  ;;  %v9505_v23 = vpop.permute.xlu0 %3026  ;;  %v6485_v3 = vpack.c.bf16 %v4660_v39, %v4659_v0 }
 0x423   : > { %12991 = vst [vmem:[#allocation257_spill] sm:$0xff] %v9505_v23  ;;  %3209 = vrot.lane.b32.xlu1 %v12992_v57, %s6617_s18  ;;  %v12996_v23 = vld [vmem:[#allocation10_spill] sm:$0xff]  ;;  %v12997_v57 = vld [vmem:[#allocation12_spill] sm:$0xff] }
 0x424   : > { %3207 = vrot.lane.b32.xlu0 %v12993_v8, %s6617_s18  ;;  %6486 = vmatprep.subr.bf16.mxu0 %v6485_v3 }
 0x425   : > { %v9511_v40 = vpop.permute.xlu1 %3032  ;;  %6488 = vmatpush3.bf16.msra.mxu0 %v6485_v3  ;;  %6494 = vmatprep.subr.bf16.mxu1 %v6485_v3 }
 0x426   : > { %12994 = vst [vmem:[#allocation258_spill] sm:$0xff] %v9511_v40  ;;  %v9519_v56 = vpop.permute.xlu0 %3030  ;;  %v4661_v40 = vld [vmem:[%s12131_s4 + $0x10] sm:$0xff]  ;;  %6496 = vmatpush3.bf16.msra.mxu1 %v6485_v3  ;;  %v4663_v3 = vld [vmem:[%s12131_s4 + $0x20] sm:$0xf] }
 0x427   : > { %12995 = vst [vmem:[#allocation259_spill] sm:$0xff] %v9519_v56  ;;  %3213 = vrot.lane.b32.xlu1 %v12996_v23, %s6617_s18  ;;  %v6489_v39 = vpack.c.bf16 %v4662_v50, %v4661_v40  ;;  %v13000_v23 = vld [vmem:[#allocation61_spill] sm:$0xff]  ;;  %v13002_v56 = vld [vmem:[#allocation70_spill] sm:$0xff] }
 0x428   : > { %3211 = vrot.lane.b32.xlu0 %v12997_v57, %s6617_s18  ;;  %v13001_v57 = vld [vmem:[#allocation63_spill] sm:$0xff]  ;;  %v1797_v48 = vadd.f32 %v8947_v62, %v13002_v56 }
 0x429   : > { %v9525_v8 = vpop.permute.xlu1 %3036  ;;  %6490 = vmatprep.subr.bf16.mxu0 %v6489_v39  ;;  %6498 = vmatprep.subr.bf16.mxu1 %v6489_v39 }
 0x42a   : > { %12998 = vst [vmem:[#allocation260_spill] sm:$0xff] %v9525_v8  ;;  %v9533_v0 = vpop.permute.xlu0 %3034  ;;  %6492 = vmatpush3.bf16.msra.mxu0 %v6489_v39  ;;  %6500 = vmatpush3.bf16.msra.mxu1 %v6489_v39 }
 0x42b   : > { %12999 = vst [vmem:[#allocation261_spill] sm:$0xff] %v9533_v0  ;;  %3217 = vrot.lane.b32.xlu1 %v13000_v23, %s6617_s18  ;;  %v13003_v0 = vld [vmem:[#allocation6_spill] sm:$0xff]  ;;  %6343 = vmatprep.subr.msk.mxu0 %vm4768_vm10, %v4663_v3 }
 0x42c   : > { %3215 = vrot.lane.b32.xlu0 %v13001_v57, %s6617_s18  ;;  %v1792_v50 = vadd.f32 %v8947_v62, %v13003_v0  ;;  %6401 = vmatprep.subr.msk.mxu1 %vm4768_vm10, %v4663_v3  ;;  %v1835_v62 = vmax.f32 %v1797_v48, 0.0 }
 0x42d   : > { %v9539_v8 = vpop.permute.xlu1 %3073 }
 0x42e   : > { %v9543_v11 = vpop.permute.xlu0 %3071  ;;  %6344 = vmatpush3.msk.msra.mxu0 %vm4768_vm10, %v4663_v3  ;;  %6402 = vmatpush3.msk.msra.mxu1 %vm4768_vm10, %v4663_v3  ;;  %v1834_v0 = vmax.f32 %v1792_v50, 0.0 }
 0x42f   : > { %3221 = vrot.lane.b32.xlu1 %v12864_v29, %s6617_s18 }
 0x430   : > { %3219 = vrot.lane.b32.xlu0 %v12865_v63, %s6617_s18  ;;  %v9570_v63 = vsel %vm9387_vm9, 0.0, %v1835_v62  ;;  %v9576_v48 = vsel %vm9387_vm9, 0.0, %v1834_v0 }
 0x431   : > { %v9555_v40 = vpop.permute.xlu1 %3077  ;;  %13005 = vst [vmem:[#allocation6_spill] sm:$0xff] %v9570_v63  ;;  %13006 = vst [vmem:[#allocation262_spill] sm:$0xff] %v9576_v48 }
 0x432   : > { %v9559_v56 = vpop.permute.xlu0 %3075 }
 0x433   : > { %3225 = vrot.lane.b32.xlu1 %v9135_v41, %s6617_s18 }
 0x434   : > { %3223 = vrot.lane.b32.xlu0 %v9139_v53, %s6617_s18 }
 0x435   : > { %v9566_v39 = vpop.permute.xlu1 %3081 }
 0x436   : > { %13004 = vst [vmem:[#allocation70_spill] sm:$0xff] %v9566_v39  ;;  %v9572_v29 = vpop.permute.xlu0 %3079  ;;  %v13041_v39 = vld [vmem:[#allocation69_spill] sm:$0xff] }
 0x437   : > { %3229 = vrot.lane.b32.xlu1 %v9570_v63, %s6617_s18 }
 0x438   : > { %3227 = vrot.lane.b32.xlu0 %v9576_v48, %s6617_s18 }
 0x439   : > { %v9582_v50 = vpop.permute.xlu1 %3085 }
 0x43a   : > { %13007 = vst [vmem:[#allocation263_spill] sm:$0xff] %v9582_v50  ;;  %v9584_v3 = vpop.permute.xlu0 %3083 }
 0x43b   : > { %13008 = vst [vmem:[#allocation264_spill] sm:$0xff] %v9584_v3  ;;  %3265 = vrot.lane.b32.xlu1 %v8582_v61, %s6618_s23 }
 0x43c   : > { %3263 = vrot.lane.b32.xlu0 %v8586_v17, %s6618_s23 }
 0x43d   : > { %v9590_v22 = vpop.permute.xlu1 %3089 }
 0x43e   : > { %13009 = vst [vmem:[#allocation265_spill] sm:$0xff] %v9590_v22  ;;  %v9592_v62 = vpop.permute.xlu0 %3087  ;;  %v13035_v22 = vld [vmem:[#allocation130_spill] sm:$0xff] }
 0x43f   : > { %13010 = vst [vmem:[#allocation266_spill] sm:$0xff] %v9592_v62  ;;  %3269 = vrot.lane.b32.xlu1 %v8592_v19, %s6618_s23  ;;  %v13036_v62 = vld [vmem:[#allocation131_spill] sm:$0xff] }
 0x440   : > { %3267 = vrot.lane.b32.xlu0 %v8596_v44, %s6618_s23 }
 0x441   : > { %v9598_v0 = vpop.permute.xlu1 %3093 }
 0x442   : > { %13011 = vst [vmem:[#allocation267_spill] sm:$0xff] %v9598_v0  ;;  %v9600_v48 = vpop.permute.xlu0 %3091  ;;  %v9695_v0 = vld [vmem:[%s12133_s6] sm:$0xf] }
 0x443   : > { %13012 = vst [vmem:[#allocation268_spill] sm:$0xff] %v9600_v48  ;;  %3273 = vrot.lane.b32.xlu1 %v8602_v10, %s6618_s23  ;;  %6451 = vmatprep.subr.msk.mxu0 %vm4768_vm10, %v9695_v0 }
 0x444   : > { %3271 = vrot.lane.b32.xlu0 %v8606_v35, %s6618_s23 }
 0x445   : > { %v9606_v63 = vpop.permute.xlu1 %3097 }
 0x446   : > { %13013 = vst [vmem:[#allocation269_spill] sm:$0xff] %v9606_v63  ;;  %v9608_v41 = vpop.permute.xlu0 %3095 }
 0x447   : > { %13014 = vst [vmem:[#allocation270_spill] sm:$0xff] %v9608_v41  ;;  %3277 = vrot.lane.b32.xlu1 %v8612_v16, %s6618_s23 }
 0x448   : > { %3275 = vrot.lane.b32.xlu0 %v8616_v32, %s6618_s23 }
 0x449   : > { %v9614_v53 = vpop.permute.xlu1 %3101 }
 0x44a   : > { %13015 = vst [vmem:[#allocation271_spill] sm:$0xff] %v9614_v53  ;;  %v9616_v57 = vpop.permute.xlu0 %3099 }
 0x44b   : > { %13016 = vst [vmem:[#allocation272_spill] sm:$0xff] %v9616_v57  ;;  %3281 = vrot.lane.b32.xlu1 %v8626_v30, %s6618_s23 }
 0x44c   : > { %3279 = vrot.lane.b32.xlu0 %v8630_v15, %s6618_s23 }
 0x44d   : > { %v9622_v23 = vpop.permute.xlu1 %3105 }
 0x44e   : > { %13017 = vst [vmem:[#allocation273_spill] sm:$0xff] %v9622_v23  ;;  %v9624_v63 = vpop.permute.xlu0 %3103 }
 0x44f   : > { %13018 = vst [vmem:[#allocation274_spill] sm:$0xff] %v9624_v63  ;;  %3285 = vrot.lane.b32.xlu1 %v8636_v12, %s6618_s23 }
 0x450   : > { %3283 = vrot.lane.b32.xlu0 %v8642_v36, %s6618_s23 }
 0x451   : > { %v9630_v41 = vpop.permute.xlu1 %3109 }
 0x452   : > { %13019 = vst [vmem:[#allocation275_spill] sm:$0xff] %v9630_v41  ;;  %v9632_v53 = vpop.permute.xlu0 %3107 }
 0x453   : > { %13020 = vst [vmem:[#allocation276_spill] sm:$0xff] %v9632_v53  ;;  %3289 = vrot.lane.b32.xlu1 %v8650_v13, %s6618_s23 }
 0x454   : > { %3287 = vrot.lane.b32.xlu0 %v8654_v7, %s6618_s23 }
 0x455   : > { %v9638_v57 = vpop.permute.xlu1 %3113 }
 0x456   : > { %13021 = vst [vmem:[#allocation277_spill] sm:$0xff] %v9638_v57  ;;  %v9640_v23 = vpop.permute.xlu0 %3111 }
 0x457   : > { %13022 = vst [vmem:[#allocation278_spill] sm:$0xff] %v9640_v23  ;;  %3293 = vrot.lane.b32.xlu1 %v8664_v52, %s6618_s23 }
 0x458   : > { %3291 = vrot.lane.b32.xlu0 %v8668_v5, %s6618_s23 }
 0x459   : > { %v9646_v63 = vpop.permute.xlu1 %3117 }
 0x45a   : > { %13023 = vst [vmem:[#allocation279_spill] sm:$0xff] %v9646_v63  ;;  %v9648_v41 = vpop.permute.xlu0 %3115 }
 0x45b   : > { %13024 = vst [vmem:[#allocation280_spill] sm:$0xff] %v9648_v41  ;;  %3297 = vrot.lane.b32.xlu1 %v8674_v51, %s6618_s23 }
 0x45c   : > { %3295 = vrot.lane.b32.xlu0 %v8680_v21, %s6618_s23 }
 0x45d   : > { %v9654_v53 = vpop.permute.xlu1 %3121 }
 0x45e   : > { %13025 = vst [vmem:[#allocation281_spill] sm:$0xff] %v9654_v53  ;;  %v9656_v57 = vpop.permute.xlu0 %3119 }
 0x45f   : > { %13026 = vst [vmem:[#allocation282_spill] sm:$0xff] %v9656_v57  ;;  %3301 = vrot.lane.b32.xlu1 %v8688_v1, %s6618_s23 }
 0x460   : > { %3299 = vrot.lane.b32.xlu0 %v8692_v37, %s6618_s23 }
 0x461   : > { %v9662_v23 = vpop.permute.xlu1 %3125 }
 0x462   : > { %13027 = vst [vmem:[#allocation283_spill] sm:$0xff] %v9662_v23  ;;  %v9664_v63 = vpop.permute.xlu0 %3123 }
 0x463   : > { %13028 = vst [vmem:[#allocation284_spill] sm:$0xff] %v9664_v63  ;;  %3305 = vrot.lane.b32.xlu1 %v8702_v55, %s6618_s23 }
 0x464   : > { %3303 = vrot.lane.b32.xlu0 %v8706_v18, %s6618_s23 }
 0x465   : > { %v9670_v41 = vpop.permute.xlu1 %3129 }
 0x466   : > { %13029 = vst [vmem:[#allocation285_spill] sm:$0xff] %v9670_v41  ;;  %v9672_v53 = vpop.permute.xlu0 %3127 }
 0x467   : > { %13030 = vst [vmem:[#allocation286_spill] sm:$0xff] %v9672_v53  ;;  %3309 = vrot.lane.b32.xlu1 %v8712_v43, %s6618_s23  ;;  %v13033_v53 = vld [vmem:[#allocation80_spill] sm:$0xff] }
 0x468   : > { %3307 = vrot.lane.b32.xlu0 %v8718_v9, %s6618_s23 }
 0x469   : > { %v9678_v57 = vpop.permute.xlu1 %3133 }
 0x46a   : > { %13031 = vst [vmem:[#allocation287_spill] sm:$0xff] %v9678_v57  ;;  %v9680_v23 = vpop.permute.xlu0 %3131  ;;  %v13034_v57 = vld [vmem:[#allocation81_spill] sm:$0xff] }
 0x46b   : > { %13032 = vst [vmem:[#allocation288_spill] sm:$0xff] %v9680_v23  ;;  %3313 = vrot.lane.b32.xlu1 %v8726_v4, %s6618_s23 }
 0x46c   : > { %3311 = vrot.lane.b32.xlu0 %v12900_v24, %s6618_s23 }
 0x46d   : > { %v9686_v63 = vpop.permute.xlu1 %3169 }
 0x46e   : > { %v9688_v41 = vpop.permute.xlu0 %3167 }
 0x46f   : > { %3317 = vrot.lane.b32.xlu1 %v13033_v53, %s6618_s23 }
 0x470   : > { %3315 = vrot.lane.b32.xlu0 %v13034_v57, %s6618_s23 }
 0x471   : > { %v9701_v23 = vpop.permute.xlu1 %3173 }
 0x472   : > { %v9703_v48 = vpop.permute.xlu0 %3171 }
 0x473   : > { %3321 = vrot.lane.b32.xlu1 %v13035_v22, %s6618_s23  ;;  %v13042_v22 = vld [vmem:[#allocation71_spill] sm:$0xff] }
 0x474   : > { %3319 = vrot.lane.b32.xlu0 %v13036_v62, %s6618_s23 }
 0x475   : > { %v9709_v50 = vpop.permute.xlu1 %3177 }
 0x476   : > { %13037 = vst [vmem:[#allocation289_spill] sm:$0xff] %v9709_v50  ;;  %v9711_v3 = vpop.permute.xlu0 %3175 }
 0x477   : > { %13038 = vst [vmem:[#allocation290_spill] sm:$0xff] %v9711_v3  ;;  %3325 = vrot.lane.b32.xlu1 %v9395_v28, %s6618_s23  ;;  %v13044_v3 = vld [vmem:[#allocation8_spill] sm:$0xff]  ;;  %v13045_v28 = vld [vmem:[#allocation7_spill] sm:$0xff] }
 0x478   : > { %3323 = vrot.lane.b32.xlu0 %v9399_v42, %s6618_s23 }
 0x479   : > { %v9717_v57 = vpop.permute.xlu1 %3181 }
 0x47a   : > { %13039 = vst [vmem:[#allocation291_spill] sm:$0xff] %v9717_v57  ;;  %v9719_v53 = vpop.permute.xlu0 %3179 }
 0x47b   : > { %13040 = vst [vmem:[#allocation292_spill] sm:$0xff] %v9719_v53  ;;  %3619 = vrot.lane.b32.xlu1 %v13041_v39, %s6611_s20 }
 0x47c   : > { %3617 = vrot.lane.b32.xlu0 %v13042_v22, %s6611_s20 }
 0x47d   : > { %v9725_v62 = vpop.permute.xlu1 %3185 }
 0x47e   : > { %13043 = vst [vmem:[#allocation69_spill] sm:$0xff] %v9725_v62  ;;  %v9727_v50 = vpop.permute.xlu0 %3183 }
 0x47f   : > { %3623 = vrot.lane.b32.xlu1 %v13044_v3, %s6611_s20 }
 0x480   : > { %3621 = vrot.lane.b32.xlu0 %v13045_v28, %s6611_s20 }
 0x481   : > { %v9733_v42 = vpop.permute.xlu1 %3189 }
 0x482   : > { %v9735_v57 = vpop.permute.xlu0 %3187 }
 0x483   : > { %3627 = vrot.lane.b32.xlu1 %v8582_v61, %s6611_s20 }
 0x484   : > { %3625 = vrot.lane.b32.xlu0 %v8586_v17, %s6611_s20 }
 0x485   : > { %v9741_v53 = vpop.permute.xlu1 %3193 }
 0x486   : > { %v9743_v62 = vpop.permute.xlu0 %3191 }
 0x487   : > { %3631 = vrot.lane.b32.xlu1 %v8592_v19, %s6611_s20 }
 0x488   : > { %3629 = vrot.lane.b32.xlu0 %v8596_v44, %s6611_s20 }
 0x489   : > { %v9749_v28 = vpop.permute.xlu1 %3197 }
 0x48a   : > { %v9751_v3 = vpop.permute.xlu0 %3195 }
 0x48b   : > { %3635 = vrot.lane.b32.xlu1 %v8602_v10, %s6611_s20 }
 0x48c   : > { %3633 = vrot.lane.b32.xlu0 %v8606_v35, %s6611_s20 }
 0x48d   : > { %v9757_v61 = vpop.permute.xlu1 %3201 }
 0x48e   : > { %13046 = vst [vmem:[#allocation71_spill] sm:$0xff] %v9757_v61  ;;  %v9759_v17 = vpop.permute.xlu0 %3199 }
 0x48f   : > { %13047 = vst [vmem:[#allocation293_spill] sm:$0xff] %v9759_v17  ;;  %3639 = vrot.lane.b32.xlu1 %v8612_v16, %s6611_s20 }
 0x490   : > { %3637 = vrot.lane.b32.xlu0 %v8616_v32, %s6611_s20 }
 0x491   : > { %v9765_v19 = vpop.permute.xlu1 %3205 }
 0x492   : > { %13048 = vst [vmem:[#allocation294_spill] sm:$0xff] %v9765_v19  ;;  %v9767_v44 = vpop.permute.xlu0 %3203 }
 0x493   : > { %13049 = vst [vmem:[#allocation295_spill] sm:$0xff] %v9767_v44  ;;  %3643 = vrot.lane.b32.xlu1 %v8626_v30, %s6611_s20  ;;  %v13054_v30 = vld [vmem:[#allocation53_spill] sm:$0xff] }
 0x494   : > { %3641 = vrot.lane.b32.xlu0 %v8630_v15, %s6611_s20  ;;  %v13055_v15 = vld [vmem:[#allocation73_spill] sm:$0xff] }
 0x495   : > { %v9773_v10 = vpop.permute.xlu1 %3209  ;;  %v2484_v44 = vrot.slane %v13055_v15, 1  ;;  %v13062_v15 = vrot.slane %v13054_v30, 1 }
 0x496   : > { %13050 = vst [vmem:[#allocation296_spill] sm:$0xff] %v9773_v10  ;;  %v9775_v35 = vpop.permute.xlu0 %3207  ;;  %v13056_v10 = vld [vmem:[#allocation55_spill] sm:$0xff] }
 0x497   : > { %13051 = vst [vmem:[#allocation297_spill] sm:$0xff] %v9775_v35  ;;  %3647 = vrot.lane.b32.xlu1 %v8636_v12, %s6611_s20  ;;  %v13057_v12 = vld [vmem:[#allocation62_spill] sm:$0xff]  ;;  %v2505_v35 = vrot.slane %v8406_v26, 1 }
 0x498   : > { %3645 = vrot.lane.b32.xlu0 %v8642_v36, %s6611_s20  ;;  %v2487_v61 = vrot.slane %v13057_v12, 1  ;;  %v2499_v12 = vrot.slane %v8344_v2, 1  ;;  %v2342_v36 = vrot.slane %v13042_v22, 7 }
 0x499   : > { %v9781_v16 = vpop.permute.xlu1 %3213 }
 0x49a   : > { %13052 = vst [vmem:[#allocation298_spill] sm:$0xff] %v9781_v16  ;;  %v9783_v32 = vpop.permute.xlu0 %3211  ;;  %v2490_v16 = vrot.slane %v8260_v34, 1  ;;  %v2430_v22 = vsel %vm412_vm0, 0.0, %v2342_v36 }
 0x49b   : > { %13053 = vst [vmem:[#allocation299_spill] sm:$0xff] %v9783_v32  ;;  %3651 = vrot.lane.b32.xlu1 %v8650_v13, %s6611_s20  ;;  %v2493_v13 = vrot.slane %v8286_v20, 1  ;;  %v2502_v20 = vrot.slane %v8376_v27, 1  ;;  %v2514_v27 = vrot.slane %v8496_v14, 1  ;;  %v13064_v32 = vrot.slane %v13056_v10, 1 }
 0x49c   : > { %3649 = vrot.lane.b32.xlu0 %v8654_v7, %s6611_s20  ;;  %v2496_v7 = vrot.slane %v8318_v60, 1 }
 0x49d   : > { %v9793_v17 = vpop.permute.xlu1 %3217  ;;  %v9839_v14 = vsel %vm472_vm1, %v2487_v61, %v13064_v32  ;;  %v13068_v61 = vrot.slane %v8338_v6, 1 }
 0x49e   : > { %13058 = vst [vmem:[#allocation53_spill] sm:$0xff] %v9793_v17  ;;  %v9799_v19 = vpop.permute.xlu0 %3215  ;;  %v2343_v17 = vrot.slane %v13041_v39, 7  ;;  %v2508_v39 = vrot.slane %v8442_v31, 1  ;;  %v13063_v31 = vld [vmem:[#allocation4_spill] sm:$0xff] }
 0x49f   : > { %13059 = vst [vmem:[#allocation55_spill] sm:$0xff] %v9799_v19  ;;  %3655 = vrot.lane.b32.xlu1 %v8664_v52, %s6611_s20  ;;  %v2511_v52 = vrot.slane %v8472_v47, 1  ;;  %v2517_v26 = vrot.slane %v13063_v31, 1  ;;  %v13065_v47 = vrot.slane %v8251_v25, 1  ;;  %v9861_v32 = vsel %vm472_vm1, %v2499_v12, %v13068_v61 }
 0x4a0   : > { %3653 = vrot.lane.b32.xlu0 %v8668_v5, %s6611_s20  ;;  %v9828_v5 = vsel %vm472_vm1, %v2484_v44, %v13062_v15  ;;  %13069 = vst [vmem:[#allocation302_spill] sm:$0xff] %v9861_v32  ;;  %v13077_v12 = vrot.slane %v8466_v38, 1  ;;  %v13114_v38 = vld [vmem:[#allocation106_spill] sm:$0xff] }
 0x4a1   : > { %v9817_v60 = vpop.permute.xlu1 %3221  ;;  %v9844_v44 = vsel %vm472_vm1, %v2490_v16, %v13065_v47  ;;  %v13070_v47 = vrot.slane %v8367_v33, 1 }
 0x4a2   : > { %13060 = vst [vmem:[#allocation300_spill] sm:$0xff] %v9817_v60  ;;  %v9823_v34 = vpop.permute.xlu0 %3219  ;;  %v2344_v60 = vsel %vm412_vm0, %v2342_v36, %v2343_v17  ;;  %v13066_v17 = vrot.slane %v8280_v46, 1  ;;  %v13067_v36 = vrot.slane %v8309_v45, 1  ;;  %v9883_v61 = vsel %vm472_vm1, %v2511_v52, %v13077_v12 }
 0x4a3   : > { %13061 = vst [vmem:[#allocation301_spill] sm:$0xff] %v9823_v34  ;;  %3659 = vrot.lane.b32.xlu1 %v8674_v51, %s6611_s20  ;;  %v9866_v16 = vsel %vm472_vm1, %v2502_v20, %v13070_v47  ;;  %13078 = vst [vmem:[#allocation307_spill] sm:$0xff] %v9883_v61  ;;  %v13079_v20 = vrot.slane %v8492_v58, 1  ;;  %v13084_v34 = vld [vmem:[#allocation86_spill] sm:$0xff]  ;;  %v13086_v52 = vrot.slane %v12988_v49, 1  ;;  %v13088_v61 = vld [vmem:[#allocation29_spill] sm:$0xff] }
 0x4a4   : > { %3657 = vrot.lane.b32.xlu0 %v8680_v21, %s6611_s20  ;;  %v9851_v15 = vsel %vm472_vm1, %v2493_v13, %v13066_v17  ;;  %v9856_v2 = vsel %vm472_vm1, %v2496_v7, %v13067_v36  ;;  %13071 = vst [vmem:[#allocation303_spill] sm:$0xff] %v9866_v16  ;;  %v13073_v13 = vrot.slane %v8400_v54, 1  ;;  %v13075_v7 = vrot.slane %v8433_v59, 1  ;;  %v13081_v21 = vld [vmem:[#allocation14_spill] sm:$0xff]  ;;  %v13116_v16 = vld [vmem:[#allocation107_spill] sm:$0xff] }
 0x4a5   : > { %v9868_v51 = vpop.permute.xlu1 %3225  ;;  %v9888_v47 = vsel %vm472_vm1, %v2514_v27, %v13079_v20  ;;  %v3360_v31 = vsel %vm815_vm3, %v2344_v60, %v13081_v21  ;;  %v9902_v12 = vsel %vm472_vm1, %v2517_v26, %v13086_v52  ;;  %v13089_v27 = vld [vmem:[#allocation87_spill] sm:$0xff]  ;;  %v13091_v60 = vld [vmem:[#allocation88_spill] sm:$0xff]  ;;  %v13096_v26 = vld [vmem:[#allocation30_spill] sm:$0xff] }
 0x4a6   : > { %13072 = vst [vmem:[#allocation304_spill] sm:$0xff] %v9868_v51  ;;  %v9873_v17 = vsel %vm472_vm1, %v2505_v35, %v13073_v13  ;;  %v9878_v36 = vsel %vm472_vm1, %v2508_v39, %v13075_v7  ;;  %13080 = vst [vmem:[#allocation308_spill] sm:$0xff] %v9888_v47  ;;  %v13082_v35 = vld [vmem:[#allocation22_spill] sm:$0xff]  ;;  %v13083_v51 = vld [vmem:[#allocation47_spill] sm:$0xff]  ;;  %v9897_v7 = vpop.permute.xlu0 %3223  ;;  %v3361_v20 = vsel %vm815_vm3, %v13089_v27, %v13088_v61 }
 0x4a7   : > { %13074 = vst [vmem:[#allocation305_spill] sm:$0xff] %v9873_v17  ;;  %13076 = vst [vmem:[#allocation306_spill] sm:$0xff] %v9878_v36  ;;  %v3359_v13 = vsel %vm815_vm3, %v2430_v22, %v13082_v35  ;;  %v3362_v39 = vsel %vm815_vm3, %v13084_v34, %v13083_v51  ;;  %v13090_v47 = vld [vmem:[#allocation16_spill] sm:$0xff]  ;;  %v13092_v22 = vld [vmem:[#allocation23_spill] sm:$0xff]  ;;  %3663 = vrot.lane.b32.xlu1 %v8688_v1, %s6611_s20 }
 0x4a8   : > { %13085 = vst [vmem:[#allocation14_spill] sm:$0xff] %v9897_v7  ;;  %13087 = vst [vmem:[#allocation22_spill] sm:$0xff] %v9902_v12  ;;  %v3364_v21 = vsel %vm815_vm3, %v13091_v60, %v13090_v47  ;;  %v13093_v35 = vld [vmem:[#allocation90_spill] sm:$0xff]  ;;  %v13094_v34 = vld [vmem:[#allocation49_spill] sm:$0xff]  ;;  %3661 = vrot.lane.b32.xlu0 %v8692_v37, %s6611_s20 }
 0x4a9   : > { %v3363_v19 = vsel %vm815_vm3, %v13093_v35, %v13092_v22  ;;  %v13095_v51 = vld [vmem:[#allocation92_spill] sm:$0xff]  ;;  %v13097_v52 = vld [vmem:[#allocation93_spill] sm:$0xff]  ;;  %v13098_v27 = vld [vmem:[#allocation18_spill] sm:$0xff] }
 0x4aa   : > { %v9916_v7 = vsel %vm815_vm3, %v13095_v51, %v13094_v34  ;;  %v9923_v61 = vsel %vm815_vm3, %v13097_v52, %v13096_v26  ;;  %v13099_v12 = vld [vmem:[#allocation96_spill] sm:$0xff]  ;;  %v13101_v22 = vld [vmem:[#allocation97_spill] sm:$0xff]  ;;  %v13103_v51 = vld [vmem:[#allocation98_spill] sm:$0xff] }
 0x4ab   : > { %v9928_v47 = vsel %vm815_vm3, %v13099_v12, %v13098_v27  ;;  %v13100_v60 = vld [vmem:[#allocation24_spill] sm:$0xff]  ;;  %v13105_v1 = vld [vmem:[#allocation31_spill] sm:$0xff]  ;;  %v13108_v58 = vld [vmem:[#allocation102_spill] sm:$0xff]  ;;  %3667 = vrot.lane.b32.xlu1 %v8702_v55, %s6611_s20 }
 0x4ac   : > { %v9933_v35 = vsel %vm815_vm3, %v13101_v22, %v13100_v60  ;;  %v13102_v34 = vld [vmem:[#allocation64_spill] sm:$0xff]  ;;  %v13107_v27 = vld [vmem:[#allocation43_spill] sm:$0xff]  ;;  %3665 = vrot.lane.b32.xlu0 %v8706_v18, %s6611_s20  ;;  %v13129_v55 = vld [vmem:[#allocation134_spill] sm:$0xff] }
 0x4ad   : > { %v9938_v49 = vsel %vm815_vm3, %v13103_v51, %v13102_v34  ;;  %v13104_v26 = vld [vmem:[#allocation132_spill] sm:$0xff]  ;;  %v9952_v60 = vsel %vm815_vm3, %v13108_v58, %v13107_v27  ;;  %v13109_v22 = vld [vmem:[#allocation79_spill] sm:$0xff]  ;;  %v9959_v51 = vpop.permute.xlu1 %3229  ;;  %v13131_v18 = vld [vmem:[#allocation2_spill] sm:$0xff] }
 0x4ae   : > { %v3391_v52 = vsel %vm834_vm2, %v3359_v13, %v13104_v26  ;;  %v13106_v36 = vld [vmem:[#allocation100_spill] sm:$0xff]  ;;  %v13110_v17 = vld [vmem:[#allocation103_spill] sm:$0xff]  ;;  %13111 = vst [vmem:[#allocation47_spill] sm:$0xff] %v9959_v51  ;;  %v13113_v26 = vld [vmem:[#allocation82_spill] sm:$0xff] }
 0x4af   : > { %v9947_v12 = vsel %vm815_vm3, %v13106_v36, %v13105_v1  ;;  %v9957_v34 = vsel %vm815_vm3, %v13110_v17, %v13109_v22  ;;  %v13112_v37 = vld [vmem:[#allocation128_spill] sm:$0xff]  ;;  %v9966_v1 = vsel %vm815_vm3, %v13114_v38, %v13113_v26  ;;  %v13117_v27 = vld [vmem:[#allocation167_spill] sm:$0xff]  ;;  %v9975_v17 = vpop.permute.xlu0 %3227  ;;  %v13119_v22 = vld [vmem:[#allocation89_spill] sm:$0xff]  ;;  %3671 = vrot.lane.b32.xlu1 %v8712_v43, %s6611_s20 }
 0x4b0   : > { %v3392_v13 = vsel %vm834_vm2, %v3360_v31, %v13112_v37  ;;  %v13115_v36 = vld [vmem:[#allocation84_spill] sm:$0xff]  ;;  %v3423_v59 = vsel %vm871_vm4, %v3391_v52, %v13117_v27  ;;  %13118 = vst [vmem:[#allocation86_spill] sm:$0xff] %v9975_v17  ;;  %v13121_v31 = vld [vmem:[#allocation166_spill] sm:$0xff]  ;;  %v13122_v38 = vld [vmem:[#allocation199_spill] sm:$0xff]  ;;  %3669 = vrot.lane.b32.xlu0 %v8718_v9, %s6611_s20 }
 0x4b1   : > { %v9971_v58 = vsel %vm815_vm3, %v13116_v16, %v13115_v36  ;;  %v13120_v51 = vld [vmem:[#allocation108_spill] sm:$0xff]  ;;  %v3424_v37 = vsel %vm871_vm4, %v3392_v13, %v13121_v31  ;;  %v3455_v26 = vsel %vm908_vm5, %v3423_v59, %v13122_v38  ;;  %v13123_v16 = vld [vmem:[#allocation91_spill] sm:$0xff]  ;;  %v13124_v36 = vld [vmem:[#allocation110_spill] sm:$0xff] }
 0x4b2   : > { %v9980_v32 = vsel %vm815_vm3, %v13120_v51, %v13119_v22  ;;  %v9991_v52 = vsel %vm815_vm3, %v13124_v36, %v13123_v16  ;;  %v13125_v27 = vld [vmem:[#allocation198_spill] sm:$0xff]  ;;  %v13126_v51 = vld [vmem:[#allocation229_spill] sm:$0xff]  ;;  %v13127_v59 = vld [vmem:[#allocation135_spill] sm:$0xff]  ;;  %v3266_v36 = vpop.permute.xlu1 %3265 }
 0x4b3   : > { %v3456_v17 = vsel %vm908_vm5, %v3424_v37, %v13125_v27  ;;  %v3487_v22 = vsel %vm945_vm6, %v3455_v26, %v13126_v51  ;;  %v3393_v13 = vsel %vm834_vm2, %v3361_v20, %v13127_v59  ;;  %v13128_v31 = vld [vmem:[#allocation228_spill] sm:$0xff]  ;;  %v3394_v37 = vsel %vm834_vm2, %v3362_v39, %v13129_v55  ;;  %v13130_v27 = vld [vmem:[#allocation39_spill] sm:$0xff]  ;;  %v3264_v59 = vpop.permute.xlu0 %3263  ;;  %3675 = vrot.lane.b32.xlu1 %v8726_v4, %s6611_s20 }
 0x4b4   : > { %v3488_v38 = vsel %vm945_vm6, %v3456_v17, %v13128_v31  ;;  %v3519_v16 = vsel %vm1446_vm7, %v3487_v22, %v9543_v11  ;;  %v3425_v26 = vsel %vm871_vm4, %v3393_v13, %v13130_v27  ;;  %v3426_v17 = vsel %vm871_vm4, %v3394_v37, %v13131_v18  ;;  %v13132_v31 = vld [vmem:[#allocation201_spill] sm:$0xff]  ;;  %v13133_v39 = vld [vmem:[#allocation200_spill] sm:$0xff]  ;;  %v13137_v27 = vld [vmem:[#allocation94_spill] sm:$0xff]  ;;  %3673 = vrot.lane.b32.xlu0 %v12900_v24, %s6611_s20 }
 0x4b5   : > { %v3520_v51 = vsel %vm1446_vm7, %v3488_v38, %v9539_v8  ;;  %v3552_v20 = vsel %vm3551_vm11, %v3519_v16, %v9688_v41  ;;  %v3457_v11 = vsel %vm908_vm5, %v3425_v26, %v13132_v31  ;;  %v3458_v8 = vsel %vm908_vm5, %v3426_v17, %v13133_v39  ;;  %v13134_v13 = vld [vmem:[#allocation233_spill] sm:$0xff]  ;;  %v13136_v16 = vld [vmem:[#allocation139_spill] sm:$0xff]  ;;  %v13138_v26 = vld [vmem:[#allocation112_spill] sm:$0xff] }
 0x4b6   : > { %v3553_v22 = vsel %vm3551_vm11, %v3520_v51, %v9686_v63  ;;  %v3585_v55 = vsel %vm3584_vm12, %v3552_v20, %v3264_v59  ;;  %v3489_v41 = vsel %vm945_vm6, %v3457_v11, %v13134_v13  ;;  %v13135_v18 = vrot.slane %v13054_v30, 1  ;;  %v13139_v20 = vld [vmem:[#allocation232_spill] sm:$0xff]  ;;  %v3270_v17 = vpop.permute.xlu1 %3269  ;;  %v13140_v31 = vld [vmem:[#allocation138_spill] sm:$0xff]  ;;  %v6564_v4 = vld [vmem:[%s6707_s17 + $0x48] sm:$0xff] }
 0x4b7   : > { %v3586_v38 = vsel %vm3584_vm12, %v3553_v22, %v3266_v36  ;;  %6345 = vmatprep.mubr.msk.f32.mxu0 %vm4671_vm13, %v3585_v55  ;;  %v3395_v37 = vsel %vm834_vm2, %v3363_v19, %v13136_v16  ;;  %v10038_v51 = vsel %vm815_vm3, %v13138_v26, %v13137_v27  ;;  %v3490_v36 = vsel %vm945_vm6, %v3458_v8, %v13139_v20  ;;  %v13141_v22 = vld [vmem:[#allocation171_spill] sm:$0xff]  ;;  %v3268_v13 = vpop.permute.xlu0 %3267  ;;  %v13147_v26 = vld [vmem:[#allocation141_spill] sm:$0xff] }
 0x4b8   : > { %v2556_v63 = vsel %vm472_vm1, %v13135_v18, 0.0  ;;  %v3521_v59 = vsel %vm1446_vm7, %v3489_v41, %v9559_v56  ;;  %6346 = vmatmul.mubr.msk.f32.vlgmr.msra.gmra.mrb[28].mxu0 %vm4671_vm13, %v3586_v38  ;;  %v3396_v11 = vsel %vm834_vm2, %v3364_v21, %v13140_v31  ;;  %v3427_v19 = vsel %vm871_vm4, %v3395_v37, %v13141_v22  ;;  %v13142_v56 = vld [vmem:[#allocation169_spill] sm:$0xff]  ;;  %v13143_v41 = vld [vmem:[#allocation203_spill] sm:$0xff] }
 0x4b9   : > { %v3522_v55 = vsel %vm1446_vm7, %v3490_v36, %v9555_v40  ;;  %v3554_v39 = vsel %vm3551_vm11, %v3521_v59, %v9703_v48  ;;  %6452 = vmatpush3.msk.msra.mxu0 %vm4768_vm10, %v9695_v0  ;;  %v3428_v8 = vsel %vm871_vm4, %v3396_v11, %v13142_v56  ;;  %v3459_v38 = vsel %vm908_vm5, %v3427_v19, %v13143_v41  ;;  %v13144_v40 = vld [vmem:[#allocation202_spill] sm:$0xff]  ;;  %v13145_v16 = vld [vmem:[#allocation235_spill] sm:$0xff]  ;;  %v13149_v59 = vld [vmem:[#allocation113_spill] sm:$0xff] }
 0x4ba   : > { %v3555_v21 = vsel %vm3551_vm11, %v3522_v55, %v9701_v23  ;;  %v3587_v18 = vsel %vm3584_vm12, %v3554_v39, %v3268_v13  ;;  %v3460_v48 = vsel %vm908_vm5, %v3428_v8, %v13144_v40  ;;  %v3491_v0 = vsel %vm945_vm6, %v3459_v38, %v13145_v16  ;;  %v13148_v36 = vld [vmem:[#allocation95_spill] sm:$0xff]  ;;  %v3274_v19 = vpop.permute.xlu1 %3273  ;;  %v13151_v55 = vld [vmem:[#allocation140_spill] sm:$0xff]  ;;  %v13152_v13 = vld [vmem:[#allocation173_spill] sm:$0xff] }
 0x4bb   : > { %v3588_v37 = vsel %vm3584_vm12, %v3555_v21, %v3270_v17  ;;  %6348 = vmatprep.mubr.msk.f32.mxu0 %vm4671_vm13, %v3587_v18  ;;  %v13146_v23 = vrot.slane %v13056_v10, 1  ;;  %v3397_v20 = vsel %vm834_vm2, %v9923_v61, %v13147_v26  ;;  %v10083_v31 = vsel %vm815_vm3, %v13149_v59, %v13148_v36  ;;  %v13150_v17 = vld [vmem:[#allocation234_spill] sm:$0xff]  ;;  %v3272_v21 = vpop.permute.xlu0 %3271  ;;  %v13155_v18 = vld [vmem:[#allocation172_spill] sm:$0xff]  ;;  %v13156_v40 = vld [vmem:[#allocation205_spill] sm:$0xff] }
 0x4bc   : > { %v3492_v11 = vsel %vm945_vm6, %v3460_v48, %v13150_v17  ;;  %v3523_v22 = vsel %vm1446_vm7, %v3491_v0, %v9572_v29  ;;  %6349 = vmatmul.mubr.msk.f32.gmra.mrb[30].mxu0 %vm4671_vm13, %v3588_v37  ;;  %v3398_v39 = vsel %vm834_vm2, %v9916_v7, %v13151_v55  ;;  %v3429_v61 = vsel %vm871_vm4, %v3397_v20, %v13152_v13  ;;  %v13153_v56 = vld [vmem:[#allocation70_spill] sm:$0xff]  ;;  %v13157_v16 = vld [vmem:[#allocation289_spill] sm:$0xff]  ;;  %v13158_v37 = vld [vmem:[#allocation80_spill] sm:$0xff] }
 0x4bd   : > { %v10075_v27 = vsel %vm472_vm1, %v13146_v23, 0.0  ;;  %v3524_v8 = vsel %vm1446_vm7, %v3492_v11, %v13153_v56  ;;  %v13154_v41 = vld [vmem:[#allocation290_spill] sm:$0xff]  ;;  %v3430_v29 = vsel %vm871_vm4, %v3398_v39, %v13155_v18  ;;  %v3461_v48 = vsel %vm908_vm5, %v3429_v61, %v13156_v40  ;;  %3679 = vrot.lane.b32.xlu1 %v13158_v37, %s6611_s20  ;;  %v13159_v23 = vld [vmem:[#allocation204_spill] sm:$0xff]  ;;  %v13160_v20 = vld [vmem:[#allocation237_spill] sm:$0xff] }
 0x4be   : > { %v3556_v38 = vsel %vm3551_vm11, %v3523_v22, %v13154_v41  ;;  %v3557_v0 = vsel %vm3551_vm11, %v3524_v8, %v13157_v16  ;;  %v3462_v26 = vsel %vm908_vm5, %v3430_v29, %v13159_v23  ;;  %v3493_v36 = vsel %vm945_vm6, %v3461_v48, %v13160_v20  ;;  %v13161_v17 = vld [vmem:[#allocation81_spill] sm:$0xff]  ;;  %v13163_v55 = vld [vmem:[#allocation143_spill] sm:$0xff]  ;;  %v13165_v61 = vld [vmem:[#allocation116_spill] sm:$0xff] }
 0x4bf   : > { %v3589_v7 = vsel %vm3584_vm12, %v3556_v38, %v3272_v21  ;;  %v3590_v59 = vsel %vm3584_vm12, %v3557_v0, %v3274_v19  ;;  %3677 = vrot.lane.b32.xlu0 %v13161_v17, %s6611_s20  ;;  %v13162_v11 = vrot.slane %v8251_v25, 1  ;;  %v3399_v39 = vsel %vm834_vm2, %v9933_v35, %v13163_v55  ;;  %v13164_v13 = vld [vmem:[#allocation99_spill] sm:$0xff]  ;;  %v13166_v19 = vld [vmem:[#allocation236_spill] sm:$0xff]  ;;  %v3278_v21 = vpop.permute.xlu1 %3277  ;;  %v13168_v18 = vld [vmem:[#allocation142_spill] sm:$0xff]  ;;  %v3276_v23 = vpop.permute.xlu0 %3275 }
 0x4c0   : > { %6351 = vmatprep.mubr.msk.f32.mxu0 %vm4671_vm13, %v3589_v7  ;;  %v10127_v56 = vsel %vm815_vm3, %v13165_v61, %v13164_v13  ;;  %v3494_v8 = vsel %vm945_vm6, %v3462_v26, %v13166_v19  ;;  %v13167_v41 = vld [vmem:[#allocation264_spill] sm:$0xff]  ;;  %v3400_v29 = vsel %vm834_vm2, %v9928_v47, %v13168_v18  ;;  %v13169_v40 = vld [vmem:[#allocation175_spill] sm:$0xff]  ;;  %v13172_v26 = vld [vmem:[#allocation174_spill] sm:$0xff] }
 0x4c1   : > { %v10119_v22 = vsel %vm472_vm1, %v13162_v11, 0.0  ;;  %v3525_v38 = vsel %vm1446_vm7, %v3493_v36, %v13167_v41  ;;  %6352 = vmatmul.mubr.msk.f32.gmra.mrb[32].mxu0 %vm4671_vm13, %v3590_v59  ;;  %v3431_v35 = vsel %vm871_vm4, %v3399_v39, %v13169_v40  ;;  %v13170_v48 = vld [vmem:[#allocation263_spill] sm:$0xff]  ;;  %v13171_v0 = vld [vmem:[#allocation292_spill] sm:$0xff]  ;;  %v3432_v20 = vsel %vm871_vm4, %v3400_v29, %v13172_v26  ;;  %3731 = vrot.lane.b32.xlu1 %v2556_v63, %s6612_s24  ;;  %v13175_v39 = vld [vmem:[#allocation206_spill] sm:$0xff] }
 0x4c2   : > { %v3526_v16 = vsel %vm1446_vm7, %v3494_v8, %v13170_v48  ;;  %v3558_v7 = vsel %vm3551_vm11, %v3525_v38, %v13171_v0  ;;  %v13173_v36 = vld [vmem:[#allocation207_spill] sm:$0xff]  ;;  %v3464_v13 = vsel %vm908_vm5, %v3432_v20, %v13175_v39  ;;  %v13177_v41 = vrot.slane %v8280_v46, 1  ;;  %v13178_v18 = vld [vmem:[#allocation145_spill] sm:$0xff]  ;;  %v6559_v17 = vld [vmem:[%s6707_s17 + $0x20] sm:$0xff] }
 0x4c3   : > { %v3463_v59 = vsel %vm908_vm5, %v3431_v35, %v13173_v36  ;;  %v13174_v11 = vld [vmem:[#allocation291_spill] sm:$0xff]  ;;  %v3591_v47 = vsel %vm3584_vm12, %v3558_v7, %v3276_v23  ;;  %3729 = vrot.lane.b32.xlu0 %v9828_v5, %s6612_s24  ;;  %v3401_v63 = vsel %vm834_vm2, %v9947_v12, %v13178_v18  ;;  %v13179_v29 = vld [vmem:[#allocation101_spill] sm:$0xff]  ;;  %v13182_v5 = vld [vmem:[#allocation266_spill] sm:$0xff]  ;;  %v3282_v0 = vpop.permute.xlu1 %3281 }
 0x4c4   : > { %v3559_v55 = vsel %vm3551_vm11, %v3526_v16, %v13174_v11  ;;  %v13176_v61 = vld [vmem:[#allocation239_spill] sm:$0xff]  ;;  %6354 = vmatprep.mubr.msk.f32.mxu0 %vm4671_vm13, %v3591_v47  ;;  %v10162_v38 = vsel %vm472_vm1, %v13177_v41, 0.0  ;;  %v13180_v40 = vld [vmem:[#allocation117_spill] sm:$0xff]  ;;  %v13183_v7 = vld [vmem:[#allocation144_spill] sm:$0xff]  ;;  %v3280_v11 = vpop.permute.xlu0 %3279 }
 0x4c5   : > { %v3495_v19 = vsel %vm945_vm6, %v3463_v59, %v13176_v61  ;;  %v3592_v8 = vsel %vm3584_vm12, %v3559_v55, %v3278_v21  ;;  %v10170_v35 = vsel %vm815_vm3, %v13180_v40, %v13179_v29  ;;  %v13181_v21 = vld [vmem:[#allocation238_spill] sm:$0xff]  ;;  %v3402_v23 = vsel %vm834_vm2, %v9938_v49, %v13183_v7  ;;  %v13184_v26 = vld [vmem:[#allocation177_spill] sm:$0xff]  ;;  %v13186_v55 = vld [vmem:[#allocation176_spill] sm:$0xff]  ;;  %3735 = vrot.lane.b32.xlu1 %v10075_v27, %s6612_s24 }
 0x4c6   : > { %v3496_v48 = vsel %vm945_vm6, %v3464_v13, %v13181_v21  ;;  %v3527_v16 = vsel %vm1446_vm7, %v3495_v19, %v13182_v5  ;;  %6355 = vmatmul.mubr.msk.f32.gmra.mrb[34].mxu0 %vm4671_vm13, %v3592_v8  ;;  %v3433_v12 = vsel %vm871_vm4, %v3401_v63, %v13184_v26  ;;  %v13185_v20 = vld [vmem:[#allocation265_spill] sm:$0xff]  ;;  %v3434_v47 = vsel %vm871_vm4, %v3402_v23, %v13186_v55  ;;  %v13189_v8 = vld [vmem:[#allocation208_spill] sm:$0xff]  ;;  %v13192_v21 = vld [vmem:[#allocation147_spill] sm:$0xff] }
 0x4c7   : > { %v3528_v36 = vsel %vm1446_vm7, %v3496_v48, %v13185_v20  ;;  %v3560_v59 = vsel %vm3551_vm11, %v3527_v16, %v9727_v50  ;;  %v13187_v39 = vld [vmem:[#allocation209_spill] sm:$0xff]  ;;  %v3466_v41 = vsel %vm908_vm5, %v3434_v47, %v13189_v8  ;;  %3733 = vrot.lane.b32.xlu0 %v9839_v14, %s6612_s24  ;;  %v13191_v29 = vrot.slane %v8309_v45, 1  ;;  %v13193_v5 = vld [vmem:[#allocation104_spill] sm:$0xff]  ;;  %v13194_v16 = vld [vmem:[#allocation118_spill] sm:$0xff]  ;;  %v3286_v20 = vpop.permute.xlu1 %3285 }
 0x4c8   : > { %v3465_v13 = vsel %vm908_vm5, %v3433_v12, %v13187_v39  ;;  %v13188_v61 = vld [vmem:[#allocation69_spill] sm:$0xff]  ;;  %v3593_v49 = vsel %vm3584_vm12, %v3560_v59, %v3280_v11  ;;  %v3403_v48 = vsel %vm834_vm2, %v9957_v34, %v13192_v21  ;;  %v10214_v7 = vsel %vm815_vm3, %v13194_v16, %v13193_v5  ;;  %v13196_v26 = vld [vmem:[#allocation268_spill] sm:$0xff]  ;;  %v13198_v11 = vld [vmem:[#allocation179_spill] sm:$0xff] }
 0x4c9   : > { %v3561_v19 = vsel %vm3551_vm11, %v3528_v36, %v13188_v61  ;;  %v13190_v18 = vld [vmem:[#allocation241_spill] sm:$0xff]  ;;  %6357 = vmatprep.mubr.msk.f32.mxu0 %vm4671_vm13, %v3593_v49  ;;  %v10206_v40 = vsel %vm472_vm1, %v13191_v29, 0.0  ;;  %v13197_v36 = vld [vmem:[#allocation146_spill] sm:$0xff]  ;;  %v3435_v34 = vsel %vm871_vm4, %v3403_v48, %v13198_v11  ;;  %v13199_v55 = vld [vmem:[#allocation267_spill] sm:$0xff]  ;;  %3739 = vrot.lane.b32.xlu1 %v10119_v22, %s6612_s24 }
 0x4ca   : > { %v3497_v50 = vsel %vm945_vm6, %v3465_v13, %v13190_v18  ;;  %v3594_v63 = vsel %vm3584_vm12, %v3561_v19, %v3282_v0  ;;  %v13195_v0 = vld [vmem:[#allocation240_spill] sm:$0xff]  ;;  %v3404_v59 = vsel %vm834_vm2, %v9952_v60, %v13197_v36  ;;  %v3284_v13 = vpop.permute.xlu0 %3283  ;;  %v13200_v61 = vld [vmem:[#allocation178_spill] sm:$0xff]  ;;  %v13201_v49 = vld [vmem:[#allocation211_spill] sm:$0xff] }
 0x4cb   : > { %v3498_v23 = vsel %vm945_vm6, %v3466_v41, %v13195_v0  ;;  %v3529_v12 = vsel %vm1446_vm7, %v3497_v50, %v13196_v26  ;;  %6358 = vmatmul.mubr.msk.f32.gmra.mrb[36].mxu0 %vm4671_vm13, %v3594_v63  ;;  %v3436_v19 = vsel %vm871_vm4, %v3404_v59, %v13200_v61  ;;  %v3467_v8 = vsel %vm908_vm5, %v3435_v34, %v13201_v49  ;;  %v13202_v18 = vld [vmem:[#allocation210_spill] sm:$0xff]  ;;  %v13203_v63 = vld [vmem:[#allocation243_spill] sm:$0xff]  ;;  %v13205_v48 = vld [vmem:[#allocation149_spill] sm:$0xff]  ;;  %v3290_v59 = vpop.permute.xlu1 %3289 }
 0x4cc   : > { %v3530_v47 = vsel %vm1446_vm7, %v3498_v23, %v13199_v55  ;;  %v3562_v39 = vsel %vm3551_vm11, %v3529_v12, %v9735_v57  ;;  %v3468_v50 = vsel %vm908_vm5, %v3436_v19, %v13202_v18  ;;  %v3499_v57 = vsel %vm945_vm6, %v3467_v8, %v13203_v63  ;;  %3737 = vrot.lane.b32.xlu0 %v9844_v44, %s6612_s24  ;;  %v13206_v16 = vld [vmem:[#allocation105_spill] sm:$0xff]  ;;  %v13207_v0 = vld [vmem:[#allocation120_spill] sm:$0xff]  ;;  %v13208_v26 = vld [vmem:[#allocation242_spill] sm:$0xff] }
 0x4cd   : > { %v3563_v41 = vsel %vm3551_vm11, %v3530_v47, %v9733_v42  ;;  %v3595_v60 = vsel %vm3584_vm12, %v3562_v39, %v3284_v13  ;;  %v13204_v42 = vrot.slane %v8338_v6, 1  ;;  %v3405_v5 = vsel %vm834_vm2, %v9971_v58, %v13205_v48  ;;  %v13210_v11 = vld [vmem:[#allocation148_spill] sm:$0xff]  ;;  %v13211_v55 = vld [vmem:[#allocation181_spill] sm:$0xff]  ;;  %3743 = vrot.lane.b32.xlu1 %v10162_v38, %s6612_s24  ;;  %v6568_v43 = vld [vmem:[%s6707_s17 + $0x68] sm:$0xff] }
 0x4ce   : > { %v3596_v29 = vsel %vm3584_vm12, %v3563_v41, %v3286_v20  ;;  %6360 = vmatprep.mubr.msk.f32.mxu0 %vm4671_vm13, %v3595_v60  ;;  %v10258_v23 = vsel %vm815_vm3, %v13207_v0, %v13206_v16  ;;  %v3500_v12 = vsel %vm945_vm6, %v3468_v50, %v13208_v26  ;;  %v13209_v20 = vld [vmem:[#allocation270_spill] sm:$0xff]  ;;  %v3406_v34 = vsel %vm834_vm2, %v9966_v1, %v13210_v11  ;;  %v13212_v47 = vld [vmem:[#allocation269_spill] sm:$0xff]  ;;  %v3288_v61 = vpop.permute.xlu0 %3287  ;;  %v13213_v19 = vld [vmem:[#allocation180_spill] sm:$0xff] }
 0x4cf   : > { %v10250_v21 = vsel %vm472_vm1, %v13204_v42, 0.0  ;;  %v3531_v36 = vsel %vm1446_vm7, %v3499_v57, %v13209_v20  ;;  %6361 = vmatmul.mubr.msk.f32.gmra.mrb[38].mxu0 %vm4671_vm13, %v3596_v29  ;;  %v3437_v58 = vsel %vm871_vm4, %v3405_v5, %v13211_v55  ;;  %v3532_v39 = vsel %vm1446_vm7, %v3500_v12, %v13212_v47  ;;  %v13214_v8 = vld [vmem:[#allocation213_spill] sm:$0xff]  ;;  %v13215_v18 = vld [vmem:[#allocation212_spill] sm:$0xff]  ;;  %v13218_v42 = vld [vmem:[#allocation151_spill] sm:$0xff] }
 0x4d0   : > { %v3564_v13 = vsel %vm3551_vm11, %v3531_v36, %v9743_v62  ;;  %v3438_v49 = vsel %vm871_vm4, %v3406_v34, %v13213_v19  ;;  %v3469_v41 = vsel %vm908_vm5, %v3437_v58, %v13214_v8  ;;  %v3565_v60 = vsel %vm3551_vm11, %v3532_v39, %v9741_v53  ;;  %v13216_v63 = vld [vmem:[#allocation245_spill] sm:$0xff]  ;;  %3741 = vrot.lane.b32.xlu0 %v9851_v15, %s6612_s24  ;;  %v13220_v16 = vld [vmem:[#allocation122_spill] sm:$0xff]  ;;  %v13221_v26 = vld [vmem:[#allocation244_spill] sm:$0xff] }
 0x4d1   : > { %v3597_v1 = vsel %vm3584_vm12, %v3564_v13, %v3288_v61  ;;  %v3470_v50 = vsel %vm908_vm5, %v3438_v49, %v13215_v18  ;;  %v3501_v62 = vsel %vm945_vm6, %v3469_v41, %v13216_v63  ;;  %v3598_v57 = vsel %vm3584_vm12, %v3565_v60, %v3290_v59  ;;  %v13219_v5 = vld [vmem:[#allocation109_spill] sm:$0xff]  ;;  %v13222_v20 = vld [vmem:[#allocation272_spill] sm:$0xff]  ;;  %v3294_v59 = vpop.permute.xlu1 %3293  ;;  %v13223_v11 = vld [vmem:[#allocation150_spill] sm:$0xff]  ;;  %3747 = vrot.lane.b32.xlu1 %v10206_v40, %s6612_s24 }
 0x4d2   : > { %6363 = vmatprep.mubr.msk.f32.mxu0 %vm4671_vm13, %v3597_v1  ;;  %v13217_v53 = vrot.slane %v8367_v33, 1  ;;  %v3407_v48 = vsel %vm834_vm2, %v9991_v52, %v13218_v42  ;;  %v10302_v0 = vsel %vm815_vm3, %v13220_v16, %v13219_v5  ;;  %v3502_v12 = vsel %vm945_vm6, %v3470_v50, %v13221_v26  ;;  %v13224_v55 = vld [vmem:[#allocation183_spill] sm:$0xff]  ;;  %v3292_v13 = vpop.permute.xlu0 %3291  ;;  %v13226_v61 = vld [vmem:[#allocation182_spill] sm:$0xff]  ;;  %v6558_v37 = vld [vmem:[%s6707_s17 + $0x18] sm:$0xff] }
 0x4d3   : > { %v3533_v36 = vsel %vm1446_vm7, %v3501_v62, %v13222_v20  ;;  %6364 = vmatmul.mubr.msk.f32.gmra.mrb[40].mxu0 %vm4671_vm13, %v3598_v57  ;;  %v3408_v34 = vsel %vm834_vm2, %v9980_v32, %v13223_v11  ;;  %v3439_v52 = vsel %vm871_vm4, %v3407_v48, %v13224_v55  ;;  %v13225_v58 = vld [vmem:[#allocation271_spill] sm:$0xff]  ;;  %v13228_v60 = vld [vmem:[#allocation214_spill] sm:$0xff]  ;;  %v13231_v62 = vld [vmem:[#allocation153_spill] sm:$0xff] }
 0x4d4   : > { %v10294_v29 = vsel %vm472_vm1, %v13217_v53, 0.0  ;;  %v3534_v47 = vsel %vm1446_vm7, %v3502_v12, %v13225_v58  ;;  %v3566_v39 = vsel %vm3551_vm11, %v3533_v36, %v9751_v3  ;;  %v3440_v19 = vsel %vm871_vm4, %v3408_v34, %v13226_v61  ;;  %v13227_v49 = vld [vmem:[#allocation215_spill] sm:$0xff]  ;;  %3745 = vrot.lane.b32.xlu0 %v9856_v2, %s6612_s24  ;;  %v13234_v5 = vld [vmem:[#allocation246_spill] sm:$0xff]  ;;  %v13236_v36 = vld [vmem:[#allocation152_spill] sm:$0xff] }
 0x4d5   : > { %v3471_v8 = vsel %vm908_vm5, %v3439_v52, %v13227_v49  ;;  %v3567_v41 = vsel %vm3551_vm11, %v3534_v47, %v9749_v28  ;;  %v3599_v32 = vsel %vm3584_vm12, %v3566_v39, %v3292_v13  ;;  %v3472_v1 = vsel %vm908_vm5, %v3440_v19, %v13228_v60  ;;  %v13229_v18 = vld [vmem:[#allocation247_spill] sm:$0xff]  ;;  %v13235_v26 = vld [vmem:[#allocation274_spill] sm:$0xff]  ;;  %v3298_v20 = vpop.permute.xlu1 %3297  ;;  %v13237_v11 = vld [vmem:[#allocation185_spill] sm:$0xff]  ;;  %3751 = vrot.lane.b32.xlu1 %v10250_v21, %s6612_s24 }
 0x4d6   : > { %v3503_v3 = vsel %vm945_vm6, %v3471_v8, %v13229_v18  ;;  %v3600_v50 = vsel %vm3584_vm12, %v3567_v41, %v3294_v59  ;;  %6366 = vmatprep.mubr.msk.f32.mxu0 %vm4671_vm13, %v3599_v32  ;;  %v13230_v28 = vrot.slane %v8400_v54, 1  ;;  %v3409_v57 = vsel %vm834_vm2, %v10083_v31, %v13231_v62  ;;  %v13232_v53 = vld [vmem:[#allocation111_spill] sm:$0xff]  ;;  %v13238_v34 = vld [vmem:[#allocation273_spill] sm:$0xff]  ;;  %v3296_v47 = vpop.permute.xlu0 %3295  ;;  %v13240_v39 = vld [vmem:[#allocation184_spill] sm:$0xff] }
 0x4d7   : > { %v13233_v42 = vld [vmem:[#allocation123_spill] sm:$0xff]  ;;  %v3504_v16 = vsel %vm945_vm6, %v3472_v1, %v13234_v5  ;;  %v3535_v12 = vsel %vm1446_vm7, %v3503_v3, %v13235_v26  ;;  %6367 = vmatmul.mubr.msk.f32.gmra.mrb[42].mxu0 %vm4671_vm13, %v3600_v50  ;;  %v3410_v59 = vsel %vm834_vm2, %v10038_v51, %v13236_v36  ;;  %v3441_v31 = vsel %vm871_vm4, %v3409_v57, %v13237_v11  ;;  %v13239_v52 = vld [vmem:[#allocation293_spill] sm:$0xff]  ;;  %v13243_v41 = vld [vmem:[#allocation216_spill] sm:$0xff] }
 0x4d8   : > { %v10338_v63 = vsel %vm472_vm1, %v13230_v28, 0.0  ;;  %v10346_v48 = vsel %vm815_vm3, %v13233_v42, %v13232_v53  ;;  %v3536_v55 = vsel %vm1446_vm7, %v3504_v16, %v13238_v34  ;;  %v3568_v58 = vsel %vm3551_vm11, %v3535_v12, %v13239_v52  ;;  %v13241_v61 = vld [vmem:[#allocation217_spill] sm:$0xff]  ;;  %v13242_v49 = vld [vmem:[#allocation71_spill] sm:$0xff]  ;;  %v13245_v3 = vld [vmem:[#allocation302_spill] sm:$0xff] }
 0x4d9   : > { %v3442_v13 = vsel %vm871_vm4, %v3410_v59, %v13240_v39  ;;  %v3473_v19 = vsel %vm908_vm5, %v3441_v31, %v13241_v61  ;;  %v3569_v8 = vsel %vm3551_vm11, %v3536_v55, %v13242_v49  ;;  %v3601_v51 = vsel %vm3584_vm12, %v3568_v58, %v3296_v47  ;;  %v13244_v60 = vld [vmem:[#allocation249_spill] sm:$0xff]  ;;  %3749 = vrot.lane.b32.xlu0 %v13245_v3, %s6612_s24  ;;  %v13246_v50 = vld [vmem:[#allocation76_spill] sm:$0xff]  ;;  %v13248_v57 = vld [vmem:[#allocation155_spill] sm:$0xff]  ;;  %v3302_v59 = vpop.permute.xlu1 %3301 }
 0x4da   : > { %v3474_v32 = vsel %vm908_vm5, %v3442_v13, %v13243_v41  ;;  %v3505_v1 = vsel %vm945_vm6, %v3473_v19, %v13244_v60  ;;  %v3602_v18 = vsel %vm3584_vm12, %v3569_v8, %v3298_v20  ;;  %6369 = vmatprep.mubr.msk.f32.mxu0 %vm4671_vm13, %v3601_v51  ;;  %v13247_v28 = vrot.slane %v13246_v50, 1  ;;  %v13249_v42 = vld [vmem:[#allocation114_spill] sm:$0xff]  ;;  %v13251_v26 = vld [vmem:[#allocation248_spill] sm:$0xff]  ;;  %v13254_v34 = vld [vmem:[#allocation187_spill] sm:$0xff]  ;;  %v3300_v39 = vpop.permute.xlu0 %3299  ;;  %3755 = vrot.lane.b32.xlu1 %v10294_v29, %s6612_s24 }
 0x4db   : > { %v3411_v53 = vsel %vm834_vm2, %v10170_v35, %v13248_v57  ;;  %v13250_v5 = vld [vmem:[#allocation126_spill] sm:$0xff]  ;;  %v3506_v12 = vsel %vm945_vm6, %v3474_v32, %v13251_v26  ;;  %v13252_v20 = vld [vmem:[#allocation276_spill] sm:$0xff]  ;;  %6370 = vmatmul.mubr.msk.f32.gmra.mrb[44].mxu0 %vm4671_vm13, %v3602_v18  ;;  %v13255_v55 = vld [vmem:[#allocation275_spill] sm:$0xff] }
 0x4dc   : > { %v10382_v62 = vsel %vm472_vm1, %v13247_v28, 0.0  ;;  %v10390_v16 = vsel %vm815_vm3, %v13250_v5, %v13249_v42  ;;  %v3537_v36 = vsel %vm1446_vm7, %v3505_v1, %v13252_v20  ;;  %v13253_v11 = vld [vmem:[#allocation154_spill] sm:$0xff]  ;;  %v3443_v35 = vsel %vm871_vm4, %v3411_v53, %v13254_v34  ;;  %v13256_v58 = vld [vmem:[#allocation295_spill] sm:$0xff]  ;;  %v13265_v5 = vld [vmem:[#allocation157_spill] sm:$0xff] }
 0x4dd   : > { %v3412_v31 = vsel %vm834_vm2, %v10127_v56, %v13253_v11  ;;  %v3538_v52 = vsel %vm1446_vm7, %v3506_v12, %v13255_v55  ;;  %v3570_v47 = vsel %vm3551_vm11, %v3537_v36, %v13256_v58  ;;  %v13257_v13 = vld [vmem:[#allocation186_spill] sm:$0xff]  ;;  %v13258_v19 = vld [vmem:[#allocation219_spill] sm:$0xff]  ;;  %v3413_v26 = vsel %vm834_vm2, %v10258_v23, %v13265_v5  ;;  %v13270_v55 = vld [vmem:[#allocation156_spill] sm:$0xff] }
 0x4de   : > { %v3444_v61 = vsel %vm871_vm4, %v3412_v31, %v13257_v13  ;;  %v3475_v49 = vsel %vm908_vm5, %v3443_v35, %v13258_v19  ;;  %v13259_v8 = vld [vmem:[#allocation294_spill] sm:$0xff]  ;;  %v3603_v56 = vsel %vm3584_vm12, %v3570_v47, %v3300_v39  ;;  %v13261_v60 = vld [vmem:[#allocation251_spill] sm:$0xff]  ;;  %v3306_v35 = vpop.permute.xlu1 %3305  ;;  %v13271_v58 = vld [vmem:[#allocation189_spill] sm:$0xff]  ;;  %v3304_v19 = vpop.permute.xlu0 %3303  ;;  %3759 = vrot.lane.b32.xlu1 %v10338_v63, %s6612_s24 }
 0x4df   : > { %v3571_v51 = vsel %vm3551_vm11, %v3538_v52, %v13259_v8  ;;  %v13260_v41 = vld [vmem:[#allocation218_spill] sm:$0xff]  ;;  %v3507_v1 = vsel %vm945_vm6, %v3475_v49, %v13261_v60  ;;  %6372 = vmatprep.mubr.msk.f32.mxu0 %vm4671_vm13, %v3603_v56  ;;  %v13262_v28 = vld [vmem:[#allocation303_spill] sm:$0xff]  ;;  %v3414_v52 = vsel %vm834_vm2, %v10214_v7, %v13270_v55  ;;  %v3445_v23 = vsel %vm871_vm4, %v3413_v26, %v13271_v58  ;;  %v13272_v47 = vld [vmem:[#allocation277_spill] sm:$0xff] }
 0x4e0   : > { %v3476_v32 = vsel %vm908_vm5, %v3444_v61, %v13260_v41  ;;  %v3604_v18 = vsel %vm3584_vm12, %v3571_v51, %v3302_v59  ;;  %3753 = vrot.lane.b32.xlu0 %v13262_v28, %s6612_s24  ;;  %v13263_v57 = vld [vmem:[#allocation27_spill] sm:$0xff]  ;;  %v13268_v11 = vld [vmem:[#allocation250_spill] sm:$0xff]  ;;  %v13273_v13 = vld [vmem:[#allocation297_spill] sm:$0xff] }
 0x4e1   : > { %v13264_v53 = vrot.slane %v13263_v57, 1  ;;  %v13266_v12 = vld [vmem:[#allocation115_spill] sm:$0xff]  ;;  %v3508_v59 = vsel %vm945_vm6, %v3476_v32, %v13268_v11  ;;  %v13269_v31 = vld [vmem:[#allocation278_spill] sm:$0xff]  ;;  %6373 = vmatmul.mubr.msk.f32.gmra.mrb[46].mxu0 %vm4671_vm13, %v3604_v18  ;;  %v13274_v49 = vld [vmem:[#allocation188_spill] sm:$0xff] }
 0x4e2   : > { %v13267_v20 = vld [vmem:[#allocation127_spill] sm:$0xff]  ;;  %v3539_v34 = vsel %vm1446_vm7, %v3507_v1, %v13269_v31  ;;  %v3540_v39 = vsel %vm1446_vm7, %v3508_v59, %v13272_v47  ;;  %v3446_v8 = vsel %vm871_vm4, %v3414_v52, %v13274_v49  ;;  %v13275_v51 = vld [vmem:[#allocation221_spill] sm:$0xff]  ;;  %v13276_v41 = vld [vmem:[#allocation296_spill] sm:$0xff]  ;;  %3763 = vrot.lane.b32.xlu1 %v10382_v62, %s6612_s24 }
 0x4e3   : > { %v10426_v42 = vsel %vm472_vm1, %v13264_v53, 0.0  ;;  %v3385_v36 = vsel %vm815_vm3, %v13267_v20, %v13266_v12  ;;  %v3572_v61 = vsel %vm3551_vm11, %v3539_v34, %v13273_v13  ;;  %v3477_v56 = vsel %vm908_vm5, %v3445_v23, %v13275_v51  ;;  %v13277_v60 = vld [vmem:[#allocation220_spill] sm:$0xff]  ;;  %v13278_v18 = vld [vmem:[#allocation253_spill] sm:$0xff]  ;;  %v13280_v12 = vld [vmem:[#allocation38_spill] sm:$0xff] }
 0x4e4   : > { %v3573_v32 = vsel %vm3551_vm11, %v3540_v39, %v13276_v41  ;;  %v3605_v7 = vsel %vm3584_vm12, %v3572_v61, %v3304_v19  ;;  %v3478_v1 = vsel %vm908_vm5, %v3446_v8, %v13277_v60  ;;  %v3509_v53 = vsel %vm945_vm6, %v3477_v56, %v13278_v18  ;;  %v13279_v26 = vld [vmem:[#allocation305_spill] sm:$0xff]  ;;  %v13282_v59 = vld [vmem:[#allocation159_spill] sm:$0xff]  ;;  %v13285_v58 = vld [vmem:[#allocation252_spill] sm:$0xff]  ;;  %v3310_v39 = vpop.permute.xlu1 %3309  ;;  %v3308_v41 = vpop.permute.xlu0 %3307 }
 0x4e5   : > { %v3606_v5 = vsel %vm3584_vm12, %v3573_v32, %v3306_v35  ;;  %6375 = vmatprep.mubr.msk.f32.mxu0 %vm4671_vm13, %v3605_v7  ;;  %3757 = vrot.lane.b32.xlu0 %v13279_v26, %s6612_s24  ;;  %v13281_v20 = vrot.slane %v13280_v12, 1  ;;  %v3415_v31 = vsel %vm834_vm2, %v10346_v48, %v13282_v59  ;;  %v13283_v34 = vld [vmem:[#allocation119_spill] sm:$0xff]  ;;  %v13284_v55 = vld [vmem:[#allocation129_spill] sm:$0xff]  ;;  %v3510_v35 = vsel %vm945_vm6, %v3478_v1, %v13285_v58  ;;  %v13286_v23 = vld [vmem:[#allocation280_spill] sm:$0xff] }
 0x4e6   : > { %v3388_v52 = vsel %vm815_vm3, %v13284_v55, %v13283_v34  ;;  %v3541_v47 = vsel %vm1446_vm7, %v3509_v53, %v13286_v23  ;;  %6376 = vmatmul.mubr.msk.f32.gmra.mrb[48].mxu0 %vm4671_vm13, %v3606_v5  ;;  %v13287_v13 = vld [vmem:[#allocation158_spill] sm:$0xff]  ;;  %v13288_v19 = vld [vmem:[#allocation191_spill] sm:$0xff]  ;;  %3767 = vrot.lane.b32.xlu1 %v10426_v42, %s6612_s24  ;;  %v6566_v24 = vld [vmem:[%s6707_s17 + $0x58] sm:$0xff] }
 0x4e7   : > { %v10468_v11 = vsel %vm472_vm1, %v13281_v20, 0.0  ;;  %v3416_v61 = vsel %vm834_vm2, %v10302_v0, %v13287_v13  ;;  %v3447_v48 = vsel %vm871_vm4, %v3415_v31, %v13288_v19  ;;  %v13289_v49 = vld [vmem:[#allocation279_spill] sm:$0xff]  ;;  %v13291_v32 = vld [vmem:[#allocation190_spill] sm:$0xff]  ;;  %v13302_v19 = vld [vmem:[#allocation133_spill] sm:$0xff] }
 0x4e8   : > { %v3542_v8 = vsel %vm1446_vm7, %v3510_v35, %v13289_v49  ;;  %v13290_v51 = vld [vmem:[#allocation299_spill] sm:$0xff]  ;;  %v3448_v7 = vsel %vm871_vm4, %v3416_v61, %v13291_v32  ;;  %v13293_v18 = vld [vmem:[#allocation298_spill] sm:$0xff]  ;;  %v13301_v61 = vld [vmem:[#allocation121_spill] sm:$0xff] }
 0x4e9   : > { %v3574_v56 = vsel %vm3551_vm11, %v3541_v47, %v13290_v51  ;;  %v13292_v60 = vld [vmem:[#allocation223_spill] sm:$0xff]  ;;  %v3575_v53 = vsel %vm3551_vm11, %v3542_v8, %v13293_v18  ;;  %v13294_v5 = vld [vmem:[#allocation222_spill] sm:$0xff]  ;;  %v13300_v47 = vld [vmem:[#allocation161_spill] sm:$0xff] }
 0x4ea   : > { %v3479_v1 = vsel %vm908_vm5, %v3447_v48, %v13292_v60  ;;  %v3607_v0 = vsel %vm3584_vm12, %v3574_v56, %v3308_v41  ;;  %v3480_v20 = vsel %vm908_vm5, %v3448_v7, %v13294_v5  ;;  %v13295_v59 = vld [vmem:[#allocation255_spill] sm:$0xff]  ;;  %v3608_v34 = vsel %vm3584_vm12, %v3575_v53, %v3310_v39  ;;  %v13296_v55 = vld [vmem:[#allocation306_spill] sm:$0xff]  ;;  %v3314_v56 = vpop.permute.xlu1 %3313  ;;  %v13305_v41 = vld [vmem:[#allocation160_spill] sm:$0xff]  ;;  %3771 = vrot.lane.b32.xlu1 %v10468_v11, %s6612_s24 }
 0x4eb   : > { %v3511_v31 = vsel %vm945_vm6, %v3479_v1, %v13295_v59  ;;  %6378 = vmatprep.mubr.msk.f32.mxu0 %vm4671_vm13, %v3607_v0  ;;  %3761 = vrot.lane.b32.xlu0 %v13296_v55, %s6612_s24  ;;  %v13297_v58 = vld [vmem:[#allocation78_spill] sm:$0xff]  ;;  %v3417_v13 = vsel %vm834_vm2, %v3385_v36, %v13300_v47  ;;  %v3387_v48 = vsel %vm815_vm3, %v13302_v19, %v13301_v61  ;;  %v13306_v7 = vld [vmem:[#allocation193_spill] sm:$0xff]  ;;  %v13308_v18 = vld [vmem:[#allocation55_spill] sm:$0xff]  ;;  %v3312_v0 = vpop.permute.xlu0 %3311 }
 0x4ec   : > { %v13298_v35 = vrot.slane %v13297_v58, 1  ;;  %v13303_v49 = vld [vmem:[#allocation254_spill] sm:$0xff]  ;;  %6379 = vmatmul.mubr.msk.f32.gmra.mrb[50].mxu0 %vm4671_vm13, %v3608_v34  ;;  %v3418_v32 = vsel %vm834_vm2, %v10390_v16, %v13305_v41  ;;  %v3449_v36 = vsel %vm871_vm4, %v3417_v13, %v13306_v7  ;;  %v13307_v60 = vld [vmem:[#allocation281_spill] sm:$0xff]  ;;  %v13309_v5 = vld [vmem:[#allocation192_spill] sm:$0xff] }
 0x4ed   : > { %v3512_v39 = vsel %vm945_vm6, %v3480_v20, %v13303_v49  ;;  %v13304_v8 = vld [vmem:[#allocation282_spill] sm:$0xff]  ;;  %v3450_v20 = vsel %vm871_vm4, %v3418_v32, %v13309_v5  ;;  %v13310_v59 = vld [vmem:[#allocation225_spill] sm:$0xff]  ;;  %v13312_v47 = vld [vmem:[#allocation224_spill] sm:$0xff] }
 0x4ee   : > { %v10510_v23 = vsel %vm472_vm1, %v13298_v35, 0.0  ;;  %v3543_v51 = vsel %vm1446_vm7, %v3511_v31, %v13304_v8  ;;  %v3544_v1 = vsel %vm1446_vm7, %v3512_v39, %v13307_v60  ;;  %v3481_v31 = vsel %vm908_vm5, %v3449_v36, %v13310_v59  ;;  %v13311_v34 = vld [vmem:[#allocation53_spill] sm:$0xff]  ;;  %v13314_v39 = vld [vmem:[#allocation307_spill] sm:$0xff]  ;;  %v13321_v5 = vld [vmem:[#allocation162_spill] sm:$0xff] }
 0x4ef   : > { %13299 = vst [vmem:[#allocation29_spill] sm:$0xff] %v10510_v23  ;;  %v3576_v53 = vsel %vm3551_vm11, %v3543_v51, %v13308_v18  ;;  %v3577_v35 = vsel %vm3551_vm11, %v3544_v1, %v13311_v34  ;;  %v3482_v13 = vsel %vm908_vm5, %v3450_v20, %v13312_v47  ;;  %v13313_v61 = vld [vmem:[#allocation257_spill] sm:$0xff]  ;;  %3765 = vrot.lane.b32.xlu0 %v13314_v39, %s6612_s24  ;;  %v13316_v41 = vld [vmem:[#allocation163_spill] sm:$0xff]  ;;  %v13319_v1 = vld [vmem:[#allocation256_spill] sm:$0xff]  ;;  %v3316_v47 = vpop.permute.xlu0 %3315 }
 0x4f0   : > { %v3609_v16 = vsel %vm3584_vm12, %v3576_v53, %v3312_v0  ;;  %v3513_v19 = vsel %vm945_vm6, %v3481_v31, %v13313_v61  ;;  %v3610_v49 = vsel %vm3584_vm12, %v3577_v35, %v3314_v56  ;;  %v13315_v8 = vld [vmem:[#allocation77_spill] sm:$0xff]  ;;  %v3419_v32 = vsel %vm834_vm2, %v3387_v48, %v13316_v41  ;;  %v13320_v53 = vld [vmem:[#allocation284_spill] sm:$0xff]  ;;  %v3318_v0 = vpop.permute.xlu1 %3317  ;;  %v13322_v59 = vld [vmem:[#allocation195_spill] sm:$0xff]  ;;  %3775 = vrot.lane.b32.xlu1 %v10510_v23, %s6612_s24 }
 0x4f1   : > { %6381 = vmatprep.mubr.msk.f32.mxu0 %vm4671_vm13, %v3609_v16  ;;  %v2521_v51 = vrot.slane %v13315_v8, 1  ;;  %v13317_v7 = vld [vmem:[#allocation125_spill] sm:$0xff]  ;;  %v3514_v18 = vsel %vm945_vm6, %v3482_v13, %v13319_v1  ;;  %v3545_v56 = vsel %vm1446_vm7, %v3513_v19, %v13320_v53  ;;  %v3420_v20 = vsel %vm834_vm2, %v3388_v52, %v13321_v5  ;;  %v13323_v48 = vld [vmem:[#allocation283_spill] sm:$0xff]  ;;  %v13325_v13 = vld [vmem:[#allocation194_spill] sm:$0xff] }
 0x4f2   : > { %v13318_v36 = vld [vmem:[#allocation137_spill] sm:$0xff]  ;;  %6382 = vmatmul.mubr.msk.f32.gmra.mrb[52].mxu0 %vm4671_vm13, %v3610_v49  ;;  %v3451_v31 = vsel %vm871_vm4, %v3419_v32, %v13322_v59  ;;  %v3546_v34 = vsel %vm1446_vm7, %v3514_v18, %v13323_v48  ;;  %v3452_v61 = vsel %vm871_vm4, %v3420_v20, %v13325_v13  ;;  %v13326_v19 = vld [vmem:[#allocation227_spill] sm:$0xff]  ;;  %v13327_v49 = vld [vmem:[#allocation300_spill] sm:$0xff] }
 0x4f3   : > { %v3389_v60 = vsel %vm815_vm3, %v13318_v36, %v13317_v7  ;;  %v13324_v35 = vld [vmem:[#allocation301_spill] sm:$0xff]  ;;  %v3483_v41 = vsel %vm908_vm5, %v3451_v31, %v13326_v19  ;;  %v3579_v7 = vsel %vm3551_vm11, %v3546_v34, %v13327_v49  ;;  %v13328_v32 = vld [vmem:[#allocation226_spill] sm:$0xff]  ;;  %v13329_v1 = vld [vmem:[#allocation259_spill] sm:$0xff] }
 0x4f4   : > { %v3578_v16 = vsel %vm3551_vm11, %v3545_v56, %v13324_v35  ;;  %v3484_v36 = vsel %vm908_vm5, %v3452_v61, %v13328_v32  ;;  %v3515_v18 = vsel %vm945_vm6, %v3483_v41, %v13329_v1  ;;  %v3612_v53 = vsel %vm3584_vm12, %v3579_v7, %v3318_v0  ;;  %v13330_v56 = vld [vmem:[#allocation308_spill] sm:$0xff]  ;;  %v13331_v5 = vld [vmem:[#allocation9_spill] sm:$0xff]  ;;  %v13336_v13 = vld [vmem:[#allocation286_spill] sm:$0xff]  ;;  %v3322_v61 = vpop.permute.xlu1 %3321 }
 0x4f5   : > { %v3611_v52 = vsel %vm3584_vm12, %v3578_v16, %v3316_v47  ;;  %3769 = vrot.lane.b32.xlu0 %v13330_v56, %s6612_s24  ;;  %v2520_v20 = vrot.slane %v13331_v5, 1  ;;  %v13332_v59 = vld [vmem:[#allocation124_spill] sm:$0xff]  ;;  %v13334_v34 = vld [vmem:[#allocation165_spill] sm:$0xff]  ;;  %v13335_v16 = vld [vmem:[#allocation258_spill] sm:$0xff]  ;;  %v3547_v0 = vsel %vm1446_vm7, %v3515_v18, %v13336_v13 }
 0x4f6   : > { %6384 = vmatprep.mubr.msk.f32.mxu0 %vm4671_vm13, %v3611_v52  ;;  %v13333_v31 = vld [vmem:[#allocation136_spill] sm:$0xff]  ;;  %v3421_v35 = vsel %vm834_vm2, %v3389_v60, %v13334_v34  ;;  %v3516_v47 = vsel %vm945_vm6, %v3484_v36, %v13335_v16  ;;  %v13338_v49 = vld [vmem:[#allocation197_spill] sm:$0xff]  ;;  %v13340_v1 = vld [vmem:[#allocation14_spill] sm:$0xff] }
 0x4f7   : > { %v3390_v48 = vsel %vm815_vm3, %v13333_v31, %v13332_v59  ;;  %6385 = vmatmul.mubr.msk.f32.gmra.mrb[54].mxu0 %vm4671_vm13, %v3612_v53  ;;  %v13337_v19 = vld [vmem:[#allocation164_spill] sm:$0xff]  ;;  %v3453_v7 = vsel %vm871_vm4, %v3421_v35, %v13338_v49  ;;  %v13339_v52 = vld [vmem:[#allocation285_spill] sm:$0xff]  ;;  %v3580_v60 = vsel %vm3551_vm11, %v3547_v0, %v13340_v1  ;;  %v3320_v59 = vpop.permute.xlu0 %3319  ;;  %v13344_v35 = vld [vmem:[#allocation83_spill] sm:$0xff] }
 0x4f8   : > { %v3422_v41 = vsel %vm834_vm2, %v3390_v48, %v13337_v19  ;;  %v3548_v32 = vsel %vm1446_vm7, %v3516_v47, %v13339_v52  ;;  %v13341_v36 = vld [vmem:[#allocation196_spill] sm:$0xff]  ;;  %v13342_v18 = vld [vmem:[#allocation85_spill] sm:$0xff]  ;;  %v3613_v48 = vsel %vm3584_vm12, %v3580_v60, %v3320_v59  ;;  %v3326_v1 = vpop.permute.xlu1 %3325  ;;  %v13349_v60 = vld [vmem:[#allocation287_spill] sm:$0xff] }
 0x4f9   : > { %v3454_v31 = vsel %vm871_vm4, %v3422_v41, %v13341_v36  ;;  %v3485_v34 = vsel %vm908_vm5, %v3453_v7, %v13342_v18  ;;  %v13343_v53 = vld [vmem:[#allocation304_spill] sm:$0xff]  ;;  %v13345_v13 = vld [vmem:[#allocation261_spill] sm:$0xff]  ;;  %6387 = vmatprep.mubr.msk.f32.mxu0 %vm4671_vm13, %v3613_v48  ;;  %v13346_v41 = vld [vmem:[#allocation22_spill] sm:$0xff]  ;;  %v10630_v18 = vsel %vm472_vm1, %v2521_v51, 0.0 }
 0x4fa   : > { %v3581_v16 = vsel %vm3551_vm11, %v3548_v32, %v13343_v53  ;;  %v3486_v47 = vsel %vm908_vm5, %v3454_v31, %v13344_v35  ;;  %v3517_v0 = vsel %vm945_vm6, %v3485_v34, %v13345_v13  ;;  %3773 = vrot.lane.b32.xlu0 %v13346_v41, %s6612_s24  ;;  %v13347_v49 = vld [vmem:[#allocation260_spill] sm:$0xff]  ;;  %v13350_v36 = vld [vmem:[#allocation86_spill] sm:$0xff]  ;;  %13351 = vst [vmem:[#allocation87_spill] sm:$0xff] %v10630_v18 }
 0x4fb   : > { %v3614_v19 = vsel %vm3584_vm12, %v3581_v16, %v3322_v61  ;;  %v3518_v7 = vsel %vm945_vm6, %v3486_v47, %v13347_v49  ;;  %v13348_v52 = vld [vmem:[#allocation288_spill] sm:$0xff]  ;;  %v3324_v31 = vpop.permute.xlu0 %3323  ;;  %v13352_v34 = vld [vmem:[#allocation10_spill] sm:$0xff]  ;;  %v13353_v16 = vld [vmem:[#allocation47_spill] sm:$0xff]  ;;  %3779 = vrot.lane.b32.xlu1 %v10630_v18, %s6612_s24  ;;  %v10639_v47 = vsel %vm472_vm1, %v2520_v20, %v2521_v51 }
 0x4fc   : > { %v3549_v32 = vsel %vm1446_vm7, %v3517_v0, %v13348_v52  ;;  %6388 = vmatmul.mubr.msk.f32.gmra.mrb[56].mxu0 %vm4671_vm13, %v3614_v19  ;;  %v3550_v59 = vsel %vm1446_vm7, %v3518_v7, %v13349_v60  ;;  %v2524_v53 = vrot.slane %v13352_v34, 1  ;;  %13354 = vst [vmem:[#allocation16_spill] sm:$0xff] %v10639_v47  ;;  %v13355_v13 = vld [vmem:[#allocation12_spill] sm:$0xff]  ;;  %v10646_v49 = vpop.permute.xlu1 %3619  ;;  %v6555_v20 = vld [vmem:[%s6707_s17] sm:$0xff]  ;;  %v13357_v52 = vld [vmem:[#allocation61_spill] sm:$0xff] }
 0x4fd   : > { %v3582_v61 = vsel %vm3551_vm11, %v3549_v32, %v13350_v36  ;;  %v3583_v48 = vsel %vm3551_vm11, %v3550_v59, %v13353_v16  ;;  %v2523_v0 = vrot.slane %v13355_v13, 1  ;;  %v2527_v32 = vrot.slane %v13357_v52, 1  ;;  %v13359_v60 = vld [vmem:[#allocation63_spill] sm:$0xff] }
 0x4fe   : > { %v3615_v35 = vsel %vm3584_vm12, %v3582_v61, %v3324_v31  ;;  %v3616_v19 = vsel %vm3584_vm12, %v3583_v48, %v3326_v1  ;;  %3777 = vrot.lane.b32.xlu0 %v10639_v47, %s6612_s24  ;;  %v10652_v51 = vsel %vm472_vm1, %v2524_v53, 0.0  ;;  %v2526_v59 = vrot.slane %v13359_v60, 1  ;;  %v6556_v61 = vld [vmem:[%s6707_s17 + $0x8] sm:$0xff]  ;;  %v6557_v48 = vld [vmem:[%s6707_s17 + $0x10] sm:$0xff] }
 0x4ff   : > { %6390 = vmatprep.mubr.msk.f32.mxu0 %vm4671_vm13, %v3615_v35  ;;  %v10649_v7 = vpop.permute.xlu0 %3617  ;;  %13356 = vst [vmem:[#allocation88_spill] sm:$0xff] %v10652_v51  ;;  %3783 = vrot.lane.b32.xlu1 %v10652_v51, %s6612_s24  ;;  %v10660_v1 = vsel %vm472_vm1, %v2523_v0, %v2524_v53  ;;  %v10672_v16 = vsel %vm472_vm1, %v2527_v32, 0.0  ;;  %v13361_v53 = vld [vmem:[#allocation65_spill] sm:$0xff] }
 0x500   : > { %6391 = vmatmul.mubr.msk.f32.gmra.mrb[58].mxu0 %vm4671_vm13, %v3616_v19  ;;  %13358 = vst [vmem:[#allocation23_spill] sm:$0xff] %v10660_v1  ;;  %v10665_v36 = vpop.permute.xlu1 %3623  ;;  %13360 = vst [vmem:[#allocation90_spill] sm:$0xff] %v10672_v16  ;;  %v2530_v35 = vrot.slane %v13361_v53, 1  ;;  %v10680_v0 = vsel %vm472_vm1, %v2526_v59, %v2527_v32  ;;  %v13363_v19 = vld [vmem:[#allocation67_spill] sm:$0xff] }
 0x501   : > { %6453 = vmatprep.mubr.msk.f32.mxu0 %vm815_vm3, %v6555_v20  ;;  %13362 = vst [vmem:[#allocation49_spill] sm:$0xff] %v10680_v0  ;;  %v2529_v20 = vrot.slane %v13363_v19, 1  ;;  %v6560_v59 = vld [vmem:[%s6707_s17 + $0x28] sm:$0xff] }
 0x502   : > { %3781 = vrot.lane.b32.xlu0 %v10660_v1, %s6612_s24  ;;  %v10692_v53 = vsel %vm472_vm1, %v2530_v35, 0.0  ;;  %v6569_v1 = vld [vmem:[%s6707_s17 + $0x70] sm:$0xff] }
 0x503   : > { %v10669_v31 = vpop.permute.xlu0 %3621  ;;  %3787 = vrot.lane.b32.xlu1 %v10672_v16, %s6612_s24  ;;  %13364 = vst [vmem:[#allocation92_spill] sm:$0xff] %v10692_v53  ;;  %v10699_v32 = vsel %vm472_vm1, %v2529_v20, %v2530_v35  ;;  %v6561_v16 = vld [vmem:[%s6707_s17 + $0x30] sm:$0xff]  ;;  %v6562_v20 = vld [vmem:[%s6707_s17 + $0x38] sm:$0xff] }
 0x504   : > { %6454 = vmatmul.mubr.msk.f32.vlgmr.msra.gmra.mrb[60].mxu0 %vm815_vm3, %v6556_v61  ;;  %v10685_v61 = vpop.permute.xlu1 %3627  ;;  %13365 = vst [vmem:[#allocation30_spill] sm:$0xff] %v10699_v32 }
 0x505   : > { %6456 = vmatprep.mubr.msk.f32.mxu0 %vm815_vm3, %v6557_v48 }
 0x506   : > { %3785 = vrot.lane.b32.xlu0 %v10680_v0, %s6612_s24 }
 0x507   : > { %v10689_v48 = vpop.permute.xlu0 %3625  ;;  %3791 = vrot.lane.b32.xlu1 %v10692_v53, %s6612_s24 }
 0x508   : > { %6457 = vmatmul.mubr.msk.f32.gmra.mrb[62].mxu0 %vm815_vm3, %v6558_v37  ;;  %v10703_v37 = vpop.permute.xlu1 %3631 }
 0x509   : > { %6459 = vmatprep.mubr.msk.f32.mxu0 %vm815_vm3, %v6559_v17  ;;  %v13366_v17 = vld [vmem:[#allocation62_spill] sm:$0xff] }
 0x50a   : > { %3789 = vrot.lane.b32.xlu0 %v10699_v32, %s6612_s24 }
 0x50b   : > { %v10707_v19 = vpop.permute.xlu0 %3629  ;;  %3827 = vrot.lane.b32.xlu1 %v13056_v10, %s6613_s14 }
 0x50c   : > { %6460 = vmatmul.mubr.msk.f32.gmra.mrb[64].mxu0 %vm815_vm3, %v6560_v59  ;;  %v10715_v35 = vpop.permute.xlu1 %3635  ;;  %v6563_v59 = vld [vmem:[%s6707_s17 + $0x40] sm:$0xff] }
 0x50d   : > { %6462 = vmatprep.mubr.msk.f32.mxu0 %vm815_vm3, %v6561_v16  ;;  %13367 = vst [vmem:[#allocation93_spill] sm:$0xff] %v10715_v35  ;;  %v13369_v16 = vld [vmem:[#allocation54_spill] sm:$0xff]  ;;  %v13404_v35 = vld [vmem:[#allocation40_spill] sm:$0xff] }
 0x50e   : > { %3825 = vrot.lane.b32.xlu0 %v13366_v17, %s6613_s14 }
 0x50f   : > { %v10719_v53 = vpop.permute.xlu0 %3633  ;;  %3831 = vrot.lane.b32.xlu1 %v8251_v25, %s6613_s14 }
 0x510   : > { %6463 = vmatmul.mubr.msk.f32.gmra.mrb[66].mxu0 %vm815_vm3, %v6562_v20  ;;  %13368 = vst [vmem:[#allocation18_spill] sm:$0xff] %v10719_v53  ;;  %v10727_v32 = vpop.permute.xlu1 %3639  ;;  %v6565_v20 = vld [vmem:[%s6707_s17 + $0x50] sm:$0xff] }
 0x511   : > { %6465 = vmatprep.mubr.msk.f32.mxu0 %vm815_vm3, %v6563_v59  ;;  %13370 = vst [vmem:[#allocation96_spill] sm:$0xff] %v10727_v32  ;;  %v13372_v59 = vld [vmem:[#allocation74_spill] sm:$0xff] }
 0x512   : > { %3829 = vrot.lane.b32.xlu0 %v13369_v16, %s6613_s14 }
 0x513   : > { %v10731_v0 = vpop.permute.xlu0 %3637  ;;  %3835 = vrot.lane.b32.xlu1 %v8280_v46, %s6613_s14 }
 0x514   : > { %6466 = vmatmul.mubr.msk.f32.gmra.mrb[68].mxu0 %vm815_vm3, %v6564_v4  ;;  %13371 = vst [vmem:[#allocation24_spill] sm:$0xff] %v10731_v0  ;;  %v10739_v52 = vpop.permute.xlu1 %3643  ;;  %v6567_v4 = vld [vmem:[%s6707_s17 + $0x60] sm:$0xff]  ;;  %v13402_v0 = vld [vmem:[#allocation7_spill] sm:$0xff] }
 0x515   : > { %6468 = vmatprep.mubr.msk.f32.mxu0 %vm815_vm3, %v6565_v20  ;;  %13373 = vst [vmem:[#allocation97_spill] sm:$0xff] %v10739_v52  ;;  %v13375_v20 = vld [vmem:[#allocation57_spill] sm:$0xff] }
 0x516   : > { %3833 = vrot.lane.b32.xlu0 %v13372_v59, %s6613_s14 }
 0x517   : > { %v10743_v60 = vpop.permute.xlu0 %3641  ;;  %3839 = vrot.lane.b32.xlu1 %v8309_v45, %s6613_s14 }
 0x518   : > { %6469 = vmatmul.mubr.msk.f32.gmra.mrb[70].mxu0 %vm815_vm3, %v6566_v24  ;;  %13374 = vst [vmem:[#allocation64_spill] sm:$0xff] %v10743_v60  ;;  %v10751_v51 = vpop.permute.xlu1 %3647  ;;  %v13378_v24 = vld [vmem:[#allocation3_spill] sm:$0xff]  ;;  %v6570_v60 = vld [vmem:[%s6707_s17 + $0x78] sm:$0xff] }
 0x519   : > { %6471 = vmatprep.mubr.msk.f32.mxu0 %vm815_vm3, %v6567_v4  ;;  %13376 = vst [vmem:[#allocation98_spill] sm:$0xff] %v10751_v51 }
 0x51a   : > { %3837 = vrot.lane.b32.xlu0 %v13375_v20, %s6613_s14 }
 0x51b   : > { %v10755_v52 = vpop.permute.xlu0 %3645  ;;  %3843 = vrot.lane.b32.xlu1 %v8338_v6, %s6613_s14 }
 0x51c   : > { %6472 = vmatmul.mubr.msk.f32.gmra.mrb[72].mxu0 %vm815_vm3, %v6568_v43  ;;  %13377 = vst [vmem:[#allocation132_spill] sm:$0xff] %v10755_v52  ;;  %v10763_v4 = vpop.permute.xlu1 %3651  ;;  %v13381_v43 = vld [vmem:[#allocation51_spill] sm:$0xff] }
 0x51d   : > { %6474 = vmatprep.mubr.msk.f32.mxu0 %vm815_vm3, %v6569_v1  ;;  %13379 = vst [vmem:[#allocation31_spill] sm:$0xff] %v10763_v4  ;;  %v13384_v4 = vld [vmem:[#allocation72_spill] sm:$0xff] }
 0x51e   : > { %3841 = vrot.lane.b32.xlu0 %v13378_v24, %s6613_s14 }
 0x51f   : > { %v10767_v51 = vpop.permute.xlu0 %3649  ;;  %3847 = vrot.lane.b32.xlu1 %v8367_v33, %s6613_s14 }
 0x520   : > { %6475 = vmatmul.mubr.msk.f32.gmra.mrb[74].mxu0 %vm815_vm3, %v6570_v60  ;;  %13380 = vst [vmem:[#allocation100_spill] sm:$0xff] %v10767_v51  ;;  %v10773_v1 = vpop.permute.xlu1 %3655  ;;  %v13387_v51 = vld [vmem:[#allocation5_spill] sm:$0xff] }
 0x521   : > { %13382 = vst [vmem:[#allocation43_spill] sm:$0xff] %v10773_v1 }
 0x522   : > { %3845 = vrot.lane.b32.xlu0 %v13381_v43, %s6613_s14 }
 0x523   : > { %v10775_v52 = vpop.permute.xlu0 %3653  ;;  %3851 = vrot.lane.b32.xlu1 %v8400_v54, %s6613_s14 }
 0x524   : > { %13383 = vst [vmem:[#allocation102_spill] sm:$0xff] %v10775_v52  ;;  %v10781_v34 = vpop.permute.xlu1 %3659  ;;  %v13390_v52 = vld [vmem:[#allocation50_spill] sm:$0xff] }
 0x525   : > { %13385 = vst [vmem:[#allocation79_spill] sm:$0xff] %v10781_v34 }
 0x526   : > { %3849 = vrot.lane.b32.xlu0 %v13384_v4, %s6613_s14 }
 0x527   : > { %v10783_v60 = vpop.permute.xlu0 %3657  ;;  %3855 = vrot.lane.b32.xlu1 %v13246_v50, %s6613_s14 }
 0x528   : > { %13386 = vst [vmem:[#allocation103_spill] sm:$0xff] %v10783_v60  ;;  %v10789_v32 = vpop.permute.xlu1 %3663  ;;  %v13393_v60 = vld [vmem:[#allocation26_spill] sm:$0xff] }
 0x529   : > { %13388 = vst [vmem:[#allocation128_spill] sm:$0xff] %v10789_v32 }
 0x52a   : > { %3853 = vrot.lane.b32.xlu0 %v13387_v51, %s6613_s14 }
 0x52b   : > { %v10791_v1 = vpop.permute.xlu0 %3661  ;;  %3859 = vrot.lane.b32.xlu1 %v13263_v57, %s6613_s14 }
 0x52c   : > { %13389 = vst [vmem:[#allocation82_spill] sm:$0xff] %v10791_v1  ;;  %v10797_v9 = vpop.permute.xlu1 %3667  ;;  %v13396_v1 = vld [vmem:[#allocation4_spill] sm:$0xff] }
 0x52d   : > { %13391 = vst [vmem:[#allocation106_spill] sm:$0xff] %v10797_v9 }
 0x52e   : > { %3857 = vrot.lane.b32.xlu0 %v13390_v52, %s6613_s14 }
 0x52f   : > { %v10799_v34 = vpop.permute.xlu0 %3665  ;;  %3863 = vrot.lane.b32.xlu1 %v13280_v12, %s6613_s14 }
 0x530   : > { %13392 = vst [vmem:[#allocation84_spill] sm:$0xff] %v10799_v34  ;;  %v10805_v13 = vpop.permute.xlu1 %3671 }
 0x531   : > { %13394 = vst [vmem:[#allocation107_spill] sm:$0xff] %v10805_v13 }
 0x532   : > { %3861 = vrot.lane.b32.xlu0 %v13393_v60, %s6613_s14 }
 0x533   : > { %v10807_v32 = vpop.permute.xlu0 %3669  ;;  %3867 = vrot.lane.b32.xlu1 %v13297_v58, %s6613_s14 }
 0x534   : > { %13395 = vst [vmem:[#allocation167_spill] sm:$0xff] %v10807_v32  ;;  %v10813_v18 = vpop.permute.xlu1 %3675  ;;  %v13401_v32 = vld [vmem:[#allocation8_spill] sm:$0xff] }
 0x535   : > { %13397 = vst [vmem:[#allocation89_spill] sm:$0xff] %v10813_v18 }
 0x536   : > { %3865 = vrot.lane.b32.xlu0 %v13396_v1, %s6613_s14 }
 0x537   : > { %v10815_v9 = vpop.permute.xlu0 %3673  ;;  %3871 = vrot.lane.b32.xlu1 %v13315_v8, %s6613_s14 }
 0x538   : > { %13398 = vst [vmem:[#allocation108_spill] sm:$0xff] %v10815_v9  ;;  %v10821_v34 = vpop.permute.xlu1 %3679 }
 0x539   : > { %13399 = vst [vmem:[#allocation166_spill] sm:$0xff] %v10821_v34 }
 0x53a   : > { %3869 = vrot.lane.b32.xlu0 %v13331_v5, %s6613_s14 }
 0x53b   : > { %v10823_v13 = vpop.permute.xlu0 %3677  ;;  %3923 = vrot.lane.b32.xlu1 %v13401_v32, %s6614_s15 }
 0x53c   : > { %13400 = vst [vmem:[#allocation199_spill] sm:$0xff] %v10823_v13  ;;  %v10829_v47 = vpop.permute.xlu1 %3731  ;;  %v13403_v13 = vld [vmem:[#allocation21_spill] sm:$0xff] }
 0x53e   : > { %3921 = vrot.lane.b32.xlu0 %v13402_v0, %s6614_s15 }
 0x53f   : > { %v10831_v18 = vpop.permute.xlu0 %3729  ;;  %4020 = vrot.lane.b32.xlu1 %v10075_v27, %s6615_s25 }
 0x540   : > { %v10837_v9 = vpop.permute.xlu1 %3735 }
 0x542   : > { %4018 = vrot.lane.b32.xlu0 %v9839_v14, %s6615_s25 }
 0x543   : > { %v10839_v34 = vpop.permute.xlu0 %3733  ;;  %4116 = vrot.lane.b32.xlu1 %v8251_v25, %s6616_s13 }
 0x544   : > { %v10845_v0 = vpop.permute.xlu1 %3739 }
 0x546   : > { %4114 = vrot.lane.b32.xlu0 %v13369_v16, %s6616_s13 }
 0x547   : > { %v10847_v32 = vpop.permute.xlu0 %3737  ;;  %3925 = vrot.lane.b32.xlu1 %v13403_v13, %s6614_s15 }
 0x548   : > { %v10853_v14 = vpop.permute.xlu1 %3743 }
 0x54a   : > { %4210 = vrot.lane.b32.xlu0 %v13403_v13, %s6617_s18 }
 0x54b   : > { %v10855_v27 = vpop.permute.xlu0 %3741  ;;  %4307 = vrot.lane.b32.xlu1 %v9844_v44, %s6618_s23 }
 0x54c   : > { %v10861_v5 = vpop.permute.xlu1 %3747 }
 0x54d   : > { %13405 = vst [vmem:[#allocation91_spill] sm:$0xff] %v10861_v5 }
 0x54e   : > { %4212 = vrot.lane.b32.xlu0 %v13404_v35, %s6617_s18 }
 0x54f   : > { %v10863_v8 = vpop.permute.xlu0 %3745  ;;  %4022 = vrot.lane.b32.xlu1 %v9844_v44, %s6615_s25 }
 0x550   : > { %v10869_v13 = vpop.permute.xlu1 %3751 }
 0x551   : > { %13406 = vst [vmem:[#allocation110_spill] sm:$0xff] %v10869_v13  ;;  %v13412_v13 = vld [vmem:[#allocation46_spill] sm:$0xff] }
 0x552   : > { %3927 = vrot.lane.b32.xlu0 %v13404_v35, %s6614_s15 }
 0x553   : > { %v10871_v23 = vpop.permute.xlu0 %3749  ;;  %4024 = vrot.lane.b32.xlu1 %v10119_v22, %s6615_s25 }
 0x554   : > { %13407 = vst [vmem:[#allocation198_spill] sm:$0xff] %v10871_v23  ;;  %v10877_v53 = vpop.permute.xlu1 %3755 }
 0x555   : > { %13408 = vst [vmem:[#allocation229_spill] sm:$0xff] %v10877_v53 }
 0x556   : > { %4309 = vrot.lane.b32.xlu0 %v10119_v22, %s6618_s23 }
 0x557   : > { %v10879_v5 = vpop.permute.xlu0 %3753  ;;  %4120 = vrot.lane.b32.xlu1 %v8280_v46, %s6616_s13 }
 0x558   : > { %13409 = vst [vmem:[#allocation135_spill] sm:$0xff] %v10879_v5  ;;  %v10885_v44 = vpop.permute.xlu1 %3759  ;;  %v13415_v5 = vld [vmem:[#allocation11_spill] sm:$0xff] }
 0x559   : > { %13410 = vst [vmem:[#allocation228_spill] sm:$0xff] %v10885_v44 }
 0x55a   : > { %4118 = vrot.lane.b32.xlu0 %v13372_v59, %s6616_s13 }
 0x55b   : > { %v10887_v35 = vpop.permute.xlu0 %3757  ;;  %3929 = vrot.lane.b32.xlu1 %v13412_v13, %s6614_s15 }
 0x55c   : > { %13411 = vst [vmem:[#allocation134_spill] sm:$0xff] %v10887_v35  ;;  %v10893_v22 = vpop.permute.xlu1 %3763 }
 0x55d   : > { %13413 = vst [vmem:[#allocation39_spill] sm:$0xff] %v10893_v22 }
 0x55e   : > { %4214 = vrot.lane.b32.xlu0 %v13412_v13, %s6617_s18 }
 0x55f   : > { %v10895_v53 = vpop.permute.xlu0 %3761  ;;  %4311 = vrot.lane.b32.xlu1 %v9851_v15, %s6618_s23 }
 0x560   : > { %13414 = vst [vmem:[#allocation2_spill] sm:$0xff] %v10895_v53  ;;  %v10901_v23 = vpop.permute.xlu1 %3767 }
 0x561   : > { %13416 = vst [vmem:[#allocation201_spill] sm:$0xff] %v10901_v23 }
 0x562   : > { %4216 = vrot.lane.b32.xlu0 %v13415_v5, %s6617_s18 }
 0x563   : > { %v10903_v44 = vpop.permute.xlu0 %3765  ;;  %4026 = vrot.lane.b32.xlu1 %v9851_v15, %s6615_s25 }
 0x564   : > { %13417 = vst [vmem:[#allocation200_spill] sm:$0xff] %v10903_v44  ;;  %v10909_v13 = vpop.permute.xlu1 %3771 }
 0x565   : > { %13418 = vst [vmem:[#allocation233_spill] sm:$0xff] %v10909_v13  ;;  %v13424_v13 = vld [vmem:[#allocation60_spill] sm:$0xff] }
 0x566   : > { %3931 = vrot.lane.b32.xlu0 %v13415_v5, %s6614_s15 }
 0x567   : > { %v10911_v22 = vpop.permute.xlu0 %3769  ;;  %4028 = vrot.lane.b32.xlu1 %v10162_v38, %s6615_s25 }
 0x568   : > { %13419 = vst [vmem:[#allocation139_spill] sm:$0xff] %v10911_v22  ;;  %v10917_v53 = vpop.permute.xlu1 %3775 }
 0x569   : > { %13420 = vst [vmem:[#allocation94_spill] sm:$0xff] %v10917_v53 }
 0x56a   : > { %4313 = vrot.lane.b32.xlu0 %v10162_v38, %s6618_s23 }
 0x56b   : > { %4124 = vrot.lane.b32.xlu1 %v8309_v45, %s6616_s13 }
 0x56c   : > { %v10919_v23 = vpop.permute.xlu0 %3773 }
 0x56d   : > { %13421 = vst [vmem:[#allocation112_spill] sm:$0xff] %v10919_v23  ;;  %v10925_v15 = vpop.permute.xlu1 %3779  ;;  %v13427_v23 = vld [vmem:[#allocation35_spill] sm:$0xff] }
 0x56e   : > { %4122 = vrot.lane.b32.xlu0 %v13375_v20, %s6616_s13  ;;  %13422 = vst [vmem:[#allocation232_spill] sm:$0xff] %v10925_v15 }
 0x56f   : > { %3933 = vrot.lane.b32.xlu1 %v13424_v13, %s6614_s15 }
 0x570   : > { %v10927_v5 = vpop.permute.xlu0 %3777 }
 0x571   : > { %13423 = vst [vmem:[#allocation138_spill] sm:$0xff] %v10927_v5  ;;  %v10933_v38 = vpop.permute.xlu1 %3783 }
 0x572   : > { %4218 = vrot.lane.b32.xlu0 %v13424_v13, %s6617_s18  ;;  %13425 = vst [vmem:[#allocation171_spill] sm:$0xff] %v10933_v38 }
 0x573   : > { %4315 = vrot.lane.b32.xlu1 %v9856_v2, %s6618_s23 }
 0x574   : > { %v10935_v53 = vpop.permute.xlu0 %3781 }
 0x575   : > { %13426 = vst [vmem:[#allocation169_spill] sm:$0xff] %v10935_v53  ;;  %v10941_v22 = vpop.permute.xlu1 %3787 }
 0x576   : > { %4220 = vrot.lane.b32.xlu0 %v13427_v23, %s6617_s18  ;;  %13428 = vst [vmem:[#allocation203_spill] sm:$0xff] %v10941_v22 }
 0x577   : > { %4030 = vrot.lane.b32.xlu1 %v9856_v2, %s6615_s25 }
 0x578   : > { %v10943_v15 = vpop.permute.xlu0 %3785 }
 0x579   : > { %13429 = vst [vmem:[#allocation202_spill] sm:$0xff] %v10943_v15  ;;  %v10949_v13 = vpop.permute.xlu1 %3791  ;;  %v13433_v15 = vld [vmem:[#allocation44_spill] sm:$0xff] }
 0x57a   : > { %3935 = vrot.lane.b32.xlu0 %v13427_v23, %s6614_s15  ;;  %13430 = vst [vmem:[#allocation235_spill] sm:$0xff] %v10949_v13  ;;  %v13432_v13 = vld [vmem:[#allocation19_spill] sm:$0xff] }
 0x57b   : > { %4032 = vrot.lane.b32.xlu1 %v10206_v40, %s6615_s25 }
 0x57c   : > { %v10951_v38 = vpop.permute.xlu0 %3789 }
 0x57d   : > { %13431 = vst [vmem:[#allocation141_spill] sm:$0xff] %v10951_v38  ;;  %v10957_v53 = vpop.permute.xlu1 %3827 }
 0x57e   : > { %4317 = vrot.lane.b32.xlu0 %v10206_v40, %s6618_s23 }
 0x57f   : > { %4128 = vrot.lane.b32.xlu1 %v8338_v6, %s6616_s13 }
 0x580   : > { %v10959_v22 = vpop.permute.xlu0 %3825 }
 0x581   : > { %v10965_v2 = vpop.permute.xlu1 %3831 }
 0x582   : > { %4126 = vrot.lane.b32.xlu0 %v13378_v24, %s6616_s13 }
 0x583   : > { %3937 = vrot.lane.b32.xlu1 %v13432_v13, %s6614_s15 }
 0x584   : > { %v10967_v23 = vpop.permute.xlu0 %3829 }
 0x585   : > { %v10973_v40 = vpop.permute.xlu1 %3835 }
 0x586   : > { %4222 = vrot.lane.b32.xlu0 %v13432_v13, %s6617_s18 }
 0x587   : > { %4319 = vrot.lane.b32.xlu1 %v13245_v3, %s6618_s23 }
 0x588   : > { %v10975_v38 = vpop.permute.xlu0 %3833 }
 0x589   : > { %v10981_v5 = vpop.permute.xlu1 %3839 }
 0x58a   : > { %4224 = vrot.lane.b32.xlu0 %v13433_v15, %s6617_s18 }
 0x58b   : > { %4034 = vrot.lane.b32.xlu1 %v13245_v3, %s6615_s25  ;;  %v11003_v3 = vpop.f32.mrb[28].mxu0 }
 0x58c   : > { %v10983_v44 = vpop.permute.xlu0 %3837  ;;  %13437 = vst [vmem:[#allocation140_spill] sm:$0xff] %v11003_v3 }
 0x58d   : > { %v10989_v13 = vpop.permute.xlu1 %3843 }
 0x58e   : > { %3939 = vrot.lane.b32.xlu0 %v13433_v15, %s6614_s15  ;;  %13434 = vst [vmem:[#allocation95_spill] sm:$0xff] %v10989_v13  ;;  %v11009_v13 = vpop.f32.mrb[29].mxu0 }
 0x58f   : > { %4036 = vrot.lane.b32.xlu1 %v10250_v21, %s6615_s25  ;;  %13439 = vst [vmem:[#allocation70_spill] sm:$0xff] %v11009_v13 }
 0x590   : > { %v10991_v35 = vpop.permute.xlu0 %3841 }
 0x591   : > { %v10997_v6 = vpop.permute.xlu1 %3847 }
 0x592   : > { %4321 = vrot.lane.b32.xlu0 %v10250_v21, %s6618_s23  ;;  %13435 = vst [vmem:[#allocation113_spill] sm:$0xff] %v10997_v6  ;;  %v13441_v21 = vld [vmem:[#allocation32_spill] sm:$0xff]  ;;  %v11015_v6 = vpop.f32.mrb[30].mxu0 }
 0x593   : > { %4132 = vrot.lane.b32.xlu1 %v8367_v33, %s6616_s13  ;;  %13442 = vst [vmem:[#allocation172_spill] sm:$0xff] %v11015_v6  ;;  %v11021_v3 = vpop.f32.mrb[31].mxu0 }
 0x594   : > { %v10999_v24 = vpop.permute.xlu0 %3845  ;;  %13444 = vst [vmem:[#allocation289_spill] sm:$0xff] %v11021_v3  ;;  %v11027_v13 = vpop.f32.mrb[32].mxu0 }
 0x595   : > { %13436 = vst [vmem:[#allocation234_spill] sm:$0xff] %v10999_v24  ;;  %v11007_v15 = vpop.permute.xlu1 %3851  ;;  %13446 = vst [vmem:[#allocation237_spill] sm:$0xff] %v11027_v13  ;;  %v11033_v6 = vpop.f32.mrb[33].mxu0 }
 0x596   : > { %4130 = vrot.lane.b32.xlu0 %v13381_v43, %s6616_s13  ;;  %13438 = vst [vmem:[#allocation173_spill] sm:$0xff] %v11007_v15  ;;  %v13447_v15 = vld [vmem:[#allocation28_spill] sm:$0xff]  ;;  %13449 = vst [vmem:[#allocation99_spill] sm:$0xff] %v11033_v6 }
 0x597   : > { %3941 = vrot.lane.b32.xlu1 %v13441_v21, %s6614_s15 }
 0x598   : > { %v11011_v45 = vpop.permute.xlu0 %3849 }
 0x599   : > { %13440 = vst [vmem:[#allocation290_spill] sm:$0xff] %v11011_v45  ;;  %v11019_v33 = vpop.permute.xlu1 %3855 }
 0x59a   : > { %4226 = vrot.lane.b32.xlu0 %v13441_v21, %s6617_s18  ;;  %13443 = vst [vmem:[#allocation205_spill] sm:$0xff] %v11019_v33  ;;  %v11039_v21 = vpop.f32.mrb[34].mxu0 }
 0x59b   : > { %4323 = vrot.lane.b32.xlu1 %v13262_v28, %s6618_s23  ;;  %13451 = vst [vmem:[#allocation236_spill] sm:$0xff] %v11039_v21  ;;  %v11045_v13 = vpop.f32.mrb[35].mxu0 }
 0x59c   : > { %v11023_v24 = vpop.permute.xlu0 %3853  ;;  %13453 = vst [vmem:[#allocation142_spill] sm:$0xff] %v11045_v13 }
 0x59d   : > { %13445 = vst [vmem:[#allocation204_spill] sm:$0xff] %v11023_v24  ;;  %v11031_v45 = vpop.permute.xlu1 %3859 }
 0x59e   : > { %4228 = vrot.lane.b32.xlu0 %v13447_v15, %s6617_s18  ;;  %13448 = vst [vmem:[#allocation143_spill] sm:$0xff] %v11031_v45  ;;  %v11051_v6 = vpop.f32.mrb[36].mxu0 }
 0x59f   : > { %4038 = vrot.lane.b32.xlu1 %v13262_v28, %s6615_s25  ;;  %13455 = vst [vmem:[#allocation263_spill] sm:$0xff] %v11051_v6  ;;  %v11057_v21 = vpop.f32.mrb[37].mxu0 }
 0x5a0   : > { %v11035_v43 = vpop.permute.xlu0 %3857  ;;  %13457 = vst [vmem:[#allocation174_spill] sm:$0xff] %v11057_v21 }
 0x5a1   : > { %13450 = vst [vmem:[#allocation116_spill] sm:$0xff] %v11035_v43  ;;  %v11043_v3 = vpop.permute.xlu1 %3863 }
 0x5a2   : > { %3943 = vrot.lane.b32.xlu0 %v13447_v15, %s6614_s15  ;;  %13452 = vst [vmem:[#allocation264_spill] sm:$0xff] %v11043_v3  ;;  %v11063_v15 = vpop.f32.mrb[38].mxu0 }
 0x5a3   : > { %4040 = vrot.lane.b32.xlu1 %v10294_v29, %s6615_s25  ;;  %13459 = vst [vmem:[#allocation291_spill] sm:$0xff] %v11063_v15  ;;  %v11069_v6 = vpop.f32.mrb[39].mxu0 }
 0x5a4   : > { %v11047_v33 = vpop.permute.xlu0 %3861  ;;  %13461 = vst [vmem:[#allocation239_spill] sm:$0xff] %v11069_v6  ;;  %v13467_v6 = vld [vmem:[#allocation13_spill] sm:$0xff] }
 0x5a5   : > { %13454 = vst [vmem:[#allocation175_spill] sm:$0xff] %v11047_v33  ;;  %v11055_v28 = vpop.permute.xlu1 %3867 }
 0x5a6   : > { %4325 = vrot.lane.b32.xlu0 %v10294_v29, %s6618_s23  ;;  %13456 = vst [vmem:[#allocation292_spill] sm:$0xff] %v11055_v28  ;;  %v13463_v29 = vld [vmem:[#allocation36_spill] sm:$0xff]  ;;  %v11075_v21 = vpop.f32.mrb[40].mxu0 }
 0x5a7   : > { %4136 = vrot.lane.b32.xlu1 %v8400_v54, %s6616_s13  ;;  %13464 = vst [vmem:[#allocation101_spill] sm:$0xff] %v11075_v21 }
 0x5a8   : > { %v11059_v45 = vpop.permute.xlu0 %3865 }
 0x5a9   : > { %13458 = vst [vmem:[#allocation207_spill] sm:$0xff] %v11059_v45  ;;  %v11067_v13 = vpop.permute.xlu1 %3871  ;;  %v11079_v45 = vpop.f32.mrb[41].mxu0 }
 0x5aa   : > { %4134 = vrot.lane.b32.xlu0 %v13384_v4, %s6616_s13  ;;  %13460 = vst [vmem:[#allocation206_spill] sm:$0xff] %v11067_v13  ;;  %13465 = vst [vmem:[#allocation117_spill] sm:$0xff] %v11079_v45  ;;  %v11083_v13 = vpop.f32.mrb[42].mxu0 }
 0x5ab   : > { %3945 = vrot.lane.b32.xlu1 %v13463_v29, %s6614_s15  ;;  %13466 = vst [vmem:[#allocation238_spill] sm:$0xff] %v11083_v13  ;;  %v11087_v33 = vpop.f32.mrb[43].mxu0  ;;  %v13471_v13 = vld [vmem:[#allocation73_spill] sm:$0xff] }
 0x5ac   : > { %v11071_v3 = vpop.permute.xlu0 %3869  ;;  %13468 = vst [vmem:[#allocation266_spill] sm:$0xff] %v11087_v33  ;;  %v4403_v24 = vsel %vm815_vm3, %v13471_v13, %v10649_v7 }
 0x5ad   : > { %13462 = vst [vmem:[#allocation145_spill] sm:$0xff] %v11071_v3  ;;  %v3924_v28 = vpop.permute.xlu1 %3923  ;;  %v4435_v33 = vsel %vm834_vm2, %v4403_v24, %v10831_v18 }
 0x5ae   : > { %4230 = vrot.lane.b32.xlu0 %v13463_v29, %s6617_s18  ;;  %v11091_v29 = vpop.f32.mrb[44].mxu0 }
 0x5af   : > { %4327 = vrot.lane.b32.xlu1 %v13279_v26, %s6618_s23  ;;  %13469 = vst [vmem:[#allocation144_spill] sm:$0xff] %v11091_v29  ;;  %v11095_v21 = vpop.f32.mrb[45].mxu0 }
 0x5b0   : > { %v3922_v15 = vpop.permute.xlu0 %3921  ;;  %13470 = vst [vmem:[#allocation177_spill] sm:$0xff] %v11095_v21 }
 0x5b1   : > { %v4021_v3 = vpop.permute.xlu1 %4020 }
 0x5b2   : > { %4232 = vrot.lane.b32.xlu0 %v13467_v6, %s6617_s18 }
 0x5b3   : > { %4042 = vrot.lane.b32.xlu1 %v13279_v26, %s6615_s25 }
 0x5b4   : > { %v4019_v43 = vpop.permute.xlu0 %4018  ;;  %v11104_v26 = vpop.f32.mrb[46].mxu0 }
 0x5b5   : > { %v4117_v45 = vpop.permute.xlu1 %4116  ;;  %v11110_v29 = vpop.f32.mrb[47].mxu0 }
 0x5b6   : > { %3947 = vrot.lane.b32.xlu0 %v13467_v6, %s6614_s15  ;;  %v4467_v6 = vsel %vm871_vm4, %v4435_v33, %v10959_v22 }
 0x5b7   : > { %4044 = vrot.lane.b32.xlu1 %v10338_v63, %s6615_s25  ;;  %v4499_v4 = vsel %vm908_vm5, %v4467_v6, %v3922_v15 }
 0x5b8   : > { %v4115_v54 = vpop.permute.xlu0 %4114  ;;  %v4531_v13 = vsel %vm945_vm6, %v4499_v4, %v4019_v43  ;;  %v13472_v4 = vld [vmem:[#allocation20_spill] sm:$0xff] }
 0x5b9   : > { %v3926_v21 = vpop.permute.xlu1 %3925  ;;  %v4563_v18 = vsel %vm1446_vm7, %v4531_v13, %v4115_v54  ;;  %v11117_v24 = vpop.f32.mrb[48].mxu0  ;;  %v4404_v54 = vsel %vm815_vm3, %v13054_v30, %v10646_v49 }
 0x5ba   : > { %4329 = vrot.lane.b32.xlu0 %v10338_v63, %s6618_s23  ;;  %v11122_v63 = vpop.f32.mrb[49].mxu0 }
 0x5bb   : > { %4140 = vrot.lane.b32.xlu1 %v13246_v50, %s6616_s13 }
 0x5bc   : > { %v4211_v7 = vpop.permute.xlu0 %4210 }
 0x5bd   : > { %v4595_v33 = vsel %vm3551_vm11, %v4563_v18, %v4211_v7  ;;  %v4308_v22 = vpop.permute.xlu1 %4307  ;;  %v4436_v7 = vsel %vm834_vm2, %v4404_v54, %v10829_v47 }
 0x5be   : > { %4138 = vrot.lane.b32.xlu0 %v13387_v51, %s6616_s13  ;;  %v4627_v15 = vsel %vm3584_vm12, %v4595_v33, %v4308_v22  ;;  %v4468_v33 = vsel %vm871_vm4, %v4436_v7, %v10957_v53 }
 0x5bf   : > { %3949 = vrot.lane.b32.xlu1 %v13472_v4, %s6614_s15  ;;  %6403 = vmatprep.mubr.msk.f32.mxu1 %vm4671_vm13, %v4627_v15  ;;  %v11131_v43 = vpop.f32.mrb[50].mxu0  ;;  %v4500_v15 = vsel %vm908_vm5, %v4468_v33, %v3924_v28 }
 0x5c0   : > { %v4213_v6 = vpop.permute.xlu0 %4212  ;;  %v11137_v13 = vpop.f32.mrb[51].mxu0  ;;  %v4532_v30 = vsel %vm945_vm6, %v4500_v15, %v4021_v3 }
 0x5c1   : > { %13473 = vst [vmem:[#allocation265_spill] sm:$0xff] %v11137_v13  ;;  %v4023_v18 = vpop.permute.xlu1 %4022  ;;  %v4564_v47 = vsel %vm1446_vm7, %v4532_v30, %v4117_v45 }
 0x5c2   : > { %4234 = vrot.lane.b32.xlu0 %v13472_v4, %s6617_s18  ;;  %v13474_v4 = vld [vmem:[#allocation58_spill] sm:$0xff]  ;;  %v4596_v53 = vsel %vm3551_vm11, %v4564_v47, %v4213_v6  ;;  %v4405_v6 = vsel %vm815_vm3, %v13366_v17, %v10669_v31 }
 0x5c3   : > { %4331 = vrot.lane.b32.xlu1 %v13296_v55, %s6618_s23 }
 0x5c4   : > { %v3928_v22 = vpop.permute.xlu0 %3927 }
 0x5c5   : > { %v11145_v49 = vpop.f32.mrb[52].mxu0  ;;  %v4025_v13 = vpop.permute.xlu1 %4024 }
 0x5c6   : > { %4236 = vrot.lane.b32.xlu0 %v13474_v4, %s6617_s18  ;;  %v11150_v54 = vpop.f32.mrb[53].mxu0 }
 0x5c7   : > { %4046 = vrot.lane.b32.xlu1 %v13296_v55, %s6615_s25  ;;  %v4437_v55 = vsel %vm834_vm2, %v4405_v6, %v10839_v34 }
 0x5c8   : > { %v4310_v7 = vpop.permute.xlu0 %4309 }
 0x5c9   : > { %v4628_v28 = vsel %vm3584_vm12, %v4596_v53, %v4310_v7  ;;  %v4121_v45 = vpop.permute.xlu1 %4120 }
 0x5ca   : > { %v11156_v33 = vpop.f32.mrb[54].mxu0  ;;  %3951 = vrot.lane.b32.xlu0 %v13474_v4, %s6614_s15  ;;  %6404 = vmatmul.mubr.msk.f32.vlgmr.msra.gmra.mrb[44].mxu1 %vm4671_vm13, %v4628_v28  ;;  %v4469_v4 = vsel %vm871_vm4, %v4437_v55, %v10967_v23 }
 0x5cb   : > { %v11161_v3 = vpop.f32.mrb[55].mxu0  ;;  %4048 = vrot.lane.b32.xlu1 %v10382_v62, %s6615_s25  ;;  %v4501_v7 = vsel %vm908_vm5, %v4469_v4, %v3926_v21 }
 0x5cc   : > { %v4119_v15 = vpop.permute.xlu0 %4118  ;;  %v4533_v17 = vsel %vm945_vm6, %v4501_v7, %v4023_v18  ;;  %v13477_v18 = vld [vmem:[#allocation33_spill] sm:$0xff] }
 0x5cd   : > { %v3930_v53 = vpop.permute.xlu1 %3929  ;;  %v4565_v34 = vsel %vm1446_vm7, %v4533_v17, %v4119_v15  ;;  %v4406_v15 = vsel %vm815_vm3, %v13056_v10, %v10665_v36 }
 0x5ce   : > { %4333 = vrot.lane.b32.xlu0 %v10382_v62, %s6618_s23  ;;  %v4438_v7 = vsel %vm834_vm2, %v4406_v15, %v10837_v9 }
 0x5cf   : > { %v11170_v30 = vpop.f32.mrb[56].mxu0  ;;  %4144 = vrot.lane.b32.xlu1 %v13263_v57, %s6616_s13 }
 0x5d0   : > { %v11176_v47 = vpop.f32.mrb[57].mxu0  ;;  %v4215_v31 = vpop.permute.xlu0 %4214 }
 0x5d1   : > { %v4597_v62 = vsel %vm3551_vm11, %v4565_v34, %v4215_v31  ;;  %v4312_v6 = vpop.permute.xlu1 %4311  ;;  %v4470_v34 = vsel %vm871_vm4, %v4438_v7, %v10965_v2 }
 0x5d2   : > { %4142 = vrot.lane.b32.xlu0 %v13390_v52, %s6616_s13  ;;  %v4629_v21 = vsel %vm3584_vm12, %v4597_v62, %v4312_v6  ;;  %v4502_v6 = vsel %vm908_vm5, %v4470_v34, %v3928_v22 }
 0x5d3   : > { %v11183_v28 = vpop.f32.mrb[58].mxu0  ;;  %3953 = vrot.lane.b32.xlu1 %v13477_v18, %s6614_s15  ;;  %6406 = vmatprep.mubr.msk.f32.mxu1 %vm4671_vm13, %v4629_v21  ;;  %v4534_v10 = vsel %vm945_vm6, %v4502_v6, %v4025_v13  ;;  %v13478_v21 = vld [vmem:[#allocation41_spill] sm:$0xff]  ;;  %v11225_v13 = vld [vmem:[%s12134_s7] ss:$0 sm:$0xff] }
 0x5d4   : > { %13475 = vst [vmem:[#allocation176_spill] sm:$0xff] %v11183_v28  ;;  %v11188_v23 = vpop.f32.mrb[59].mxu0  ;;  %v4217_v55 = vpop.permute.xlu0 %4216  ;;  %v4566_v9 = vsel %vm1446_vm7, %v4534_v10, %v4121_v45 }
 0x5d5   : > { %13476 = vst [vmem:[#allocation209_spill] sm:$0xff] %v11188_v23  ;;  %v4027_v17 = vpop.permute.xlu1 %4026  ;;  %v4598_v2 = vsel %vm3551_vm11, %v4566_v9, %v4217_v55  ;;  %v4407_v9 = vsel %vm815_vm3, %v13369_v16, %v10689_v48 }
 0x5d6   : > { %4238 = vrot.lane.b32.xlu0 %v13477_v18, %s6617_s18 }
 0x5d7   : > { %v11197_v4 = vpop.f32.mrb[60].mxu0  ;;  %4335 = vrot.lane.b32.xlu1 %v13314_v39, %s6618_s23 }
 0x5d8   : > { %v11203_v31 = vpop.f32.mrb[61].mxu0  ;;  %v3932_v62 = vpop.permute.xlu0 %3931 }
 0x5d9   : > { %v4029_v15 = vpop.permute.xlu1 %4028 }
 0x5da   : > { %4240 = vrot.lane.b32.xlu0 %v13478_v21, %s6617_s18 }
 0x5db   : > { %v11211_v36 = vpop.f32.mrb[62].mxu0  ;;  %4050 = vrot.lane.b32.xlu1 %v13314_v39, %s6615_s25 }
 0x5dc   : > { %v11216_v18 = vpop.f32.mrb[63].mxu0  ;;  %v4314_v7 = vpop.permute.xlu0 %4313 }
 0x5dd   : > { %v4630_v22 = vsel %vm3584_vm12, %v4598_v2, %v4314_v7  ;;  %v4125_v6 = vpop.permute.xlu1 %4124 }
 0x5de   : > { %3955 = vrot.lane.b32.xlu0 %v13478_v21, %s6614_s15  ;;  %6407 = vmatmul.mubr.msk.f32.gmra.mrb[46].mxu1 %vm4671_vm13, %v4630_v22  ;;  %v4439_v21 = vsel %vm834_vm2, %v4407_v9, %v10847_v32 }
 0x5df   : > { %v6461_v34 = vpop.f32.mrb[64].mxu0  ;;  %4052 = vrot.lane.b32.xlu1 %v10426_v42, %s6615_s25  ;;  %v4471_v7 = vsel %vm871_vm4, %v4439_v21, %v10975_v38 }
 0x5e0   : > { %v11231_v45 = vadd.f32 %v6461_v34, %v11225_v13  ;;  %v5463_v55 = vpop.f32.mrb[65].mxu0  ;;  %v4123_v39 = vpop.permute.xlu0 %4122  ;;  %v4503_v48 = vsel %vm908_vm5, %v4471_v7, %v3930_v53 }
 0x5e1   : > { %v11234_v10 = vadd.f32 %v11225_v13, %v5463_v55  ;;  %v3934_v55 = vpop.permute.xlu1 %3933  ;;  %v4535_v32 = vsel %vm945_vm6, %v4503_v48, %v4027_v17  ;;  %v13479_v48 = vld [vmem:[#allocation45_spill] sm:$0xff] }
 0x5e2   : > { %4337 = vrot.lane.b32.xlu0 %v10426_v42, %s6618_s23  ;;  %v4567_v42 = vsel %vm1446_vm7, %v4535_v32, %v4123_v39 }
 0x5e3   : > { %v6464_v2 = vpop.f32.mrb[66].mxu0  ;;  %4148 = vrot.lane.b32.xlu1 %v13280_v12, %s6616_s13 }
 0x5e4   : > { %v11248_v22 = vadd.f32 %v6464_v2, %v11225_v13  ;;  %v5473_v34 = vpop.f32.mrb[67].mxu0  ;;  %v4219_v23 = vpop.permute.xlu0 %4218 }
 0x5e5   : > { %v11252_v16 = vadd.f32 %v11225_v13, %v5473_v34  ;;  %v4599_v38 = vsel %vm3551_vm11, %v4567_v42, %v4219_v23  ;;  %v4316_v2 = vpop.permute.xlu1 %4315  ;;  %v4408_v23 = vsel %vm815_vm3, %v8251_v25, %v10685_v61 }
 0x5e6   : > { %4146 = vrot.lane.b32.xlu0 %v13393_v60, %s6616_s13  ;;  %v4631_v17 = vsel %vm3584_vm12, %v4599_v38, %v4316_v2  ;;  %v4440_v32 = vsel %vm834_vm2, %v4408_v23, %v10845_v0 }
 0x5e7   : > { %v6467_v9 = vpop.f32.mrb[68].mxu0  ;;  %3957 = vrot.lane.b32.xlu1 %v13479_v48, %s6614_s15  ;;  %6409 = vmatprep.mubr.msk.f32.mxu1 %vm4671_vm13, %v4631_v17 }
 0x5e8   : > { %v11262_v21 = vadd.f32 %v6467_v9, %v11225_v13  ;;  %v5483_v53 = vpop.f32.mrb[69].mxu0  ;;  %v4221_v34 = vpop.permute.xlu0 %4220 }
 0x5e9   : > { %v11265_v7 = vadd.f32 %v11225_v13, %v5483_v53  ;;  %v4031_v38 = vpop.permute.xlu1 %4030  ;;  %v4472_v53 = vsel %vm871_vm4, %v4440_v32, %v10973_v40 }
 0x5ea   : > { %4242 = vrot.lane.b32.xlu0 %v13479_v48, %s6617_s18  ;;  %v4504_v25 = vsel %vm908_vm5, %v4472_v53, %v3932_v62  ;;  %v13480_v48 = vld [vmem:[#allocation15_spill] sm:$0xff] }
 0x5eb   : > { %v6470_v39 = vpop.f32.mrb[70].mxu0  ;;  %4339 = vrot.lane.b32.xlu1 %v13330_v56, %s6618_s23  ;;  %v4536_v61 = vsel %vm945_vm6, %v4504_v25, %v4029_v15 }
 0x5ec   : > { %v11279_v42 = vadd.f32 %v6470_v39, %v11225_v13  ;;  %v5493_v9 = vpop.f32.mrb[71].mxu0  ;;  %v3936_v17 = vpop.permute.xlu0 %3935  ;;  %v4568_v23 = vsel %vm1446_vm7, %v4536_v61, %v4125_v6 }
 0x5ed   : > { %v11284_v2 = vadd.f32 %v11225_v13, %v5493_v9  ;;  %v4033_v32 = vpop.permute.xlu1 %4032  ;;  %v4600_v9 = vsel %vm3551_vm11, %v4568_v23, %v4221_v34  ;;  %v4409_v23 = vsel %vm815_vm3, %v13372_v59, %v10707_v19 }
 0x5ee   : > { %4244 = vrot.lane.b32.xlu0 %v13480_v48, %s6617_s18 }
 0x5ef   : > { %v6473_v0 = vpop.f32.mrb[72].mxu0  ;;  %4054 = vrot.lane.b32.xlu1 %v13330_v56, %s6615_s25  ;;  %v4441_v56 = vsel %vm834_vm2, %v4409_v23, %v10855_v27 }
 0x5f0   : > { %v11294_v39 = vadd.f32 %v6473_v0, %v11225_v13  ;;  %v5503_v40 = vpop.f32.mrb[73].mxu0  ;;  %v4318_v53 = vpop.permute.xlu0 %4317 }
 0x5f1   : > { %v11298_v62 = vadd.f32 %v11225_v13, %v5503_v40  ;;  %v4632_v28 = vsel %vm3584_vm12, %v4600_v9, %v4318_v53  ;;  %v4129_v34 = vpop.permute.xlu1 %4128 }
 0x5f2   : > { %3959 = vrot.lane.b32.xlu0 %v13480_v48, %s6614_s15  ;;  %6410 = vmatmul.mubr.msk.f32.gmra.mrb[48].mxu1 %vm4671_vm13, %v4632_v28  ;;  %v4473_v28 = vsel %vm871_vm4, %v4441_v56, %v10983_v44 }
 0x5f3   : > { %v6476_v15 = vpop.f32.mrb[74].mxu0  ;;  %4056 = vrot.lane.b32.xlu1 %v10468_v11, %s6615_s25  ;;  %v4505_v40 = vsel %vm908_vm5, %v4473_v28, %v3934_v55  ;;  %v4410_v55 = vsel %vm815_vm3, %v8280_v46, %v10703_v37  ;;  %v13482_v46 = vld [vmem:[#allocation48_spill] sm:$0xff] }
 0x5f4   : > { %v11307_v6 = vadd.f32 %v6476_v15, %v11225_v13  ;;  %v5513_v25 = vpop.f32.mrb[75].mxu0  ;;  %v4127_v0 = vpop.permute.xlu0 %4126  ;;  %v4537_v53 = vsel %vm945_vm6, %v4505_v40, %v4031_v38  ;;  %v13481_v15 = vld [vmem:[#allocation34_spill] sm:$0xff]  ;;  %v4442_v38 = vsel %vm834_vm2, %v4410_v55, %v10853_v14 }
 0x5f5   : > { %v11310_v61 = vadd.f32 %v11225_v13, %v5513_v25  ;;  %v3938_v48 = vpop.permute.xlu1 %3937  ;;  %v4569_v19 = vsel %vm1446_vm7, %v4537_v53, %v4127_v0  ;;  %v4474_v0 = vsel %vm871_vm4, %v4442_v38, %v10981_v5  ;;  %v13486_v38 = vld [vmem:[#allocation9_spill] sm:$0xff] }
 0x5f6   : > { %4341 = vrot.lane.b32.xlu0 %v10468_v11, %s6618_s23  ;;  %v4506_v56 = vsel %vm908_vm5, %v4474_v0, %v3936_v17 }
 0x5f7   : > { %4152 = vrot.lane.b32.xlu1 %v13297_v58, %s6616_s13  ;;  %v4538_v28 = vsel %vm945_vm6, %v4506_v56, %v4033_v32  ;;  %v13483_v32 = vld [vmem:[#allocation18_spill] sm:$0xff] }
 0x5f8   : > { %v4223_v9 = vpop.permute.xlu0 %4222  ;;  %v4570_v37 = vsel %vm1446_vm7, %v4538_v28, %v4129_v34  ;;  %v4411_v34 = vsel %vm815_vm3, %v13375_v20, %v13483_v32  ;;  %v13485_v20 = vld [vmem:[#allocation77_spill] sm:$0xff]  ;;  %v13487_v28 = vld [vmem:[#allocation59_spill] sm:$0xff] }
 0x5f9   : > { %v4601_v59 = vsel %vm3551_vm11, %v4569_v19, %v4223_v9  ;;  %v4320_v11 = vpop.permute.xlu1 %4319  ;;  %v13484_v19 = vld [vmem:[#allocation29_spill] sm:$0xff] }
 0x5fa   : > { %4150 = vrot.lane.b32.xlu0 %v13396_v1, %s6616_s13  ;;  %v4633_v27 = vsel %vm3584_vm12, %v4601_v59, %v4320_v11  ;;  %v4443_v59 = vsel %vm834_vm2, %v4411_v34, %v10863_v8 }
 0x5fb   : > { %3961 = vrot.lane.b32.xlu1 %v13481_v15, %s6614_s15  ;;  %6412 = vmatprep.mubr.msk.f32.mxu1 %vm4671_vm13, %v4633_v27 }
 0x5fc   : > { %v4225_v44 = vpop.permute.xlu0 %4224 }
 0x5fd   : > { %v4035_v25 = vpop.permute.xlu1 %4034  ;;  %v4602_v14 = vsel %vm3551_vm11, %v4570_v37, %v4225_v44  ;;  %v13490_v37 = vld [vmem:[#allocation91_spill] sm:$0xff] }
 0x5fe   : > { %4246 = vrot.lane.b32.xlu0 %v13481_v15, %s6617_s18 }
 0x5ff   : > { %4343 = vrot.lane.b32.xlu1 %v13346_v41, %s6618_s23 }
 0x600   : > { %v3940_v23 = vpop.permute.xlu0 %3939 }
 0x601   : > { %v4037_v40 = vpop.permute.xlu1 %4036 }
 0x602   : > { %4248 = vrot.lane.b32.xlu0 %v13482_v46, %s6617_s18 }
 0x603   : > { %4058 = vrot.lane.b32.xlu1 %v13346_v41, %s6615_s25  ;;  %v4475_v41 = vsel %vm871_vm4, %v4443_v59, %v10991_v35 }
 0x604   : > { %v4322_v9 = vpop.permute.xlu0 %4321  ;;  %v4507_v27 = vsel %vm908_vm5, %v4475_v41, %v3938_v48  ;;  %v13488_v48 = vld [vmem:[#allocation93_spill] sm:$0xff]  ;;  %v13493_v41 = vld [vmem:[#allocation42_spill] sm:$0xff] }
 0x605   : > { %v4634_v53 = vsel %vm3584_vm12, %v4602_v14, %v4322_v9  ;;  %v4133_v5 = vpop.permute.xlu1 %4132  ;;  %v4539_v15 = vsel %vm945_vm6, %v4507_v27, %v4035_v25  ;;  %v13489_v25 = vld [vmem:[#allocation68_spill] sm:$0xff] }
 0x606   : > { %3963 = vrot.lane.b32.xlu0 %v13482_v46, %s6614_s15  ;;  %6413 = vmatmul.mubr.msk.f32.gmra.mrb[50].mxu1 %vm4671_vm13, %v4634_v53  ;;  %v4412_v46 = vsel %vm815_vm3, %v13489_v25, %v13488_v48  ;;  %v13491_v53 = vld [vmem:[#allocation95_spill] sm:$0xff]  ;;  %v13498_v25 = vld [vmem:[#allocation234_spill] sm:$0xff] }
 0x607   : > { %4060 = vrot.lane.b32.xlu1 %v13484_v19, %s6615_s25  ;;  %v4444_v14 = vsel %vm834_vm2, %v4412_v46, %v13490_v37 }
 0x608   : > { %v4131_v17 = vpop.permute.xlu0 %4130 }
 0x609   : > { %v3942_v11 = vpop.permute.xlu1 %3941  ;;  %v4571_v55 = vsel %vm1446_vm7, %v4539_v15, %v4131_v17  ;;  %v4476_v17 = vsel %vm871_vm4, %v4444_v14, %v13491_v53 }
 0x60a   : > { %4345 = vrot.lane.b32.xlu0 %v13484_v19, %s6618_s23  ;;  %v4508_v34 = vsel %vm908_vm5, %v4476_v17, %v3940_v23  ;;  %v13492_v19 = vld [vmem:[#allocation16_spill] sm:$0xff] }
 0x60b   : > { %4156 = vrot.lane.b32.xlu1 %v13485_v20, %s6616_s13  ;;  %v4540_v59 = vsel %vm945_vm6, %v4508_v34, %v4037_v40  ;;  %v13499_v34 = vld [vmem:[#allocation12_spill] sm:$0xff] }
 0x60c   : > { %v4227_v44 = vpop.permute.xlu0 %4226  ;;  %v4572_v27 = vsel %vm1446_vm7, %v4540_v59, %v4133_v5 }
 0x60d   : > { %v4603_v8 = vsel %vm3551_vm11, %v4571_v55, %v4227_v44  ;;  %v4324_v0 = vpop.permute.xlu1 %4323 }
 0x60e   : > { %4154 = vrot.lane.b32.xlu0 %v13486_v38, %s6616_s13  ;;  %v4635_v56 = vsel %vm3584_vm12, %v4603_v8, %v4324_v0  ;;  %v13494_v0 = vld [vmem:[#allocation24_spill] sm:$0xff] }
 0x60f   : > { %3965 = vrot.lane.b32.xlu1 %v13487_v28, %s6614_s15  ;;  %6415 = vmatprep.mubr.msk.f32.mxu1 %vm4671_vm13, %v4635_v56  ;;  %v13495_v56 = vld [vmem:[#allocation3_spill] sm:$0xff] }
 0x610   : > { %v4229_v35 = vpop.permute.xlu0 %4228  ;;  %v4413_v5 = vsel %vm815_vm3, %v13495_v56, %v13494_v0  ;;  %v13504_v0 = vld [vmem:[#allocation110_spill] sm:$0xff] }
 0x611   : > { %v4039_v9 = vpop.permute.xlu1 %4038  ;;  %v4604_v15 = vsel %vm3551_vm11, %v4572_v27, %v4229_v35  ;;  %v13497_v35 = vld [vmem:[#allocation198_spill] sm:$0xff] }
 0x612   : > { %4250 = vrot.lane.b32.xlu0 %v13487_v28, %s6617_s18  ;;  %v13496_v28 = vld [vmem:[#allocation87_spill] sm:$0xff]  ;;  %v4445_v48 = vsel %vm834_vm2, %v4413_v5, %v13497_v35 }
 0x613   : > { %4347 = vrot.lane.b32.xlu1 %v13492_v19, %s6618_s23  ;;  %v4477_v46 = vsel %vm871_vm4, %v4445_v48, %v13498_v25 }
 0x614   : > { %v3944_v32 = vpop.permute.xlu0 %3943  ;;  %v4509_v14 = vsel %vm908_vm5, %v4477_v46, %v3942_v11  ;;  %v13501_v11 = vld [vmem:[#allocation96_spill] sm:$0xff] }
 0x615   : > { %v4041_v44 = vpop.permute.xlu1 %4040  ;;  %v4541_v17 = vsel %vm945_vm6, %v4509_v14, %v4039_v9  ;;  %v13502_v9 = vld [vmem:[#allocation66_spill] sm:$0xff] }
 0x616   : > { %4252 = vrot.lane.b32.xlu0 %v13493_v41, %s6617_s18 }
 0x617   : > { %4062 = vrot.lane.b32.xlu1 %v13492_v19, %s6615_s25 }
 0x618   : > { %v4326_v55 = vpop.permute.xlu0 %4325 }
 0x619   : > { %v4636_v8 = vsel %vm3584_vm12, %v4604_v15, %v4326_v55  ;;  %v4137_v23 = vpop.permute.xlu1 %4136  ;;  %v13500_v55 = vld [vmem:[#allocation25_spill] sm:$0xff] }
 0x61a   : > { %3967 = vrot.lane.b32.xlu0 %v13493_v41, %s6614_s15  ;;  %6416 = vmatmul.mubr.msk.f32.gmra.mrb[52].mxu1 %vm4671_vm13, %v4636_v8  ;;  %v4414_v8 = vsel %vm815_vm3, %v13502_v9, %v13501_v11  ;;  %v13509_v11 = vld [vmem:[#allocation51_spill] sm:$0xff] }
 0x61b   : > { %4064 = vrot.lane.b32.xlu1 %v13496_v28, %s6615_s25  ;;  %v4446_v56 = vsel %vm834_vm2, %v4414_v8, %v13504_v0  ;;  %v13511_v8 = vld [vmem:[#allocation290_spill] sm:$0xff] }
 0x61c   : > { %v4135_v40 = vpop.permute.xlu0 %4134 }
 0x61d   : > { %v3946_v37 = vpop.permute.xlu1 %3945  ;;  %v4573_v19 = vsel %vm1446_vm7, %v4541_v17, %v4135_v40  ;;  %v13503_v40 = vld [vmem:[#allocation10_spill] sm:$0xff] }
 0x61e   : > { %4349 = vrot.lane.b32.xlu0 %v13496_v28, %s6618_s23  ;;  %v13505_v28 = vld [vmem:[#allocation113_spill] sm:$0xff] }
 0x61f   : > { %3873 = vrot.lane.b32.xlu1 %v13499_v34, %s6613_s14  ;;  %v4478_v35 = vsel %vm871_vm4, %v4446_v56, %v13505_v28 }
 0x620   : > { %v4231_v53 = vpop.permute.xlu0 %4230  ;;  %v4510_v25 = vsel %vm908_vm5, %v4478_v35, %v3944_v32  ;;  %v13507_v32 = vld [vmem:[#allocation17_spill] sm:$0xff] }
 0x621   : > { %v4605_v59 = vsel %vm3551_vm11, %v4573_v19, %v4231_v53  ;;  %v4328_v41 = vpop.permute.xlu1 %4327  ;;  %v4542_v46 = vsel %vm945_vm6, %v4510_v25, %v4041_v44 }
 0x622   : > { %4158 = vrot.lane.b32.xlu0 %v13499_v34, %s6616_s13  ;;  %v4637_v27 = vsel %vm3584_vm12, %v4605_v59, %v4328_v41  ;;  %v4574_v14 = vsel %vm1446_vm7, %v4542_v46, %v4137_v23  ;;  %v13506_v41 = vld [vmem:[#allocation23_spill] sm:$0xff]  ;;  %v13512_v46 = vld [vmem:[#allocation88_spill] sm:$0xff] }
 0x623   : > { %4254 = vrot.lane.b32.xlu1 %v13500_v55, %s6617_s18  ;;  %6418 = vmatprep.mubr.msk.f32.mxu1 %vm4671_vm13, %v4637_v27 }
 0x624   : > { %v4233_v15 = vpop.permute.xlu0 %4232 }
 0x625   : > { %v4043_v5 = vpop.permute.xlu1 %4042  ;;  %v4606_v17 = vsel %vm3551_vm11, %v4574_v14, %v4233_v15  ;;  %v13510_v15 = vld [vmem:[#allocation135_spill] sm:$0xff] }
 0x626   : > { %4160 = vrot.lane.b32.xlu0 %v13503_v40, %s6616_s13 }
 0x627   : > { %3969 = vrot.lane.b32.xlu1 %v13500_v55, %s6614_s15  ;;  %v13508_v55 = vld [vmem:[#allocation64_spill] sm:$0xff] }
 0x628   : > { %v3948_v48 = vpop.permute.xlu0 %3947  ;;  %v4415_v23 = vsel %vm815_vm3, %v13509_v11, %v13508_v55 }
 0x629   : > { %v4045_v53 = vpop.permute.xlu1 %4044  ;;  %v4447_v9 = vsel %vm834_vm2, %v4415_v23, %v13510_v15  ;;  %v13517_v15 = vld [vmem:[#allocation173_spill] sm:$0xff] }
 0x62a   : > { %3875 = vrot.lane.b32.xlu0 %v13503_v40, %s6613_s14  ;;  %v4479_v0 = vsel %vm871_vm4, %v4447_v9, %v13511_v8 }
 0x62b   : > { %4351 = vrot.lane.b32.xlu1 %v13506_v41, %s6618_s23  ;;  %v4511_v28 = vsel %vm908_vm5, %v4479_v0, %v3946_v37  ;;  %v13514_v37 = vld [vmem:[#allocation97_spill] sm:$0xff] }
 0x62c   : > { %v4330_v19 = vpop.permute.xlu0 %4329  ;;  %v4543_v25 = vsel %vm945_vm6, %v4511_v28, %v4043_v5  ;;  %v13515_v5 = vld [vmem:[#allocation56_spill] sm:$0xff]  ;;  %v13518_v28 = vld [vmem:[#allocation37_spill] sm:$0xff] }
 0x62d   : > { %v4638_v59 = vsel %vm3584_vm12, %v4606_v17, %v4330_v19  ;;  %v4141_v44 = vpop.permute.xlu1 %4140  ;;  %v4416_v55 = vsel %vm815_vm3, %v13515_v5, %v13514_v37  ;;  %v13520_v37 = vld [vmem:[#allocation132_spill] sm:$0xff] }
 0x62e   : > { %4256 = vrot.lane.b32.xlu0 %v13507_v32, %s6617_s18  ;;  %6419 = vmatmul.mubr.msk.f32.gmra.mrb[54].mxu1 %vm4671_vm13, %v4638_v59  ;;  %v13521_v5 = vld [vmem:[#allocation72_spill] sm:$0xff] }
 0x62f   : > { %4066 = vrot.lane.b32.xlu1 %v13506_v41, %s6615_s25 }
 0x630   : > { %v4139_v27 = vpop.permute.xlu0 %4138 }
 0x631   : > { %v3950_v56 = vpop.permute.xlu1 %3949  ;;  %v4575_v14 = vsel %vm1446_vm7, %v4543_v25, %v4139_v27  ;;  %v13516_v27 = vld [vmem:[#allocation229_spill] sm:$0xff] }
 0x632   : > { %3971 = vrot.lane.b32.xlu0 %v13507_v32, %s6614_s15  ;;  %v13513_v32 = vld [vmem:[#allocation63_spill] sm:$0xff]  ;;  %v4448_v11 = vsel %vm834_vm2, %v4416_v55, %v13516_v27  ;;  %v13519_v25 = vld [vmem:[#allocation61_spill] sm:$0xff] }
 0x633   : > { %4068 = vrot.lane.b32.xlu1 %v13512_v46, %s6615_s25  ;;  %v4480_v9 = vsel %vm871_vm4, %v4448_v11, %v13517_v15  ;;  %v13522_v55 = vld [vmem:[#allocation49_spill] sm:$0xff]  ;;  %v13524_v11 = vld [vmem:[#allocation52_spill] sm:$0xff] }
 0x634   : > { %v4235_v35 = vpop.permute.xlu0 %4234  ;;  %v4512_v0 = vsel %vm908_vm5, %v4480_v9, %v3948_v48  ;;  %v13525_v15 = vld [vmem:[#allocation204_spill] sm:$0xff] }
 0x635   : > { %v4607_v17 = vsel %vm3551_vm11, %v4575_v14, %v4235_v35  ;;  %v4332_v19 = vpop.permute.xlu1 %4331  ;;  %v4544_v35 = vsel %vm945_vm6, %v4512_v0, %v4045_v53 }
 0x636   : > { %4353 = vrot.lane.b32.xlu0 %v13512_v46, %s6618_s23  ;;  %v4639_v59 = vsel %vm3584_vm12, %v4607_v17, %v4332_v19  ;;  %v4576_v46 = vsel %vm1446_vm7, %v4544_v35, %v4141_v44  ;;  %v4417_v44 = vsel %vm815_vm3, %v13521_v5, %v13520_v37 }
 0x637   : > { %3877 = vrot.lane.b32.xlu1 %v13513_v32, %s6613_s14  ;;  %6421 = vmatprep.mubr.msk.f32.mxu1 %vm4671_vm13, %v4639_v59 }
 0x638   : > { %v4237_v41 = vpop.permute.xlu0 %4236 }
 0x639   : > { %v4047_v23 = vpop.permute.xlu1 %4046  ;;  %v4608_v17 = vsel %vm3551_vm11, %v4576_v46, %v4237_v41  ;;  %v13523_v41 = vld [vmem:[#allocation134_spill] sm:$0xff] }
 0x63a   : > { %4162 = vrot.lane.b32.xlu0 %v13513_v32, %s6616_s13  ;;  %v4449_v27 = vsel %vm834_vm2, %v4417_v44, %v13523_v41  ;;  %v13526_v44 = vld [vmem:[#allocation90_spill] sm:$0xff] }
 0x63b   : > { %4258 = vrot.lane.b32.xlu1 %v13518_v28, %s6617_s18  ;;  %v4481_v9 = vsel %vm871_vm4, %v4449_v27, %v13525_v15 }
 0x63c   : > { %v3952_v8 = vpop.permute.xlu0 %3951 }
 0x63d   : > { %v4049_v14 = vpop.permute.xlu1 %4048 }
 0x63e   : > { %4164 = vrot.lane.b32.xlu0 %v13519_v25, %s6616_s13 }
 0x63f   : > { %3973 = vrot.lane.b32.xlu1 %v13518_v28, %s6614_s15  ;;  %v4513_v28 = vsel %vm908_vm5, %v4481_v9, %v3950_v56  ;;  %v13527_v56 = vld [vmem:[#allocation98_spill] sm:$0xff] }
 0x640   : > { %v4334_v19 = vpop.permute.xlu0 %4333  ;;  %v4545_v46 = vsel %vm945_vm6, %v4513_v28, %v4047_v23  ;;  %v13528_v23 = vld [vmem:[#allocation75_spill] sm:$0xff] }
 0x641   : > { %v4640_v59 = vsel %vm3584_vm12, %v4608_v17, %v4334_v19  ;;  %v4145_v48 = vpop.permute.xlu1 %4144 }
 0x642   : > { %3879 = vrot.lane.b32.xlu0 %v13519_v25, %s6613_s14  ;;  %6422 = vmatmul.mubr.msk.f32.gmra.mrb[56].mxu1 %vm4671_vm13, %v4640_v59 }
 0x643   : > { %4355 = vrot.lane.b32.xlu1 %v13522_v55, %s6618_s23 }
 0x644   : > { %v4143_v53 = vpop.permute.xlu0 %4142 }
 0x645   : > { %v3954_v0 = vpop.permute.xlu1 %3953  ;;  %v4577_v17 = vsel %vm1446_vm7, %v4545_v46, %v4143_v53  ;;  %v13529_v53 = vld [vmem:[#allocation228_spill] sm:$0xff] }
 0x646   : > { %4260 = vrot.lane.b32.xlu0 %v13524_v11, %s6617_s18 }
 0x647   : > { %4070 = vrot.lane.b32.xlu1 %v13522_v55, %s6615_s25  ;;  %v4418_v55 = vsel %vm815_vm3, %v13528_v23, %v13527_v56  ;;  %v13532_v56 = vld [vmem:[#allocation81_spill] sm:$0xff] }
 0x648   : > { %v4239_v35 = vpop.permute.xlu0 %4238  ;;  %v4450_v41 = vsel %vm834_vm2, %v4418_v55, %v13529_v53  ;;  %v13534_v55 = vld [vmem:[#allocation100_spill] sm:$0xff] }
 0x649   : > { %v4609_v19 = vsel %vm3551_vm11, %v4577_v17, %v4239_v35  ;;  %v4336_v59 = vpop.permute.xlu1 %4335  ;;  %v13531_v35 = vld [vmem:[#allocation67_spill] sm:$0xff] }
 0x64a   : > { %3975 = vrot.lane.b32.xlu0 %v13524_v11, %s6614_s15  ;;  %v4641_v37 = vsel %vm3584_vm12, %v4609_v19, %v4336_v59  ;;  %v13530_v11 = vld [vmem:[#allocation205_spill] sm:$0xff] }
 0x64b   : > { %4072 = vrot.lane.b32.xlu1 %v13526_v44, %s6615_s25  ;;  %6424 = vmatprep.mubr.msk.f32.mxu1 %vm4671_vm13, %v4641_v37  ;;  %v4482_v15 = vsel %vm871_vm4, %v4450_v41, %v13530_v11  ;;  %v13536_v41 = vld [vmem:[#allocation116_spill] sm:$0xff] }
 0x64c   : > { %v4241_v5 = vpop.permute.xlu0 %4240  ;;  %v4514_v28 = vsel %vm908_vm5, %v4482_v15, %v3952_v8  ;;  %v13533_v8 = vld [vmem:[#allocation65_spill] sm:$0xff] }
 0x64d   : > { %v4051_v27 = vpop.permute.xlu1 %4050  ;;  %v4546_v46 = vsel %vm945_vm6, %v4514_v28, %v4049_v14 }
 0x64e   : > { %4357 = vrot.lane.b32.xlu0 %v13526_v44, %s6618_s23  ;;  %v4578_v17 = vsel %vm1446_vm7, %v4546_v46, %v4145_v48  ;;  %v4419_v48 = vsel %vm815_vm3, %v13387_v51, %v13534_v55  ;;  %v13537_v51 = vld [vmem:[#allocation30_spill] sm:$0xff] }
 0x64f   : > { %3881 = vrot.lane.b32.xlu1 %v13531_v35, %s6613_s14  ;;  %v4610_v59 = vsel %vm3551_vm11, %v4578_v17, %v4241_v5  ;;  %v13535_v5 = vld [vmem:[#allocation2_spill] sm:$0xff] }
 0x650   : > { %v3956_v9 = vpop.permute.xlu0 %3955  ;;  %v4451_v53 = vsel %vm834_vm2, %v4419_v48, %v13535_v5 }
 0x651   : > { %v4053_v19 = vpop.permute.xlu1 %4052  ;;  %v4483_v11 = vsel %vm871_vm4, %v4451_v53, %v13536_v41  ;;  %v13541_v41 = vld [vmem:[#allocation143_spill] sm:$0xff] }
 0x652   : > { %4166 = vrot.lane.b32.xlu0 %v13531_v35, %s6616_s13  ;;  %v4515_v28 = vsel %vm908_vm5, %v4483_v11, %v3954_v0  ;;  %v13539_v0 = vld [vmem:[#allocation31_spill] sm:$0xff] }
 0x653   : > { %4262 = vrot.lane.b32.xlu1 %v13532_v56, %s6617_s18  ;;  %v4547_v17 = vsel %vm945_vm6, %v4515_v28, %v4051_v27  ;;  %v4420_v27 = vsel %vm815_vm3, %v13246_v50, %v13539_v0  ;;  %v13544_v0 = vld [vmem:[#allocation102_spill] sm:$0xff] }
 0x654   : > { %v4338_v37 = vpop.permute.xlu0 %4337 }
 0x655   : > { %v4642_v44 = vsel %vm3584_vm12, %v4610_v59, %v4338_v37  ;;  %v4149_v14 = vpop.permute.xlu1 %4148  ;;  %v13538_v37 = vld [vmem:[#allocation80_spill] sm:$0xff] }
 0x656   : > { %4168 = vrot.lane.b32.xlu0 %v13533_v8, %s6616_s13  ;;  %6425 = vmatmul.mubr.msk.f32.gmra.mrb[58].mxu1 %vm4671_vm13, %v4642_v44 }
 0x657   : > { %3977 = vrot.lane.b32.xlu1 %v13532_v56, %s6614_s15 }
 0x658   : > { %v4147_v23 = vpop.permute.xlu0 %4146 }
 0x659   : > { %v3958_v15 = vpop.permute.xlu1 %3957  ;;  %v4579_v59 = vsel %vm1446_vm7, %v4547_v17, %v4147_v23  ;;  %v13540_v23 = vld [vmem:[#allocation39_spill] sm:$0xff]  ;;  %v13542_v17 = vld [vmem:[#allocation92_spill] sm:$0xff] }
 0x65a   : > { %3883 = vrot.lane.b32.xlu0 %v13533_v8, %s6613_s14  ;;  %v4452_v5 = vsel %vm834_vm2, %v4420_v27, %v13540_v23  ;;  %v13545_v27 = vld [vmem:[#allocation131_spill] sm:$0xff] }
 0x65b   : > { %4359 = vrot.lane.b32.xlu1 %v13537_v51, %s6618_s23  ;;  %v4484_v11 = vsel %vm871_vm4, %v4452_v5, %v13541_v41  ;;  %v13547_v5 = vld [vmem:[#allocation168_spill] sm:$0xff]  ;;  %v13548_v41 = vld [vmem:[#allocation175_spill] sm:$0xff] }
 0x65c   : > { %v4243_v46 = vpop.permute.xlu0 %4242 }
 0x65d   : > { %v4611_v44 = vsel %vm3551_vm11, %v4579_v59, %v4243_v46  ;;  %v4340_v56 = vpop.permute.xlu1 %4339  ;;  %v4516_v46 = vsel %vm908_vm5, %v4484_v11, %v3956_v9 }
 0x65e   : > { %4264 = vrot.lane.b32.xlu0 %v13538_v37, %s6617_s18  ;;  %v4643_v55 = vsel %vm3584_vm12, %v4611_v44, %v4340_v56 }
 0x65f   : > { %4074 = vrot.lane.b32.xlu1 %v13537_v51, %s6615_s25  ;;  %6427 = vmatprep.mubr.msk.f32.mxu1 %vm4671_vm13, %v4643_v55  ;;  %v4548_v51 = vsel %vm945_vm6, %v4516_v46, %v4053_v19  ;;  %v13543_v55 = vld [vmem:[#allocation170_spill] sm:$0xff] }
 0x660   : > { %v4245_v48 = vpop.permute.xlu0 %4244  ;;  %v4580_v50 = vsel %vm1446_vm7, %v4548_v51, %v4149_v14  ;;  %v4421_v14 = vsel %vm815_vm3, %v13390_v52, %v13544_v0  ;;  %v2533_v52 = vrot.slane %v13547_v5, 1 }
 0x661   : > { %v4055_v53 = vpop.permute.xlu1 %4054 }
 0x662   : > { %3979 = vrot.lane.b32.xlu0 %v13538_v37, %s6614_s15  ;;  %v4612_v37 = vsel %vm3551_vm11, %v4580_v50, %v4245_v48  ;;  %v13546_v48 = vld [vmem:[#allocation200_spill] sm:$0xff]  ;;  %v2532_v50 = vrot.slane %v13543_v55, 1 }
 0x663   : > { %4076 = vrot.lane.b32.xlu1 %v13542_v17, %s6615_s25  ;;  %v4453_v23 = vsel %vm834_vm2, %v4421_v14, %v13546_v48  ;;  %v13551_v48 = vld [vmem:[#allocation201_spill] sm:$0xff] }
 0x664   : > { %v3960_v28 = vpop.permute.xlu0 %3959  ;;  %v4485_v11 = vsel %vm871_vm4, %v4453_v23, %v13548_v41  ;;  %v13552_v41 = vld [vmem:[#allocation264_spill] sm:$0xff] }
 0x665   : > { %v4057_v59 = vpop.permute.xlu1 %4056 }
 0x666   : > { %4361 = vrot.lane.b32.xlu0 %v13542_v17, %s6618_s23  ;;  %v4517_v17 = vsel %vm908_vm5, %v4485_v11, %v3958_v15 }
 0x667   : > { %3885 = vrot.lane.b32.xlu1 %v13543_v55, %s6613_s14 }
 0x668   : > { %v4342_v44 = vpop.permute.xlu0 %4341 }
 0x669   : > { %v4644_v56 = vsel %vm3584_vm12, %v4612_v37, %v4342_v44  ;;  %v4153_v9 = vpop.permute.xlu1 %4152  ;;  %v4549_v37 = vsel %vm945_vm6, %v4517_v17, %v4055_v53  ;;  %v13549_v53 = vld [vmem:[#allocation43_spill] sm:$0xff] }
 0x66a   : > { %4170 = vrot.lane.b32.xlu0 %v13543_v55, %s6616_s13  ;;  %6428 = vmatmul.mubr.msk.f32.gmra.mrb[60].mxu1 %vm4671_vm13, %v4644_v56  ;;  %v2534_v55 = vsel %vm472_vm1, %v2532_v50, %v2533_v52 }
 0x66b   : > { %4266 = vrot.lane.b32.xlu1 %v13545_v27, %s6617_s18 }
 0x66c   : > { %v4151_v19 = vpop.permute.xlu0 %4150 }
 0x66d   : > { %v3962_v46 = vpop.permute.xlu1 %3961  ;;  %v4581_v44 = vsel %vm1446_vm7, %v4549_v37, %v4151_v19  ;;  %v13550_v19 = vld [vmem:[#allocation130_spill] sm:$0xff] }
 0x66e   : > { %4172 = vrot.lane.b32.xlu0 %v13547_v5, %s6616_s13 }
 0x66f   : > { %3981 = vrot.lane.b32.xlu1 %v13545_v27, %s6614_s15  ;;  %v4422_v27 = vsel %vm815_vm3, %v13263_v57, %v13549_v53  ;;  %v13554_v53 = vld [vmem:[#allocation6_spill] sm:$0xff] }
 0x670   : > { %v4247_v51 = vpop.permute.xlu0 %4246  ;;  %v4454_v23 = vsel %vm834_vm2, %v4422_v27, %v13551_v48  ;;  %v13556_v27 = vld [vmem:[#allocation262_spill] sm:$0xff] }
 0x671   : > { %v4613_v56 = vsel %vm3551_vm11, %v4581_v44, %v4247_v51  ;;  %v4344_v0 = vpop.permute.xlu1 %4343  ;;  %v4486_v11 = vsel %vm871_vm4, %v4454_v23, %v13552_v41  ;;  %v2536_v41 = vrot.slane %v13554_v53, 1 }
 0x672   : > { %3887 = vrot.lane.b32.xlu0 %v13547_v5, %s6613_s14  ;;  %v4645_v15 = vsel %vm3584_vm12, %v4613_v56, %v4344_v0  ;;  %v4518_v51 = vsel %vm908_vm5, %v4486_v11, %v3960_v28  ;;  %v2572_v0 = vsel %vm472_vm1, %v2533_v52, 0.0 }
 0x673   : > { %4363 = vrot.lane.b32.xlu1 %v2534_v55, %s6618_s23  ;;  %6430 = vmatprep.mubr.msk.f32.mxu1 %vm4671_vm13, %v4645_v15  ;;  %v4550_v50 = vsel %vm945_vm6, %v4518_v51, %v4057_v59 }
 0x674   : > { %v4249_v14 = vpop.permute.xlu0 %4248  ;;  %v4582_v57 = vsel %vm1446_vm7, %v4550_v50, %v4153_v9 }
 0x675   : > { %v4059_v5 = vpop.permute.xlu1 %4058  ;;  %v4614_v44 = vsel %vm3551_vm11, %v4582_v57, %v4249_v14  ;;  %v13555_v14 = vld [vmem:[#allocation139_spill] sm:$0xff]  ;;  %v13558_v57 = vld [vmem:[#allocation230_spill] sm:$0xff] }
 0x676   : > { %4268 = vrot.lane.b32.xlu0 %v13550_v19, %s6617_s18 }
 0x677   : > { %4078 = vrot.lane.b32.xlu1 %v2534_v55, %s6615_s25  ;;  %v13553_v55 = vld [vmem:[#allocation103_spill] sm:$0xff] }
 0x678   : > { %v3964_v17 = vpop.permute.xlu0 %3963  ;;  %v4423_v9 = vsel %vm815_vm3, %v13393_v60, %v13553_v55  ;;  %v2535_v60 = vrot.slane %v13556_v27, 1 }
 0x679   : > { %v4061_v37 = vpop.permute.xlu1 %4060  ;;  %v4455_v52 = vsel %vm834_vm2, %v4423_v9, %v13555_v14  ;;  %v13561_v14 = vld [vmem:[#allocation233_spill] sm:$0xff] }
 0x67a   : > { %3983 = vrot.lane.b32.xlu0 %v13550_v19, %s6614_s15  ;;  %v13557_v19 = vld [vmem:[#allocation207_spill] sm:$0xff]  ;;  %s6619_s15 = smov 2  }
 0x67b   : > { %4080 = vrot.lane.b32.xlu1 %v2572_v0, %s6615_s25  ;;  %v4487_v48 = vsel %vm871_vm4, %v4455_v52, %v13557_v19  ;;  %v13562_v19 = vld [vmem:[#allocation292_spill] sm:$0xff]  ;;  %s5876_s25 = sshll.u32 %s6593_s27, 5 }
 0x67c   : > { %v4346_v56 = vpop.permute.xlu0 %4345  ;;  %v4519_v11 = vsel %vm908_vm5, %v4487_v48, %v3962_v46  ;;  %v2573_v46 = vsel %vm472_vm1, %v2536_v41, 0.0  ;;  %p322_p10 = scmp.lt.s32.totalorder %s5876_s25, 63 }
 0x67d   : > { %v4646_v15 = vsel %vm3584_vm12, %v4614_v44, %v4346_v56  ;;  %v4157_v28 = vpop.permute.xlu1 %4156  ;;  %v4551_v50 = vsel %vm945_vm6, %v4519_v11, %v4059_v5  ;;  %v13559_v56 = vld [vmem:[#allocation231_spill] sm:$0xff]  ;;  %v2537_v5 = vsel %vm472_vm1, %v2535_v60, %v2536_v41 }
 0x67e   : > { %4365 = vrot.lane.b32.xlu0 %v2572_v0, %s6618_s23  ;;  %6431 = vmatmul.mubr.msk.f32.gmra.mrb[62].mxu1 %vm4671_vm13, %v4646_v15  ;;  %s13623_s25 = smov (!%p322_p10, %s5876_s25), 63 }
 0x67f   : > { %4176 = vrot.lane.b32.xlu1 %v13554_v53, %s6616_s13  ;;  %v13560_v53 = vld [vmem:[#allocation79_spill] sm:$0xff] }
 0x680   : > { %v4155_v59 = vpop.permute.xlu0 %4154 }
 0x681   : > { %v3966_v23 = vpop.permute.xlu1 %3965  ;;  %v4583_v44 = vsel %vm1446_vm7, %v4551_v50, %v4155_v59  ;;  %v4424_v59 = vsel %vm815_vm3, %v13280_v12, %v13560_v53 }
 0x682   : > { %4174 = vrot.lane.b32.xlu0 %v13556_v27, %s6616_s13  ;;  %v4456_v52 = vsel %vm834_vm2, %v4424_v59, %v13561_v14  ;;  %s5877_s13 = sshll.u32 %s13617_s28, 6 }
 0x683   : > { %4272 = vrot.lane.b32.xlu1 %v13558_v57, %s6617_s18  ;;  %v4488_v48 = vsel %vm871_vm4, %v4456_v52, %v13562_v19  ;;  %v11685_v52 = vld [vmem:[%s12132_s5] ss:$0 sm:$0xff] }
 0x684   : > { %v4251_v51 = vpop.permute.xlu0 %4250 }
 0x685   : > { %v4615_v0 = vsel %vm3551_vm11, %v4583_v44, %v4251_v51  ;;  %v4348_v15 = vpop.permute.xlu1 %4347  ;;  %v4520_v51 = vsel %vm908_vm5, %v4488_v48, %v3964_v17 }
 0x686   : > { %4270 = vrot.lane.b32.xlu0 %v13559_v56, %s6617_s18  ;;  %v4647_v55 = vsel %vm3584_vm12, %v4615_v0, %v4348_v15  ;;  %v4552_v50 = vsel %vm945_vm6, %v4520_v51, %v4061_v37  ;;  %s325_s18 = sadd.s32 %s5877_s13, %s13623_s25 }
 0x687   : > { %4369 = vrot.lane.b32.xlu1 %v2573_v46, %s6618_s23  ;;  %6433 = vmatprep.mubr.msk.f32.mxu1 %vm4671_vm13, %v4647_v55  ;;  %v4584_v41 = vsel %vm1446_vm7, %v4552_v50, %v4157_v28  ;;  %v13563_v46 = vld [vmem:[#allocation82_spill] sm:$0xff]  ;;  %v13565_v28 = vld [vmem:[#allocation145_spill] sm:$0xff]  ;;  %s5878_s16 = sshll.u32 %s325_s18, 3 }
 0x688   : > { %v4253_v9 = vpop.permute.xlu0 %4252  ;;  %v4425_v17 = vsel %vm815_vm3, %v13396_v1, %v13563_v46  ;;  %v11690_v1 = vadd.f32 %v11197_v4, %v11225_v13  ;;  %s11862_s21 = scalar_lea.vmem %s12135_s8, %s5878_s16 }
 0x689   : > { %v4063_v27 = vpop.permute.xlu1 %4062  ;;  %v4616_v57 = vsel %vm3551_vm11, %v4584_v41, %v4253_v9 }
 0x68a   : > { %4367 = vrot.lane.b32.xlu0 %v2537_v5, %s6618_s23  ;;  %v13564_v5 = vld [vmem:[#allocation112_spill] sm:$0xff] }
 0x68b   : > { %v4457_v37 = vsel %vm834_vm2, %v4425_v17, %v13564_v5 }
 0x68c   : > { %v3968_v11 = vpop.permute.xlu0 %3967  ;;  %v4489_v53 = vsel %vm871_vm4, %v4457_v37, %v13565_v28  ;;  %v13568_v28 = vld [vmem:[#allocation206_spill] sm:$0xff] }
 0x68d   : > { %v4065_v60 = vpop.permute.xlu1 %4064  ;;  %v4521_v59 = vsel %vm908_vm5, %v4489_v53, %v3966_v23  ;;  %v11696_v23 = vadd.f32 %v11225_v13, %v11203_v31  ;;  %v13567_v31 = vld [vmem:[#allocation94_spill] sm:$0xff] }
 0x68e   : > { %v4553_v19 = vsel %vm945_vm6, %v4521_v59, %v4063_v27 }
 0x690   : > { %v4350_v12 = vpop.permute.xlu0 %4349 }
 0x691   : > { %v4648_v44 = vsel %vm3584_vm12, %v4616_v57, %v4350_v12  ;;  %v3874_v56 = vpop.permute.xlu1 %3873 }
 0x692   : > { %6434 = vmatmul.mubr.msk.f32.gmra.mrb[64].mxu1 %vm4671_vm13, %v4648_v44 }
 0x694   : > { %v4159_v0 = vpop.permute.xlu0 %4158 }
 0x695   : > { %v4255_v15 = vpop.permute.xlu1 %4254  ;;  %v4585_v51 = vsel %vm1446_vm7, %v4553_v19, %v4159_v0  ;;  %v13566_v0 = vld [vmem:[#allocation128_spill] sm:$0xff] }
 0x696   : > { %v4617_v57 = vsel %vm3551_vm11, %v4585_v51, %v4255_v15  ;;  %v4426_v5 = vsel %vm815_vm3, %v13297_v58, %v13566_v0 }
 0x697   : > { %v4458_v15 = vsel %vm834_vm2, %v4426_v5, %v13567_v31 }
 0x698   : > { %v4161_v55 = vpop.permute.xlu0 %4160  ;;  %v4490_v53 = vsel %vm871_vm4, %v4458_v15, %v13568_v28 }
 0x699   : > { %v3970_v9 = vpop.permute.xlu1 %3969  ;;  %v4522_v19 = vsel %vm908_vm5, %v4490_v53, %v3968_v11 }
 0x69c   : > { %v3876_v14 = vpop.permute.xlu0 %3875 }
 0x69d   : > { %v6405_v48 = vpop.f32.mrb[44].mxu1  ;;  %v4352_v44 = vpop.permute.xlu1 %4351 }
 0x69e   : > { %v5165_v50 = vadd.f32 %v6405_v48, %v11685_v52  ;;  %v5159_v41 = vpop.f32.mrb[45].mxu1  ;;  %v4649_v46 = vsel %vm3584_vm12, %v4617_v57, %v4352_v44  ;;  %v4554_v48 = vsel %vm945_vm6, %v4522_v19, %v4065_v60  ;;  %v13570_v60 = vld [vmem:[#allocation138_spill] sm:$0xff] }
 0x69f   : > { %v5160_v12 = vadd.f32 %v11685_v52, %v5159_v41  ;;  %6436 = vmatprep.mubr.msk.f32.mxu1 %vm4671_vm13, %v4649_v46  ;;  %v4586_v51 = vsel %vm1446_vm7, %v4554_v48, %v4161_v55 }
 0x6a0   : > { %v5555_v27 = vadd.f32 %v11690_v1, %v5165_v50  ;;  %v4257_v4 = vpop.permute.xlu0 %4256 }
 0x6a1   : > { %v5554_v17 = vadd.f32 %v11696_v23, %v5160_v12  ;;  %v4067_v37 = vpop.permute.xlu1 %4066  ;;  %v4618_v50 = vsel %vm3551_vm11, %v4586_v51, %v4257_v4 }
 0x6a2   : > { %5620 = vrot.lane.b32.xlu1 %v5555_v27, %s6619_s15 }
 0x6a3   : > { %5618 = vrot.lane.b32.xlu0 %v5554_v17, %s6619_s15  ;;  %v13569_v17 = vld [vmem:[#allocation84_spill] sm:$0xff] }
 0x6a4   : > { %v3972_v59 = vpop.permute.xlu0 %3971  ;;  %v4427_v11 = vsel %vm815_vm3, %v13486_v38, %v13569_v17 }
 0x6a5   : > { %v4069_v58 = vpop.permute.xlu1 %4068  ;;  %v4459_v55 = vsel %vm834_vm2, %v4427_v11, %v13570_v60  ;;  %v13572_v11 = vld [vmem:[#allocation232_spill] sm:$0xff] }
 0x6a6   : > { %v4491_v31 = vsel %vm871_vm4, %v4459_v55, %v3874_v56 }
 0x6a7   : > { %v4523_v53 = vsel %vm908_vm5, %v4491_v31, %v3970_v9  ;;  %v13571_v9 = vld [vmem:[#allocation106_spill] sm:$0xff] }
 0x6a8   : > { %v4354_v41 = vpop.permute.xlu0 %4353  ;;  %v4555_v51 = vsel %vm945_vm6, %v4523_v53, %v4067_v37  ;;  %v4428_v37 = vsel %vm815_vm3, %v13485_v20, %v13571_v9 }
 0x6a9   : > { %v4650_v57 = vsel %vm3584_vm12, %v4618_v50, %v4354_v41  ;;  %v3878_v12 = vpop.permute.xlu1 %3877 }
 0x6aa   : > { %6437 = vmatmul.mubr.msk.f32.gmra.mrb[66].mxu1 %vm4671_vm13, %v4650_v57 }
 0x6ac   : > { %v4163_v44 = vpop.permute.xlu0 %4162 }
 0x6ad   : > { %v4259_v27 = vpop.permute.xlu1 %4258  ;;  %v4587_v50 = vsel %vm1446_vm7, %v4555_v51, %v4163_v44 }
 0x6ae   : > { %v4619_v41 = vsel %vm3551_vm11, %v4587_v50, %v4259_v27 }
 0x6b0   : > { %v4165_v46 = vpop.permute.xlu0 %4164 }
 0x6b1   : > { %v6408_v0 = vpop.f32.mrb[46].mxu1  ;;  %v3974_v28 = vpop.permute.xlu1 %3973 }
 0x6b2   : > { %v5175_v5 = vadd.f32 %v6408_v0, %v11685_v52  ;;  %v5169_v4 = vpop.f32.mrb[47].mxu1  ;;  %v4460_v0 = vsel %vm834_vm2, %v4428_v37, %v13572_v11  ;;  %v13574_v37 = vld [vmem:[#allocation169_spill] sm:$0xff] }
 0x6b3   : > { %v5170_v15 = vadd.f32 %v11685_v52, %v5169_v4  ;;  %v4492_v60 = vsel %vm871_vm4, %v4460_v0, %v3876_v14  ;;  %v11751_v14 = vadd.f32 %v11211_v36, %v11225_v13 }
 0x6b4   : > { %v5557_v19 = vadd.f32 %v11690_v1, %v5175_v5  ;;  %v3880_v48 = vpop.permute.xlu0 %3879  ;;  %v4524_v27 = vsel %vm908_vm5, %v4492_v60, %v3972_v59 }
 0x6b5   : > { %v5556_v38 = vadd.f32 %v11696_v23, %v5170_v15  ;;  %v4356_v57 = vpop.permute.xlu1 %4355  ;;  %v4556_v5 = vsel %vm945_vm6, %v4524_v27, %v4069_v58 }
 0x6b6   : > { %5624 = vrot.lane.b32.xlu1 %v5557_v19, %s6619_s15  ;;  %v4651_v56 = vsel %vm3584_vm12, %v4619_v41, %v4356_v57  ;;  %v4588_v4 = vsel %vm1446_vm7, %v4556_v5, %v4165_v46  ;;  %v11756_v46 = vadd.f32 %v11225_v13, %v11216_v18 }
 0x6b7   : > { %5622 = vrot.lane.b32.xlu0 %v5556_v38, %s6619_s15  ;;  %6439 = vmatprep.mubr.msk.f32.mxu1 %vm4671_vm13, %v4651_v56 }
 0x6b8   : > { %v4261_v17 = vpop.permute.xlu0 %4260 }
 0x6b9   : > { %v4071_v44 = vpop.permute.xlu1 %4070  ;;  %v4620_v15 = vsel %vm3551_vm11, %v4588_v4, %v4261_v17  ;;  %v13573_v17 = vld [vmem:[#allocation167_spill] sm:$0xff] }
 0x6ba   : > { %v4429_v9 = vsel %vm815_vm3, %v13499_v34, %v13573_v17 }
 0x6bb   : > { %v4461_v11 = vsel %vm834_vm2, %v4429_v9, %v13574_v37 }
 0x6bc   : > { %v3976_v55 = vpop.permute.xlu0 %3975  ;;  %v4493_v18 = vsel %vm871_vm4, %v4461_v11, %v3878_v12 }
 0x6bd   : > { %v4073_v31 = vpop.permute.xlu1 %4072  ;;  %v4525_v0 = vsel %vm908_vm5, %v4493_v18, %v3974_v28 }
 0x6be   : > { %v4557_v27 = vsel %vm945_vm6, %v4525_v0, %v4071_v44 }
 0x6c0   : > { %v4358_v53 = vpop.permute.xlu0 %4357 }
 0x6c1   : > { %v4652_v19 = vsel %vm3584_vm12, %v4620_v15, %v4358_v53  ;;  %v3882_v20 = vpop.permute.xlu1 %3881 }
 0x6c2   : > { %6440 = vmatmul.mubr.msk.f32.gmra.mrb[68].mxu1 %vm4671_vm13, %v4652_v19  ;;  %v13575_v19 = vld [vmem:[#allocation107_spill] sm:$0xff] }
 0x6c3   : > { %v4430_v12 = vsel %vm815_vm3, %v13503_v40, %v13575_v19 }
 0x6c4   : > { %v4167_v51 = vpop.permute.xlu0 %4166 }
 0x6c5   : > { %v6411_v38 = vpop.f32.mrb[48].mxu1  ;;  %v4263_v41 = vpop.permute.xlu1 %4262  ;;  %v4589_v5 = vsel %vm1446_vm7, %v4557_v27, %v4167_v51 }
 0x6c6   : > { %v5185_v59 = vadd.f32 %v6411_v38, %v11685_v52  ;;  %v5179_v58 = vpop.f32.mrb[49].mxu1  ;;  %v4621_v34 = vsel %vm3551_vm11, %v4589_v5, %v4263_v41  ;;  %v13576_v38 = vld [vmem:[#allocation171_spill] sm:$0xff]  ;;  %v13577_v5 = vld [vmem:[#allocation108_spill] sm:$0xff] }
 0x6c7   : > { %v5180_v50 = vadd.f32 %v11685_v52, %v5179_v58  ;;  %v4462_v28 = vsel %vm834_vm2, %v4430_v12, %v13576_v38 }
 0x6c8   : > { %v5559_v57 = vadd.f32 %v11751_v14, %v5185_v59  ;;  %v4169_v56 = vpop.permute.xlu0 %4168  ;;  %v4494_v44 = vsel %vm871_vm4, %v4462_v28, %v3880_v48 }
 0x6c9   : > { %v5558_v36 = vadd.f32 %v11756_v46, %v5180_v50  ;;  %v3978_v13 = vpop.permute.xlu1 %3977  ;;  %v4526_v51 = vsel %vm908_vm5, %v4494_v44, %v3976_v55 }
 0x6ca   : > { %5628 = vrot.lane.b32.xlu1 %v5559_v57, %s6619_s15  ;;  %v4558_v50 = vsel %vm945_vm6, %v4526_v51, %v4073_v31 }
 0x6cb   : > { %5626 = vrot.lane.b32.xlu0 %v5558_v36, %s6619_s15  ;;  %v4590_v41 = vsel %vm1446_vm7, %v4558_v50, %v4169_v56 }
 0x6cc   : > { %v3884_v60 = vpop.permute.xlu0 %3883 }
 0x6cd   : > { %v4360_v4 = vpop.permute.xlu1 %4359 }
 0x6ce   : > { %v4653_v15 = vsel %vm3584_vm12, %v4621_v34, %v4360_v4  ;;  %v4431_v34 = vsel %vm815_vm3, %v13513_v32, %v13577_v5  ;;  %v13578_v4 = vld [vmem:[#allocation202_spill] sm:$0xff]  ;;  %v13579_v32 = vld [vmem:[#allocation89_spill] sm:$0xff] }
 0x6cf   : > { %6442 = vmatprep.mubr.msk.f32.mxu1 %vm4671_vm13, %v4653_v15  ;;  %v4463_v15 = vsel %vm834_vm2, %v4431_v34, %v13578_v4 }
 0x6d0   : > { %v4265_v53 = vpop.permute.xlu0 %4264 }
 0x6d1   : > { %v4075_v59 = vpop.permute.xlu1 %4074  ;;  %v4622_v17 = vsel %vm3551_vm11, %v4590_v41, %v4265_v53  ;;  %v4495_v53 = vsel %vm871_vm4, %v4463_v15, %v3882_v20  ;;  %v4432_v20 = vsel %vm815_vm3, %v13519_v25, %v13579_v32  ;;  %v13581_v15 = vld [vmem:[#allocation199_spill] sm:$0xff] }
 0x6d2   : > { %v4527_v12 = vsel %vm908_vm5, %v4495_v53, %v3978_v13  ;;  %v4433_v53 = vsel %vm815_vm3, %v13531_v35, %v13581_v15 }
 0x6d3   : > { %v4559_v28 = vsel %vm945_vm6, %v4527_v12, %v4075_v59  ;;  %v13582_v12 = vld [vmem:[#allocation166_spill] sm:$0xff] }
 0x6d4   : > { %v3980_v58 = vpop.permute.xlu0 %3979 }
 0x6d5   : > { %v4077_v57 = vpop.permute.xlu1 %4076 }
 0x6d8   : > { %v4362_v9 = vpop.permute.xlu0 %4361 }
 0x6d9   : > { %v4654_v36 = vsel %vm3584_vm12, %v4622_v17, %v4362_v9  ;;  %v6414_v40 = vpop.f32.mrb[50].mxu1  ;;  %v3886_v18 = vpop.permute.xlu1 %3885  ;;  %v13580_v9 = vld [vmem:[#allocation203_spill] sm:$0xff] }
 0x6da   : > { %v5195_v37 = vadd.f32 %v6414_v40, %v11685_v52  ;;  %v5189_v11 = vpop.f32.mrb[51].mxu1  ;;  %6443 = vmatmul.mubr.msk.f32.gmra.mrb[70].mxu1 %vm4671_vm13, %v4654_v36  ;;  %v4464_v13 = vsel %vm834_vm2, %v4432_v20, %v13580_v9 }
 0x6db   : > { %v5190_v48 = vadd.f32 %v11685_v52, %v5189_v11  ;;  %v4496_v59 = vsel %vm871_vm4, %v4464_v13, %v3884_v60 }
 0x6dc   : > { %v5561_v55 = vadd.f32 %v11751_v14, %v5195_v37  ;;  %v4171_v31 = vpop.permute.xlu0 %4170  ;;  %v4528_v37 = vsel %vm908_vm5, %v4496_v59, %v3980_v58 }
 0x6dd   : > { %v5560_v56 = vadd.f32 %v11756_v46, %v5190_v48  ;;  %v4267_v0 = vpop.permute.xlu1 %4266  ;;  %v4591_v44 = vsel %vm1446_vm7, %v4559_v28, %v4171_v31  ;;  %v4560_v48 = vsel %vm945_vm6, %v4528_v37, %v4077_v57  ;;  %v4434_v28 = vsel %vm815_vm3, %v13533_v8, %v13582_v12 }
 0x6de   : > { %5632 = vrot.lane.b32.xlu1 %v5561_v55, %s6619_s15  ;;  %v4623_v51 = vsel %vm3551_vm11, %v4591_v44, %v4267_v0  ;;  %v13583_v44 = vld [vmem:[#allocation141_spill] sm:$0xff] }
 0x6df   : > { %5630 = vrot.lane.b32.xlu0 %v5560_v56, %s6619_s15 }
 0x6e0   : > { %v4173_v27 = vpop.permute.xlu0 %4172 }
 0x6e1   : > { %v3982_v19 = vpop.permute.xlu1 %3981  ;;  %v4592_v56 = vsel %vm1446_vm7, %v4560_v48, %v4173_v27 }
 0x6e4   : > { %v3888_v38 = vpop.permute.xlu0 %3887 }
 0x6e5   : > { %v4364_v50 = vpop.permute.xlu1 %4363 }
 0x6e6   : > { %v4655_v41 = vsel %vm3584_vm12, %v4623_v51, %v4364_v50  ;;  %v4465_v51 = vsel %vm834_vm2, %v4433_v53, %v13583_v44 }
 0x6e7   : > { %6445 = vmatprep.mubr.msk.f32.mxu1 %vm4671_vm13, %v4655_v41  ;;  %v13584_v41 = vld [vmem:[#allocation235_spill] sm:$0xff]  ;;  %v4497_v32 = vsel %vm871_vm4, %v4465_v51, %v3886_v18 }
 0x6e8   : > { %v4269_v17 = vpop.permute.xlu0 %4268  ;;  %v4529_v9 = vsel %vm908_vm5, %v4497_v32, %v3982_v19 }
 0x6e9   : > { %v4079_v36 = vpop.permute.xlu1 %4078  ;;  %v4624_v5 = vsel %vm3551_vm11, %v4592_v56, %v4269_v17  ;;  %v4466_v17 = vsel %vm834_vm2, %v4434_v28, %v13584_v41 }
 0x6ea   : > { %v4498_v13 = vsel %vm871_vm4, %v4466_v17, %v3888_v38  ;;  %v4561_v35 = vsel %vm945_vm6, %v4529_v9, %v4079_v36 }
 0x6ec   : > { %v3984_v40 = vpop.permute.xlu0 %3983 }
 0x6ed   : > { %v6417_v11 = vpop.f32.mrb[52].mxu1  ;;  %v4081_v25 = vpop.permute.xlu1 %4080  ;;  %v4530_v59 = vsel %vm908_vm5, %v4498_v13, %v3984_v40  ;;  %v13588_v13 = vld [vmem:[#allocation289_spill] sm:$0xff] }
 0x6ee   : > { %v5205_v55 = vadd.f32 %v6417_v11, %v11685_v52  ;;  %v5199_v31 = vpop.f32.mrb[53].mxu1  ;;  %v4562_v8 = vsel %vm945_vm6, %v4530_v59, %v4081_v25 }
 0x6ef   : > { %v5200_v0 = vadd.f32 %v11685_v52, %v5199_v31 }
 0x6f0   : > { %v5563_v34 = vadd.f32 %v11231_v45, %v5205_v55  ;;  %v4366_v4 = vpop.permute.xlu0 %4365 }
 0x6f1   : > { %v5562_v60 = vadd.f32 %v11234_v10, %v5200_v0  ;;  %v4656_v58 = vsel %vm3584_vm12, %v4624_v5, %v4366_v4  ;;  %v4177_v57 = vpop.permute.xlu1 %4176 }
 0x6f2   : > { %5636 = vrot.lane.b32.xlu1 %v5563_v34, %s6619_s15  ;;  %6446 = vmatmul.mubr.msk.f32.gmra.mrb[72].mxu1 %vm4671_vm13, %v4656_v58  ;;  %v4594_v48 = vsel %vm1446_vm7, %v4562_v8, %v4177_v57  ;;  %v13585_v34 = vld [vmem:[#allocation140_spill] sm:$0xff] }
 0x6f3   : > { %5634 = vrot.lane.b32.xlu0 %v5562_v60, %s6619_s15  ;;  %v4844_v4 = vadd.f32 %v13585_v34, %v11685_v52  ;;  %v13586_v60 = vld [vmem:[#allocation70_spill] sm:$0xff] }
 0x6f4   : > { %v4175_v27 = vpop.permute.xlu0 %4174  ;;  %v4839_v58 = vadd.f32 %v11685_v52, %v13586_v60 }
 0x6f5   : > { %v4273_v50 = vpop.permute.xlu1 %4272  ;;  %v4593_v37 = vsel %vm1446_vm7, %v4561_v35, %v4175_v27  ;;  %v5523_v57 = vadd.f32 %v11690_v1, %v4844_v4  ;;  %v4849_v35 = vadd.f32 %v11685_v52, %v13588_v13 }
 0x6f6   : > { %v4626_v31 = vsel %vm3551_vm11, %v4594_v48, %v4273_v50  ;;  %v5522_v15 = vadd.f32 %v11696_v23, %v4839_v58 }
 0x6f8   : > { %v4271_v20 = vpop.permute.xlu0 %4270 }
 0x6f9   : > { %v4370_v11 = vpop.permute.xlu1 %4369  ;;  %v4625_v55 = vsel %vm3551_vm11, %v4593_v37, %v4271_v20  ;;  %v13587_v20 = vld [vmem:[#allocation172_spill] sm:$0xff]  ;;  %v5524_v37 = vadd.f32 %v11696_v23, %v4849_v35 }
 0x6fa   : > { %v4658_v38 = vsel %vm3584_vm12, %v4626_v31, %v4370_v11  ;;  %v4854_v9 = vadd.f32 %v13587_v20, %v11685_v52 }
 0x6fc   : > { %v4368_v18 = vpop.permute.xlu0 %4367  ;;  %v5525_v59 = vadd.f32 %v11690_v1, %v4854_v9 }
 0x6fd   : > { %v4657_v19 = vsel %vm3584_vm12, %v4625_v55, %v4368_v18 }
 0x6fe   : > { %6448 = vmatprep.mubr.msk.f32.mxu1 %vm4671_vm13, %v4657_v19 }
 0x6ff   : > { %6449 = vmatmul.mubr.msk.f32.gmra.mrb[74].mxu1 %vm4671_vm13, %v4658_v38 }
 0x701   : > { %v6420_v36 = vpop.f32.mrb[54].mxu1 }
 0x702   : > { %v5215_v40 = vadd.f32 %v6420_v36, %v11685_v52  ;;  %v5209_v56 = vpop.f32.mrb[55].mxu1  ;;  %v13589_v36 = vld [vmem:[#allocation237_spill] sm:$0xff] }
 0x703   : > { %v5210_v0 = vadd.f32 %v11685_v52, %v5209_v56  ;;  %v13590_v56 = vld [vmem:[#allocation99_spill] sm:$0xff] }
 0x704   : > { %v5565_v25 = vadd.f32 %v11231_v45, %v5215_v40  ;;  %v4864_v40 = vadd.f32 %v13589_v36, %v11685_v52 }
 0x705   : > { %v5564_v5 = vadd.f32 %v11234_v10, %v5210_v0  ;;  %v4859_v0 = vadd.f32 %v11685_v52, %v13590_v56 }
 0x706   : > { %5640 = vrot.lane.b32.xlu1 %v5565_v25, %s6619_s15  ;;  %v5527_v25 = vadd.f32 %v11751_v14, %v4864_v40 }
 0x707   : > { %5638 = vrot.lane.b32.xlu0 %v5564_v5, %s6619_s15  ;;  %v5526_v34 = vadd.f32 %v11756_v46, %v4859_v0 }
 0x714   : > { %v5621_v27 = vpop.permute.xlu1 %5620 }
 0x715   : > { %v5716_v53 = vsel %vm5714_vm14, %v5523_v57, %v5621_v27  ;;  %v6423_v12 = vpop.f32.mrb[56].mxu1  ;;  %v5619_v28 = vpop.permute.xlu0 %5618 }
 0x716   : > { %5748 = vst.msk [vmem:[%s11862_s21 + $0x8] sm:$0xff] %vm815_vm3, %v5716_v53  ;;  %v5225_v44 = vadd.f32 %v6423_v12, %v11685_v52  ;;  %v5715_v51 = vsel %vm5714_vm14, %v5522_v15, %v5619_v28  ;;  %v5219_v50 = vpop.f32.mrb[57].mxu1 }
 0x717   : > { %5747 = vst.msk [vmem:[%s11862_s21] sm:$0xff] %vm815_vm3, %v5715_v51  ;;  %v5220_v41 = vadd.f32 %v11685_v52, %v5219_v50  ;;  %v13592_v50 = vld [vmem:[#allocation142_spill] sm:$0xff] }
 0x718   : > { %v5567_v17 = vadd.f32 %v11248_v22, %v5225_v44  ;;  %v13591_v44 = vld [vmem:[#allocation236_spill] sm:$0xff] }
 0x719   : > { %v5566_v32 = vadd.f32 %v11252_v16, %v5220_v41  ;;  %v4874_v51 = vadd.f32 %v13591_v44, %v11685_v52  ;;  %v4869_v41 = vadd.f32 %v11685_v52, %v13592_v50 }
 0x71a   : > { %5644 = vrot.lane.b32.xlu1 %v5567_v17, %s6619_s15 }
 0x71b   : > { %5642 = vrot.lane.b32.xlu0 %v5566_v32, %s6619_s15  ;;  %v5529_v17 = vadd.f32 %v11751_v14, %v4874_v51  ;;  %v5528_v20 = vadd.f32 %v11756_v46, %v4869_v41 }
 0x728   : > { %v5625_v8 = vpop.permute.xlu1 %5624 }
 0x729   : > { %v5718_v11 = vsel %vm5714_vm14, %v5525_v59, %v5625_v8  ;;  %v6426_v48 = vpop.f32.mrb[58].mxu1  ;;  %v5623_v55 = vpop.permute.xlu0 %5622 }
 0x72a   : > { %5750 = vst.msk [vmem:[%s11862_s21 + $0x18] sm:$0xff] %vm815_vm3, %v5718_v11  ;;  %v5235_v18 = vadd.f32 %v6426_v48, %v11685_v52  ;;  %v5717_v31 = vsel %vm5714_vm14, %v5524_v37, %v5623_v55  ;;  %v5229_v19 = vpop.f32.mrb[59].mxu1  ;;  %v13593_v48 = vld [vmem:[#allocation263_spill] sm:$0xff] }
 0x72b   : > { %5749 = vst.msk [vmem:[%s11862_s21 + $0x10] sm:$0xff] %vm815_vm3, %v5717_v31  ;;  %v5230_v38 = vadd.f32 %v11685_v52, %v5229_v19  ;;  %v4884_v55 = vadd.f32 %v13593_v48, %v11685_v52 }
 0x72c   : > { %v5569_v1 = vadd.f32 %v11248_v22, %v5235_v18  ;;  %v13594_v18 = vld [vmem:[#allocation174_spill] sm:$0xff] }
 0x72d   : > { %v5568_v23 = vadd.f32 %v11252_v16, %v5230_v38  ;;  %v4879_v31 = vadd.f32 %v11685_v52, %v13594_v18  ;;  %v5531_v19 = vadd.f32 %v11231_v45, %v4884_v55 }
 0x72e   : > { %5648 = vrot.lane.b32.xlu1 %v5569_v1, %s6619_s15 }
 0x72f   : > { %5646 = vrot.lane.b32.xlu0 %v5568_v23, %s6619_s15  ;;  %v5530_v1 = vadd.f32 %v11234_v10, %v4879_v31 }
 0x73c   : > { %v5629_v5 = vpop.permute.xlu1 %5628 }
 0x73d   : > { %v5720_v4 = vsel %vm5714_vm14, %v5527_v25, %v5629_v5  ;;  %v6429_v60 = vpop.f32.mrb[60].mxu1  ;;  %v5627_v58 = vpop.permute.xlu0 %5626 }
 0x73e   : > { %5752 = vst.msk [vmem:[%s11862_s21 + $0x28] sm:$0xff] %vm815_vm3, %v5720_v4  ;;  %v5245_v57 = vadd.f32 %v6429_v60, %v11685_v52  ;;  %v5719_v27 = vsel %vm5714_vm14, %v5526_v34, %v5627_v58  ;;  %v5239_v15 = vpop.f32.mrb[61].mxu1  ;;  %v13595_v60 = vld [vmem:[#allocation291_spill] sm:$0xff] }
 0x73f   : > { %5751 = vst.msk [vmem:[%s11862_s21 + $0x20] sm:$0xff] %vm815_vm3, %v5719_v27  ;;  %v5240_v53 = vadd.f32 %v11685_v52, %v5239_v15  ;;  %v4894_v58 = vadd.f32 %v13595_v60, %v11685_v52 }
 0x740   : > { %v5571_v12 = vadd.f32 %v11262_v21, %v5245_v57  ;;  %v13596_v57 = vld [vmem:[#allocation239_spill] sm:$0xff] }
 0x741   : > { %v5570_v28 = vadd.f32 %v11265_v7, %v5240_v53  ;;  %v4889_v27 = vadd.f32 %v11685_v52, %v13596_v57  ;;  %v5533_v15 = vadd.f32 %v11231_v45, %v4894_v58 }
 0x742   : > { %5652 = vrot.lane.b32.xlu1 %v5571_v12, %s6619_s15 }
 0x743   : > { %5650 = vrot.lane.b32.xlu0 %v5570_v28, %s6619_s15  ;;  %v5532_v12 = vadd.f32 %v11234_v10, %v4889_v27 }
 0x750   : > { %v5633_v32 = vpop.permute.xlu1 %5632 }
 0x751   : > { %v5722_v9 = vsel %vm5714_vm14, %v5529_v17, %v5633_v32  ;;  %v6432_v13 = vpop.f32.mrb[62].mxu1  ;;  %v5631_v35 = vpop.permute.xlu0 %5630 }
 0x752   : > { %5754 = vst.msk [vmem:[%s11862_s21 + $0x38] sm:$0xff] %vm815_vm3, %v5722_v9  ;;  %v5255_v59 = vadd.f32 %v6432_v13, %v11685_v52  ;;  %v5721_v8 = vsel %vm5714_vm14, %v5528_v20, %v5631_v35  ;;  %v5249_v37 = vpop.f32.mrb[63].mxu1  ;;  %v13597_v20 = vld [vmem:[#allocation101_spill] sm:$0xff] }
 0x753   : > { %5753 = vst.msk [vmem:[%s11862_s21 + $0x30] sm:$0xff] %vm815_vm3, %v5721_v8  ;;  %v5250_v11 = vadd.f32 %v11685_v52, %v5249_v37  ;;  %v4904_v9 = vadd.f32 %v13597_v20, %v11685_v52  ;;  %v13598_v13 = vld [vmem:[#allocation117_spill] sm:$0xff]  ;;  %v4929_v20 = vadd.f32 %v11685_v52, %v11110_v29 }
 0x754   : > { %v5573_v14 = vadd.f32 %v11262_v21, %v5255_v59  ;;  %v4899_v35 = vadd.f32 %v11685_v52, %v13598_v13 }
 0x755   : > { %v5572_v46 = vadd.f32 %v11265_v7, %v5250_v11  ;;  %v5535_v59 = vadd.f32 %v11248_v22, %v4904_v9 }
 0x756   : > { %5656 = vrot.lane.b32.xlu1 %v5573_v14, %s6619_s15  ;;  %v5534_v37 = vadd.f32 %v11252_v16, %v4899_v35 }
 0x757   : > { %5654 = vrot.lane.b32.xlu0 %v5572_v46, %s6619_s15 }
 0x764   : > { %v5637_v38 = vpop.permute.xlu1 %5636 }
 0x765   : > { %v5724_v23 = vsel %vm5714_vm14, %v5531_v19, %v5637_v38  ;;  %v6435_v36 = vpop.f32.mrb[64].mxu1  ;;  %v5635_v40 = vpop.permute.xlu0 %5634 }
 0x766   : > { %5756 = vst.msk [vmem:[%s11862_s21 + $0x48] sm:$0xff] %vm815_vm3, %v5724_v23  ;;  %v5265_v56 = vadd.f32 %v6435_v36, %v11685_v52  ;;  %v5723_v0 = vsel %vm5714_vm14, %v5530_v1, %v5635_v40  ;;  %v5259_v25 = vpop.f32.mrb[65].mxu1  ;;  %v13599_v1 = vld [vmem:[#allocation238_spill] sm:$0xff] }
 0x767   : > { %5755 = vst.msk [vmem:[%s11862_s21 + $0x40] sm:$0xff] %vm815_vm3, %v5723_v0  ;;  %v5260_v5 = vadd.f32 %v11685_v52, %v5259_v25  ;;  %v4914_v23 = vadd.f32 %v13599_v1, %v11685_v52  ;;  %v13600_v36 = vld [vmem:[#allocation266_spill] sm:$0xff] }
 0x768   : > { %v5575_v34 = vadd.f32 %v11279_v42, %v5265_v56  ;;  %v4909_v40 = vadd.f32 %v11685_v52, %v13600_v36 }
 0x769   : > { %v5574_v4 = vadd.f32 %v11284_v2, %v5260_v5  ;;  %v5537_v56 = vadd.f32 %v11248_v22, %v4914_v23 }
 0x76a   : > { %5660 = vrot.lane.b32.xlu1 %v5575_v34, %s6619_s15  ;;  %v5536_v25 = vadd.f32 %v11252_v16, %v4909_v40  ;;  %v13601_v16 = vld [vmem:[#allocation144_spill] sm:$0xff] }
 0x76b   : > { %5658 = vrot.lane.b32.xlu0 %v5574_v4, %s6619_s15 }
 0x778   : > { %v5641_v53 = vpop.permute.xlu1 %5640 }
 0x779   : > { %v5726_v28 = vsel %vm5714_vm14, %v5533_v15, %v5641_v53  ;;  %v5639_v44 = vpop.permute.xlu0 %5638  ;;  %v4924_v15 = vadd.f32 %v13601_v16, %v11685_v52 }
 0x77a   : > { %5758 = vst.msk [vmem:[%s11862_s21 + $0x58] sm:$0xff] %vm815_vm3, %v5726_v28  ;;  %v5725_v51 = vsel %vm5714_vm14, %v5532_v12, %v5639_v44  ;;  %v13602_v12 = vld [vmem:[#allocation177_spill] sm:$0xff] }
 0x77b   : > { %5757 = vst.msk [vmem:[%s11862_s21 + $0x50] sm:$0xff] %vm815_vm3, %v5725_v51  ;;  %v4919_v28 = vadd.f32 %v11685_v52, %v13602_v12  ;;  %v5539_v44 = vadd.f32 %v11262_v21, %v4924_v15 }
 0x77d   : > { %v6438_v50 = vpop.f32.mrb[66].mxu1 }
 0x77e   : > { %v5275_v41 = vadd.f32 %v6438_v50, %v11685_v52  ;;  %v5269_v17 = vpop.f32.mrb[67].mxu1  ;;  %v5538_v50 = vadd.f32 %v11265_v7, %v4919_v28 }
 0x77f   : > { %v5270_v45 = vadd.f32 %v11685_v52, %v5269_v17 }
 0x780   : > { %v5577_v32 = vadd.f32 %v11279_v42, %v5275_v41 }
 0x781   : > { %v5576_v10 = vadd.f32 %v11284_v2, %v5270_v45 }
 0x782   : > { %5664 = vrot.lane.b32.xlu1 %v5577_v32, %s6619_s15  ;;  %v4934_v32 = vadd.f32 %v11104_v26, %v11685_v52 }
 0x783   : > { %5662 = vrot.lane.b32.xlu0 %v5576_v10, %s6619_s15 }
 0x78c   : > { %v5645_v8 = vpop.permute.xlu1 %5644 }
 0x78d   : > { %v5728_v11 = vsel %vm5714_vm14, %v5535_v59, %v5645_v8  ;;  %v5643_v14 = vpop.permute.xlu0 %5642  ;;  %v5541_v59 = vadd.f32 %v11262_v21, %v4934_v32 }
 0x78e   : > { %5760 = vst.msk [vmem:[%s11862_s21 + $0x68] sm:$0xff] %vm815_vm3, %v5728_v11  ;;  %v5727_v46 = vsel %vm5714_vm14, %v5534_v37, %v5643_v14  ;;  %v5540_v11 = vadd.f32 %v11265_v7, %v4929_v20 }
 0x78f   : > { %5759 = vst.msk [vmem:[%s11862_s21 + $0x60] sm:$0xff] %vm815_vm3, %v5727_v46 }
 0x795   : > { %v6441_v48 = vpop.f32.mrb[68].mxu1 }
 0x796   : > { %v5285_v55 = vadd.f32 %v6441_v48, %v11685_v52  ;;  %v5279_v18 = vpop.f32.mrb[69].mxu1 }
 0x797   : > { %v5280_v31 = vadd.f32 %v11685_v52, %v5279_v18 }
 0x798   : > { %v5579_v19 = vadd.f32 %v11294_v39, %v5285_v55 }
 0x799   : > { %v5578_v38 = vadd.f32 %v11298_v62, %v5280_v31 }
 0x79a   : > { %5668 = vrot.lane.b32.xlu1 %v5579_v19, %s6619_s15  ;;  %v4944_v19 = vadd.f32 %v11117_v24, %v11685_v52  ;;  %v4954_v24 = vadd.f32 %v11131_v43, %v11685_v52  ;;  %v4964_v43 = vadd.f32 %v11145_v49, %v11685_v52  ;;  %v4974_v49 = vadd.f32 %v11156_v33, %v11685_v52 }
 0x79b   : > { %5666 = vrot.lane.b32.xlu0 %v5578_v38, %s6619_s15  ;;  %v4939_v38 = vadd.f32 %v11685_v52, %v11122_v63  ;;  %v13603_v63 = vld [vmem:[#allocation265_spill] sm:$0xff]  ;;  %v4984_v33 = vadd.f32 %v11170_v30, %v11685_v52  ;;  %v13604_v30 = vld [vmem:[#allocation176_spill] sm:$0xff] }
 0x79c   : > { %v5543_v1 = vadd.f32 %v11279_v42, %v4944_v19  ;;  %v5549_v12 = vadd.f32 %v11294_v39, %v4974_v49  ;;  %v4994_v20 = vadd.f32 %v13604_v30, %v11685_v52 }
 0x79d   : > { %v5542_v36 = vadd.f32 %v11284_v2, %v4939_v38 }
 0x7a0   : > { %v5649_v0 = vpop.permute.xlu1 %5648 }
 0x7a1   : > { %v5730_v5 = vsel %vm5714_vm14, %v5537_v56, %v5649_v0  ;;  %v5647_v34 = vpop.permute.xlu0 %5646 }
 0x7a2   : > { %5762 = vst.msk [vmem:[%s11862_s21 + $0x78] sm:$0xff] %vm815_vm3, %v5730_v5  ;;  %v5729_v4 = vsel %vm5714_vm14, %v5536_v25, %v5647_v34  ;;  %v4949_v25 = vadd.f32 %v11685_v52, %v13603_v63  ;;  %v5545_v5 = vadd.f32 %v11279_v42, %v4954_v24  ;;  %v5547_v42 = vadd.f32 %v11294_v39, %v4964_v43 }
 0x7a3   : > { %5761 = vst.msk [vmem:[%s11862_s21 + $0x70] sm:$0xff] %vm815_vm3, %v5729_v4 }
 0x7a4   : > { %v5544_v4 = vadd.f32 %v11284_v2, %v4949_v25 }
 0x7ad   : > { %v6444_v60 = vpop.f32.mrb[70].mxu1 }
 0x7ae   : > { %v5295_v58 = vadd.f32 %v6444_v60, %v11685_v52  ;;  %v5289_v57 = vpop.f32.mrb[71].mxu1 }
 0x7af   : > { %v5290_v22 = vadd.f32 %v11685_v52, %v5289_v57 }
 0x7b0   : > { %v5581_v27 = vadd.f32 %v11294_v39, %v5295_v58  ;;  %v5551_v39 = vadd.f32 %v11307_v6, %v4984_v33 }
 0x7b1   : > { %v5580_v53 = vadd.f32 %v11298_v62, %v5290_v22  ;;  %v4959_v22 = vadd.f32 %v11685_v52, %v11150_v54  ;;  %v4969_v54 = vadd.f32 %v11685_v52, %v11161_v3  ;;  %v4979_v3 = vadd.f32 %v11685_v52, %v11176_v47  ;;  %v13605_v47 = vld [vmem:[#allocation209_spill] sm:$0xff] }
 0x7b2   : > { %5672 = vrot.lane.b32.xlu1 %v5581_v27, %s6619_s15 }
 0x7b3   : > { %5670 = vrot.lane.b32.xlu0 %v5580_v53, %s6619_s15  ;;  %v5546_v2 = vadd.f32 %v11298_v62, %v4959_v22 }
 0x7b4   : > { %v5653_v51 = vpop.permute.xlu1 %5652 }
 0x7b5   : > { %v5732_v41 = vsel %vm5714_vm14, %v5539_v44, %v5653_v51  ;;  %v5651_v17 = vpop.permute.xlu0 %5650  ;;  %v5548_v44 = vadd.f32 %v11298_v62, %v4969_v54  ;;  %v5550_v62 = vadd.f32 %v11310_v61, %v4979_v3 }
 0x7b6   : > { %5764 = vst.msk [vmem:[%s11862_s21 + $0x88] sm:$0xff] %vm815_vm3, %v5732_v41  ;;  %v5731_v45 = vsel %vm5714_vm14, %v5538_v50, %v5651_v17 }
 0x7b7   : > { %5763 = vst.msk [vmem:[%s11862_s21 + $0x80] sm:$0xff] %vm815_vm3, %v5731_v45 }
 0x7c5   : > { %v6447_v10 = vpop.f32.mrb[72].mxu1 }
 0x7c6   : > { %v5305_v9 = vadd.f32 %v6447_v10, %v11685_v52  ;;  %v5299_v13 = vpop.f32.mrb[73].mxu1 }
 0x7c7   : > { %v5300_v35 = vadd.f32 %v11685_v52, %v5299_v13  ;;  %v5553_v13 = vadd.f32 %v11307_v6, %v4994_v20 }
 0x7c8   : > { %v5583_v8 = vadd.f32 %v11307_v6, %v5305_v9  ;;  %v5657_v37 = vpop.permute.xlu1 %5656  ;;  %v4989_v9 = vadd.f32 %v11685_v52, %v13605_v47 }
 0x7c9   : > { %v5582_v14 = vadd.f32 %v11310_v61, %v5300_v35  ;;  %v5734_v26 = vsel %vm5714_vm14, %v5541_v59, %v5657_v37  ;;  %v5655_v46 = vpop.permute.xlu0 %5654 }
 0x7ca   : > { %5766 = vst.msk [vmem:[%s11862_s21 + $0x98] sm:$0xff] %vm815_vm3, %v5734_v26  ;;  %v5733_v29 = vsel %vm5714_vm14, %v5540_v11, %v5655_v46  ;;  %5676 = vrot.lane.b32.xlu1 %v5583_v8, %s6619_s15  ;;  %v5552_v59 = vadd.f32 %v11310_v61, %v4989_v9 }
 0x7cb   : > { %5765 = vst.msk [vmem:[%s11862_s21 + $0x90] sm:$0xff] %vm815_vm3, %v5733_v29  ;;  %5674 = vrot.lane.b32.xlu0 %v5582_v14, %s6619_s15 }
 0x7d2   : > { %v6450_v21 = vpop.f32.mrb[74].mxu1 }
 0x7d3   : > { %v5315_v48 = vadd.f32 %v6450_v21, %v11685_v52  ;;  %v5309_v7 = vpop.f32.mrb[75].mxu1 }
 0x7d4   : > { %v5310_v55 = vadd.f32 %v11685_v52, %v5309_v7 }
 0x7d5   : > { %v5585_v18 = vadd.f32 %v11307_v6, %v5315_v48 }
 0x7d6   : > { %v5584_v31 = vadd.f32 %v11310_v61, %v5310_v55 }
 0x7d7   : > { %5680 = vrot.lane.b32.xlu1 %v5585_v18, %s6619_s15 }
 0x7d8   : > { %5678 = vrot.lane.b32.xlu0 %v5584_v31, %s6619_s15 }
 0x7dc   : > { %v5661_v23 = vpop.permute.xlu1 %5660 }
 0x7dd   : > { %v5736_v40 = vsel %vm5714_vm14, %v5543_v1, %v5661_v23  ;;  %v5659_v56 = vpop.permute.xlu0 %5658 }
 0x7de   : > { %5768 = vst.msk [vmem:[%s11862_s21 + $0xa8] sm:$0xff] %vm815_vm3, %v5736_v40  ;;  %v5735_v0 = vsel %vm5714_vm14, %v5542_v36, %v5659_v56 }
 0x7df   : > { %5767 = vst.msk [vmem:[%s11862_s21 + $0xa0] sm:$0xff] %vm815_vm3, %v5735_v0 }
 0x7f4   : > { %v5665_v34 = vpop.permute.xlu1 %5664 }
 0x7f5   : > { %v5738_v60 = vsel %vm5714_vm14, %v5545_v5, %v5665_v34  ;;  %v5663_v58 = vpop.permute.xlu0 %5662 }
 0x7f6   : > { %5770 = vst.msk [vmem:[%s11862_s21 + $0xb8] sm:$0xff] %vm815_vm3, %v5738_v60  ;;  %v5737_v57 = vsel %vm5714_vm14, %v5544_v4, %v5663_v58 }
 0x7f7   : > { %5769 = vst.msk [vmem:[%s11862_s21 + $0xb0] sm:$0xff] %vm815_vm3, %v5737_v57 }
 0x80c   : > { %v5669_v27 = vpop.permute.xlu1 %5668 }
 0x80d   : > { %v5740_v16 = vsel %vm5714_vm14, %v5547_v42, %v5669_v27  ;;  %v5667_v15 = vpop.permute.xlu0 %5666 }
 0x80e   : > { %5772 = vst.msk [vmem:[%s11862_s21 + $0xc8] sm:$0xff] %vm815_vm3, %v5740_v16  ;;  %v5739_v53 = vsel %vm5714_vm14, %v5546_v2, %v5667_v15 }
 0x80f   : > { %5771 = vst.msk [vmem:[%s11862_s21 + $0xc0] sm:$0xff] %vm815_vm3, %v5739_v53 }
 0x824   : > { %v5673_v28 = vpop.permute.xlu1 %5672 }
 0x825   : > { %v5742_v51 = vsel %vm5714_vm14, %v5549_v12, %v5673_v28  ;;  %v5671_v50 = vpop.permute.xlu0 %5670 }
 0x826   : > { %5774 = vst.msk [vmem:[%s11862_s21 + $0xd8] sm:$0xff] %vm815_vm3, %v5742_v51  ;;  %v5741_v41 = vsel %vm5714_vm14, %v5548_v44, %v5671_v50 }
 0x827   : > { %5773 = vst.msk [vmem:[%s11862_s21 + $0xd0] sm:$0xff] %vm815_vm3, %v5741_v41 }
 0x83c   : > { %v5677_v17 = vpop.permute.xlu1 %5676 }
 0x83d   : > { %v5744_v45 = vsel %vm5714_vm14, %v5551_v39, %v5677_v17  ;;  %v5675_v32 = vpop.permute.xlu0 %5674 }
 0x83e   : > { %5776 = vst.msk [vmem:[%s11862_s21 + $0xe8] sm:$0xff] %vm815_vm3, %v5744_v45  ;;  %v5743_v10 = vsel %vm5714_vm14, %v5550_v62, %v5675_v32 }
 0x83f   : > { %5775 = vst.msk [vmem:[%s11862_s21 + $0xe0] sm:$0xff] %vm815_vm3, %v5743_v10 }
 0x849   : > { %v5681_v35 = vpop.permute.xlu1 %5680 }
 0x84a   : > { %v5746_v8 = vsel %vm5714_vm14, %v5553_v13, %v5681_v35  ;;  %v5679_v37 = vpop.permute.xlu0 %5678 }
 0x84b   : > { %5778 = vst.msk [vmem:[%s11862_s21 + $0xf8] sm:$0xff] %vm815_vm3, %v5746_v8  ;;  %v5745_v11 = vsel %vm5714_vm14, %v5552_v59, %v5679_v37 }
 0x84c   : > { %5777 = vst.msk [vmem:[%s11862_s21 + $0xf0] sm:$0xff] %vm815_vm3, %v5745_v11 }
 0x84d PF: > { %s18_s9 = sadd.s32 1, %s6609_s9   ;;  %s13606_s27 = smov %s6601_s29 }
 0x84e   : > { %p15_p11 = scmp.ge.s32.totalorder %s18_s9, 6   ;;  %s13607_s28 = smov %s6605_s30 }
 0x84f   : > { %s13608_s29 = smov %s13611_s10  ;;  %s13609_s30 = smov %s13615_s11 }
 0x850   :  { %17 = sbr.rel (!%p15_p11) target bundleno = 3 (0x3), region = 85 }

</bundles_post_ra>
